<compile_context>
chip_gen: v7x
topology: tpu7x:2x2x1
jax: 0.10.0
libtpu: 0.0.40
codegen_flags: <defaults>
</compile_context>

<pallas_src>
import functools

import jax
import jax.numpy as jnp
from jax import lax
from jax.experimental import pallas as pl
from jax.experimental.pallas import tpu as pltpu

NEG_SLOPE = 0.01     # nn.LeakyReLU default negative_slope
BN_EPS = 1e-5        # nn.BatchNorm2d default eps
L2_EPS = 1e-12       # F.normalize default eps
LANE = 128           # TPU lane width


def _round_up(x, m):
    return (x + m - 1) // m * m


def _mlp_adj_kernel(xn_ref,
                    w1_ref, b1_ref, w2_ref, b2_ref,
                    w3_ref, b3_ref, w4_ref, b4_ref,
                    wl_ref, bl_ref,
                    out_ref, *, n_real):
    it = pl.program_id(1)
    tile_i = out_ref.shape[1]

    xj = xn_ref[0]                          # (NP, Dp) bf16, all (padded) j-rows
    np_j, dp = xj.shape

    # i-tile rows live inside the resident all-j block: slice, don't re-DMA.
    start = pl.multiple_of(it * tile_i, tile_i)
    xi = xn_ref[0, pl.ds(start, tile_i), :]   # (tile_i, Dp) bf16

    def bias_lrelu(y, b_ref):
        y = y + b_ref[...]
        return jnp.maximum(y, NEG_SLOPE * y)   # LeakyReLU, 2 VALU ops

    # ---- layer 1: (xi ⊙ xj) @ W1 == xj @ (diag(xi) @ W1) ---------------------
    # Scale W1 per i-row (tiny Dp x C1p bf16 multiply) and reuse the all-j
    # block directly on the MXU; no rows x Dp outer-product intermediate.
    w1 = w1_ref[...]                          # (Dp, C1p) bf16
    parts = []
    for r in range(tile_i):                   # tile_i is small & static
        w1r = xi[r][:, None] * w1             # (Dp, C1p) bf16
        parts.append(jnp.dot(xj, w1r, preferred_element_type=jnp.float32))
    y1 = jnp.concatenate(parts, axis=0)       # (tile_i*NP, C1p) f32
    h = bias_lrelu(y1, b1_ref).astype(jnp.bfloat16)

    # ---- layers 2..4: bf16 matmul (f32 acc) + folded BN bias + LeakyReLU -----
    def conv_bn_lrelu(h, w_ref, b_ref):
        y = jnp.dot(h, w_ref[...], preferred_element_type=jnp.float32)
        return bias_lrelu(y, b_ref).astype(jnp.bfloat16)

    h = conv_bn_lrelu(h, w2_ref, b2_ref)
    h = conv_bn_lrelu(h, w3_ref, b3_ref)
    h = conv_bn_lrelu(h, w4_ref, b4_ref)      # (tile_i*NP, C4p) bf16

    # ---- conv_last (out_channels = 1): VPU multiply + lane reduction ---------
    prod = (h * wl_ref[...]).astype(jnp.float32)
    m = jnp.sum(prod, axis=-1, keepdims=True)             # (tile_i*NP, 1) f32
    matrix = (m + bl_ref[0]).reshape(tile_i, np_j)         # (TILE_I, NP) f32

    # edge_mask = eye(N); softmax(matrix * (1 - eye), -1) + eye; padded
    # j-columns (>= n_real) are excluded from the softmax (only if any exist).
    rows = it * tile_i + lax.broadcasted_iota(jnp.int32, (tile_i, np_j), 0)
    cols = lax.broadcasted_iota(jnp.int32, (tile_i, np_j), 1)
    eye = (rows == cols).astype(jnp.float32)

    logits = matrix * (1.0 - eye)             # diagonal logit -> 0 (as in ref)
    if n_real % LANE:                         # static: skip when lane-aligned
        logits = jnp.where(cols < n_real, logits, -1e30)
    logits = logits - jnp.max(logits, axis=-1, keepdims=True)
    e = jnp.exp(logits)
    sm = e * pl.reciprocal(jnp.sum(e, axis=-1, keepdims=True), approx=True)
    out_ref[0] = sm + eye


def _default_vmem_limit():
    try:
        phys = pltpu.get_tpu_info().vmem_capacity_bytes
    except Exception:
        phys = 64 << 20                       # conservative (v7x per-TC)
    return min(int(phys * 3 // 4), 96 << 20)


def mlp_adjacency(X, params, *, tile_i=8, vmem_limit_bytes=None):
    """X: [B, N, D] or [N, D]. Returns adjacency [B, N, N] (or [N, N]).

    tile_i: i-rows per grid step.  Default 8 is safe everywhere; raise to
    32-64 on v5e/v6e (128 MiB VMEM) for large N to amortize per-step overhead.
    """
    assert tile_i >= 8 and LANE % tile_i == 0
    squeeze = (X.ndim == 2)
    if squeeze:
        X = X[None]                           # dims==2 path == batch of 1
    B, N, D = X.shape
    X = X.astype(jnp.float32)

    (w1, b1), (w2, b2), (w3, b3), (w4, b4), (wl, bl) = params
    dp = w1.shape[0]                          # lane-padded input-feature dim
    assert dp >= D

    # F.normalize(x, p=2, dim=-1) once per batch, in f32, then cast to bf16
    # (activations are bf16 end-to-end; softmax path stays f32 in-kernel).
    nrm = jnp.sqrt(jnp.sum(X * X, axis=-1, keepdims=True))
    xn = (X / jnp.maximum(nrm, L2_EPS)).astype(jnp.bfloat16)

    np_j = _round_up(N, LANE)                 # lane-dense j / output width
    nr = _round_up(N, tile_i)                 # i rows covered by the grid
    xn_p = jnp.zeros((B, np_j, dp), jnp.bfloat16).at[:, :N, :D].set(xn)

    if vmem_limit_bytes is None:
        vmem_limit_bytes = _default_vmem_limit()

    def const2d(a):
        return pl.BlockSpec(a.shape, lambda b, i: (0, 0))

    out = pl.pallas_call(
        functools.partial(_mlp_adj_kernel, n_real=N),
        out_shape=jax.ShapeDtypeStruct((B, nr, np_j), jnp.float32),
        grid_spec=pltpu.PrefetchScalarGridSpec(
            num_scalar_prefetch=0,
            grid=(B, nr // tile_i),
            in_specs=[
                pl.BlockSpec((1, np_j, dp), lambda b, i: (b, 0, 0)),     # all j
                const2d(w1), const2d(b1),
                const2d(w2), const2d(b2),
                const2d(w3), const2d(b3),
                const2d(w4), const2d(b4),
                const2d(wl),
                pl.BlockSpec(memory_space=pltpu.MemorySpace.SMEM),       # scalar bias
            ],
            out_specs=pl.BlockSpec((1, tile_i, np_j), lambda b, i: (b, i, 0)),
        ),
        compiler_params=pltpu.CompilerParams(
            dimension_semantics=("parallel", "parallel"),
            vmem_limit_bytes=vmem_limit_bytes),
    )(xn_p, w1, b1, w2, b2, w3, b3, w4, b4, wl, bl)

    out = out[:, :N, :N]                      # drop row/column padding
    return out[0] if squeeze else out


def make_params(key, in_dim, hidden=96, ratio=(2, 2, 1, 1)):
    """Synthetic params; eval-mode BN folded into the 1x1 convs; all channel
    dims zero-padded to multiples of 128; conv weights stored in bf16."""
    chans = [in_dim, hidden * ratio[0], hidden * ratio[1],
             hidden * ratio[2], hidden * ratio[3]]
    pad = [_round_up(c, LANE) for c in chans]
    keys = jax.random.split(key, 14)
    params = []
    ki = 0
    for l in range(4):
        cin, cout = chans[l], chans[l + 1]
        cin_p, cout_p = pad[l], pad[l + 1]
        w = jax.random.normal(keys[ki], (cin, cout), jnp.float32) * 0.2; ki += 1
        gamma = 1.0 + 0.1 * jax.random.normal(keys[ki], (cout,), jnp.float32); ki += 1
        beta = 0.1 * jax.random.normal(keys[ki], (cout,), jnp.float32); ki += 1
        rmean = jnp.zeros((cout,), jnp.float32)        # running stats (eval BN)
        rvar = jnp.ones((cout,), jnp.float32)
        scale = gamma / jnp.sqrt(rvar + BN_EPS)
        w_eff = w * scale[None, :]                     # fold BN scale into conv
        b_eff = beta - rmean * scale
        w_pad = jnp.zeros((cin_p, cout_p), jnp.float32)
        w_pad = w_pad.at[:cin, :cout].set(w_eff).astype(jnp.bfloat16)
        b_pad = jnp.zeros((1, cout_p), jnp.float32).at[0, :cout].set(b_eff)
        params.append((w_pad, b_pad))
    # conv_last: lane-padded bf16 row (VPU multiply + reduce), scalar f32 bias.
    c4, c4_p = chans[4], pad[4]
    wl = jax.random.normal(keys[ki], (c4,), jnp.float32) * 0.2; ki += 1
    bl = 0.1 * jax.random.normal(keys[ki], (1,), jnp.float32); ki += 1
    wl_pad = jnp.zeros((1, c4_p), jnp.float32).at[0, :c4].set(wl).astype(jnp.bfloat16)
    params.append((wl_pad, bl))
    return params


def _reference(X, params):
    """Pure-JAX reference mirroring the kernel's padded bf16-activation math."""
    squeeze = (X.ndim == 2)
    if squeeze:
        X = X[None]
    B, N, D = X.shape
    (w1, b1), (w2, b2), (w3, b3), (w4, b4), (wl, bl) = params
    dp = w1.shape[0]

    X = X.astype(jnp.float32)
    nrm = jnp.sqrt(jnp.sum(X * X, axis=-1, keepdims=True))
    xn = (X / jnp.maximum(nrm, L2_EPS)).astype(jnp.bfloat16)
    xn = jnp.pad(xn, ((0, 0), (0, 0), (0, dp - D)))

    h = (xn[:, :, None, :] * xn[:, None, :, :]).reshape(B, N * N, dp)
    for w, b in ((w1, b1), (w2, b2), (w3, b3), (w4, b4)):
        y = jnp.dot(h, w, preferred_element_type=jnp.float32) + b
        h = jnp.maximum(y, NEG_SLOPE * y).astype(jnp.bfloat16)
    matrix = (jnp.sum((h * wl).astype(jnp.float32), axis=-1)
              + bl[0]).reshape(B, N, N)

    eye = jnp.eye(N, dtype=jnp.float32)
    adj = jax.nn.softmax(matrix * (1.0 - eye), axis=-1) + eye
    return adj[0] if squeeze else adj


if __name__ == "__main__":
    key = jax.random.PRNGKey(0)
    k_x, k_p = jax.random.split(key)

    B, N, D = 2, 8, 4          # small shapes: batch=2, nodes=8, in_dim=4
    hidden = 32                # small hidden (module default is 96)

    X = jax.random.normal(k_x, (B, N, D), jnp.float32)
    params = make_params(k_p, in_dim=D, hidden=hidden, ratio=(2, 2, 1, 1))

    adj = mlp_adjacency(X, params)             # dims==3 path -> [B, N, N]
    jax.block_until_ready(adj)

    adj2 = mlp_adjacency(X[0], params)         # dims==2 path -> [N, N]
    jax.block_until_ready(adj2)

    ref = _reference(X, params)
    err = float(jnp.max(jnp.abs(adj - ref)))

    assert adj.shape == (B, N, N) and adj2.shape == (N, N)
    assert err < 1e-2, f"max abs error vs reference too large: {err}"
    print("KERNEL_OK")
</pallas_src>

<mosaic_0001>
module attributes {stable_mosaic.version = 11 : i64} {
  func.func @_mlp_adj_kernel(%arg0: i32, %arg1: i32, %arg2: memref<1x128x128xbf16, #tpu.memory_space<vmem>>, %arg3: memref<128x128xbf16, #tpu.memory_space<vmem>>, %arg4: memref<1x128xf32, #tpu.memory_space<vmem>>, %arg5: memref<128x128xbf16, #tpu.memory_space<vmem>>, %arg6: memref<1x128xf32, #tpu.memory_space<vmem>>, %arg7: memref<128x128xbf16, #tpu.memory_space<vmem>>, %arg8: memref<1x128xf32, #tpu.memory_space<vmem>>, %arg9: memref<128x128xbf16, #tpu.memory_space<vmem>>, %arg10: memref<1x128xf32, #tpu.memory_space<vmem>>, %arg11: memref<1x128xbf16, #tpu.memory_space<vmem>>, %arg12: memref<1xf32, #tpu.memory_space<smem>>, %arg13: memref<1x8x128xf32, #tpu.memory_space<vmem>>) attributes {dimension_semantics = [#tpu.dimension_semantics<parallel>, #tpu.dimension_semantics<parallel>], iteration_bounds = array<i64: 2, 1>, scalar_prefetch = 0 : i64, scratch_operands = 0 : i64, tpu.core_type = #tpu.core_type<tc>, window_params = [{transform_indices = @transform_0, window_bounds = array<i64: 1, 128, 128>}, {pipeline_mode = #tpu.pipeline_mode<synchronous>, transform_indices = @transform_1, window_bounds = array<i64: 128, 128>}, {pipeline_mode = #tpu.pipeline_mode<synchronous>, transform_indices = @transform_2, window_bounds = array<i64: 1, 128>}, {pipeline_mode = #tpu.pipeline_mode<synchronous>, transform_indices = @transform_3, window_bounds = array<i64: 128, 128>}, {pipeline_mode = #tpu.pipeline_mode<synchronous>, transform_indices = @transform_4, window_bounds = array<i64: 1, 128>}, {pipeline_mode = #tpu.pipeline_mode<synchronous>, transform_indices = @transform_5, window_bounds = array<i64: 128, 128>}, {pipeline_mode = #tpu.pipeline_mode<synchronous>, transform_indices = @transform_6, window_bounds = array<i64: 1, 128>}, {pipeline_mode = #tpu.pipeline_mode<synchronous>, transform_indices = @transform_7, window_bounds = array<i64: 128, 128>}, {pipeline_mode = #tpu.pipeline_mode<synchronous>, transform_indices = @transform_8, window_bounds = array<i64: 1, 128>}, {pipeline_mode = #tpu.pipeline_mode<synchronous>, transform_indices = @transform_9, window_bounds = array<i64: 1, 128>}, {transform_indices = @transform_10, window_bounds = array<i64: 1>}, {transform_indices = @transform_11, window_bounds = array<i64: 1, 8, 128>}]} {
    %c0 = arith.constant 0 : index
    %c0_0 = arith.constant 0 : index
    %c0_1 = arith.constant 0 : index
    %0 = vector.load %arg2[%c0, %c0_0, %c0_1] : memref<1x128x128xbf16, #tpu.memory_space<vmem>>, vector<1x128x128xbf16>
    %1 = vector.shape_cast %0 : vector<1x128x128xbf16> to vector<128x128xbf16>
    %c8_i32 = arith.constant 8 : i32
    %2 = arith.muli %arg1, %c8_i32 : i32
    %3 = tpu.assume_multiple %2, 8 : i32
    %c0_2 = arith.constant 0 : index
    %4 = arith.index_cast %3 : i32 to index
    %c0_3 = arith.constant 0 : index
    %5 = vector.load %arg2[%c0_2, %4, %c0_3] : memref<1x128x128xbf16, #tpu.memory_space<vmem>>, vector<1x8x128xbf16>
    %6 = vector.shape_cast %5 : vector<1x8x128xbf16> to vector<8x128xbf16>
    %c0_4 = arith.constant 0 : index
    %c0_5 = arith.constant 0 : index
    %7 = vector.load %arg3[%c0_4, %c0_5] : memref<128x128xbf16, #tpu.memory_space<vmem>>, vector<128x128xbf16>
    %8 = vector.extract_strided_slice %6 {offsets = [0, 0], sizes = [1, 128], strides = [1, 1]} : vector<8x128xbf16> to vector<1x128xbf16>
    %9 = vector.shape_cast %8 : vector<1x128xbf16> to vector<128xbf16>
    %10 = vector.shape_cast %9 : vector<128xbf16> to vector<128x1xbf16>
    %11 = vector.broadcast %10 : vector<128x1xbf16> to vector<128x128xbf16>
    %12 = arith.mulf %11, %7 : vector<128x128xbf16>
    %cst = arith.constant dense<0.000000e+00> : vector<128x128xf32>
    %13 = tpu.matmul %1, %12, %cst {dimension_numbers = #tpu.dot_dimension_numbers<[1], [0], [0], [1], [0, 0, 1, 1], [], []>} : vector<128x128xbf16>, vector<128x128xbf16>, vector<128x128xf32> -> vector<128x128xf32>
    %14 = vector.extract_strided_slice %6 {offsets = [1, 0], sizes = [1, 128], strides = [1, 1]} : vector<8x128xbf16> to vector<1x128xbf16>
    %15 = vector.shape_cast %14 : vector<1x128xbf16> to vector<128xbf16>
    %16 = vector.shape_cast %15 : vector<128xbf16> to vector<128x1xbf16>
    %17 = vector.broadcast %16 : vector<128x1xbf16> to vector<128x128xbf16>
    %18 = arith.mulf %17, %7 : vector<128x128xbf16>
    %cst_6 = arith.constant dense<0.000000e+00> : vector<128x128xf32>
    %19 = tpu.matmul %1, %18, %cst_6 {dimension_numbers = #tpu.dot_dimension_numbers<[1], [0], [0], [1], [0, 0, 1, 1], [], []>} : vector<128x128xbf16>, vector<128x128xbf16>, vector<128x128xf32> -> vector<128x128xf32>
    %20 = vector.extract_strided_slice %6 {offsets = [2, 0], sizes = [1, 128], strides = [1, 1]} : vector<8x128xbf16> to vector<1x128xbf16>
    %21 = vector.shape_cast %20 : vector<1x128xbf16> to vector<128xbf16>
    %22 = vector.shape_cast %21 : vector<128xbf16> to vector<128x1xbf16>
    %23 = vector.broadcast %22 : vector<128x1xbf16> to vector<128x128xbf16>
    %24 = arith.mulf %23, %7 : vector<128x128xbf16>
    %cst_7 = arith.constant dense<0.000000e+00> : vector<128x128xf32>
    %25 = tpu.matmul %1, %24, %cst_7 {dimension_numbers = #tpu.dot_dimension_numbers<[1], [0], [0], [1], [0, 0, 1, 1], [], []>} : vector<128x128xbf16>, vector<128x128xbf16>, vector<128x128xf32> -> vector<128x128xf32>
    %26 = vector.extract_strided_slice %6 {offsets = [3, 0], sizes = [1, 128], strides = [1, 1]} : vector<8x128xbf16> to vector<1x128xbf16>
    %27 = vector.shape_cast %26 : vector<1x128xbf16> to vector<128xbf16>
    %28 = vector.shape_cast %27 : vector<128xbf16> to vector<128x1xbf16>
    %29 = vector.broadcast %28 : vector<128x1xbf16> to vector<128x128xbf16>
    %30 = arith.mulf %29, %7 : vector<128x128xbf16>
    %cst_8 = arith.constant dense<0.000000e+00> : vector<128x128xf32>
    %31 = tpu.matmul %1, %30, %cst_8 {dimension_numbers = #tpu.dot_dimension_numbers<[1], [0], [0], [1], [0, 0, 1, 1], [], []>} : vector<128x128xbf16>, vector<128x128xbf16>, vector<128x128xf32> -> vector<128x128xf32>
    %32 = vector.extract_strided_slice %6 {offsets = [4, 0], sizes = [1, 128], strides = [1, 1]} : vector<8x128xbf16> to vector<1x128xbf16>
    %33 = vector.shape_cast %32 : vector<1x128xbf16> to vector<128xbf16>
    %34 = vector.shape_cast %33 : vector<128xbf16> to vector<128x1xbf16>
    %35 = vector.broadcast %34 : vector<128x1xbf16> to vector<128x128xbf16>
    %36 = arith.mulf %35, %7 : vector<128x128xbf16>
    %cst_9 = arith.constant dense<0.000000e+00> : vector<128x128xf32>
    %37 = tpu.matmul %1, %36, %cst_9 {dimension_numbers = #tpu.dot_dimension_numbers<[1], [0], [0], [1], [0, 0, 1, 1], [], []>} : vector<128x128xbf16>, vector<128x128xbf16>, vector<128x128xf32> -> vector<128x128xf32>
    %38 = vector.extract_strided_slice %6 {offsets = [5, 0], sizes = [1, 128], strides = [1, 1]} : vector<8x128xbf16> to vector<1x128xbf16>
    %39 = vector.shape_cast %38 : vector<1x128xbf16> to vector<128xbf16>
    %40 = vector.shape_cast %39 : vector<128xbf16> to vector<128x1xbf16>
    %41 = vector.broadcast %40 : vector<128x1xbf16> to vector<128x128xbf16>
    %42 = arith.mulf %41, %7 : vector<128x128xbf16>
    %cst_10 = arith.constant dense<0.000000e+00> : vector<128x128xf32>
    %43 = tpu.matmul %1, %42, %cst_10 {dimension_numbers = #tpu.dot_dimension_numbers<[1], [0], [0], [1], [0, 0, 1, 1], [], []>} : vector<128x128xbf16>, vector<128x128xbf16>, vector<128x128xf32> -> vector<128x128xf32>
    %44 = vector.extract_strided_slice %6 {offsets = [6, 0], sizes = [1, 128], strides = [1, 1]} : vector<8x128xbf16> to vector<1x128xbf16>
    %45 = vector.shape_cast %44 : vector<1x128xbf16> to vector<128xbf16>
    %46 = vector.shape_cast %45 : vector<128xbf16> to vector<128x1xbf16>
    %47 = vector.broadcast %46 : vector<128x1xbf16> to vector<128x128xbf16>
    %48 = arith.mulf %47, %7 : vector<128x128xbf16>
    %cst_11 = arith.constant dense<0.000000e+00> : vector<128x128xf32>
    %49 = tpu.matmul %1, %48, %cst_11 {dimension_numbers = #tpu.dot_dimension_numbers<[1], [0], [0], [1], [0, 0, 1, 1], [], []>} : vector<128x128xbf16>, vector<128x128xbf16>, vector<128x128xf32> -> vector<128x128xf32>
    %50 = vector.extract_strided_slice %6 {offsets = [7, 0], sizes = [1, 128], strides = [1, 1]} : vector<8x128xbf16> to vector<1x128xbf16>
    %51 = vector.shape_cast %50 : vector<1x128xbf16> to vector<128xbf16>
    %52 = vector.shape_cast %51 : vector<128xbf16> to vector<128x1xbf16>
    %53 = vector.broadcast %52 : vector<128x1xbf16> to vector<128x128xbf16>
    %54 = arith.mulf %53, %7 : vector<128x128xbf16>
    %cst_12 = arith.constant dense<0.000000e+00> : vector<128x128xf32>
    %55 = tpu.matmul %1, %54, %cst_12 {dimension_numbers = #tpu.dot_dimension_numbers<[1], [0], [0], [1], [0, 0, 1, 1], [], []>} : vector<128x128xbf16>, vector<128x128xbf16>, vector<128x128xf32> -> vector<128x128xf32>
    %56 = tpu.concatenate %13, %19, %25, %31, %37, %43, %49, %55 in 0 : vector<128x128xf32>, vector<128x128xf32>, vector<128x128xf32>, vector<128x128xf32>, vector<128x128xf32>, vector<128x128xf32>, vector<128x128xf32>, vector<128x128xf32> -> vector<1024x128xf32>
    %c0_13 = arith.constant 0 : index
    %c0_14 = arith.constant 0 : index
    %57 = vector.load %arg4[%c0_13, %c0_14] : memref<1x128xf32, #tpu.memory_space<vmem>>, vector<1x128xf32>
    %58 = vector.broadcast %57 : vector<1x128xf32> to vector<1024x128xf32>
    %59 = arith.addf %56, %58 : vector<1024x128xf32>
    %cst_15 = arith.constant 0.00999999977 : f32
    %60 = vector.broadcast %cst_15 : f32 to vector<1024x128xf32>
    %61 = arith.mulf %60, %59 : vector<1024x128xf32>
    %62 = arith.maximumf %59, %61 : vector<1024x128xf32>
    %63 = arith.truncf %62 : vector<1024x128xf32> to vector<1024x128xbf16>
    %c0_16 = arith.constant 0 : index
    %c0_17 = arith.constant 0 : index
    %64 = vector.load %arg5[%c0_16, %c0_17] : memref<128x128xbf16, #tpu.memory_space<vmem>>, vector<128x128xbf16>
    %cst_18 = arith.constant dense<0.000000e+00> : vector<1024x128xf32>
    %65 = tpu.matmul %63, %64, %cst_18 {dimension_numbers = #tpu.dot_dimension_numbers<[1], [0], [0], [1], [0, 0, 1, 1], [], []>} : vector<1024x128xbf16>, vector<128x128xbf16>, vector<1024x128xf32> -> vector<1024x128xf32>
    %c0_19 = arith.constant 0 : index
    %c0_20 = arith.constant 0 : index
    %66 = vector.load %arg6[%c0_19, %c0_20] : memref<1x128xf32, #tpu.memory_space<vmem>>, vector<1x128xf32>
    %67 = vector.broadcast %66 : vector<1x128xf32> to vector<1024x128xf32>
    %68 = arith.addf %65, %67 : vector<1024x128xf32>
    %cst_21 = arith.constant 0.00999999977 : f32
    %69 = vector.broadcast %cst_21 : f32 to vector<1024x128xf32>
    %70 = arith.mulf %69, %68 : vector<1024x128xf32>
    %71 = arith.maximumf %68, %70 : vector<1024x128xf32>
    %72 = arith.truncf %71 : vector<1024x128xf32> to vector<1024x128xbf16>
    %c0_22 = arith.constant 0 : index
    %c0_23 = arith.constant 0 : index
    %73 = vector.load %arg7[%c0_22, %c0_23] : memref<128x128xbf16, #tpu.memory_space<vmem>>, vector<128x128xbf16>
    %cst_24 = arith.constant dense<0.000000e+00> : vector<1024x128xf32>
    %74 = tpu.matmul %72, %73, %cst_24 {dimension_numbers = #tpu.dot_dimension_numbers<[1], [0], [0], [1], [0, 0, 1, 1], [], []>} : vector<1024x128xbf16>, vector<128x128xbf16>, vector<1024x128xf32> -> vector<1024x128xf32>
    %c0_25 = arith.constant 0 : index
    %c0_26 = arith.constant 0 : index
    %75 = vector.load %arg8[%c0_25, %c0_26] : memref<1x128xf32, #tpu.memory_space<vmem>>, vector<1x128xf32>
    %76 = vector.broadcast %75 : vector<1x128xf32> to vector<1024x128xf32>
    %77 = arith.addf %74, %76 : vector<1024x128xf32>
    %cst_27 = arith.constant 0.00999999977 : f32
    %78 = vector.broadcast %cst_27 : f32 to vector<1024x128xf32>
    %79 = arith.mulf %78, %77 : vector<1024x128xf32>
    %80 = arith.maximumf %77, %79 : vector<1024x128xf32>
    %81 = arith.truncf %80 : vector<1024x128xf32> to vector<1024x128xbf16>
    %c0_28 = arith.constant 0 : index
    %c0_29 = arith.constant 0 : index
    %82 = vector.load %arg9[%c0_28, %c0_29] : memref<128x128xbf16, #tpu.memory_space<vmem>>, vector<128x128xbf16>
    %cst_30 = arith.constant dense<0.000000e+00> : vector<1024x128xf32>
    %83 = tpu.matmul %81, %82, %cst_30 {dimension_numbers = #tpu.dot_dimension_numbers<[1], [0], [0], [1], [0, 0, 1, 1], [], []>} : vector<1024x128xbf16>, vector<128x128xbf16>, vector<1024x128xf32> -> vector<1024x128xf32>
    %c0_31 = arith.constant 0 : index
    %c0_32 = arith.constant 0 : index
    %84 = vector.load %arg10[%c0_31, %c0_32] : memref<1x128xf32, #tpu.memory_space<vmem>>, vector<1x128xf32>
    %85 = vector.broadcast %84 : vector<1x128xf32> to vector<1024x128xf32>
    %86 = arith.addf %83, %85 : vector<1024x128xf32>
    %cst_33 = arith.constant 0.00999999977 : f32
    %87 = vector.broadcast %cst_33 : f32 to vector<1024x128xf32>
    %88 = arith.mulf %87, %86 : vector<1024x128xf32>
    %89 = arith.maximumf %86, %88 : vector<1024x128xf32>
    %90 = arith.truncf %89 : vector<1024x128xf32> to vector<1024x128xbf16>
    %c0_34 = arith.constant 0 : index
    %c0_35 = arith.constant 0 : index
    %91 = vector.load %arg11[%c0_34, %c0_35] : memref<1x128xbf16, #tpu.memory_space<vmem>>, vector<1x128xbf16>
    %92 = vector.broadcast %91 : vector<1x128xbf16> to vector<1024x128xbf16>
    %93 = arith.mulf %90, %92 : vector<1024x128xbf16>
    %94 = arith.extf %93 : vector<1024x128xbf16> to vector<1024x128xf32>
    %cst_36 = arith.constant dense<0.000000e+00> : vector<1024xf32>
    %95 = vector.multi_reduction <add>, %94, %cst_36 [1] : vector<1024x128xf32> to vector<1024xf32>
    %96 = vector.shape_cast %95 : vector<1024xf32> to vector<1024x1xf32>
    %c0_37 = arith.constant 0 : index
    %97 = memref.load %arg12[%c0_37] : memref<1xf32, #tpu.memory_space<smem>>
    %98 = vector.broadcast %97 : f32 to vector<1024x1xf32>
    %99 = arith.addf %96, %98 : vector<1024x1xf32>
    %100 = vector.shape_cast %99 : vector<1024x1xf32> to vector<8x128xf32>
    %c8_i32_38 = arith.constant 8 : i32
    %101 = arith.muli %arg1, %c8_i32_38 : i32
    %102 = tpu.iota {dimensions = array<i32: 0>} : vector<8x128xi32>
    %103 = vector.broadcast %101 : i32 to vector<8x128xi32>
    %104 = arith.addi %103, %102 : vector<8x128xi32>
    %105 = tpu.iota {dimensions = array<i32: 1>} : vector<8x128xi32>
    %106 = arith.cmpi eq, %104, %105 : vector<8x128xi32>
    %107 = arith.extui %106 : vector<8x128xi1> to vector<8x128xi32>
    %108 = arith.sitofp %107 : vector<8x128xi32> to vector<8x128xf32>
    %cst_39 = arith.constant 1.000000e+00 : f32
    %109 = vector.broadcast %cst_39 : f32 to vector<8x128xf32>
    %110 = arith.subf %109, %108 : vector<8x128xf32>
    %111 = arith.mulf %100, %110 : vector<8x128xf32>
    %c8_i32_40 = arith.constant 8 : i32
    %112 = vector.broadcast %c8_i32_40 : i32 to vector<8x128xi32>
    %113 = arith.cmpi slt, %105, %112 : vector<8x128xi32>
    %cst_41 = arith.constant -1.000000e+30 : f32
    %114 = vector.broadcast %cst_41 : f32 to vector<8x128xf32>
    %115 = arith.select %113, %111, %114 : vector<8x128xi1>, vector<8x128xf32>
    %cst_42 = arith.constant dense<0xFF800000> : vector<8xf32>
    %116 = vector.multi_reduction <maximumf>, %115, %cst_42 [1] : vector<8x128xf32> to vector<8xf32>
    %117 = vector.shape_cast %116 : vector<8xf32> to vector<8x1xf32>
    %118 = vector.broadcast %117 : vector<8x1xf32> to vector<8x128xf32>
    %119 = arith.subf %115, %118 : vector<8x128xf32>
    %120 = math.exp %119 : vector<8x128xf32>
    %cst_43 = arith.constant dense<0.000000e+00> : vector<8xf32>
    %121 = vector.multi_reduction <add>, %120, %cst_43 [1] : vector<8x128xf32> to vector<8xf32>
    %122 = vector.shape_cast %121 : vector<8xf32> to vector<8x1xf32>
    %123 = tpu.reciprocal %122 {approx = true} : vector<8x1xf32> -> vector<8x1xf32>
    %124 = vector.broadcast %123 : vector<8x1xf32> to vector<8x128xf32>
    %125 = arith.mulf %120, %124 : vector<8x128xf32>
    %126 = arith.addf %125, %108 : vector<8x128xf32>
    %c0_44 = arith.constant 0 : index
    %c0_45 = arith.constant 0 : index
    %c0_46 = arith.constant 0 : index
    %127 = vector.load %arg13[%c0_44, %c0_45, %c0_46] : memref<1x8x128xf32, #tpu.memory_space<vmem>>, vector<1x8x128xf32>
    %128 = vector.shape_cast %127 : vector<1x8x128xf32> to vector<8x128xf32>
    %129 = vector.shape_cast %126 : vector<8x128xf32> to vector<1x8x128xf32>
    tpu.vector_store %arg13[%c0_44, %c0_45, %c0_46], %129 {strides = array<i32>} : memref<1x8x128xf32, #tpu.memory_space<vmem>>, vector<1x8x128xf32>,
    return
  }
  func.func @transform_0(%arg0: i32, %arg1: i32) -> (i32, i32, i32) {
    %c0_i32 = arith.constant 0 : i32
    %c0_i32_0 = arith.constant 0 : i32
    %c0_i32_1 = arith.constant 0 : i32
    return %arg0, %c0_i32, %c0_i32_0 : i32, i32, i32
  }
  func.func @transform_1(%arg0: i32, %arg1: i32) -> (i32, i32) {
    %c0_i32 = arith.constant 0 : i32
    %c0_i32_0 = arith.constant 0 : i32
    %c0_i32_1 = arith.constant 0 : i32
    return %c0_i32, %c0_i32_0 : i32, i32
  }
  func.func @transform_2(%arg0: i32, %arg1: i32) -> (i32, i32) {
    %c0_i32 = arith.constant 0 : i32
    %c0_i32_0 = arith.constant 0 : i32
    %c0_i32_1 = arith.constant 0 : i32
    return %c0_i32, %c0_i32_0 : i32, i32
  }
  func.func @transform_3(%arg0: i32, %arg1: i32) -> (i32, i32) {
    %c0_i32 = arith.constant 0 : i32
    %c0_i32_0 = arith.constant 0 : i32
    %c0_i32_1 = arith.constant 0 : i32
    return %c0_i32, %c0_i32_0 : i32, i32
  }
  func.func @transform_4(%arg0: i32, %arg1: i32) -> (i32, i32) {
    %c0_i32 = arith.constant 0 : i32
    %c0_i32_0 = arith.constant 0 : i32
    %c0_i32_1 = arith.constant 0 : i32
    return %c0_i32, %c0_i32_0 : i32, i32
  }
  func.func @transform_5(%arg0: i32, %arg1: i32) -> (i32, i32) {
    %c0_i32 = arith.constant 0 : i32
    %c0_i32_0 = arith.constant 0 : i32
    %c0_i32_1 = arith.constant 0 : i32
    return %c0_i32, %c0_i32_0 : i32, i32
  }
  func.func @transform_6(%arg0: i32, %arg1: i32) -> (i32, i32) {
    %c0_i32 = arith.constant 0 : i32
    %c0_i32_0 = arith.constant 0 : i32
    %c0_i32_1 = arith.constant 0 : i32
    return %c0_i32, %c0_i32_0 : i32, i32
  }
  func.func @transform_7(%arg0: i32, %arg1: i32) -> (i32, i32) {
    %c0_i32 = arith.constant 0 : i32
    %c0_i32_0 = arith.constant 0 : i32
    %c0_i32_1 = arith.constant 0 : i32
    return %c0_i32, %c0_i32_0 : i32, i32
  }
  func.func @transform_8(%arg0: i32, %arg1: i32) -> (i32, i32) {
    %c0_i32 = arith.constant 0 : i32
    %c0_i32_0 = arith.constant 0 : i32
    %c0_i32_1 = arith.constant 0 : i32
    return %c0_i32, %c0_i32_0 : i32, i32
  }
  func.func @transform_9(%arg0: i32, %arg1: i32) -> (i32, i32) {
    %c0_i32 = arith.constant 0 : i32
    %c0_i32_0 = arith.constant 0 : i32
    %c0_i32_1 = arith.constant 0 : i32
    return %c0_i32, %c0_i32_0 : i32, i32
  }
  func.func @transform_10(%arg0: i32, %arg1: i32) -> i32 {
    %c0_i32 = arith.constant 0 : i32
    %c0_i32_0 = arith.constant 0 : i32
    return %c0_i32 : i32
  }
  func.func @transform_11(%arg0: i32, %arg1: i32) -> (i32, i32, i32) {
    %c0_i32 = arith.constant 0 : i32
    %c0_i32_0 = arith.constant 0 : i32
    return %arg0, %arg1, %c0_i32 : i32, i32, i32
  }
}

</mosaic_0001>

<bundles_post_ra>
// kernel: tpu_custom_call.1
= control target key start
LH: loop header
LB: loop body
LE: loop exit
PB: predicated region body
PF: predicated region fallthrough
CT: control target
= control target key end

     0   :  { %s12115_s0 = inlined_call_operand.hbm [shape: bf16[2,128,128], index: 0, kind: input, shape index: {}]   ;;  %s12116_s1 = inlined_call_operand.hbm [shape: bf16[128,128], index: 1, kind: input, shape index: {}]   ;;  %s12117_s2 = inlined_call_operand.vmem [shape: f32[1,128], index: 2, kind: input, shape index: {}]   ;;  %s12118_s3 = inlined_call_operand.hbm [shape: bf16[128,128], index: 3, kind: input, shape index: {}]   ;;  %s12119_s4 = inlined_call_operand.vmem [shape: f32[1,128], index: 4, kind: input, shape index: {}]   ;;  %s12120_s5 = inlined_call_operand.hbm [shape: bf16[128,128], index: 5, kind: input, shape index: {}]   ;;  %s12121_s6 = inlined_call_operand.vmem [shape: f32[1,128], index: 6, kind: input, shape index: {}]   ;;  %s12122_s7 = inlined_call_operand.hbm [shape: bf16[128,128], index: 7, kind: input, shape index: {}]   ;;  %s12123_s8 = inlined_call_operand.vmem [shape: f32[1,128], index: 8, kind: input, shape index: {}]   ;;  %s12124_s9 = inlined_call_operand.vmem [shape: bf16[1,128], index: 9, kind: input, shape index: {}]   ;;  %s12125_s10 = inlined_call_operand.<no memory space> [shape: f32[1], index: 10, kind: input, shape index: {}]   ;;  %s12126_s11 = inlined_call_operand.hbm [shape: f32[2,8,128], index: 11, kind: output, shape index: {}]  }
   0x1   :  { %12149 = sst [smem:[#allocation160_spill]] %s12121_s6 }
   0x2   :  { %12150 = sst [smem:[#allocation161_spill]] %s12123_s8 }
   0x3   :  { %12151 = sst [smem:[#allocation162_spill]] %s12124_s9 }
   0x4   :  { %12152 = sst [smem:[#allocation163_spill]] %s12126_s11 }
   0x5   :  { %16 = sst [smem:[#allocation2]] %s12125_s10 }
   0x6   :  { %17 = vsyncpa [#allocation4], 0 }
   0x7   :  { %19 = vsyncpa [#allocation4 + $0x1], 0 }
   0x8   :  { %20 = vsyncpa [#allocation7], 0 }
   0x9   :  { %21 = vsyncpa [#allocation10], 0 }
   0xa   :  { %22 = vsyncpa [#allocation5], 0 }
   0xb   :  { %24 = vsyncpa [#allocation5 + $0x1], 0  ;;  %s9307_s19 = smov 0   ;;  %s9309_s20 = smov 0  }
   0xc   :  { %s9311_s21 = smov 0   ;;  %s9313_s22 = smov 0  }
   0xd   :  { %s9315_s23 = smov 0   ;;  %s9317_s24 = smov 0  }
   0xe LB: > { %12153 = sst [smem:[#allocation17_spill]] %s9212_s19  ;;  %s7727_s10 = sadd.s32 4294967295, %s9232_s24   ;;  %s9232_s24 = sphi %s9317_s24, %s30_s24   ;;  %s9228_s23 = sphi %s9315_s23, %s12536_s23   ;;  %s9224_s22 = sphi %s9313_s22, %s12535_s22   ;;  %s9220_s21 = sphi %s9311_s21, %s12534_s21   ;;  %s9216_s20 = sphi %s9309_s20, %s12533_s20   ;;  %s9212_s19 = sphi %s9307_s19, %s12532_s19  }
   0xf   : > { %12154 = sst [smem:[#allocation18_spill]] %s9224_s22  ;;  %s7728_s25 = sadd.s32 4294967294, %s9232_s24  }
  0x10   : > { %p62_p0 = scmp.ne.s32.totalorder %s9216_s20, %s9212_s19  ;;  %p9341_p1 = scmp.eq.s32.totalorder %s7727_s10, 0 }
  0x11   : > { %p9345_p2 = scmp.eq.s32.totalorder %s7727_s10, 1  ;;  %p304_p3 = scmp.eq.s32.totalorder %s7728_s25, 1 }
  0x12   : > { %s12155_s26 = scalar_select %p9341_p1, 1, 0 }
  0x13   : > { %s12156_s27 = scalar_select %p9345_p2, 1, 0 }
  0x14   : > { %p9351_p4 = por %p9341_p1, %p62_p0  ;;  %p7729_p5 = scmp.ge.s32.totalorder %s9232_s24, 1 }
  0x15   : > { %p9356_p6 = por %p304_p3, %p62_p0  ;;  %p311_p7 = scmp.lt.s32.totalorder %s9232_s24, 3 }
  0x16   : > { %s12157_s28 = scalar_select %p9351_p4, 1, 0 }
  0x17   : > { %s12158_s29 = scalar_select %p9356_p6, 1, 0 }
  0x18   : > { %p9361_p8 = pnand %p7729_p5, %p311_p7  ;;  %s9234_s12 = smov [#allocation6]  }
  0x19   : > { %12159 = sst [smem:[#allocation19_spill]] %s12158_s29  ;;  %s323_s13 = sshll.u32 %s9234_s12, 4  ;;  %s9365_s13 = int_to_ptr.vmem [resolvable:$true] %s323_s13 }
  0x1a   : > { %s12160_s30 = scalar_select %p9361_p8, 1, 0 }
  0x1b   : > { %p8863_p9 = pneg %p9361_p8  ;;  %s9235_s15 = smov [#allocation9]  }
  0x1c   : > { %s355_s16 = sshll.u32 %s9235_s15, 4  ;;  %s9236_s17 = smov [#allocation8]   ;;  %s9376_s16 = int_to_ptr.vmem [resolvable:$true] %s355_s16 }
  0x1d   : > { %p9372_p11 = pnand %p8863_p9, %p9341_p1  ;;  %s9378_s18 = sshll.u32 %s9236_s17, 4  ;;  %s340_s18 = int_to_ptr.vmem [resolvable:$true] %s9378_s18 }
  0x1e   : > { %s9000_s12 = scalar_lea.hbm %s12116_s1, 1024 }
  0x1f   : > { %p9001_p12 = scmp.ne.s32.totalorder %s12116_s1, %s9000_s12  ;;  %p9388_p13 = pneg %p9372_p11 }
  0x20   : > { %p9007_p5 = scmp.lt.u32.totalorder %s9000_s12, %s12116_s1 }
  0x21   : > { %p9003_p0 = pnand %p9388_p13, %p9001_p12 }
  0x23   : > { %p9004_p3 = pneg %p9003_p0 }
  0x25   : > { %p9009_p7 = pnand %p9007_p5, %p9004_p3 }
  0x27   : > { %9012 = shalt.err (!%p9009_p7)
}
  0x28   : > { %s9013_s19 = scalar_lea.vmem %s9365_s13, 1024  ;;  %p9021_p1 = scmp.lt.s32.totalorder %s9365_s13, %s9365_s13 }
  0x29   : > { %p9014_p9 = scmp.ne.s32.totalorder %s9365_s13, %s9013_s19  ;;  %p9022_p4 = scmp.lt.s32.totalorder %s9013_s19, %s9013_s19 }
  0x2b   : > { %p9016_p10 = pnand %p9014_p9, %p9388_p13  ;;  %p9023_p12 = por %p9022_p4, %p9021_p1 }
  0x2d   : > { %p9017_p6 = pneg %p9016_p10 }
  0x2f   : > { %p9024_p0 = pnand %p9023_p12, %p9017_p6 }
  0x31   : > { %9027 = shalt.err (!%p9024_p0)
}
  0x32   : > { %s9237_s29 = smov 64   ;;  %s9238_s10 = smov 4  }
  0x33   : > { %8866 = dma.hbm_to_vmem [thread:$0]  (!%p9372_p11), %s12116_s1, 1024, %s9365_s13, [#allocation7], %s9237_s29, %s9237_s29, %s9238_s10  }
  0x34   : > { %s9028_s19 = scalar_lea.hbm %s12120_s5, 1024 }
  0x35   : > { %p9029_p1 = scmp.ne.s32.totalorder %s12120_s5, %s9028_s19  ;;  %p9035_p10 = scmp.lt.u32.totalorder %s9028_s19, %s12120_s5 }
  0x37   : > { %p9031_p4 = pnand %p9029_p1, %p9388_p13 }
  0x39   : > { %p9032_p6 = pneg %p9031_p4 }
  0x3b   : > { %p9037_p3 = pnand %p9035_p10, %p9032_p6 }
  0x3d   : > { %9040 = shalt.err (!%p9037_p3)
}
  0x3e   : > { %s9041_s13 = scalar_lea.vmem %s9376_s16, 1024  ;;  %p9049_p12 = scmp.lt.s32.totalorder %s9376_s16, %s9376_s16 }
  0x3f   : > { %p9042_p5 = scmp.ne.s32.totalorder %s9376_s16, %s9041_s13  ;;  %p9050_p0 = scmp.lt.s32.totalorder %s9041_s13, %s9041_s13 }
  0x41   : > { %p9044_p7 = pnand %p9042_p5, %p9388_p13  ;;  %p9051_p1 = por %p9050_p0, %p9049_p12 }
  0x43   : > { %p9045_p9 = pneg %p9044_p7 }
  0x45   : > { %p9052_p4 = pnand %p9051_p1, %p9045_p9 }
  0x47   : > { %9055 = shalt.err (!%p9052_p4)
}
  0x48   : > { %8872 = dma.hbm_to_vmem [thread:$0]  (!%p9372_p11), %s12120_s5, 1024, %s9376_s16, [#allocation10], %s9237_s29, %s9237_s29, %s9238_s10  }
  0x49   : > { %s9056_s25 = scalar_lea.hbm %s12118_s3, 1024 }
  0x4a   : > { %p9057_p6 = scmp.ne.s32.totalorder %s12118_s3, %s9056_s25  ;;  %p9063_p5 = scmp.lt.u32.totalorder %s9056_s25, %s12118_s3 }
  0x4c   : > { %p9059_p10 = pnand %p9057_p6, %p9388_p13 }
  0x4e   : > { %p9060_p3 = pneg %p9059_p10 }
  0x50   : > { %p9065_p7 = pnand %p9063_p5, %p9060_p3 }
  0x52   : > { %9068 = shalt.err (!%p9065_p7)
}
  0x53   : > { %s9069_s13 = scalar_lea.vmem %s340_s18, 1024  ;;  %p9077_p1 = scmp.lt.s32.totalorder %s340_s18, %s340_s18 }
  0x54   : > { %p9070_p9 = scmp.ne.s32.totalorder %s340_s18, %s9069_s13  ;;  %p9078_p4 = scmp.lt.s32.totalorder %s9069_s13, %s9069_s13 }
  0x56   : > { %p9072_p12 = pnand %p9070_p9, %p9388_p13  ;;  %p9079_p8 = por %p9078_p4, %p9077_p1 }
  0x58   : > { %p9073_p0 = pneg %p9072_p12 }
  0x5a   : > { %p9080_p2 = pnand %p9079_p8, %p9073_p0 }
  0x5c   : > { %9083 = shalt.err (!%p9080_p2)
}
  0x5d   : > { %8869 = dma.hbm_to_vmem [thread:$0]  (!%p9372_p11), %s12118_s3, 1024, %s340_s18, [#allocation7], %s9237_s29, %s9237_s29, %s9238_s10  }
  0x5e   : > { %s9239_s8 = smov [#allocation11]   ;;  %s9084_s12 = scalar_lea.hbm %s12122_s7, 1024 }
  0x5f   : > { %s371_s9 = sshll.u32 %s9239_s8, 4  ;;  %p9085_p2 = scmp.ne.s32.totalorder %s12122_s7, %s9084_s12  ;;  %s372_s9 = int_to_ptr.vmem [resolvable:$true] %s371_s9 }
  0x60   : > { %p9091_p10 = scmp.lt.u32.totalorder %s9084_s12, %s12122_s7 }
  0x61   : > { %p9087_p8 = pnand %p9085_p2, %p9388_p13 }
  0x63   : > { %p9088_p6 = pneg %p9087_p8 }
  0x65   : > { %p9093_p3 = pnand %p9091_p10, %p9088_p6 }
  0x67   : > { %9096 = shalt.err (!%p9093_p3)
}
  0x68   : > { %s9097_s18 = scalar_lea.vmem %s372_s9, 1024  ;;  %p9105_p12 = scmp.lt.s32.totalorder %s372_s9, %s372_s9 }
  0x69   : > { %p9098_p5 = scmp.ne.s32.totalorder %s372_s9, %s9097_s18  ;;  %p9106_p0 = scmp.lt.s32.totalorder %s9097_s18, %s9097_s18 }
  0x6b   : > { %p9100_p7 = pnand %p9098_p5, %p9388_p13  ;;  %p9107_p1 = por %p9106_p0, %p9105_p12 }
  0x6d   : > { %p9101_p9 = pneg %p9100_p7 }
  0x6f   : > { %p9108_p4 = pnand %p9107_p1, %p9101_p9 }
  0x71   : > { %9111 = shalt.err (!%p9108_p4)
}
  0x72   : > { %8875 = dma.hbm_to_vmem [thread:$0]  (!%p9372_p11), %s12122_s7, 1024, %s372_s9, [#allocation10], %s9237_s29, %s9237_s29, %s9238_s10  }
  0x73   : > { %s42_s11 = sadd.s32 1, %s9228_s23  ;;  %s49_s14 = sadd.s32 1, %s9220_s21 }
  0x74   : > { %p44_p13 = scmp.ge.s32.totalorder %s42_s11, 2  ;;  %p56_p2 = scmp.ne.s32.totalorder %s9220_s21, %s9216_s20 }
  0x75   : > { %p57_p8 = scmp.eq.s32.totalorder %s9232_s24, 0  ;;  %p8888_p6 = scmp.lt.s32.totalorder %s9232_s24, 2 }
  0x76   : > { %s12538_s11 = smov (%p44_p13, %s42_s11), 0  ;;  %p12163_p3 = scmp.ne.s32.totalorder %s12156_s27, 0 }
  0x77   : > { %p58_p10 = por %p57_p8, %p56_p2  ;;  %s46_s22 = ssub.s32 %s9228_s23, %s12538_s11 }
  0x78   : > { %p9491_p5 = por %p12163_p3, %p56_p2  ;;  %s394_s25 = sand.u32 1, %s9220_s21  }
  0x79   : > { %p47_p7 = scmp.eq.s32.totalorder %s46_s22, 0  ;;  %s7735_s9 = sshll.u32 %s394_s25, 6 }
  0x7a   : > { %s7794_s12 = sshll.u32 %s9228_s23, 10  ;;  %s398_s27 = scalar_lea.vmem [#allocation3], %s7735_s9 }
  0x7b   : > { %s9500_s15 = scalar_select %p47_p7, %s9220_s21, %s49_s14  }
  0x7c   : > { %s9505_s13 = scalar_lea.hbm %s12115_s0, %s7794_s12  ;;  %s405_s18 = sshll.u32 %s398_s27, 4  ;;  %s9513_s18 = int_to_ptr.vmem [resolvable:$true] %s405_s18 }
  0x7d   : > { %p9509_p11 = pnand %p8888_p6, %p58_p10  ;;  %s9515_s6 = scalar_lea.sflag [#allocation4], %s394_s25 }
  0x7e   : > { %s9112_s14 = scalar_lea.hbm %s9505_s13, 1024  ;;  %s9117_s12 = scalar_lea.hbm %s12115_s0, 2048 }
  0x7f   : > { %p9113_p9 = scmp.ne.s32.totalorder %s9505_s13, %s9112_s14  ;;  %p9114_p12 = pneg %p9509_p11 }
  0x80   : > { %p9118_p4 = scmp.lt.u32.totalorder %s9505_s13, %s12115_s0  ;;  %p9119_p13 = scmp.lt.u32.totalorder %s9117_s12, %s9112_s14 }
  0x81   : > { %p9115_p0 = pnand %p9114_p12, %p9113_p9  ;;  %p9121_p8 = scmp.lt.u32.totalorder %s9112_s14, %s9505_s13 }
  0x82   : > { %p9120_p2 = por %p9119_p13, %p9118_p4 }
  0x83   : > { %p9116_p1 = pneg %p9115_p0 }
  0x84   : > { %p9122_p6 = por %p9121_p8, %p9120_p2 }
  0x86   : > { %p9123_p10 = pnand %p9122_p6, %p9116_p1 }
  0x88   : > { %9126 = shalt.err (!%p9123_p10)
}
  0x89   : > { %s9127_s25 = scalar_lea.vmem %s9513_s18, 1024  ;;  %s9240_s27 = smov [#allocation3]  }
  0x8a   : > { %p9128_p3 = scmp.ne.s32.totalorder %s9513_s18, %s9127_s25  ;;  %s9132_s22 = sshll.u32 %s9240_s27, 4  ;;  %s9133_s22 = int_to_ptr.vmem [resolvable:$false] %s9132_s22 }
  0x8b   : > { %s9134_s9 = scalar_lea.vmem %s9133_s22, 2048  ;;  %p9135_p0 = scmp.lt.s32.totalorder %s9513_s18, %s9133_s22 }
  0x8c   : > { %p9130_p7 = pnand %p9128_p3, %p9114_p12  ;;  %p9136_p4 = scmp.lt.s32.totalorder %s9134_s9, %s9127_s25 }
  0x8e   : > { %p9131_p9 = pneg %p9130_p7  ;;  %p9137_p13 = por %p9136_p4, %p9135_p0 }
  0x90   : > { %p9138_p2 = pnand %p9137_p13, %p9131_p9 }
  0x92   : > { %9141 = shalt.err (!%p9138_p2)
}
  0x93   : > { %8879 = dma.hbm_to_vmem [thread:$0]  (!%p9509_p11), %s9505_s13, 1024, %s9513_s18, %s9515_s6, %s9237_s29, %s9237_s29, %s9238_s10  }
  0x94   : > { %p12166_p12 = scmp.ne.s32.totalorder %s12160_s30, 0 }
  0x96   : > { %417 = sbr.rel (%p12166_p12) target bundleno = 2801 (0xaf1), region = 64 }
  0x9d   : > { %s9549_s14 = sand.u32 1, %s9216_s20   ;;  %p12167_p1 = scmp.ne.s32.totalorder %s12157_s28, 0 }
  0x9e   : > { %s7739_s12 = sshll.u32 %s9549_s14, 6  ;;  %s420_s17 = scalar_lea.sflag [#allocation4], %s9549_s14 }
  0x9f   : > { %s9553_s19 = scalar_lea.vmem [#allocation3], %s7739_s12 }
  0xa0   : > { %9195 = dma.done.wait (%p12167_p1), %s420_s17, 1024  }
  0xa1   : > { %9197 = vsyncadd (%p12167_p1), %s420_s17, 4294966272  ;;  %p12168_p11 = scmp.ne.s32.totalorder %s12155_s26, 0 }
  0xa3   : > { %9199 = dma.done.wait (%p12168_p11), [#allocation7], 2048  }
  0xa4   : > { %9201 = vsyncadd (%p12168_p11), [#allocation7], 4294965248 }
  0xa5   : > { %9203 = dma.done.wait (%p12168_p11), [#allocation10], 2048  }
  0xa6   : > { %9205 = vsyncadd (%p12168_p11), [#allocation10], 4294965248  ;;  %v520_v0 = vlaneseq  ;;  %v9241_v4 = vmov 0.0   ;;  %v500_v6 = vld [vmem:[%s9553_s19] sm:$0xf]  ;;  %v9617_v29 = vld [vmem:[#allocation6 + $0x8] sm:$0xff]  }
  0xa7   : > { %v9579_v7 = vpack.i.b16 %v500_v6, %v500_v6  ;;  %v756_v12 = vshrl.u32 %v500_v6, 16  ;;  %v9596_v16 = vld [vmem:[%s9553_s19] sm:$0xff]   ;;  %v9619_v30 = vld [vmem:[#allocation6 + $0x10] sm:$0xff]   ;;  %v9623_v35 = vld [vmem:[#allocation6 + $0x18] sm:$0xff]   ;;  %s12173_s27 = sld [smem:[#allocation160_spill]]  ;;  %s12219_s29 = sld [smem:[#allocation162_spill]] }
  0xa8   : > { %v9567_v1 = vshrl.u32 %v520_v0, 7  ;;  %v9569_v2 = vand.u32 127, %v520_v0  ;;  %8155 = vmatprep.mubr.bf16.mxu0 %v9596_v16  ;;  %8187 = vmatprep.mubr.bf16.mxu1 %v9596_v16  ;;  %v9614_v25 = vld [vmem:[#allocation6] sm:$0xff]   ;;  %v9633_v44 = vld [vmem:[#allocation6 + $0x28] sm:$0xff]   ;;  %v9638_v48 = vld [vmem:[#allocation6 + $0x30] sm:$0xff]   ;;  %s5458_s18 = sld [smem:[#allocation2]] }
  0xa9   : > { %v9590_v13 = vpack.i.b16 %v756_v12, %v756_v12  ;;  %v9626_v39 = vld [vmem:[#allocation6 + $0x20] sm:$0xff]   ;;  %v9645_v54 = vld [vmem:[#allocation6 + $0x38] sm:$0xff]   ;;  %v9658_v63 = vld [vmem:[%s9553_s19 + $0x8] sm:$0xff]   ;;  %vm6913_vm1 = vcmask 130112   ;;  %vm6920_vm2 = vcmask 195712   ;;  %vm6927_vm3 = vcmask 261312  }
  0xaa   : > { %12169 = vst [vmem:[#allocation20_spill] sm:$0xff] %v9567_v1  ;;  %12170 = vst [vmem:[#allocation21_spill] sm:$0xff] %v9569_v2  ;;  %vm5594_vm0 = vcmp.eq.s32.totalorder %v9567_v1, %v9569_v2  ;;  %v9574_v3 = vsub.s32 0, %v9567_v1  ;;  %v1181_v9 = vsub.s32 2, %v9567_v1  ;;  %v1461_v15 = vsub.s32 3, %v9567_v1  ;;  %v9661_v0 = vld [vmem:[%s9553_s19 + $0x10] sm:$0xff]  }
  0xab   : > { %v9576_v5 = vsel %vm5594_vm0, 1.0, %v9241_v4  ;;  %v9604_v18 = vsub.s32 1, %v9567_v1  ;;  %vm6934_vm4 = vcmask 326912   ;;  %vm6941_vm5 = vcmask 392512   ;;  %s12524_s16 = sld [smem:[#allocation18_spill]]  ;;  %s7744_s6 = sshll.u32 %s9549_s14, 3 }
  0xac   : > { %12171 = vst [vmem:[#allocation22_spill] sm:$0xff] %v9576_v5  ;;  %v9582_v8 = vsub.f32 1.0, %v9576_v5  ;;  %v523_v10 = vrot.slane %v9579_v7, %v9574_v3  ;;  %v762_v14 = vrot.slane %v9590_v13, %v9574_v3  ;;  %v1182_v20 = vrot.slane %v9579_v7, %v1181_v9  ;;  %s477_s22 = scalar_lea.vmem [#allocation12], %s7744_s6  ;;  %s9243_s13 = smov [#allocation12]  }
  0xad   : > { %v902_v19 = vrot.slane %v9579_v7, %v9604_v18  ;;  %v1042_v21 = vrot.slane %v9590_v13, %v9604_v18  ;;  %v1322_v22 = vrot.slane %v9590_v13, %v1181_v9  ;;  %v1462_v23 = vrot.slane %v9579_v7, %v1461_v15  ;;  %s7608_s9 = sshll.u32 %s477_s22, 4  ;;  %s12068_s9 = int_to_ptr.vmem [resolvable:$true] %s7608_s9 }
  0xae   : > { %v9588_v11 = vrot.slane %v9582_v8, %v1181_v9  ;;  %525 = vbcast.lane.c.b16.xlu0 %v523_v10, 256  ;;  %533 = vbcast.lane.c.b16.xlu1 %v523_v10, 288  ;;  %v9599_v17 = vrot.slane %v9582_v8, %v1461_v15  ;;  %v1602_v24 = vrot.slane %v9590_v13, %v1461_v15  ;;  %vm6948_vm6 = vcmask 458112   ;;  %s9142_s10 = scalar_lea.vmem %s12068_s9, 128 }
  0xaf   : > { %v9630_v40 = vrot.slane %v9582_v8, %v9574_v3  ;;  %vm6955_vm7 = vcmask 523712   ;;  %vm6962_vm8 = vcmask 589312   ;;  %vm6969_vm9 = vcmask 654912   ;;  %p9143_p8 = scmp.ne.s32.totalorder %s12068_s9, %s9142_s10 }
  0xb0   : > { %vm6976_vm10 = vcmask 720512   ;;  %vm12147_vm11 = vcmask 786112   ;;  %vm12148_vm12 = vcmask 851712   ;;  %vm6997_vm13 = vcmask 917312  }
  0xb1   : > { %vm7004_vm14 = vcmask 982912   ;;  %vm7011_vm15 = vcmask 1048512   ;;  %vm7566_vm0 = vcmask 1041409   ;;  %s7791_s25 = sshll.u32 %s12524_s16, 7  ;;  %p9144_p6 = pnand %p9143_p8, %p9491_p5 }
  0xb2   : > { %529 = vbcast.lane.c.b16.xlu0 %v523_v10, 272  ;;  %537 = vbcast.lane.c.b16.xlu1 %v523_v10, 304 }
  0xb3   : > { %p9145_p10 = pneg %p9144_p6 }
  0xb6   : > { %541 = vbcast.lane.c.b16.xlu0 %v523_v10, 320  ;;  %545 = vbcast.lane.c.b16.xlu1 %v523_v10, 336 }
  0xba   : > { %549 = vbcast.lane.c.b16.xlu0 %v523_v10, 352  ;;  %553 = vbcast.lane.c.b16.xlu1 %v523_v10, 368 }
  0xbe   : > { %764 = vbcast.lane.c.b16.xlu0 %v762_v14, 256  ;;  %768 = vbcast.lane.c.b16.xlu1 %v762_v14, 272 }
  0xc2   : > { %772 = vbcast.lane.c.b16.xlu0 %v762_v14, 288  ;;  %776 = vbcast.lane.c.b16.xlu1 %v762_v14, 304 }
  0xc6   : > { %780 = vbcast.lane.c.b16.xlu0 %v762_v14, 320  ;;  %784 = vbcast.lane.c.b16.xlu1 %v762_v14, 336 }
  0xca   : > { %788 = vbcast.lane.c.b16.xlu0 %v762_v14, 352  ;;  %792 = vbcast.lane.c.b16.xlu1 %v762_v14, 368 }
  0xce   : > { %904 = vbcast.lane.c.b16.xlu0 %v902_v19, 256  ;;  %908 = vbcast.lane.c.b16.xlu1 %v902_v19, 272 }
  0xd2   : > { %912 = vbcast.lane.c.b16.xlu0 %v902_v19, 288  ;;  %916 = vbcast.lane.c.b16.xlu1 %v902_v19, 304 }
  0xd6   : > { %920 = vbcast.lane.c.b16.xlu0 %v902_v19, 320  ;;  %924 = vbcast.lane.c.b16.xlu1 %v902_v19, 336 }
  0xda   : > { %928 = vbcast.lane.c.b16.xlu0 %v902_v19, 352  ;;  %932 = vbcast.lane.c.b16.xlu1 %v902_v19, 368  ;;  %v9674_v19 = vld [vmem:[%s9553_s19 + $0x18] sm:$0xff]  }
  0xde   : > { %1184 = vbcast.lane.c.b16.xlu1 %v1182_v20, 256  ;;  %1044 = vbcast.lane.c.b16.xlu0 %v1042_v21, 256 }
  0xe2   : > { %1188 = vbcast.lane.c.b16.xlu1 %v1182_v20, 272  ;;  %1048 = vbcast.lane.c.b16.xlu0 %v1042_v21, 272 }
  0xe6   : > { %1192 = vbcast.lane.c.b16.xlu1 %v1182_v20, 288  ;;  %1052 = vbcast.lane.c.b16.xlu0 %v1042_v21, 288 }
  0xea   : > { %1196 = vbcast.lane.c.b16.xlu1 %v1182_v20, 304  ;;  %1056 = vbcast.lane.c.b16.xlu0 %v1042_v21, 304 }
  0xee   : > { %1200 = vbcast.lane.c.b16.xlu1 %v1182_v20, 320  ;;  %1060 = vbcast.lane.c.b16.xlu0 %v1042_v21, 320 }
  0xf2   : > { %1204 = vbcast.lane.c.b16.xlu1 %v1182_v20, 336  ;;  %1064 = vbcast.lane.c.b16.xlu0 %v1042_v21, 336 }
  0xf6   : > { %1208 = vbcast.lane.c.b16.xlu1 %v1182_v20, 352  ;;  %1068 = vbcast.lane.c.b16.xlu0 %v1042_v21, 352 }
  0xfa   : > { %1212 = vbcast.lane.c.b16.xlu1 %v1182_v20, 368  ;;  %1072 = vbcast.lane.c.b16.xlu0 %v1042_v21, 368  ;;  %v9678_v20 = vld [vmem:[%s9553_s19 + $0x20] sm:$0xff]  }
  0xfe   : > { %1324 = vbcast.lane.c.b16.xlu0 %v1322_v22, 256  ;;  %1328 = vbcast.lane.c.b16.xlu1 %v1322_v22, 272 }
 0x102   : > { %1332 = vbcast.lane.c.b16.xlu0 %v1322_v22, 288  ;;  %1336 = vbcast.lane.c.b16.xlu1 %v1322_v22, 304 }
 0x106   : > { %1340 = vbcast.lane.c.b16.xlu0 %v1322_v22, 320  ;;  %1344 = vbcast.lane.c.b16.xlu1 %v1322_v22, 336 }
 0x10a   : > { %1348 = vbcast.lane.c.b16.xlu0 %v1322_v22, 352  ;;  %1352 = vbcast.lane.c.b16.xlu1 %v1322_v22, 368 }
 0x10e   : > { %1464 = vbcast.lane.c.b16.xlu0 %v1462_v23, 256  ;;  %1468 = vbcast.lane.c.b16.xlu1 %v1462_v23, 272 }
 0x112   : > { %1472 = vbcast.lane.c.b16.xlu0 %v1462_v23, 288  ;;  %1476 = vbcast.lane.c.b16.xlu1 %v1462_v23, 304 }
 0x116   : > { %1480 = vbcast.lane.c.b16.xlu0 %v1462_v23, 320  ;;  %1484 = vbcast.lane.c.b16.xlu1 %v1462_v23, 336 }
 0x11a   : > { %1488 = vbcast.lane.c.b16.xlu0 %v1462_v23, 352  ;;  %1492 = vbcast.lane.c.b16.xlu1 %v1462_v23, 368  ;;  %v9682_v23 = vrot.slane %v9582_v8, %v9604_v18 }
 0x11e   : > { %1604 = vbcast.lane.c.b16.xlu0 %v1602_v24, 256  ;;  %1608 = vbcast.lane.c.b16.xlu1 %v1602_v24, 272 }
 0x120   : > { %v526_v26 = vpop.permute.xlu0 %525  ;;  %v534_v27 = vpop.permute.xlu1 %533 }
 0x121   : > { %v603_v28 = vmul.bf16 %v9614_v25, %v526_v26  ;;  %v605_v34 = vmul.bf16 %v9619_v30, %v534_v27 }
 0x122   : > { %1612 = vbcast.lane.c.b16.xlu0 %v1602_v24, 288  ;;  %1616 = vbcast.lane.c.b16.xlu1 %v1602_v24, 304 }
 0x123   : > { %8139 = vmatprep.subr.bf16.mxu0 %v603_v28 }
 0x124   : > { %8140 = vmatpush3.bf16.msra.mxu0 %v603_v28  ;;  %v530_v31 = vpop.permute.xlu0 %529  ;;  %v538_v32 = vpop.permute.xlu1 %537 }
 0x125   : > { %v604_v33 = vmul.bf16 %v9617_v29, %v530_v31  ;;  %v606_v38 = vmul.bf16 %v9623_v35, %v538_v32  ;;  %v9693_v31 = vld [vmem:[%s9553_s19 + $0x28] sm:$0xff]   ;;  %v9697_v32 = vld [vmem:[%s9553_s19 + $0x30] sm:$0xff]  }
 0x126   : > { %1620 = vbcast.lane.c.b16.xlu0 %v1602_v24, 320  ;;  %1624 = vbcast.lane.c.b16.xlu1 %v1602_v24, 336 }
 0x127   : > { %8141 = vmatprep.subr.bf16.mxu0 %v604_v33 }
 0x128   : > { %8142 = vmatpush3.bf16.msra.mxu0 %v604_v33  ;;  %v542_v36 = vpop.permute.xlu0 %541  ;;  %v546_v37 = vpop.permute.xlu1 %545 }
 0x129   : > { %8143 = vmatprep.subr.bf16.mxu0 %v605_v34  ;;  %v607_v43 = vmul.bf16 %v9626_v39, %v542_v36  ;;  %v608_v47 = vmul.bf16 %v9633_v44, %v546_v37 }
 0x12a   : > { %1628 = vbcast.lane.c.b16.xlu0 %v1602_v24, 352  ;;  %1632 = vbcast.lane.c.b16.xlu1 %v1602_v24, 368 }
 0x12c   : > { %8144 = vmatpush3.bf16.msra.mxu0 %v605_v34  ;;  %v550_v41 = vpop.permute.xlu0 %549  ;;  %v554_v42 = vpop.permute.xlu1 %553 }
 0x12d   : > { %8145 = vmatprep.subr.bf16.mxu0 %v606_v38  ;;  %v609_v53 = vmul.bf16 %v9638_v48, %v550_v41  ;;  %v610_v58 = vmul.bf16 %v9645_v54, %v554_v42 }
 0x12e   : > { %5604 = vbcast.lane.b32.xlu1 %v9630_v40, 256  ;;  %5608 = vbcast.lane.b32.xlu0 %v9630_v40, 264 }
 0x130   : > { %8146 = vmatpush3.bf16.msra.mxu0 %v606_v38  ;;  %v765_v45 = vpop.permute.xlu0 %764  ;;  %v769_v46 = vpop.permute.xlu1 %768 }
 0x131   : > { %8147 = vmatprep.subr.bf16.mxu0 %v607_v43  ;;  %v794_v49 = vmul.bf16 %v9614_v25, %v765_v45  ;;  %v795_v50 = vmul.bf16 %v9617_v29, %v769_v46 }
 0x132   : > { %5612 = vbcast.lane.b32.xlu1 %v9630_v40, 272  ;;  %5620 = vbcast.lane.b32.xlu0 %v9630_v40, 288 }
 0x133   : > { %8171 = vmatprep.subr.bf16.mxu1 %v794_v49 }
 0x134   : > { %8148 = vmatpush3.bf16.msra.mxu0 %v607_v43  ;;  %8172 = vmatpush3.bf16.msra.mxu1 %v794_v49  ;;  %v773_v51 = vpop.permute.xlu0 %772  ;;  %v777_v52 = vpop.permute.xlu1 %776  ;;  %v9709_v43 = vld [vmem:[%s9553_s19 + $0x38] sm:$0xff]   ;;  %s12217_s19 = sld [smem:[#allocation161_spill]] }
 0x135   : > { %8149 = vmatprep.subr.bf16.mxu0 %v608_v47  ;;  %8173 = vmatprep.subr.bf16.mxu1 %v795_v50  ;;  %v796_v55 = vmul.bf16 %v9619_v30, %v773_v51  ;;  %v797_v59 = vmul.bf16 %v9623_v35, %v777_v52 }
 0x136   : > { %5616 = vbcast.lane.b32.xlu1 %v9630_v40, 280  ;;  %5628 = vbcast.lane.b32.xlu0 %v9630_v40, 304 }
 0x138   : > { %8150 = vmatpush3.bf16.msra.mxu0 %v608_v47  ;;  %8174 = vmatpush3.bf16.msra.mxu1 %v795_v50  ;;  %v781_v56 = vpop.permute.xlu0 %780  ;;  %v785_v57 = vpop.permute.xlu1 %784 }
 0x139   : > { %8151 = vmatprep.subr.bf16.mxu0 %v609_v53  ;;  %8175 = vmatprep.subr.bf16.mxu1 %v796_v55  ;;  %v798_v62 = vmul.bf16 %v9626_v39, %v781_v56  ;;  %v799_v7 = vmul.bf16 %v9633_v44, %v785_v57 }
 0x13a   : > { %5624 = vbcast.lane.b32.xlu1 %v9630_v40, 296  ;;  %5636 = vbcast.lane.b32.xlu0 %v9630_v40, 320  ;;  %s12218_s26 = smov %s12217_s19 }
 0x13c   : > { %8152 = vmatpush3.bf16.msra.mxu0 %v609_v53  ;;  %8176 = vmatpush3.bf16.msra.mxu1 %v796_v55  ;;  %v789_v60 = vpop.permute.xlu0 %788  ;;  %v793_v61 = vpop.permute.xlu1 %792 }
 0x13d   : > { %8153 = vmatprep.subr.bf16.mxu0 %v610_v58  ;;  %8177 = vmatprep.subr.bf16.mxu1 %v797_v59  ;;  %v800_v14 = vmul.bf16 %v9638_v48, %v789_v60  ;;  %v801_v24 = vmul.bf16 %v9645_v54, %v793_v61 }
 0x13e   : > { %5632 = vbcast.lane.b32.xlu1 %v9630_v40, 312  ;;  %5644 = vbcast.lane.b32.xlu0 %v9630_v40, 336 }
 0x140   : > { %8154 = vmatpush3.bf16.msra.mxu0 %v610_v58  ;;  %8178 = vmatpush3.bf16.msra.mxu1 %v797_v59  ;;  %v905_v4 = vpop.permute.xlu0 %904  ;;  %v909_v6 = vpop.permute.xlu1 %908 }
 0x141   : > { %8179 = vmatprep.subr.bf16.mxu1 %v798_v62  ;;  %v934_v9 = vmul.bf16 %v9614_v25, %v905_v4  ;;  %v935_v10 = vmul.bf16 %v9617_v29, %v909_v6 }
 0x142   : > { %5640 = vbcast.lane.b32.xlu1 %v9630_v40, 328  ;;  %5652 = vbcast.lane.b32.xlu0 %v9630_v40, 352 }
 0x143   : > { %8156 = vmatmul.mubr.bf16.vlgmr.msra.gmra.mrb[0].mxu0 %v9658_v63  ;;  %8203 = vmatprep.subr.bf16.mxu0 %v934_v9 }
 0x144   : > { %8159 = vmatprep.mubr.bf16.mxu0 %v9661_v0  ;;  %8180 = vmatpush3.bf16.msra.mxu1 %v798_v62  ;;  %v913_v12 = vpop.permute.xlu0 %912  ;;  %v917_v13 = vpop.permute.xlu1 %916 }
 0x145   : > { %8181 = vmatprep.subr.bf16.mxu1 %v799_v7  ;;  %8204 = vmatpush3.bf16.msra.mxu0 %v934_v9  ;;  %v936_v15 = vmul.bf16 %v9619_v30, %v913_v12  ;;  %v937_v26 = vmul.bf16 %v9623_v35, %v917_v13 }
 0x146   : > { %8205 = vmatprep.subr.bf16.mxu0 %v935_v10  ;;  %5648 = vbcast.lane.b32.xlu1 %v9630_v40, 344 }
 0x147   : > { %5660 = vbcast.lane.b32.xlu0 %v9630_v40, 368 }
 0x148   : > { %8182 = vmatpush3.bf16.msra.mxu1 %v799_v7  ;;  %v921_v21 = vpop.permute.xlu0 %920  ;;  %v925_v22 = vpop.permute.xlu1 %924 }
 0x149   : > { %8183 = vmatprep.subr.bf16.mxu1 %v800_v14  ;;  %8206 = vmatpush3.bf16.msra.mxu0 %v935_v10  ;;  %v938_v28 = vmul.bf16 %v9626_v39, %v921_v21  ;;  %v939_v37 = vmul.bf16 %v9633_v44, %v925_v22 }
 0x14a   : > { %8207 = vmatprep.subr.bf16.mxu0 %v936_v15  ;;  %5656 = vbcast.lane.b32.xlu1 %v9630_v40, 360 }
 0x14b   : > { %8160 = vmatmul.mubr.bf16.gmra.mrb[4].mxu0 %v9674_v19  ;;  %5671 = vbcast.lane.b32.xlu0 %v9682_v23, 256 }
 0x14c   : > { %8163 = vmatprep.mubr.bf16.mxu0 %v9678_v20  ;;  %8184 = vmatpush3.bf16.msra.mxu1 %v800_v14  ;;  %v929_v18 = vpop.permute.xlu0 %928  ;;  %v933_v27 = vpop.permute.xlu1 %932 }
 0x14d   : > { %8185 = vmatprep.subr.bf16.mxu1 %v801_v24  ;;  %8208 = vmatpush3.bf16.msra.mxu0 %v936_v15  ;;  %v940_v42 = vmul.bf16 %v9638_v48, %v929_v18  ;;  %v941_v49 = vmul.bf16 %v9645_v54, %v933_v27 }
 0x14e   : > { %8209 = vmatprep.subr.bf16.mxu0 %v937_v26  ;;  %5664 = vbcast.lane.b32.xlu1 %v9630_v40, 376 }
 0x14f   : > { %5679 = vbcast.lane.b32.xlu0 %v9682_v23, 272 }
 0x150   : > { %8186 = vmatpush3.bf16.msra.mxu1 %v801_v24  ;;  %v1185_v33 = vpop.permute.xlu1 %1184  ;;  %v1045_v34 = vpop.permute.xlu0 %1044 }
 0x151   : > { %8210 = vmatpush3.bf16.msra.mxu0 %v937_v26  ;;  %v1074_v36 = vmul.bf16 %v9614_v25, %v1045_v34  ;;  %v1214_v53 = vmul.bf16 %v9614_v25, %v1185_v33 }
 0x152   : > { %8211 = vmatprep.subr.bf16.mxu0 %v938_v28  ;;  %5675 = vbcast.lane.b32.xlu1 %v9682_v23, 264 }
 0x153   : > { %8164 = vmatmul.mubr.bf16.gmra.mrb[8].mxu0 %v9693_v31  ;;  %8188 = vmatmul.mubr.bf16.vlgmr.msra.gmra.mrb[0].mxu1 %v9658_v63 }
 0x154   : > { %8167 = vmatprep.mubr.bf16.mxu0 %v9697_v32  ;;  %8191 = vmatprep.mubr.bf16.mxu1 %v9661_v0  ;;  %v1189_v38 = vpop.permute.xlu1 %1188  ;;  %v1049_v40 = vpop.permute.xlu0 %1048 }
 0x155   : > { %8212 = vmatpush3.bf16.msra.mxu0 %v938_v28  ;;  %8235 = vmatprep.subr.bf16.mxu1 %v1074_v36  ;;  %v1075_v41 = vmul.bf16 %v9617_v29, %v1049_v40  ;;  %v1215_v58 = vmul.bf16 %v9617_v29, %v1189_v38 }
 0x156   : > { %8213 = vmatprep.subr.bf16.mxu0 %v939_v37  ;;  %8236 = vmatpush3.bf16.msra.mxu1 %v1074_v36 }
 0x157   : > { %8237 = vmatprep.subr.bf16.mxu1 %v1075_v41  ;;  %5683 = vbcast.lane.b32.xlu1 %v9682_v23, 280 }
 0x158   : > { %v1193_v45 = vpop.permute.xlu1 %1192  ;;  %v1053_v46 = vpop.permute.xlu0 %1052  ;;  %5687 = vbcast.lane.b32.xlu0 %v9682_v23, 288 }
 0x159   : > { %8214 = vmatpush3.bf16.msra.mxu0 %v939_v37  ;;  %v1076_v47 = vmul.bf16 %v9619_v30, %v1053_v46  ;;  %v1216_v62 = vmul.bf16 %v9619_v30, %v1193_v45 }
 0x15a   : > { %8215 = vmatprep.subr.bf16.mxu0 %v940_v42  ;;  %8238 = vmatpush3.bf16.msra.mxu1 %v1075_v41 }
 0x15b   : > { %8168 = vmatmul.mubr.bf16.gmra.mrb[12].mxu0 %v9709_v43  ;;  %8192 = vmatmul.mubr.bf16.gmra.mrb[4].mxu1 %v9674_v19 }
 0x15c   : > { %8195 = vmatprep.mubr.bf16.mxu1 %v9678_v20  ;;  %8219 = vmatprep.mubr.bf16.mxu0 %v9596_v16  ;;  %v1197_v50 = vpop.permute.xlu1 %1196  ;;  %v1057_v51 = vpop.permute.xlu0 %1056 }
 0x15d   : > { %8216 = vmatpush3.bf16.msra.mxu0 %v940_v42  ;;  %8239 = vmatprep.subr.bf16.mxu1 %v1076_v47  ;;  %v1077_v52 = vmul.bf16 %v9623_v35, %v1057_v51  ;;  %v1217_v9 = vmul.bf16 %v9623_v35, %v1197_v50 }
 0x15e   : > { %8217 = vmatprep.subr.bf16.mxu0 %v941_v49  ;;  %8240 = vmatpush3.bf16.msra.mxu1 %v1076_v47 }
 0x15f   : > { %8241 = vmatprep.subr.bf16.mxu1 %v1077_v52  ;;  %5691 = vbcast.lane.b32.xlu1 %v9682_v23, 296 }
 0x160   : > { %v1201_v55 = vpop.permute.xlu1 %1200  ;;  %v1061_v56 = vpop.permute.xlu0 %1060  ;;  %5695 = vbcast.lane.b32.xlu0 %v9682_v23, 304 }
 0x161   : > { %8218 = vmatpush3.bf16.msra.mxu0 %v941_v49  ;;  %v1078_v57 = vmul.bf16 %v9626_v39, %v1061_v56  ;;  %v1218_v14 = vmul.bf16 %v9626_v39, %v1201_v55 }
 0x162   : > { %8267 = vmatprep.subr.bf16.mxu0 %v1214_v53  ;;  %8242 = vmatpush3.bf16.msra.mxu1 %v1077_v52 }
 0x163   : > { %8196 = vmatmul.mubr.bf16.gmra.mrb[8].mxu1 %v9693_v31  ;;  %8243 = vmatprep.subr.bf16.mxu1 %v1078_v57 }
 0x164   : > { %8220 = vmatmul.mubr.bf16.vlgmr.msra.gmra.mrb[16].mxu0 %v9658_v63  ;;  %8199 = vmatprep.mubr.bf16.mxu1 %v9697_v32  ;;  %v1205_v59 = vpop.permute.xlu1 %1204  ;;  %v1065_v60 = vpop.permute.xlu0 %1064 }
 0x165   : > { %8268 = vmatpush3.bf16.msra.mxu0 %v1214_v53  ;;  %8223 = vmatprep.mubr.bf16.mxu0 %v9661_v0  ;;  %v1079_v61 = vmul.bf16 %v9633_v44, %v1065_v60  ;;  %v1219_v24 = vmul.bf16 %v9633_v44, %v1205_v59 }
 0x166   : > { %8269 = vmatprep.subr.bf16.mxu0 %v1215_v58  ;;  %8244 = vmatpush3.bf16.msra.mxu1 %v1078_v57 }
 0x167   : > { %8245 = vmatprep.subr.bf16.mxu1 %v1079_v61  ;;  %5699 = vbcast.lane.b32.xlu1 %v9682_v23, 312 }
 0x168   : > { %v1209_v4 = vpop.permute.xlu1 %1208  ;;  %v1069_v6 = vpop.permute.xlu0 %1068  ;;  %5703 = vbcast.lane.b32.xlu0 %v9682_v23, 320 }
 0x169   : > { %8270 = vmatpush3.bf16.msra.mxu0 %v1215_v58  ;;  %v1080_v7 = vmul.bf16 %v9638_v48, %v1069_v6  ;;  %v1220_v28 = vmul.bf16 %v9638_v48, %v1209_v4 }
 0x16a   : > { %8271 = vmatprep.subr.bf16.mxu0 %v1216_v62  ;;  %8246 = vmatpush3.bf16.msra.mxu1 %v1079_v61 }
 0x16b   : > { %8200 = vmatmul.mubr.bf16.gmra.mrb[12].mxu1 %v9709_v43  ;;  %8247 = vmatprep.subr.bf16.mxu1 %v1080_v7 }
 0x16c   : > { %8224 = vmatmul.mubr.bf16.gmra.mrb[20].mxu0 %v9674_v19  ;;  %v1213_v10 = vpop.permute.xlu1 %1212  ;;  %v1073_v12 = vpop.permute.xlu0 %1072  ;;  %8251 = vmatprep.mubr.bf16.mxu1 %v9596_v16 }
 0x16d   : > { %8272 = vmatpush3.bf16.msra.mxu0 %v1216_v62  ;;  %8227 = vmatprep.mubr.bf16.mxu0 %v9678_v20  ;;  %v1081_v13 = vmul.bf16 %v9645_v54, %v1073_v12  ;;  %v1221_v37 = vmul.bf16 %v9645_v54, %v1213_v10 }
 0x16e   : > { %8273 = vmatprep.subr.bf16.mxu0 %v1217_v9  ;;  %8248 = vmatpush3.bf16.msra.mxu1 %v1080_v7 }
 0x16f   : > { %8249 = vmatprep.subr.bf16.mxu1 %v1081_v13  ;;  %5707 = vbcast.lane.b32.xlu1 %v9682_v23, 328 }
 0x170   : > { %v1325_v15 = vpop.permute.xlu0 %1324  ;;  %v1329_v21 = vpop.permute.xlu1 %1328  ;;  %5711 = vbcast.lane.b32.xlu0 %v9682_v23, 336 }
 0x171   : > { %8274 = vmatpush3.bf16.msra.mxu0 %v1217_v9  ;;  %v1354_v22 = vmul.bf16 %v9614_v25, %v1325_v15  ;;  %v1355_v26 = vmul.bf16 %v9617_v29, %v1329_v21 }
 0x172   : > { %8275 = vmatprep.subr.bf16.mxu0 %v1218_v14  ;;  %8250 = vmatpush3.bf16.msra.mxu1 %v1081_v13 }
 0x173   : > { %8299 = vmatprep.subr.bf16.mxu1 %v1354_v22  ;;  %5715 = vbcast.lane.b32.xlu1 %v9682_v23, 344 }
 0x174   : > { %8228 = vmatmul.mubr.bf16.gmra.mrb[24].mxu0 %v9693_v31  ;;  %v1333_v18 = vpop.permute.xlu0 %1332  ;;  %v1337_v27 = vpop.permute.xlu1 %1336  ;;  %5719 = vbcast.lane.b32.xlu0 %v9682_v23, 352 }
 0x175   : > { %8276 = vmatpush3.bf16.msra.mxu0 %v1218_v14  ;;  %8231 = vmatprep.mubr.bf16.mxu0 %v9697_v32  ;;  %v1356_v33 = vmul.bf16 %v9619_v30, %v1333_v18  ;;  %v1357_v38 = vmul.bf16 %v9623_v35, %v1337_v27 }
 0x176   : > { %8277 = vmatprep.subr.bf16.mxu0 %v1219_v24  ;;  %8252 = vmatmul.mubr.bf16.vlgmr.msra.gmra.mrb[16].mxu1 %v9658_v63 }
 0x177   : > { %8300 = vmatpush3.bf16.msra.mxu1 %v1354_v22  ;;  %8255 = vmatprep.mubr.bf16.mxu1 %v9661_v0 }
 0x178   : > { %8301 = vmatprep.subr.bf16.mxu1 %v1355_v26  ;;  %v1341_v34 = vpop.permute.xlu0 %1340  ;;  %v1345_v36 = vpop.permute.xlu1 %1344  ;;  %5723 = vbcast.lane.b32.xlu1 %v9682_v23, 360 }
 0x179   : > { %8278 = vmatpush3.bf16.msra.mxu0 %v1219_v24  ;;  %5727 = vbcast.lane.b32.xlu0 %v9682_v23, 368  ;;  %v1358_v42 = vmul.bf16 %v9626_v39, %v1341_v34  ;;  %v1359_v50 = vmul.bf16 %v9633_v44, %v1345_v36 }
 0x17a   : > { %8279 = vmatprep.subr.bf16.mxu0 %v1220_v28 }
 0x17b   : > { %8302 = vmatpush3.bf16.msra.mxu1 %v1355_v26 }
 0x17c   : > { %8232 = vmatmul.mubr.bf16.gmra.mrb[28].mxu0 %v9709_v43  ;;  %8303 = vmatprep.subr.bf16.mxu1 %v1356_v33  ;;  %v1349_v40 = vpop.permute.xlu0 %1348  ;;  %v1353_v41 = vpop.permute.xlu1 %1352 }
 0x17d   : > { %8280 = vmatpush3.bf16.msra.mxu0 %v1220_v28  ;;  %8283 = vmatprep.mubr.bf16.mxu0 %v9596_v16  ;;  %v1360_v53 = vmul.bf16 %v9638_v48, %v1349_v40  ;;  %v1361_v58 = vmul.bf16 %v9645_v54, %v1353_v41  ;;  %v6003_v41 = vsub.s32 6, %v9567_v1 }
 0x17e   : > { %8281 = vmatprep.subr.bf16.mxu0 %v1221_v37  ;;  %8256 = vmatmul.mubr.bf16.gmra.mrb[20].mxu1 %v9674_v19 }
 0x17f   : > { %8304 = vmatpush3.bf16.msra.mxu1 %v1356_v33  ;;  %8259 = vmatprep.mubr.bf16.mxu1 %v9678_v20  ;;  %v8973_v33 = vld [vmem:[#allocation8 + $0x28] sm:$0xff]  }
 0x180   : > { %8305 = vmatprep.subr.bf16.mxu1 %v1357_v38  ;;  %v1465_v45 = vpop.permute.xlu0 %1464  ;;  %v1469_v46 = vpop.permute.xlu1 %1468  ;;  %5731 = vbcast.lane.b32.xlu1 %v9682_v23, 376 }
 0x181   : > { %8282 = vmatpush3.bf16.msra.mxu0 %v1221_v37  ;;  %v1494_v47 = vmul.bf16 %v9614_v25, %v1465_v45  ;;  %5738 = vbcast.lane.b32.xlu0 %v9588_v11, 256  ;;  %v1495_v49 = vmul.bf16 %v9617_v29, %v1469_v46 }
 0x183   : > { %8306 = vmatpush3.bf16.msra.mxu1 %v1357_v38  ;;  %8331 = vmatprep.subr.bf16.mxu0 %v1494_v47 }
 0x184   : > { %8284 = vmatmul.mubr.bf16.vlgmr.msra.gmra.mrb[32].mxu0 %v9658_v63  ;;  %8307 = vmatprep.subr.bf16.mxu1 %v1358_v42  ;;  %v1473_v51 = vpop.permute.xlu0 %1472  ;;  %v1477_v52 = vpop.permute.xlu1 %1476 }
 0x185   : > { %8287 = vmatprep.mubr.bf16.mxu0 %v9661_v0  ;;  %8332 = vmatpush3.bf16.msra.mxu0 %v1494_v47  ;;  %v1496_v23 = vmul.bf16 %v9619_v30, %v1473_v51  ;;  %v1497_v57 = vmul.bf16 %v9623_v35, %v1477_v52  ;;  %v9867_v51 = vrot.slane %v9582_v8, %v6003_v41 }
 0x186   : > { %8260 = vmatmul.mubr.bf16.gmra.mrb[24].mxu1 %v9693_v31  ;;  %8333 = vmatprep.subr.bf16.mxu0 %v1495_v49 }
 0x187   : > { %8308 = vmatpush3.bf16.msra.mxu1 %v1358_v42  ;;  %8263 = vmatprep.mubr.bf16.mxu1 %v9697_v32 }
 0x188   : > { %8309 = vmatprep.subr.bf16.mxu1 %v1359_v50  ;;  %v1481_v55 = vpop.permute.xlu0 %1480  ;;  %5742 = vbcast.lane.b32.xlu1 %v9588_v11, 264  ;;  %v1485_v56 = vpop.permute.xlu1 %1484 }
 0x189   : > { %8334 = vmatpush3.bf16.msra.mxu0 %v1495_v49  ;;  %5746 = vbcast.lane.b32.xlu0 %v9588_v11, 272  ;;  %v1498_v61 = vmul.bf16 %v9626_v39, %v1481_v55  ;;  %v1499_v7 = vmul.bf16 %v9633_v44, %v1485_v56 }
 0x18a   : > { %8335 = vmatprep.subr.bf16.mxu0 %v1496_v23 }
 0x18b   : > { %8310 = vmatpush3.bf16.msra.mxu1 %v1359_v50 }
 0x18c   : > { %8288 = vmatmul.mubr.bf16.gmra.mrb[36].mxu0 %v9674_v19  ;;  %8311 = vmatprep.subr.bf16.mxu1 %v1360_v53  ;;  %v1489_v59 = vpop.permute.xlu0 %1488  ;;  %v1493_v60 = vpop.permute.xlu1 %1492 }
 0x18d   : > { %8291 = vmatprep.mubr.bf16.mxu0 %v9678_v20  ;;  %8336 = vmatpush3.bf16.msra.mxu0 %v1496_v23 }
 0x18e   : > { %8264 = vmatmul.mubr.bf16.gmra.mrb[28].mxu1 %v9709_v43  ;;  %8337 = vmatprep.subr.bf16.mxu0 %v1497_v57 }
 0x18f   : > { %8312 = vmatpush3.bf16.msra.mxu1 %v1360_v53  ;;  %8315 = vmatprep.mubr.bf16.mxu1 %v9596_v16 }
 0x190   : > { %8313 = vmatprep.subr.bf16.mxu1 %v1361_v58  ;;  %v1605_v62 = vpop.permute.xlu0 %1604  ;;  %5750 = vbcast.lane.b32.xlu1 %v9588_v11, 280  ;;  %v1609_v6 = vpop.permute.xlu1 %1608 }
 0x191   : > { %8338 = vmatpush3.bf16.msra.mxu0 %v1497_v57  ;;  %v1634_v4 = vmul.bf16 %v9614_v25, %v1605_v62  ;;  %5754 = vbcast.lane.b32.xlu0 %v9588_v11, 288  ;;  %v1635_v9 = vmul.bf16 %v9617_v29, %v1609_v6  ;;  %v1500_v25 = vmul.bf16 %v9638_v48, %v1489_v59 }
 0x192   : > { %8339 = vmatprep.subr.bf16.mxu0 %v1498_v61  ;;  %v1501_v29 = vmul.bf16 %v9645_v54, %v1493_v60 }
 0x193   : > { %8314 = vmatpush3.bf16.msra.mxu1 %v1361_v58 }
 0x194   : > { %8292 = vmatmul.mubr.bf16.gmra.mrb[40].mxu0 %v9693_v31  ;;  %8363 = vmatprep.subr.bf16.mxu1 %v1634_v4  ;;  %v1613_v10 = vpop.permute.xlu0 %1612  ;;  %v1617_v13 = vpop.permute.xlu1 %1616 }
 0x195   : > { %8295 = vmatprep.mubr.bf16.mxu0 %v9697_v32  ;;  %8340 = vmatpush3.bf16.msra.mxu0 %v1498_v61  ;;  %v1636_v12 = vmul.bf16 %v9619_v30, %v1613_v10  ;;  %v1637_v14 = vmul.bf16 %v9623_v35, %v1617_v13  ;;  %v8968_v30 = vld [vmem:[#allocation8] sm:$0xff]   ;;  %v8969_v35 = vld [vmem:[#allocation8 + $0x8] sm:$0xff]  }
 0x196   : > { %8316 = vmatmul.mubr.bf16.vlgmr.msra.gmra.mrb[32].mxu1 %v9658_v63  ;;  %8341 = vmatprep.subr.bf16.mxu0 %v1499_v7 }
 0x197   : > { %8319 = vmatprep.mubr.bf16.mxu1 %v9661_v0  ;;  %8364 = vmatpush3.bf16.msra.mxu1 %v1634_v4 }
 0x198   : > { %8365 = vmatprep.subr.bf16.mxu1 %v1635_v9  ;;  %5758 = vbcast.lane.b32.xlu1 %v9588_v11, 296  ;;  %v1621_v15 = vpop.permute.xlu0 %1620  ;;  %v1625_v22 = vpop.permute.xlu1 %1624 }
 0x199   : > { %8342 = vmatpush3.bf16.msra.mxu0 %v1499_v7  ;;  %5762 = vbcast.lane.b32.xlu0 %v9588_v11, 304  ;;  %v1638_v21 = vmul.bf16 %v9626_v39, %v1621_v15  ;;  %v1639_v24 = vmul.bf16 %v9633_v44, %v1625_v22  ;;  %v8970_v39 = vld [vmem:[#allocation8 + $0x10] sm:$0xff]   ;;  %v8971_v44 = vld [vmem:[#allocation8 + $0x18] sm:$0xff]  }
 0x19a   : > { %8343 = vmatprep.subr.bf16.mxu0 %v1500_v25 }
 0x19b   : > { %8366 = vmatpush3.bf16.msra.mxu1 %v1635_v9 }
 0x19c   : > { %8296 = vmatmul.mubr.bf16.gmra.mrb[44].mxu0 %v9709_v43  ;;  %8367 = vmatprep.subr.bf16.mxu1 %v1636_v12  ;;  %v1629_v26 = vpop.permute.xlu0 %1628  ;;  %v1633_v27 = vpop.permute.xlu1 %1632 }
 0x19d   : > { %8344 = vmatpush3.bf16.msra.mxu0 %v1500_v25  ;;  %8347 = vmatprep.mubr.bf16.mxu0 %v9596_v16  ;;  %v1640_v18 = vmul.bf16 %v9638_v48, %v1629_v26  ;;  %v1641_v28 = vmul.bf16 %v9645_v54, %v1633_v27  ;;  %v8972_v48 = vld [vmem:[#allocation8 + $0x20] sm:$0xff]   ;;  %v8974_v54 = vld [vmem:[#allocation8 + $0x30] sm:$0xff]  }
 0x19e   : > { %8320 = vmatmul.mubr.bf16.gmra.mrb[36].mxu1 %v9674_v19  ;;  %8345 = vmatprep.subr.bf16.mxu0 %v1501_v29 }
 0x19f   : > { %8323 = vmatprep.mubr.bf16.mxu1 %v9678_v20  ;;  %8368 = vmatpush3.bf16.msra.mxu1 %v1636_v12 }
 0x1a0   : > { %8369 = vmatprep.subr.bf16.mxu1 %v1637_v14  ;;  %5766 = vbcast.lane.b32.xlu1 %v9588_v11, 312 }
 0x1a1   : > { %8346 = vmatpush3.bf16.msra.mxu0 %v1501_v29  ;;  %5770 = vbcast.lane.b32.xlu0 %v9588_v11, 320 }
 0x1a2   : > { %8395 = vmatprep.subr.bf16.mxu0 %v8968_v30 }
 0x1a3   : > { %8370 = vmatpush3.bf16.msra.mxu1 %v1637_v14 }
 0x1a4   : > { %8348 = vmatmul.mubr.bf16.vlgmr.msra.gmra.mrb[48].mxu0 %v9658_v63  ;;  %8371 = vmatprep.subr.bf16.mxu1 %v1638_v21 }
 0x1a5   : > { %8351 = vmatprep.mubr.bf16.mxu0 %v9661_v0  ;;  %8396 = vmatpush3.bf16.msra.mxu0 %v8968_v30 }
 0x1a6   : > { %8324 = vmatmul.mubr.bf16.gmra.mrb[40].mxu1 %v9693_v31  ;;  %8397 = vmatprep.subr.bf16.mxu0 %v8969_v35 }
 0x1a7   : > { %8327 = vmatprep.mubr.bf16.mxu1 %v9697_v32  ;;  %8372 = vmatpush3.bf16.msra.mxu1 %v1638_v21 }
 0x1a8   : > { %8373 = vmatprep.subr.bf16.mxu1 %v1639_v24  ;;  %5774 = vbcast.lane.b32.xlu1 %v9588_v11, 328 }
 0x1a9   : > { %8398 = vmatpush3.bf16.msra.mxu0 %v8969_v35  ;;  %5778 = vbcast.lane.b32.xlu0 %v9588_v11, 336 }
 0x1aa   : > { %8399 = vmatprep.subr.bf16.mxu0 %v8970_v39 }
 0x1ab   : > { %8374 = vmatpush3.bf16.msra.mxu1 %v1639_v24 }
 0x1ac   : > { %8352 = vmatmul.mubr.bf16.gmra.mrb[52].mxu0 %v9674_v19  ;;  %8375 = vmatprep.subr.bf16.mxu1 %v1640_v18 }
 0x1ad   : > { %8355 = vmatprep.mubr.bf16.mxu0 %v9678_v20  ;;  %8400 = vmatpush3.bf16.msra.mxu0 %v8970_v39 }
 0x1ae   : > { %8328 = vmatmul.mubr.bf16.gmra.mrb[44].mxu1 %v9709_v43  ;;  %8401 = vmatprep.subr.bf16.mxu0 %v8971_v44 }
 0x1af   : > { %8376 = vmatpush3.bf16.msra.mxu1 %v1640_v18  ;;  %8379 = vmatprep.mubr.bf16.mxu1 %v9596_v16  ;;  %v8975_v16 = vld [vmem:[#allocation8 + $0x38] sm:$0xff]  }
 0x1b0   : > { %8377 = vmatprep.subr.bf16.mxu1 %v1641_v28  ;;  %5782 = vbcast.lane.b32.xlu1 %v9588_v11, 344 }
 0x1b1   : > { %8402 = vmatpush3.bf16.msra.mxu0 %v8971_v44  ;;  %5786 = vbcast.lane.b32.xlu0 %v9588_v11, 352 }
 0x1b2   : > { %8403 = vmatprep.subr.bf16.mxu0 %v8972_v48 }
 0x1b3   : > { %8378 = vmatpush3.bf16.msra.mxu1 %v1641_v28 }
 0x1b4   : > { %8356 = vmatmul.mubr.bf16.gmra.mrb[56].mxu0 %v9693_v31  ;;  %8827 = vmatprep.subr.bf16.mxu1 %v8968_v30 }
 0x1b5   : > { %8359 = vmatprep.mubr.bf16.mxu0 %v9697_v32  ;;  %8404 = vmatpush3.bf16.msra.mxu0 %v8972_v48 }
 0x1b6   : > { %8380 = vmatmul.mubr.bf16.vlgmr.msra.gmra.mrb[48].mxu1 %v9658_v63  ;;  %8405 = vmatprep.subr.bf16.mxu0 %v8973_v33 }
 0x1b7   : > { %8383 = vmatprep.mubr.bf16.mxu1 %v9661_v0  ;;  %8835 = vmatpush3.bf16.msra.mxu1 %v8968_v30  ;;  %v5936_v0 = vsub.s32 5, %v9567_v1 }
 0x1b8   : > { %8828 = vmatprep.subr.bf16.mxu1 %v8969_v35  ;;  %5790 = vbcast.lane.b32.xlu1 %v9588_v11, 360 }
 0x1b9   : > { %8406 = vmatpush3.bf16.msra.mxu0 %v8973_v33  ;;  %5794 = vbcast.lane.b32.xlu0 %v9588_v11, 368 }
 0x1ba   : > { %8407 = vmatprep.subr.bf16.mxu0 %v8974_v54 }
 0x1bb   : > { %8836 = vmatpush3.bf16.msra.mxu1 %v8969_v35 }
 0x1bc   : > { %8360 = vmatmul.mubr.bf16.gmra.mrb[60].mxu0 %v9709_v43  ;;  %8829 = vmatprep.subr.bf16.mxu1 %v8970_v39 }
 0x1bd   : > { %8408 = vmatpush3.bf16.msra.mxu0 %v8974_v54  ;;  %5798 = vbcast.lane.b32.xlu1 %v9588_v11, 376  ;;  %v5869_v11 = vsub.s32 4, %v9567_v1 }
 0x1be   : > { %8384 = vmatmul.mubr.bf16.gmra.mrb[52].mxu1 %v9674_v19  ;;  %8409 = vmatprep.subr.bf16.mxu0 %v8975_v16  ;;  %v9852_v19 = vld [vmem:[#allocation9] sm:$0xff]  }
 0x1bf   : > { %8387 = vmatprep.mubr.bf16.mxu1 %v9678_v20  ;;  %8837 = vmatpush3.bf16.msra.mxu1 %v8970_v39  ;;  %v5870_v63 = vrot.slane %v9582_v8, %v5869_v11  ;;  %v9859_v20 = vld [vmem:[%s12117_s2] ss:$0 sm:$0xff] }
 0x1c0   : > { %8830 = vmatprep.subr.bf16.mxu1 %v8971_v44  ;;  %5805 = vbcast.lane.b32.xlu0 %v9599_v17, 256 }
 0x1c1   : > { %8410 = vmatpush3.bf16.msra.mxu0 %v8975_v16  ;;  %5809 = vbcast.lane.b32.xlu1 %v9599_v17, 264 }
 0x1c3   : > { %8838 = vmatpush3.bf16.msra.mxu1 %v8971_v44 }
 0x1c4   : > { %8831 = vmatprep.subr.bf16.mxu1 %v8972_v48  ;;  %5813 = vbcast.lane.b32.xlu0 %v9599_v17, 272 }
 0x1c5   : > { %5817 = vbcast.lane.b32.xlu1 %v9599_v17, 280 }
 0x1c6   : > { %8388 = vmatmul.mubr.bf16.gmra.mrb[56].mxu1 %v9693_v31 }
 0x1c7   : > { %8391 = vmatprep.mubr.bf16.mxu1 %v9697_v32  ;;  %8839 = vmatpush3.bf16.msra.mxu1 %v8972_v48 }
 0x1c8   : > { %8832 = vmatprep.subr.bf16.mxu1 %v8973_v33  ;;  %5821 = vbcast.lane.b32.xlu0 %v9599_v17, 288 }
 0x1c9   : > { %5825 = vbcast.lane.b32.xlu1 %v9599_v17, 296 }
 0x1cb   : > { %8840 = vmatpush3.bf16.msra.mxu1 %v8973_v33 }
 0x1cc   : > { %8833 = vmatprep.subr.bf16.mxu1 %v8974_v54  ;;  %5829 = vbcast.lane.b32.xlu0 %v9599_v17, 304 }
 0x1cd   : > { %5833 = vbcast.lane.b32.xlu1 %v9599_v17, 312 }
 0x1ce   : > { %8392 = vmatmul.mubr.bf16.gmra.mrb[60].mxu1 %v9709_v43 }
 0x1cf   : > { %8841 = vmatpush3.bf16.msra.mxu1 %v8974_v54 }
 0x1d0   : > { %8834 = vmatprep.subr.bf16.mxu1 %v8975_v16  ;;  %5837 = vbcast.lane.b32.xlu0 %v9599_v17, 320 }
 0x1d1   : > { %5841 = vbcast.lane.b32.xlu1 %v9599_v17, 328 }
 0x1d3   : > { %8842 = vmatpush3.bf16.msra.mxu1 %v8975_v16 }
 0x1d4   : > { %5845 = vbcast.lane.b32.xlu0 %v9599_v17, 336  ;;  %8539 = vmatprep.subr.bf16.mxu1 %v9852_v19 }
 0x1d5   : > { %5849 = vbcast.lane.b32.xlu1 %v9599_v17, 344 }
 0x1d8   : > { %5853 = vbcast.lane.b32.xlu0 %v9599_v17, 352 }
 0x1d9   : > { %5857 = vbcast.lane.b32.xlu1 %v9599_v17, 360 }
 0x1dc   : > { %5861 = vbcast.lane.b32.xlu0 %v9599_v17, 368 }
 0x1dd   : > { %5865 = vbcast.lane.b32.xlu1 %v9599_v17, 376  ;;  %v5937_v17 = vrot.slane %v9582_v8, %v5936_v0 }
 0x1e0   : > { %5872 = vbcast.lane.b32.xlu0 %v5870_v63, 256 }
 0x1e1   : > { %5876 = vbcast.lane.b32.xlu1 %v5870_v63, 264 }
 0x1e4   : > { %5880 = vbcast.lane.b32.xlu0 %v5870_v63, 272 }
 0x1e5   : > { %5884 = vbcast.lane.b32.xlu1 %v5870_v63, 280 }
 0x1e8   : > { %5888 = vbcast.lane.b32.xlu0 %v5870_v63, 288 }
 0x1e9   : > { %5892 = vbcast.lane.b32.xlu1 %v5870_v63, 296 }
 0x1ec   : > { %5896 = vbcast.lane.b32.xlu0 %v5870_v63, 304 }
 0x1ed   : > { %5900 = vbcast.lane.b32.xlu1 %v5870_v63, 312 }
 0x1f0   : > { %5904 = vbcast.lane.b32.xlu0 %v5870_v63, 320 }
 0x1f1   : > { %5908 = vbcast.lane.b32.xlu1 %v5870_v63, 328 }
 0x1f4   : > { %5912 = vbcast.lane.b32.xlu0 %v5870_v63, 336 }
 0x1f5   : > { %5916 = vbcast.lane.b32.xlu1 %v5870_v63, 344 }
 0x1f8   : > { %5920 = vbcast.lane.b32.xlu0 %v5870_v63, 352 }
 0x1f9   : > { %5924 = vbcast.lane.b32.xlu1 %v5870_v63, 360 }
 0x1fc   : > { %5928 = vbcast.lane.b32.xlu0 %v5870_v63, 368 }
 0x1fd   : > { %5932 = vbcast.lane.b32.xlu1 %v5870_v63, 376 }
 0x200   : > { %5939 = vbcast.lane.b32.xlu0 %v5937_v17, 256 }
 0x201   : > { %5943 = vbcast.lane.b32.xlu1 %v5937_v17, 264 }
 0x204   : > { %5947 = vbcast.lane.b32.xlu0 %v5937_v17, 272 }
 0x205   : > { %5951 = vbcast.lane.b32.xlu1 %v5937_v17, 280 }
 0x208   : > { %5955 = vbcast.lane.b32.xlu0 %v5937_v17, 288 }
 0x209   : > { %5959 = vbcast.lane.b32.xlu1 %v5937_v17, 296 }
 0x20c   : > { %5963 = vbcast.lane.b32.xlu0 %v5937_v17, 304 }
 0x20d   : > { %5967 = vbcast.lane.b32.xlu1 %v5937_v17, 312 }
 0x210   : > { %5971 = vbcast.lane.b32.xlu0 %v5937_v17, 320 }
 0x211   : > { %5975 = vbcast.lane.b32.xlu1 %v5937_v17, 328 }
 0x214   : > { %5979 = vbcast.lane.b32.xlu0 %v5937_v17, 336 }
 0x215   : > { %5983 = vbcast.lane.b32.xlu1 %v5937_v17, 344 }
 0x216   : > { %v8157_v31 = vpop.f32.mrb[0].mxu0 }
 0x217   : > { %v1748_v32 = vadd.f32 %v8157_v31, %v9859_v20  ;;  %v693_v43 = vpop.f32.mrb[1].mxu0 }
 0x218   : > { %v1746_v34 = vadd.f32 %v9859_v20, %v693_v43  ;;  %v8158_v36 = vpop.f32.mrb[2].mxu0  ;;  %5987 = vbcast.lane.b32.xlu0 %v5937_v17, 352 }
 0x219   : > { %v1876_v37 = vmul.f32 0.01, %v1748_v32  ;;  %v1749_v38 = vadd.f32 %v8158_v36, %v9859_v20  ;;  %v696_v40 = vpop.f32.mrb[3].mxu0  ;;  %5991 = vbcast.lane.b32.xlu1 %v5937_v17, 360 }
 0x21a   : > { %v1874_v42 = vmul.f32 0.01, %v1746_v34  ;;  %v1747_v45 = vadd.f32 %v9859_v20, %v696_v40 }
 0x21b   : > { %v1877_v46 = vmul.f32 0.01, %v1749_v38  ;;  %v2004_v49 = vmax.f32 %v1748_v32, %v1876_v37 }
 0x21c   : > { %v1875_v47 = vmul.f32 0.01, %v1747_v45  ;;  %5995 = vbcast.lane.b32.xlu0 %v5937_v17, 368  ;;  %v2002_v52 = vmax.f32 %v1746_v34, %v1874_v42 }
 0x21d   : > { %v2005_v50 = vmax.f32 %v1749_v38, %v1877_v46  ;;  %5999 = vbcast.lane.b32.xlu1 %v5937_v17, 376 }
 0x21e   : > { %v2003_v23 = vmax.f32 %v1747_v45, %v1875_v47  ;;  %v8161_v53 = vpop.f32.mrb[4].mxu0 }
 0x21f   : > { %v2131_v55 = vpack.c.bf16 %v2005_v50, %v2004_v49  ;;  %v1752_v56 = vadd.f32 %v8161_v53, %v9859_v20  ;;  %v709_v57 = vpop.f32.mrb[5].mxu0 }
 0x220   : > { %v1750_v58 = vadd.f32 %v9859_v20, %v709_v57  ;;  %v8162_v59 = vpop.f32.mrb[6].mxu0  ;;  %v2130_v60 = vpack.c.bf16 %v2003_v23, %v2002_v52  ;;  %6006 = vbcast.lane.b32.xlu0 %v9867_v51, 256 }
 0x221   : > { %v1880_v61 = vmul.f32 0.01, %v1752_v56  ;;  %v1753_v62 = vadd.f32 %v8162_v59, %v9859_v20  ;;  %v712_v4 = vpop.f32.mrb[7].mxu0 }
 0x222   : > { %v1878_v6 = vmul.f32 0.01, %v1750_v58  ;;  %v1751_v7 = vadd.f32 %v9859_v20, %v712_v4  ;;  %8411 = vmatprep.mubr.bf16.mxu0 %v2130_v60 }
 0x223   : > { %v2008_v9 = vmax.f32 %v1752_v56, %v1880_v61  ;;  %v1881_v10 = vmul.f32 0.01, %v1753_v62  ;;  %8412 = vmatmul.mubr.bf16.vlgmr.msra.gmra.mrb[64].mxu0 %v2131_v55 }
 0x224   : > { %v2006_v25 = vmax.f32 %v1750_v58, %v1878_v6  ;;  %v1879_v12 = vmul.f32 0.01, %v1751_v7  ;;  %6014 = vbcast.lane.b32.xlu0 %v9867_v51, 272 }
 0x225   : > { %v2009_v13 = vmax.f32 %v1753_v62, %v1881_v10 }
 0x226   : > { %v2007_v29 = vmax.f32 %v1751_v7, %v1879_v12  ;;  %v8165_v14 = vpop.f32.mrb[8].mxu0  ;;  %v8189_v15 = vpop.f32.mrb[0].mxu1 }
 0x227   : > { %v1756_v30 = vadd.f32 %v8165_v14, %v9859_v20  ;;  %v725_v21 = vpop.f32.mrb[9].mxu0  ;;  %v2133_v22 = vpack.c.bf16 %v2009_v13, %v2008_v9  ;;  %v1764_v35 = vadd.f32 %v8189_v15, %v9859_v20  ;;  %v836_v24 = vpop.f32.mrb[1].mxu1 }
 0x228   : > { %v1754_v26 = vadd.f32 %v9859_v20, %v725_v21  ;;  %v8166_v39 = vpop.f32.mrb[10].mxu0  ;;  %v2132_v18 = vpack.c.bf16 %v2007_v29, %v2006_v25  ;;  %v1762_v27 = vadd.f32 %v9859_v20, %v836_v24  ;;  %v8190_v44 = vpop.f32.mrb[2].mxu1 }
 0x229   : > { %v1884_v28 = vmul.f32 0.01, %v1756_v30  ;;  %v1757_v48 = vadd.f32 %v8166_v39, %v9859_v20  ;;  %v728_v33 = vpop.f32.mrb[11].mxu0  ;;  %v1892_v54 = vmul.f32 0.01, %v1764_v35  ;;  %v1765_v16 = vadd.f32 %v8190_v44, %v9859_v20  ;;  %v839_v11 = vpop.f32.mrb[3].mxu1 }
 0x22a   : > { %v1882_v63 = vmul.f32 0.01, %v1754_v26  ;;  %v1755_v0 = vadd.f32 %v9859_v20, %v728_v33  ;;  %8415 = vmatprep.mubr.bf16.mxu0 %v2132_v18  ;;  %v1890_v17 = vmul.f32 0.01, %v1762_v27  ;;  %v1763_v31 = vadd.f32 %v9859_v20, %v839_v11 }
 0x22b   : > { %v2012_v32 = vmax.f32 %v1756_v30, %v1884_v28  ;;  %v1885_v43 = vmul.f32 0.01, %v1757_v48  ;;  %8416 = vmatmul.mubr.bf16.gmra.mrb[68].mxu0 %v2133_v22  ;;  %v2020_v34 = vmax.f32 %v1764_v35, %v1892_v54  ;;  %v1893_v36 = vmul.f32 0.01, %v1765_v16 }
 0x22c   : > { %v2010_v37 = vmax.f32 %v1754_v26, %v1882_v63  ;;  %v1883_v38 = vmul.f32 0.01, %v1755_v0  ;;  %v2018_v40 = vmax.f32 %v1762_v27, %v1890_v17  ;;  %v1891_v41 = vmul.f32 0.01, %v1763_v31 }
 0x22d   : > { %v2013_v42 = vmax.f32 %v1757_v48, %v1885_v43  ;;  %v2021_v45 = vmax.f32 %v1765_v16, %v1893_v36 }
 0x22e   : > { %v2011_v46 = vmax.f32 %v1755_v0, %v1883_v38  ;;  %v8169_v47 = vpop.f32.mrb[12].mxu0  ;;  %v2019_v49 = vmax.f32 %v1763_v31, %v1891_v41  ;;  %v8193_v50 = vpop.f32.mrb[4].mxu1 }
 0x22f   : > { %v1760_v52 = vadd.f32 %v8169_v47, %v9859_v20  ;;  %v741_v23 = vpop.f32.mrb[13].mxu0  ;;  %v2135_v53 = vpack.c.bf16 %v2013_v42, %v2012_v32  ;;  %v1768_v55 = vadd.f32 %v8193_v50, %v9859_v20  ;;  %v852_v56 = vpop.f32.mrb[5].mxu1  ;;  %v9885_v57 = vpack.c.bf16 %v2021_v45, %v2020_v34 }
 0x230   : > { %v1758_v58 = vadd.f32 %v9859_v20, %v741_v23  ;;  %v8170_v59 = vpop.f32.mrb[14].mxu0  ;;  %v2134_v60 = vpack.c.bf16 %v2011_v46, %v2010_v37  ;;  %v1766_v61 = vadd.f32 %v9859_v20, %v852_v56  ;;  %v8194_v62 = vpop.f32.mrb[6].mxu1  ;;  %v2138_v4 = vpack.c.bf16 %v2019_v49, %v2018_v40 }
 0x231   : > { %v1888_v6 = vmul.f32 0.01, %v1760_v52  ;;  %v1761_v7 = vadd.f32 %v8170_v59, %v9859_v20  ;;  %v744_v9 = vpop.f32.mrb[15].mxu0  ;;  %v1896_v10 = vmul.f32 0.01, %v1768_v55  ;;  %v1769_v25 = vadd.f32 %v8194_v62, %v9859_v20  ;;  %v855_v12 = vpop.f32.mrb[7].mxu1 }
 0x232   : > { %v1886_v13 = vmul.f32 0.01, %v1758_v58  ;;  %v1759_v29 = vadd.f32 %v9859_v20, %v744_v9  ;;  %8419 = vmatprep.mubr.bf16.mxu0 %v2134_v60  ;;  %v1894_v14 = vmul.f32 0.01, %v1766_v61  ;;  %v1767_v15 = vadd.f32 %v9859_v20, %v855_v12 }
 0x233   : > { %v2016_v30 = vmax.f32 %v1760_v52, %v1888_v6  ;;  %v1889_v21 = vmul.f32 0.01, %v1761_v7  ;;  %8420 = vmatmul.mubr.bf16.gmra.mrb[72].mxu0 %v2135_v53  ;;  %v2024_v22 = vmax.f32 %v1768_v55, %v1896_v10  ;;  %v1897_v35 = vmul.f32 0.01, %v1769_v25 }
 0x234   : > { %v2014_v24 = vmax.f32 %v1758_v58, %v1886_v13  ;;  %v1887_v26 = vmul.f32 0.01, %v1759_v29  ;;  %v2022_v39 = vmax.f32 %v1766_v61, %v1894_v14  ;;  %v1895_v18 = vmul.f32 0.01, %v1767_v15 }
 0x235   : > { %v2017_v27 = vmax.f32 %v1761_v7, %v1889_v21  ;;  %v2025_v44 = vmax.f32 %v1769_v25, %v1897_v35 }
 0x236   : > { %v2015_v28 = vmax.f32 %v1759_v29, %v1887_v26  ;;  %v2023_v48 = vmax.f32 %v1767_v15, %v1895_v18  ;;  %v8197_v33 = vpop.f32.mrb[8].mxu1 }
 0x237   : > { %v2137_v54 = vpack.c.bf16 %v2017_v27, %v2016_v30  ;;  %v1772_v16 = vadd.f32 %v8197_v33, %v9859_v20  ;;  %v868_v11 = vpop.f32.mrb[9].mxu1  ;;  %v9894_v63 = vpack.c.bf16 %v2025_v44, %v2024_v22  ;;  %v8221_v0 = vpop.f32.mrb[16].mxu0 }
 0x238   : > { %v2136_v17 = vpack.c.bf16 %v2015_v28, %v2014_v24  ;;  %v1770_v31 = vadd.f32 %v9859_v20, %v868_v11  ;;  %v8198_v32 = vpop.f32.mrb[10].mxu1  ;;  %v2140_v43 = vpack.c.bf16 %v2023_v48, %v2022_v39  ;;  %v1780_v34 = vadd.f32 %v8221_v0, %v9859_v20  ;;  %v976_v36 = vpop.f32.mrb[17].mxu0 }
 0x239   : > { %v1900_v37 = vmul.f32 0.01, %v1772_v16  ;;  %v1773_v38 = vadd.f32 %v8198_v32, %v9859_v20  ;;  %v871_v40 = vpop.f32.mrb[11].mxu1  ;;  %v1778_v41 = vadd.f32 %v9859_v20, %v976_v36  ;;  %v8222_v42 = vpop.f32.mrb[18].mxu0 }
 0x23a   : > { %8423 = vmatprep.mubr.bf16.mxu0 %v2136_v17  ;;  %v1898_v45 = vmul.f32 0.01, %v1770_v31  ;;  %v1771_v46 = vadd.f32 %v9859_v20, %v871_v40  ;;  %v1908_v47 = vmul.f32 0.01, %v1780_v34  ;;  %v1781_v49 = vadd.f32 %v8222_v42, %v9859_v20  ;;  %v979_v50 = vpop.f32.mrb[19].mxu0 }
 0x23b   : > { %8424 = vmatmul.mubr.bf16.gmra.mrb[76].mxu0 %v2137_v54  ;;  %v2028_v52 = vmax.f32 %v1772_v16, %v1900_v37  ;;  %v1901_v23 = vmul.f32 0.01, %v1773_v38  ;;  %v1906_v53 = vmul.f32 0.01, %v1778_v41  ;;  %v1779_v55 = vadd.f32 %v9859_v20, %v979_v50 }
 0x23c   : > { %8427 = vmatprep.mubr.bf16.mxu0 %v2138_v4  ;;  %v2026_v56 = vmax.f32 %v1770_v31, %v1898_v45  ;;  %v1899_v58 = vmul.f32 0.01, %v1771_v46  ;;  %v2036_v59 = vmax.f32 %v1780_v34, %v1908_v47  ;;  %v1909_v60 = vmul.f32 0.01, %v1781_v49 }
 0x23d   : > { %v2029_v61 = vmax.f32 %v1773_v38, %v1901_v23  ;;  %v2034_v62 = vmax.f32 %v1778_v41, %v1906_v53  ;;  %v1907_v6 = vmul.f32 0.01, %v1779_v55 }
 0x23e   : > { %v2027_v7 = vmax.f32 %v1771_v46, %v1899_v58  ;;  %v8201_v9 = vpop.f32.mrb[12].mxu1  ;;  %v2037_v10 = vmax.f32 %v1781_v49, %v1909_v60 }
 0x23f   : > { %v1776_v25 = vadd.f32 %v8201_v9, %v9859_v20  ;;  %v884_v12 = vpop.f32.mrb[13].mxu1  ;;  %v9904_v13 = vpack.c.bf16 %v2029_v61, %v2028_v52  ;;  %v2035_v29 = vmax.f32 %v1779_v55, %v1907_v6  ;;  %v8225_v14 = vpop.f32.mrb[20].mxu0 }
 0x240   : > { %v1774_v15 = vadd.f32 %v9859_v20, %v884_v12  ;;  %v8202_v4 = vpop.f32.mrb[14].mxu1  ;;  %v2142_v30 = vpack.c.bf16 %v2027_v7, %v2026_v56  ;;  %v1784_v21 = vadd.f32 %v8225_v14, %v9859_v20  ;;  %v992_v22 = vpop.f32.mrb[21].mxu0  ;;  %v9908_v35 = vpack.c.bf16 %v2037_v10, %v2036_v59 }
 0x241   : > { %v1904_v24 = vmul.f32 0.01, %v1776_v25  ;;  %v1777_v26 = vadd.f32 %v8202_v4, %v9859_v20  ;;  %v887_v39 = vpop.f32.mrb[15].mxu1  ;;  %v1782_v18 = vadd.f32 %v9859_v20, %v992_v22  ;;  %v8226_v27 = vpop.f32.mrb[22].mxu0  ;;  %v9912_v44 = vpack.c.bf16 %v2035_v29, %v2034_v62 }
 0x242   : > { %v1902_v28 = vmul.f32 0.01, %v1774_v15  ;;  %v1775_v48 = vadd.f32 %v9859_v20, %v887_v39  ;;  %v1912_v33 = vmul.f32 0.01, %v1784_v21  ;;  %v1785_v54 = vadd.f32 %v8226_v27, %v9859_v20  ;;  %v995_v16 = vpop.f32.mrb[23].mxu0 }
 0x243   : > { %8428 = vmatmul.mubr.bf16.gmra.mrb[80].mxu0 %v9885_v57  ;;  %v2032_v11 = vmax.f32 %v1776_v25, %v1904_v24  ;;  %v1905_v0 = vmul.f32 0.01, %v1777_v26  ;;  %v1910_v17 = vmul.f32 0.01, %v1782_v18  ;;  %v1783_v31 = vadd.f32 %v9859_v20, %v995_v16 }
 0x244   : > { %8431 = vmatprep.mubr.bf16.mxu0 %v2140_v43  ;;  %v2030_v32 = vmax.f32 %v1774_v15, %v1902_v28  ;;  %v1903_v34 = vmul.f32 0.01, %v1775_v48  ;;  %v2040_v36 = vmax.f32 %v1784_v21, %v1912_v33  ;;  %v1913_v37 = vmul.f32 0.01, %v1785_v54 }
 0x245   : > { %v2033_v38 = vmax.f32 %v1777_v26, %v1905_v0  ;;  %v2038_v40 = vmax.f32 %v1782_v18, %v1910_v17  ;;  %v1911_v41 = vmul.f32 0.01, %v1783_v31 }
 0x246   : > { %v2031_v42 = vmax.f32 %v1775_v48, %v1903_v34  ;;  %v2041_v45 = vmax.f32 %v1785_v54, %v1913_v37 }
 0x247   : > { %v9918_v46 = vpack.c.bf16 %v2033_v38, %v2032_v11  ;;  %v2039_v47 = vmax.f32 %v1783_v31, %v1911_v41  ;;  %v8229_v49 = vpop.f32.mrb[24].mxu0 }
 0x248   : > { %v2144_v57 = vpack.c.bf16 %v2031_v42, %v2030_v32  ;;  %v1788_v50 = vadd.f32 %v8229_v49, %v9859_v20  ;;  %v1008_v52 = vpop.f32.mrb[25].mxu0  ;;  %v9921_v23 = vpack.c.bf16 %v2041_v45, %v2040_v36 }
 0x249   : > { %v1786_v43 = vadd.f32 %v9859_v20, %v1008_v52  ;;  %v8230_v53 = vpop.f32.mrb[26].mxu0  ;;  %v9924_v55 = vpack.c.bf16 %v2039_v47, %v2038_v40  ;;  %v8253_v56 = vpop.f32.mrb[16].mxu1 }
 0x24a   : > { %v1916_v58 = vmul.f32 0.01, %v1788_v50  ;;  %v1789_v59 = vadd.f32 %v8230_v53, %v9859_v20  ;;  %v1011_v60 = vpop.f32.mrb[27].mxu0  ;;  %v1796_v61 = vadd.f32 %v8253_v56, %v9859_v20  ;;  %v1116_v62 = vpop.f32.mrb[17].mxu1 }
 0x24b   : > { %8432 = vmatmul.mubr.bf16.gmra.mrb[84].mxu0 %v9894_v63  ;;  %v1914_v6 = vmul.f32 0.01, %v1786_v43  ;;  %v1787_v7 = vadd.f32 %v9859_v20, %v1011_v60  ;;  %v1794_v9 = vadd.f32 %v9859_v20, %v1116_v62  ;;  %v8254_v10 = vpop.f32.mrb[18].mxu1 }
 0x24c   : > { %8435 = vmatprep.mubr.bf16.mxu0 %v2142_v30  ;;  %v2044_v25 = vmax.f32 %v1788_v50, %v1916_v58  ;;  %v1917_v12 = vmul.f32 0.01, %v1789_v59  ;;  %v1924_v29 = vmul.f32 0.01, %v1796_v61  ;;  %v1797_v14 = vadd.f32 %v8254_v10, %v9859_v20  ;;  %v1119_v15 = vpop.f32.mrb[19].mxu1 }
 0x24d   : > { %v2042_v4 = vmax.f32 %v1786_v43, %v1914_v6  ;;  %v1915_v21 = vmul.f32 0.01, %v1787_v7  ;;  %v1922_v22 = vmul.f32 0.01, %v1794_v9  ;;  %v1795_v24 = vadd.f32 %v9859_v20, %v1119_v15 }
 0x24e   : > { %v2045_v26 = vmax.f32 %v1789_v59, %v1917_v12  ;;  %v2052_v63 = vmax.f32 %v1796_v61, %v1924_v29  ;;  %v1925_v39 = vmul.f32 0.01, %v1797_v14 }
 0x24f   : > { %v2043_v18 = vmax.f32 %v1787_v7, %v1915_v21  ;;  %v8233_v27 = vpop.f32.mrb[28].mxu0  ;;  %v2050_v28 = vmax.f32 %v1794_v9, %v1922_v22  ;;  %v1923_v48 = vmul.f32 0.01, %v1795_v24 }
 0x250   : > { %v1792_v30 = vadd.f32 %v8233_v27, %v9859_v20  ;;  %v1024_v33 = vpop.f32.mrb[29].mxu0  ;;  %v2053_v54 = vmax.f32 %v1797_v14, %v1925_v39  ;;  %v9934_v16 = vpack.c.bf16 %v2045_v26, %v2044_v25 }
 0x251   : > { %v1790_v11 = vadd.f32 %v9859_v20, %v1024_v33  ;;  %v8234_v0 = vpop.f32.mrb[30].mxu0  ;;  %v9937_v17 = vpack.c.bf16 %v2043_v18, %v2042_v4  ;;  %v2051_v31 = vmax.f32 %v1795_v24, %v1923_v48  ;;  %v8257_v32 = vpop.f32.mrb[20].mxu1 }
 0x252   : > { %v1920_v34 = vmul.f32 0.01, %v1792_v30  ;;  %v1793_v36 = vadd.f32 %v8234_v0, %v9859_v20  ;;  %v1027_v37 = vpop.f32.mrb[31].mxu0  ;;  %v1800_v38 = vadd.f32 %v8257_v32, %v9859_v20  ;;  %v1132_v40 = vpop.f32.mrb[21].mxu1  ;;  %v9941_v41 = vpack.c.bf16 %v2053_v54, %v2052_v63 }
 0x253   : > { %8436 = vmatmul.mubr.bf16.gmra.mrb[88].mxu0 %v9904_v13  ;;  %v1918_v42 = vmul.f32 0.01, %v1790_v11  ;;  %v1791_v45 = vadd.f32 %v9859_v20, %v1027_v37  ;;  %v1798_v47 = vadd.f32 %v9859_v20, %v1132_v40  ;;  %v8258_v49 = vpop.f32.mrb[22].mxu1  ;;  %v9946_v50 = vpack.c.bf16 %v2051_v31, %v2050_v28 }
 0x254   : > { %8439 = vmatprep.mubr.bf16.mxu0 %v2144_v57  ;;  %v2048_v52 = vmax.f32 %v1792_v30, %v1920_v34  ;;  %v1921_v43 = vmul.f32 0.01, %v1793_v36  ;;  %v1928_v53 = vmul.f32 0.01, %v1800_v38  ;;  %v1801_v56 = vadd.f32 %v8258_v49, %v9859_v20  ;;  %v1135_v58 = vpop.f32.mrb[23].mxu1 }
 0x255   : > { %v2046_v59 = vmax.f32 %v1790_v11, %v1918_v42  ;;  %v1919_v60 = vmul.f32 0.01, %v1791_v45  ;;  %v1926_v61 = vmul.f32 0.01, %v1798_v47  ;;  %v1799_v13 = vadd.f32 %v9859_v20, %v1135_v58 }
 0x256   : > { %v2049_v62 = vmax.f32 %v1793_v36, %v1921_v43  ;;  %v2056_v6 = vmax.f32 %v1800_v38, %v1928_v53  ;;  %v1929_v7 = vmul.f32 0.01, %v1801_v56 }
 0x257   : > { %v2047_v9 = vmax.f32 %v1791_v45, %v1919_v60  ;;  %v8285_v10 = vpop.f32.mrb[32].mxu0  ;;  %v2054_v25 = vmax.f32 %v1798_v47, %v1926_v61  ;;  %v1927_v12 = vmul.f32 0.01, %v1799_v13 }
 0x258   : > { %v1812_v57 = vadd.f32 %v8285_v10, %v9859_v20  ;;  %v1256_v29 = vpop.f32.mrb[33].mxu0  ;;  %v2057_v14 = vmax.f32 %v1801_v56, %v1929_v7  ;;  %v9951_v15 = vpack.c.bf16 %v2049_v62, %v2048_v52 }
 0x259   : > { %v1810_v4 = vadd.f32 %v9859_v20, %v1256_v29  ;;  %v8286_v21 = vpop.f32.mrb[34].mxu0  ;;  %v9954_v22 = vpack.c.bf16 %v2047_v9, %v2046_v59  ;;  %v2055_v24 = vmax.f32 %v1799_v13, %v1927_v12  ;;  %v8261_v26 = vpop.f32.mrb[24].mxu1  ;;  %v8977_v29 = vld [vmem:[#allocation9 + $0x8] sm:$0xff]  }
 0x25a   : > { %v1940_v63 = vmul.f32 0.01, %v1812_v57  ;;  %v1813_v39 = vadd.f32 %v8286_v21, %v9859_v20  ;;  %v1259_v18 = vpop.f32.mrb[35].mxu0  ;;  %v1804_v27 = vadd.f32 %v8261_v26, %v9859_v20  ;;  %v1148_v28 = vpop.f32.mrb[25].mxu1  ;;  %v9958_v48 = vpack.c.bf16 %v2057_v14, %v2056_v6 }
 0x25b   : > { %8440 = vmatmul.mubr.bf16.gmra.mrb[92].mxu0 %v9918_v46  ;;  %v1938_v30 = vmul.f32 0.01, %v1810_v4  ;;  %v1811_v33 = vadd.f32 %v9859_v20, %v1259_v18  ;;  %v1802_v54 = vadd.f32 %v9859_v20, %v1148_v28  ;;  %v8262_v11 = vpop.f32.mrb[26].mxu1  ;;  %v9963_v0 = vpack.c.bf16 %v2055_v24, %v2054_v25 }
 0x25c   : > { %8443 = vmatprep.mubr.bf16.mxu0 %v9912_v44  ;;  %v2068_v31 = vmax.f32 %v1812_v57, %v1940_v63  ;;  %v1941_v32 = vmul.f32 0.01, %v1813_v39  ;;  %v1932_v34 = vmul.f32 0.01, %v1804_v27  ;;  %v1805_v36 = vadd.f32 %v8262_v11, %v9859_v20  ;;  %v1151_v37 = vpop.f32.mrb[27].mxu1 }
 0x25d   : > { %v2066_v38 = vmax.f32 %v1810_v4, %v1938_v30  ;;  %v1939_v40 = vmul.f32 0.01, %v1811_v33  ;;  %v1930_v42 = vmul.f32 0.01, %v1802_v54  ;;  %v1803_v46 = vadd.f32 %v9859_v20, %v1151_v37 }
 0x25e   : > { %v2069_v45 = vmax.f32 %v1813_v39, %v1941_v32  ;;  %v2060_v47 = vmax.f32 %v1804_v27, %v1932_v34  ;;  %v1933_v49 = vmul.f32 0.01, %v1805_v36 }
 0x25f   : > { %v2067_v52 = vmax.f32 %v1811_v33, %v1939_v40  ;;  %v8289_v43 = vpop.f32.mrb[36].mxu0  ;;  %v2058_v53 = vmax.f32 %v1802_v54, %v1930_v42  ;;  %v1931_v56 = vmul.f32 0.01, %v1803_v46 }
 0x260   : > { %v2163_v58 = vpack.c.bf16 %v2069_v45, %v2068_v31  ;;  %v1816_v44 = vadd.f32 %v8289_v43, %v9859_v20  ;;  %v1272_v59 = vpop.f32.mrb[37].mxu0  ;;  %v2061_v60 = vmax.f32 %v1805_v36, %v1933_v49  ;;  %v8978_v36 = vld [vmem:[#allocation9 + $0x10] sm:$0xff]  }
 0x261   : > { %v1814_v61 = vadd.f32 %v9859_v20, %v1272_v59  ;;  %v8290_v13 = vpop.f32.mrb[38].mxu0  ;;  %v2162_v62 = vpack.c.bf16 %v2067_v52, %v2066_v38  ;;  %v2059_v6 = vmax.f32 %v1803_v46, %v1931_v56  ;;  %v8265_v7 = vpop.f32.mrb[28].mxu1 }
 0x262   : > { %v1944_v9 = vmul.f32 0.01, %v1816_v44  ;;  %v1817_v10 = vadd.f32 %v8290_v13, %v9859_v20  ;;  %v1275_v25 = vpop.f32.mrb[39].mxu0  ;;  %v1808_v12 = vadd.f32 %v8265_v7, %v9859_v20  ;;  %v1164_v57 = vpop.f32.mrb[29].mxu1  ;;  %v9972_v14 = vpack.c.bf16 %v2061_v60, %v2060_v47  ;;  %v8979_v13 = vld [vmem:[#allocation9 + $0x18] sm:$0xff]  }
 0x263   : > { %8444 = vmatmul.mubr.bf16.gmra.mrb[96].mxu0 %v9908_v35  ;;  %v1942_v4 = vmul.f32 0.01, %v1814_v61  ;;  %v1815_v21 = vadd.f32 %v9859_v20, %v1275_v25  ;;  %8475 = vmatprep.mubr.bf16.mxu1 %v2162_v62  ;;  %v1806_v24 = vadd.f32 %v9859_v20, %v1164_v57  ;;  %v8266_v26 = vpop.f32.mrb[30].mxu1  ;;  %v9977_v63 = vpack.c.bf16 %v2059_v6, %v2058_v53 }
 0x264   : > { %8447 = vmatprep.mubr.bf16.mxu0 %v9924_v55  ;;  %v2072_v39 = vmax.f32 %v1816_v44, %v1944_v9  ;;  %v1945_v18 = vmul.f32 0.01, %v1817_v10  ;;  %8476 = vmatmul.mubr.bf16.vlgmr.msra.gmra.mrb[64].mxu1 %v2163_v58  ;;  %v1936_v27 = vmul.f32 0.01, %v1808_v12  ;;  %v1809_v28 = vadd.f32 %v8266_v26, %v9859_v20  ;;  %v1167_v30 = vpop.f32.mrb[31].mxu1 }
 0x265   : > { %v2070_v33 = vmax.f32 %v1814_v61, %v1942_v4  ;;  %v1943_v35 = vmul.f32 0.01, %v1815_v21  ;;  %8540 = vmatpush3.bf16.msra.mxu1 %v9852_v19  ;;  %v1934_v54 = vmul.f32 0.01, %v1806_v24  ;;  %v1807_v11 = vadd.f32 %v9859_v20, %v1167_v30 }
 0x266   : > { %v2073_v31 = vmax.f32 %v1817_v10, %v1945_v18  ;;  %v2064_v32 = vmax.f32 %v1808_v12, %v1936_v27  ;;  %v1937_v34 = vmul.f32 0.01, %v1809_v28  ;;  %8541 = vmatprep.subr.bf16.mxu1 %v8977_v29 }
 0x267   : > { %v2071_v55 = vmax.f32 %v1815_v21, %v1943_v35  ;;  %v8293_v37 = vpop.f32.mrb[40].mxu0  ;;  %v2062_v38 = vmax.f32 %v1806_v24, %v1934_v54  ;;  %v1935_v40 = vmul.f32 0.01, %v1807_v11 }
 0x268   : > { %v1820_v42 = vadd.f32 %v8293_v37, %v9859_v20  ;;  %v1288_v46 = vpop.f32.mrb[41].mxu0  ;;  %v2165_v45 = vpack.c.bf16 %v2073_v31, %v2072_v39  ;;  %v2065_v47 = vmax.f32 %v1809_v28, %v1937_v34  ;;  %v8980_v28 = vld [vmem:[#allocation9 + $0x20] sm:$0xff]  }
 0x269   : > { %v1818_v49 = vadd.f32 %v9859_v20, %v1288_v46  ;;  %v8294_v19 = vpop.f32.mrb[42].mxu0  ;;  %v2164_v52 = vpack.c.bf16 %v2071_v55, %v2070_v33  ;;  %v2063_v43 = vmax.f32 %v1807_v11, %v1935_v40  ;;  %v8317_v53 = vpop.f32.mrb[32].mxu1  ;;  %8542 = vmatpush3.bf16.msra.mxu1 %v8977_v29 }
 0x26a   : > { %v1948_v56 = vmul.f32 0.01, %v1820_v42  ;;  %v1821_v58 = vadd.f32 %v8294_v19, %v9859_v20  ;;  %v1291_v44 = vpop.f32.mrb[43].mxu0  ;;  %v1828_v59 = vadd.f32 %v8317_v53, %v9859_v20  ;;  %v1396_v60 = vpop.f32.mrb[33].mxu1  ;;  %v9987_v61 = vpack.c.bf16 %v2065_v47, %v2064_v32  ;;  %8543 = vmatprep.subr.bf16.mxu1 %v8978_v36  ;;  %v8981_v19 = vld [vmem:[#allocation9 + $0x28] sm:$0xff]  }
 0x26b   : > { %8448 = vmatmul.mubr.bf16.gmra.mrb[100].mxu0 %v9921_v23  ;;  %v1946_v62 = vmul.f32 0.01, %v1818_v49  ;;  %v1819_v6 = vadd.f32 %v9859_v20, %v1291_v44  ;;  %8479 = vmatprep.mubr.bf16.mxu1 %v2164_v52  ;;  %v1826_v7 = vadd.f32 %v9859_v20, %v1396_v60  ;;  %v8318_v9 = vpop.f32.mrb[34].mxu1  ;;  %v9992_v10 = vpack.c.bf16 %v2063_v43, %v2062_v38 }
 0x26c   : > { %8451 = vmatprep.mubr.bf16.mxu0 %v9937_v17  ;;  %v2076_v25 = vmax.f32 %v1820_v42, %v1948_v56  ;;  %v1949_v12 = vmul.f32 0.01, %v1821_v58  ;;  %8480 = vmatmul.mubr.bf16.gmra.mrb[68].mxu1 %v2165_v45  ;;  %v1956_v57 = vmul.f32 0.01, %v1828_v59  ;;  %v1829_v29 = vadd.f32 %v8318_v9, %v9859_v20  ;;  %v1399_v4 = vpop.f32.mrb[35].mxu1 }
 0x26d   : > { %v2074_v21 = vmax.f32 %v1818_v49, %v1946_v62  ;;  %v1947_v23 = vmul.f32 0.01, %v1819_v6  ;;  %v1954_v24 = vmul.f32 0.01, %v1826_v7  ;;  %v1827_v26 = vadd.f32 %v9859_v20, %v1399_v4  ;;  %8544 = vmatpush3.bf16.msra.mxu1 %v8978_v36 }
 0x26e   : > { %v2077_v39 = vmax.f32 %v1821_v58, %v1949_v12  ;;  %v2084_v18 = vmax.f32 %v1828_v59, %v1956_v57  ;;  %v1957_v27 = vmul.f32 0.01, %v1829_v29  ;;  %8545 = vmatprep.subr.bf16.mxu1 %v8979_v13 }
 0x26f   : > { %v2075_v30 = vmax.f32 %v1819_v6, %v1947_v23  ;;  %v8297_v17 = vpop.f32.mrb[44].mxu0  ;;  %v2082_v33 = vmax.f32 %v1826_v7, %v1954_v24  ;;  %v1955_v35 = vmul.f32 0.01, %v1827_v26 }
 0x270   : > { %v1824_v54 = vadd.f32 %v8297_v17, %v9859_v20  ;;  %v1304_v11 = vpop.f32.mrb[45].mxu0  ;;  %v2167_v31 = vpack.c.bf16 %v2077_v39, %v2076_v25  ;;  %v2085_v32 = vmax.f32 %v1829_v29, %v1957_v27  ;;  %v8982_v29 = vld [vmem:[#allocation9 + $0x30] sm:$0xff]  }
 0x271   : > { %v1822_v34 = vadd.f32 %v9859_v20, %v1304_v11  ;;  %v8298_v55 = vpop.f32.mrb[46].mxu0  ;;  %v2166_v37 = vpack.c.bf16 %v2075_v30, %v2074_v21  ;;  %v2083_v38 = vmax.f32 %v1827_v26, %v1955_v35  ;;  %v8321_v36 = vpop.f32.mrb[36].mxu1  ;;  %8546 = vmatpush3.bf16.msra.mxu1 %v8979_v13 }
 0x272   : > { %v1952_v40 = vmul.f32 0.01, %v1824_v54  ;;  %v1825_v42 = vadd.f32 %v8298_v55, %v9859_v20  ;;  %v1307_v46 = vpop.f32.mrb[47].mxu0  ;;  %v1832_v45 = vadd.f32 %v8321_v36, %v9859_v20  ;;  %v1412_v47 = vpop.f32.mrb[37].mxu1  ;;  %v10001_v49 = vpack.c.bf16 %v2085_v32, %v2084_v18  ;;  %8547 = vmatprep.subr.bf16.mxu1 %v8980_v28  ;;  %v8983_v55 = vld [vmem:[#allocation9 + $0x38] sm:$0xff]  }
 0x273   : > { %8452 = vmatmul.mubr.bf16.gmra.mrb[104].mxu0 %v9934_v16  ;;  %v1950_v52 = vmul.f32 0.01, %v1822_v34  ;;  %v1823_v43 = vadd.f32 %v9859_v20, %v1307_v46  ;;  %8483 = vmatprep.mubr.bf16.mxu1 %v2166_v37  ;;  %v1830_v53 = vadd.f32 %v9859_v20, %v1412_v47  ;;  %v8322_v56 = vpop.f32.mrb[38].mxu1  ;;  %v2170_v58 = vpack.c.bf16 %v2083_v38, %v2082_v33 }
 0x274   : > { %8455 = vmatprep.mubr.bf16.mxu0 %v9954_v22  ;;  %v2080_v44 = vmax.f32 %v1824_v54, %v1952_v40  ;;  %v1953_v59 = vmul.f32 0.01, %v1825_v42  ;;  %8484 = vmatmul.mubr.bf16.gmra.mrb[72].mxu1 %v2167_v31  ;;  %v1960_v60 = vmul.f32 0.01, %v1832_v45  ;;  %v1833_v13 = vadd.f32 %v8322_v56, %v9859_v20  ;;  %v1415_v62 = vpop.f32.mrb[39].mxu1 }
 0x275   : > { %v2078_v6 = vmax.f32 %v1822_v34, %v1950_v52  ;;  %v1951_v7 = vmul.f32 0.01, %v1823_v43  ;;  %v1958_v16 = vmul.f32 0.01, %v1830_v53  ;;  %v1831_v9 = vadd.f32 %v9859_v20, %v1415_v62  ;;  %8548 = vmatpush3.bf16.msra.mxu1 %v8980_v28 }
 0x276   : > { %v2081_v25 = vmax.f32 %v1825_v42, %v1953_v59  ;;  %v2088_v12 = vmax.f32 %v1832_v45, %v1960_v60  ;;  %v1961_v57 = vmul.f32 0.01, %v1833_v13  ;;  %8549 = vmatprep.subr.bf16.mxu1 %v8981_v19 }
 0x277   : > { %v2079_v4 = vmax.f32 %v1823_v43, %v1951_v7  ;;  %v2086_v22 = vmax.f32 %v1830_v53, %v1958_v16  ;;  %v1959_v21 = vmul.f32 0.01, %v1831_v9  ;;  %v8349_v23 = vpop.f32.mrb[48].mxu0 }
 0x278   : > { %v2169_v24 = vpack.c.bf16 %v2081_v25, %v2080_v44  ;;  %v2089_v26 = vmax.f32 %v1833_v13, %v1961_v57  ;;  %v1844_v39 = vadd.f32 %v8349_v23, %v9859_v20  ;;  %v1536_v18 = vpop.f32.mrb[49].mxu0 }
 0x279   : > { %v2168_v27 = vpack.c.bf16 %v2079_v4, %v2078_v6  ;;  %v2087_v30 = vmax.f32 %v1831_v9, %v1959_v21  ;;  %v8325_v17 = vpop.f32.mrb[40].mxu1  ;;  %v1842_v33 = vadd.f32 %v9859_v20, %v1536_v18  ;;  %v8350_v28 = vpop.f32.mrb[50].mxu0  ;;  %8550 = vmatpush3.bf16.msra.mxu1 %v8981_v19 }
 0x27a   : > { %v1836_v35 = vadd.f32 %v8325_v17, %v9859_v20  ;;  %v1428_v54 = vpop.f32.mrb[41].mxu1  ;;  %v10012_v11 = vpack.c.bf16 %v2089_v26, %v2088_v12  ;;  %v1972_v31 = vmul.f32 0.01, %v1844_v39  ;;  %v1845_v32 = vadd.f32 %v8350_v28, %v9859_v20  ;;  %v1539_v34 = vpop.f32.mrb[51].mxu0  ;;  %8551 = vmatprep.subr.bf16.mxu1 %v8982_v29 }
 0x27b   : > { %8456 = vmatmul.mubr.bf16.gmra.mrb[108].mxu0 %v9951_v15  ;;  %8487 = vmatprep.mubr.bf16.mxu1 %v2168_v27  ;;  %v1834_v37 = vadd.f32 %v9859_v20, %v1428_v54  ;;  %v8326_v38 = vpop.f32.mrb[42].mxu1  ;;  %v2172_v36 = vpack.c.bf16 %v2087_v30, %v2086_v22  ;;  %v1970_v40 = vmul.f32 0.01, %v1842_v33  ;;  %v1843_v42 = vadd.f32 %v9859_v20, %v1539_v34 }
 0x27c   : > { %8459 = vmatprep.mubr.bf16.mxu0 %v9946_v50  ;;  %8488 = vmatmul.mubr.bf16.gmra.mrb[76].mxu1 %v2169_v24  ;;  %v1964_v46 = vmul.f32 0.01, %v1836_v35  ;;  %v1837_v45 = vadd.f32 %v8326_v38, %v9859_v20  ;;  %v1431_v47 = vpop.f32.mrb[43].mxu1  ;;  %v2100_v19 = vmax.f32 %v1844_v39, %v1972_v31  ;;  %v1973_v52 = vmul.f32 0.01, %v1845_v32 }
 0x27d   : > { %8491 = vmatprep.mubr.bf16.mxu1 %v2170_v58  ;;  %v1962_v43 = vmul.f32 0.01, %v1834_v37  ;;  %v1835_v15 = vadd.f32 %v9859_v20, %v1431_v47  ;;  %v2098_v53 = vmax.f32 %v1842_v33, %v1970_v40  ;;  %v1971_v56 = vmul.f32 0.01, %v1843_v42  ;;  %8552 = vmatpush3.bf16.msra.mxu1 %v8982_v29  ;;  %v10036_v33 = vld [vmem:[%s12117_s2] ss:$0 sm:$0xff] }
 0x27e   : > { %v2092_v44 = vmax.f32 %v1836_v35, %v1964_v46  ;;  %v1965_v59 = vmul.f32 0.01, %v1837_v45  ;;  %v2101_v60 = vmax.f32 %v1845_v32, %v1973_v52  ;;  %8553 = vmatprep.subr.bf16.mxu1 %v8983_v55 }
 0x27f   : > { %v2090_v13 = vmax.f32 %v1834_v37, %v1962_v43  ;;  %v1963_v50 = vmul.f32 0.01, %v1835_v15  ;;  %v2099_v62 = vmax.f32 %v1843_v42, %v1971_v56  ;;  %v8353_v6 = vpop.f32.mrb[52].mxu0 }
 0x280   : > { %v2093_v7 = vmax.f32 %v1837_v45, %v1965_v59  ;;  %v1848_v16 = vadd.f32 %v8353_v6, %v9859_v20  ;;  %v1552_v9 = vpop.f32.mrb[53].mxu0  ;;  %v10022_v25 = vpack.c.bf16 %v2101_v60, %v2100_v19 }
 0x281   : > { %v2091_v58 = vmax.f32 %v1835_v15, %v1963_v50  ;;  %v8329_v12 = vpop.f32.mrb[44].mxu1  ;;  %v1846_v57 = vadd.f32 %v9859_v20, %v1552_v9  ;;  %v8354_v4 = vpop.f32.mrb[54].mxu0  ;;  %v10025_v29 = vpack.c.bf16 %v2099_v62, %v2098_v53  ;;  %8554 = vmatpush3.bf16.msra.mxu1 %v8983_v55 }
 0x282   : > { %v1840_v22 = vadd.f32 %v8329_v12, %v9859_v20  ;;  %v1444_v21 = vpop.f32.mrb[45].mxu1  ;;  %v10028_v23 = vpack.c.bf16 %v2093_v7, %v2092_v44  ;;  %v1976_v24 = vmul.f32 0.01, %v1848_v16  ;;  %v1849_v26 = vadd.f32 %v8354_v4, %v9859_v20  ;;  %v1555_v39 = vpop.f32.mrb[55].mxu0 }
 0x283   : > { %8460 = vmatmul.mubr.bf16.gmra.mrb[112].mxu0 %v9941_v41  ;;  %v1838_v18 = vadd.f32 %v9859_v20, %v1444_v21  ;;  %v8330_v27 = vpop.f32.mrb[46].mxu1  ;;  %v2174_v30 = vpack.c.bf16 %v2091_v58, %v2090_v13  ;;  %v1974_v17 = vmul.f32 0.01, %v1846_v57  ;;  %v1847_v28 = vadd.f32 %v10036_v33, %v1555_v39 }
 0x284   : > { %8463 = vmatprep.mubr.bf16.mxu0 %v9963_v0  ;;  %8492 = vmatmul.mubr.bf16.gmra.mrb[80].mxu1 %v10001_v49  ;;  %v1968_v35 = vmul.f32 0.01, %v1840_v22  ;;  %v1841_v54 = vadd.f32 %v10036_v33, %v8330_v27  ;;  %v1447_v41 = vpop.f32.mrb[47].mxu1  ;;  %v2104_v31 = vmax.f32 %v1848_v16, %v1976_v24  ;;  %v1977_v20 = vmul.f32 0.01, %v1849_v26 }
 0x285   : > { %8495 = vmatprep.mubr.bf16.mxu1 %v2172_v36  ;;  %v1966_v32 = vmul.f32 0.01, %v1838_v18  ;;  %v1839_v34 = vadd.f32 %v10036_v33, %v1447_v41  ;;  %v2102_v55 = vmax.f32 %v1846_v57, %v1974_v17  ;;  %v1975_v37 = vmul.f32 0.01, %v1847_v28 }
 0x286   : > { %v2096_v38 = vmax.f32 %v1840_v22, %v1968_v35  ;;  %v1969_v40 = vmul.f32 0.01, %v1841_v54  ;;  %v2105_v42 = vmax.f32 %v1849_v26, %v1977_v20 }
 0x287   : > { %v2094_v46 = vmax.f32 %v1838_v18, %v1966_v32  ;;  %v1967_v45 = vmul.f32 0.01, %v1839_v34  ;;  %v2103_v0 = vmax.f32 %v1847_v28, %v1975_v37  ;;  %v8357_v47 = vpop.f32.mrb[56].mxu0 }
 0x288   : > { %v2097_v49 = vmax.f32 %v1841_v54, %v1969_v40  ;;  %v1852_v19 = vadd.f32 %v10036_v33, %v8357_v47  ;;  %v1568_v52 = vpop.f32.mrb[57].mxu0  ;;  %v10044_v43 = vpack.c.bf16 %v2105_v42, %v2104_v31 }
 0x289   : > { %v2095_v15 = vmax.f32 %v1839_v34, %v1967_v45  ;;  %v1850_v36 = vadd.f32 %v10036_v33, %v1568_v52  ;;  %v8358_v53 = vpop.f32.mrb[58].mxu0  ;;  %v10047_v56 = vpack.c.bf16 %v2103_v0, %v2102_v55  ;;  %v8381_v44 = vpop.f32.mrb[48].mxu1 }
 0x28a   : > { %v10049_v59 = vpack.c.bf16 %v2097_v49, %v2096_v38  ;;  %v1980_v60 = vmul.f32 0.01, %v1852_v19  ;;  %v1853_v13 = vadd.f32 %v10036_v33, %v8358_v53  ;;  %v1571_v50 = vpop.f32.mrb[59].mxu0  ;;  %v1860_v62 = vadd.f32 %v10036_v33, %v8381_v44  ;;  %v1676_v6 = vpop.f32.mrb[49].mxu1 }
 0x28b   : > { %8464 = vmatmul.mubr.bf16.gmra.mrb[116].mxu0 %v9958_v48  ;;  %v2176_v7 = vpack.c.bf16 %v2095_v15, %v2094_v46  ;;  %v1978_v16 = vmul.f32 0.01, %v1850_v36  ;;  %v1851_v9 = vadd.f32 %v10036_v33, %v1571_v50  ;;  %v1858_v58 = vadd.f32 %v10036_v33, %v1676_v6  ;;  %v8382_v12 = vpop.f32.mrb[50].mxu1 }
 0x28c   : > { %8467 = vmatprep.mubr.bf16.mxu0 %v9977_v63  ;;  %8496 = vmatmul.mubr.bf16.gmra.mrb[84].mxu1 %v10012_v11  ;;  %v2108_v57 = vmax.f32 %v1852_v19, %v1980_v60  ;;  %v1981_v4 = vmul.f32 0.01, %v1853_v13  ;;  %v1988_v22 = vmul.f32 0.01, %v1860_v62  ;;  %v1861_v21 = vadd.f32 %v10036_v33, %v8382_v12  ;;  %v1679_v24 = vpop.f32.mrb[51].mxu1 }
 0x28d   : > { %8499 = vmatprep.mubr.bf16.mxu1 %v2174_v30  ;;  %v2106_v26 = vmax.f32 %v1850_v36, %v1978_v16  ;;  %v1979_v48 = vmul.f32 0.01, %v1851_v9  ;;  %v1986_v39 = vmul.f32 0.01, %v1858_v58  ;;  %v1859_v18 = vadd.f32 %v10036_v33, %v1679_v24 }
 0x28e   : > { %v2109_v27 = vmax.f32 %v1853_v13, %v1981_v4  ;;  %v2116_v17 = vmax.f32 %v1860_v62, %v1988_v22  ;;  %v1989_v28 = vmul.f32 0.01, %v1861_v21 }
 0x28f   : > { %v2107_v35 = vmax.f32 %v1851_v9, %v1979_v48  ;;  %v8361_v54 = vpop.f32.mrb[60].mxu0  ;;  %v2114_v63 = vmax.f32 %v1858_v58, %v1986_v39  ;;  %v1987_v41 = vmul.f32 0.01, %v1859_v18 }
 0x290   : > { %v1856_v11 = vadd.f32 %v10036_v33, %v8361_v54  ;;  %v1584_v31 = vpop.f32.mrb[61].mxu0  ;;  %v10061_v20 = vpack.c.bf16 %v2109_v27, %v2108_v57  ;;  %v2117_v32 = vmax.f32 %v1861_v21, %v1989_v28 }
 0x291   : > { %v1854_v30 = vadd.f32 %v10036_v33, %v1584_v31  ;;  %v8362_v34 = vpop.f32.mrb[62].mxu0  ;;  %v10064_v55 = vpack.c.bf16 %v2107_v35, %v2106_v26  ;;  %v2115_v37 = vmax.f32 %v1859_v18, %v1987_v41  ;;  %v8385_v38 = vpop.f32.mrb[52].mxu1 }
 0x292   : > { %v1984_v40 = vmul.f32 0.01, %v1856_v11  ;;  %v1857_v42 = vadd.f32 %v10036_v33, %v8362_v34  ;;  %v1587_v46 = vpop.f32.mrb[63].mxu0  ;;  %v1864_v45 = vadd.f32 %v10036_v33, %v8385_v38  ;;  %v1692_v0 = vpop.f32.mrb[53].mxu1  ;;  %v10068_v47 = vpack.c.bf16 %v2117_v32, %v2116_v17 }
 0x293   : > { %8468 = vmatmul.mubr.bf16.gmra.mrb[120].mxu0 %v9972_v14  ;;  %v1982_v49 = vmul.f32 0.01, %v1854_v30  ;;  %v1855_v19 = vadd.f32 %v10036_v33, %v1587_v46  ;;  %v1862_v52 = vadd.f32 %v10036_v33, %v1692_v0  ;;  %v8386_v15 = vpop.f32.mrb[54].mxu1  ;;  %v10073_v36 = vpack.c.bf16 %v2115_v37, %v2114_v63 }
 0x294   : > { %8471 = vmatprep.mubr.bf16.mxu0 %v9992_v10  ;;  %8500 = vmatmul.mubr.bf16.gmra.mrb[88].mxu1 %v10028_v23  ;;  %v2112_v53 = vmax.f32 %v1856_v11, %v1984_v40  ;;  %v1985_v44 = vmul.f32 0.01, %v1857_v42  ;;  %v1992_v60 = vmul.f32 0.01, %v1864_v45  ;;  %v1865_v13 = vadd.f32 %v10036_v33, %v8386_v15  ;;  %v1695_v50 = vpop.f32.mrb[55].mxu1 }
 0x295   : > { %8503 = vmatprep.mubr.bf16.mxu1 %v2176_v7  ;;  %v2110_v14 = vmax.f32 %v1854_v30, %v1982_v49  ;;  %v1983_v62 = vmul.f32 0.01, %v1855_v19  ;;  %v1990_v6 = vmul.f32 0.01, %v1862_v52  ;;  %v1863_v16 = vadd.f32 %v10036_v33, %v1695_v50 }
 0x296   : > { %v2113_v9 = vmax.f32 %v1857_v42, %v1985_v44  ;;  %v2120_v58 = vmax.f32 %v1864_v45, %v1992_v60  ;;  %v1993_v12 = vmul.f32 0.01, %v1865_v13 }
 0x297   : > { %v2111_v57 = vmax.f32 %v1855_v19, %v1983_v62  ;;  %v2118_v4 = vmax.f32 %v1862_v52, %v1990_v6  ;;  %v1991_v10 = vmul.f32 0.01, %v1863_v16 }
 0x298   : > { %v2185_v22 = vpack.c.bf16 %v2113_v9, %v2112_v53  ;;  %v2121_v23 = vmax.f32 %v1865_v13, %v1993_v12 }
 0x299   : > { %v2184_v21 = vpack.c.bf16 %v2111_v57, %v2110_v14  ;;  %v2119_v24 = vmax.f32 %v1863_v16, %v1991_v10  ;;  %v8389_v26 = vpop.f32.mrb[56].mxu1  ;;  %v8986_v10 = vld [vmem:[#allocation11 + $0x10] sm:$0xff]  }
 0x29a   : > { %v1868_v48 = vadd.f32 %v10036_v33, %v8389_v26  ;;  %v1708_v39 = vpop.f32.mrb[57].mxu1  ;;  %v2189_v7 = vpack.c.bf16 %v2121_v23, %v2120_v58 }
 0x29b   : > { %8472 = vmatmul.mubr.bf16.gmra.mrb[124].mxu0 %v9987_v61  ;;  %v1866_v18 = vadd.f32 %v10036_v33, %v1708_v39  ;;  %v8390_v27 = vpop.f32.mrb[58].mxu1  ;;  %v2188_v17 = vpack.c.bf16 %v2119_v24, %v2118_v4 }
 0x29c   : > { %8504 = vmatmul.mubr.bf16.gmra.mrb[92].mxu1 %v10049_v59  ;;  %v1996_v28 = vmul.f32 0.01, %v1868_v48  ;;  %v1869_v35 = vadd.f32 %v10036_v33, %v8390_v27  ;;  %v1711_v54 = vpop.f32.mrb[59].mxu1 }
 0x29d   : > { %8507 = vmatprep.mubr.bf16.mxu1 %v10025_v29  ;;  %v1994_v63 = vmul.f32 0.01, %v1866_v18  ;;  %v1867_v41 = vadd.f32 %v10036_v33, %v1711_v54 }
 0x29e   : > { %v2124_v11 = vmax.f32 %v1868_v48, %v1996_v28  ;;  %v1997_v31 = vmul.f32 0.01, %v1869_v35 }
 0x29f   : > { %v2122_v32 = vmax.f32 %v1866_v18, %v1994_v63  ;;  %v1995_v30 = vmul.f32 0.01, %v1867_v41 }
 0x2a0   : > { %v2125_v61 = vmax.f32 %v1869_v35, %v1997_v31 }
 0x2a1   : > { %v2123_v34 = vmax.f32 %v1867_v41, %v1995_v30  ;;  %v8393_v37 = vpop.f32.mrb[60].mxu1 }
 0x2a2   : > { %v1872_v38 = vadd.f32 %v10036_v33, %v8393_v37  ;;  %v1724_v40 = vpop.f32.mrb[61].mxu1  ;;  %v2191_v59 = vpack.c.bf16 %v2125_v61, %v2124_v11 }
 0x2a3   : > { %v1870_v42 = vadd.f32 %v10036_v33, %v1724_v40  ;;  %v8394_v46 = vpop.f32.mrb[62].mxu1  ;;  %v2190_v45 = vpack.c.bf16 %v2123_v34, %v2122_v32 }
 0x2a4   : > { %8508 = vmatmul.mubr.bf16.gmra.mrb[96].mxu1 %v10022_v25  ;;  %v2000_v29 = vmul.f32 0.01, %v1872_v38  ;;  %v1873_v0 = vadd.f32 %v10036_v33, %v8394_v46  ;;  %v1727_v49 = vpop.f32.mrb[63].mxu1  ;;  %v8984_v25 = vld [vmem:[#allocation11] sm:$0xff]  }
 0x2a5   : > { %8511 = vmatprep.mubr.bf16.mxu1 %v10047_v56  ;;  %v1998_v19 = vmul.f32 0.01, %v1870_v42  ;;  %v1871_v52 = vadd.f32 %v10036_v33, %v1727_v49  ;;  %8683 = vmatprep.subr.bf16.mxu0 %v8984_v25  ;;  %v10100_v33 = vld [vmem:[%s12119_s4] ss:$0 sm:$0xff]  ;;  %v8985_v56 = vld [vmem:[#allocation11 + $0x8] sm:$0xff]  }
 0x2a6   : > { %v2128_v15 = vmax.f32 %v1872_v38, %v2000_v29  ;;  %v2001_v53 = vmul.f32 0.01, %v1873_v0  ;;  %8684 = vmatpush3.bf16.msra.mxu0 %v8984_v25 }
 0x2a7   : > { %v2126_v44 = vmax.f32 %v1870_v42, %v1998_v19  ;;  %v1999_v60 = vmul.f32 0.01, %v1871_v52  ;;  %8685 = vmatprep.subr.bf16.mxu0 %v8985_v56 }
 0x2a8   : > { %v2129_v13 = vmax.f32 %v1873_v0, %v2001_v53 }
 0x2a9   : > { %v2127_v50 = vmax.f32 %v1871_v52, %v1999_v60 }
 0x2aa   : > { %v2193_v14 = vpack.c.bf16 %v2129_v13, %v2128_v15  ;;  %8686 = vmatpush3.bf16.msra.mxu0 %v8985_v56 }
 0x2ab   : > { %v2192_v62 = vpack.c.bf16 %v2127_v50, %v2126_v44  ;;  %8687 = vmatprep.subr.bf16.mxu0 %v8986_v10  ;;  %v8987_v44 = vld [vmem:[#allocation11 + $0x18] sm:$0xff]  }
 0x2ac   : > { %8512 = vmatmul.mubr.bf16.gmra.mrb[100].mxu1 %v10044_v43 }
 0x2ad   : > { %8515 = vmatprep.mubr.bf16.mxu1 %v10064_v55 }
 0x2ae   : > { %8688 = vmatpush3.bf16.msra.mxu0 %v8986_v10 }
 0x2af   : > { %8689 = vmatprep.subr.bf16.mxu0 %v8987_v44 }
 0x2b2   : > { %8690 = vmatpush3.bf16.msra.mxu0 %v8987_v44 }
 0x2b4   : > { %8516 = vmatmul.mubr.bf16.gmra.mrb[104].mxu1 %v10061_v20 }
 0x2b5   : > { %8519 = vmatprep.mubr.bf16.mxu1 %v2184_v21 }
 0x2bc   : > { %8520 = vmatmul.mubr.bf16.gmra.mrb[108].mxu1 %v2185_v22 }
 0x2bd   : > { %8523 = vmatprep.mubr.bf16.mxu1 %v10073_v36 }
 0x2c4   : > { %8524 = vmatmul.mubr.bf16.gmra.mrb[112].mxu1 %v10068_v47 }
 0x2c5   : > { %8527 = vmatprep.mubr.bf16.mxu1 %v2188_v17 }
 0x2cc   : > { %8528 = vmatmul.mubr.bf16.gmra.mrb[116].mxu1 %v2189_v7 }
 0x2cd   : > { %8531 = vmatprep.mubr.bf16.mxu1 %v2190_v45 }
 0x2d4   : > { %8532 = vmatmul.mubr.bf16.gmra.mrb[120].mxu1 %v2191_v59 }
 0x2d5   : > { %8535 = vmatprep.mubr.bf16.mxu1 %v2192_v62 }
 0x2dc   : > { %8536 = vmatmul.mubr.bf16.gmra.mrb[124].mxu1 %v2193_v14 }
 0x2f6   : > { %v8413_v43 = vpop.f32.mrb[64].mxu0 }
 0x2f7   : > { %v2308_v20 = vadd.f32 %v8413_v43, %v10100_v33  ;;  %v2299_v55 = vpop.f32.mrb[65].mxu0 }
 0x2f8   : > { %v2300_v47 = vadd.f32 %v10100_v33, %v2299_v55  ;;  %v8414_v36 = vpop.f32.mrb[66].mxu0 }
 0x2f9   : > { %v2812_v6 = vmul.f32 0.01, %v2308_v20  ;;  %v2311_v16 = vadd.f32 %v8414_v36, %v10100_v33  ;;  %v2302_v9 = vpop.f32.mrb[67].mxu0 }
 0x2fa   : > { %v2810_v58 = vmul.f32 0.01, %v2300_v47  ;;  %v2303_v12 = vadd.f32 %v10100_v33, %v2302_v9 }
 0x2fb   : > { %v2813_v57 = vmul.f32 0.01, %v2311_v16  ;;  %v2940_v22 = vmax.f32 %v2308_v20, %v2812_v6 }
 0x2fc   : > { %v2811_v4 = vmul.f32 0.01, %v2303_v12  ;;  %v2938_v21 = vmax.f32 %v2300_v47, %v2810_v58 }
 0x2fd   : > { %v2941_v23 = vmax.f32 %v2311_v16, %v2813_v57 }
 0x2fe   : > { %v2939_v24 = vmax.f32 %v2303_v12, %v2811_v4  ;;  %v8417_v26 = vpop.f32.mrb[68].mxu0 }
 0x2ff   : > { %v3067_v48 = vpack.c.bf16 %v2941_v23, %v2940_v22  ;;  %v2324_v39 = vadd.f32 %v8417_v26, %v10100_v33  ;;  %v2315_v7 = vpop.f32.mrb[69].mxu0 }
 0x300   : > { %v2316_v18 = vadd.f32 %v10100_v33, %v2315_v7  ;;  %v8418_v27 = vpop.f32.mrb[70].mxu0  ;;  %v3066_v17 = vpack.c.bf16 %v2939_v24, %v2938_v21 }
 0x301   : > { %v2816_v28 = vmul.f32 0.01, %v2324_v39  ;;  %v2327_v35 = vadd.f32 %v8418_v27, %v10100_v33  ;;  %v2318_v54 = vpop.f32.mrb[71].mxu0 }
 0x302   : > { %v2814_v63 = vmul.f32 0.01, %v2316_v18  ;;  %v2319_v41 = vadd.f32 %v10100_v33, %v2318_v54  ;;  %8555 = vmatprep.mubr.bf16.mxu1 %v3066_v17 }
 0x303   : > { %v2817_v11 = vmul.f32 0.01, %v2327_v35  ;;  %8556 = vmatmul.mubr.bf16.vlgmr.msra.gmra.mrb[128].mxu1 %v3067_v48  ;;  %v2944_v32 = vmax.f32 %v2324_v39, %v2816_v28 }
 0x304   : > { %v2815_v31 = vmul.f32 0.01, %v2319_v41  ;;  %v2942_v61 = vmax.f32 %v2316_v18, %v2814_v63 }
 0x305   : > { %v2945_v30 = vmax.f32 %v2327_v35, %v2817_v11  ;;  %v8988_v11 = vld [vmem:[#allocation11 + $0x20] sm:$0xff]  }
 0x306   : > { %v2943_v34 = vmax.f32 %v2319_v41, %v2815_v31  ;;  %v8421_v37 = vpop.f32.mrb[72].mxu0  ;;  %8691 = vmatprep.subr.bf16.mxu0 %v8988_v11 }
 0x307   : > { %v2340_v38 = vadd.f32 %v8421_v37, %v10100_v33  ;;  %v2331_v40 = vpop.f32.mrb[73].mxu0  ;;  %v3069_v59 = vpack.c.bf16 %v2945_v30, %v2944_v32  ;;  %8692 = vmatpush3.bf16.msra.mxu0 %v8988_v11 }
 0x308   : > { %v2332_v42 = vadd.f32 %v10100_v33, %v2331_v40  ;;  %v8422_v46 = vpop.f32.mrb[74].mxu0  ;;  %v3068_v45 = vpack.c.bf16 %v2943_v34, %v2942_v61 }
 0x309   : > { %v2820_v29 = vmul.f32 0.01, %v2340_v38  ;;  %v2343_v0 = vadd.f32 %v8422_v46, %v10100_v33  ;;  %v2334_v49 = vpop.f32.mrb[75].mxu0 }
 0x30a   : > { %v2818_v19 = vmul.f32 0.01, %v2332_v42  ;;  %v2335_v52 = vadd.f32 %v10100_v33, %v2334_v49  ;;  %8559 = vmatprep.mubr.bf16.mxu1 %v3068_v45 }
 0x30b   : > { %v2821_v15 = vmul.f32 0.01, %v2343_v0  ;;  %8560 = vmatmul.mubr.bf16.gmra.mrb[132].mxu1 %v3069_v59  ;;  %v2948_v60 = vmax.f32 %v2340_v38, %v2820_v29 }
 0x30c   : > { %v2819_v53 = vmul.f32 0.01, %v2335_v52  ;;  %v2946_v50 = vmax.f32 %v2332_v42, %v2818_v19 }
 0x30d   : > { %v2949_v13 = vmax.f32 %v2343_v0, %v2821_v15 }
 0x30e   : > { %v2947_v14 = vmax.f32 %v2335_v52, %v2819_v53  ;;  %v8425_v62 = vpop.f32.mrb[76].mxu0 }
 0x30f   : > { %v2356_v25 = vadd.f32 %v8425_v62, %v10100_v33  ;;  %v2347_v43 = vpop.f32.mrb[77].mxu0  ;;  %v3071_v56 = vpack.c.bf16 %v2949_v13, %v2948_v60 }
 0x310   : > { %v2348_v20 = vadd.f32 %v10100_v33, %v2347_v43  ;;  %v8426_v55 = vpop.f32.mrb[78].mxu0  ;;  %v3070_v47 = vpack.c.bf16 %v2947_v14, %v2946_v50 }
 0x311   : > { %v2824_v36 = vmul.f32 0.01, %v2356_v25  ;;  %v2359_v6 = vadd.f32 %v8426_v55, %v10100_v33  ;;  %v2350_v16 = vpop.f32.mrb[79].mxu0 }
 0x312   : > { %v2822_v9 = vmul.f32 0.01, %v2348_v20  ;;  %v2351_v58 = vadd.f32 %v10100_v33, %v2350_v16  ;;  %8563 = vmatprep.mubr.bf16.mxu1 %v3070_v47 }
 0x313   : > { %v2825_v12 = vmul.f32 0.01, %v2359_v6  ;;  %8564 = vmatmul.mubr.bf16.gmra.mrb[136].mxu1 %v3071_v56  ;;  %v2952_v4 = vmax.f32 %v2356_v25, %v2824_v36 }
 0x314   : > { %v2823_v57 = vmul.f32 0.01, %v2351_v58  ;;  %v2950_v22 = vmax.f32 %v2348_v20, %v2822_v9 }
 0x315   : > { %v2953_v10 = vmax.f32 %v2359_v6, %v2825_v12  ;;  %v8989_v12 = vld [vmem:[#allocation11 + $0x28] sm:$0xff]  }
 0x316   : > { %v2951_v23 = vmax.f32 %v2351_v58, %v2823_v57  ;;  %v8429_v21 = vpop.f32.mrb[80].mxu0  ;;  %8693 = vmatprep.subr.bf16.mxu0 %v8989_v12 }
 0x317   : > { %v2372_v24 = vadd.f32 %v8429_v21, %v10100_v33  ;;  %v2363_v26 = vpop.f32.mrb[81].mxu0  ;;  %v3073_v48 = vpack.c.bf16 %v2953_v10, %v2952_v4  ;;  %8694 = vmatpush3.bf16.msra.mxu0 %v8989_v12 }
 0x318   : > { %v2364_v39 = vadd.f32 %v10100_v33, %v2363_v26  ;;  %v8430_v7 = vpop.f32.mrb[82].mxu0  ;;  %v3072_v18 = vpack.c.bf16 %v2951_v23, %v2950_v22 }
 0x319   : > { %v2828_v27 = vmul.f32 0.01, %v2372_v24  ;;  %v2375_v17 = vadd.f32 %v8430_v7, %v10100_v33  ;;  %v2366_v28 = vpop.f32.mrb[83].mxu0 }
 0x31a   : > { %v2826_v35 = vmul.f32 0.01, %v2364_v39  ;;  %v2367_v54 = vadd.f32 %v10100_v33, %v2366_v28  ;;  %8567 = vmatprep.mubr.bf16.mxu1 %v3072_v18 }
 0x31b   : > { %v2829_v63 = vmul.f32 0.01, %v2375_v17  ;;  %8568 = vmatmul.mubr.bf16.gmra.mrb[140].mxu1 %v3073_v48  ;;  %v2956_v31 = vmax.f32 %v2372_v24, %v2828_v27 }
 0x31c   : > { %v2827_v41 = vmul.f32 0.01, %v2367_v54  ;;  %v2954_v30 = vmax.f32 %v2364_v39, %v2826_v35 }
 0x31d   : > { %v2957_v32 = vmax.f32 %v2375_v17, %v2829_v63 }
 0x31e   : > { %v2955_v61 = vmax.f32 %v2367_v54, %v2827_v41  ;;  %v8433_v34 = vpop.f32.mrb[84].mxu0 }
 0x31f   : > { %v2388_v37 = vadd.f32 %v8433_v34, %v10100_v33  ;;  %v2379_v38 = vpop.f32.mrb[85].mxu0  ;;  %v3075_v40 = vpack.c.bf16 %v2957_v32, %v2956_v31 }
 0x320   : > { %v2380_v59 = vadd.f32 %v10100_v33, %v2379_v38  ;;  %v8434_v42 = vpop.f32.mrb[86].mxu0  ;;  %v3074_v46 = vpack.c.bf16 %v2955_v61, %v2954_v30 }
 0x321   : > { %v2832_v45 = vmul.f32 0.01, %v2388_v37  ;;  %v2391_v29 = vadd.f32 %v8434_v42, %v10100_v33  ;;  %v2382_v0 = vpop.f32.mrb[87].mxu0 }
 0x322   : > { %v2830_v49 = vmul.f32 0.01, %v2380_v59  ;;  %v2383_v19 = vadd.f32 %v10100_v33, %v2382_v0  ;;  %8571 = vmatprep.mubr.bf16.mxu1 %v3074_v46 }
 0x323   : > { %v2833_v52 = vmul.f32 0.01, %v2391_v29  ;;  %8572 = vmatmul.mubr.bf16.gmra.mrb[144].mxu1 %v3075_v40  ;;  %v2960_v53 = vmax.f32 %v2388_v37, %v2832_v45 }
 0x324   : > { %v2831_v15 = vmul.f32 0.01, %v2383_v19  ;;  %v2958_v60 = vmax.f32 %v2380_v59, %v2830_v49 }
 0x325   : > { %v2961_v44 = vmax.f32 %v2391_v29, %v2833_v52 }
 0x326   : > { %v2959_v13 = vmax.f32 %v2383_v19, %v2831_v15  ;;  %v8437_v50 = vpop.f32.mrb[88].mxu0 }
 0x327   : > { %v2404_v14 = vadd.f32 %v8437_v50, %v10100_v33  ;;  %v2395_v62 = vpop.f32.mrb[89].mxu0  ;;  %v3077_v25 = vpack.c.bf16 %v2961_v44, %v2960_v53 }
 0x328   : > { %v2396_v43 = vadd.f32 %v10100_v33, %v2395_v62  ;;  %v8438_v56 = vpop.f32.mrb[90].mxu0  ;;  %v3076_v20 = vpack.c.bf16 %v2959_v13, %v2958_v60 }
 0x329   : > { %v2836_v55 = vmul.f32 0.01, %v2404_v14  ;;  %v2407_v47 = vadd.f32 %v8438_v56, %v10100_v33  ;;  %v2398_v36 = vpop.f32.mrb[91].mxu0 }
 0x32a   : > { %v2834_v6 = vmul.f32 0.01, %v2396_v43  ;;  %v2399_v16 = vadd.f32 %v10100_v33, %v2398_v36  ;;  %8575 = vmatprep.mubr.bf16.mxu1 %v3076_v20  ;;  %v8990_v20 = vld [vmem:[#allocation11 + $0x30] sm:$0xff]  }
 0x32b   : > { %v2837_v9 = vmul.f32 0.01, %v2407_v47  ;;  %8576 = vmatmul.mubr.bf16.gmra.mrb[148].mxu1 %v3077_v25  ;;  %v2964_v57 = vmax.f32 %v2404_v14, %v2836_v55  ;;  %8695 = vmatprep.subr.bf16.mxu0 %v8990_v20 }
 0x32c   : > { %v2835_v58 = vmul.f32 0.01, %v2399_v16  ;;  %v2962_v10 = vmax.f32 %v2396_v43, %v2834_v6  ;;  %8696 = vmatpush3.bf16.msra.mxu0 %v8990_v20 }
 0x32d   : > { %v2965_v4 = vmax.f32 %v2407_v47, %v2837_v9 }
 0x32e   : > { %v2963_v22 = vmax.f32 %v2399_v16, %v2835_v58  ;;  %v8441_v23 = vpop.f32.mrb[92].mxu0 }
 0x32f   : > { %v2420_v21 = vadd.f32 %v8441_v23, %v10100_v33  ;;  %v2411_v24 = vpop.f32.mrb[93].mxu0  ;;  %v3079_v26 = vpack.c.bf16 %v2965_v4, %v2964_v57 }
 0x330   : > { %v2412_v48 = vadd.f32 %v10100_v33, %v2411_v24  ;;  %v8442_v39 = vpop.f32.mrb[94].mxu0  ;;  %v3078_v7 = vpack.c.bf16 %v2963_v22, %v2962_v10 }
 0x331   : > { %v2840_v18 = vmul.f32 0.01, %v2420_v21  ;;  %v2423_v27 = vadd.f32 %v8442_v39, %v10100_v33  ;;  %v2414_v17 = vpop.f32.mrb[95].mxu0 }
 0x332   : > { %v2838_v28 = vmul.f32 0.01, %v2412_v48  ;;  %v2415_v35 = vadd.f32 %v10100_v33, %v2414_v17  ;;  %8579 = vmatprep.mubr.bf16.mxu1 %v3078_v7 }
 0x333   : > { %v2841_v54 = vmul.f32 0.01, %v2423_v27  ;;  %8580 = vmatmul.mubr.bf16.gmra.mrb[152].mxu1 %v3079_v26  ;;  %v2968_v41 = vmax.f32 %v2420_v21, %v2840_v18 }
 0x334   : > { %v2839_v63 = vmul.f32 0.01, %v2415_v35  ;;  %v2966_v31 = vmax.f32 %v2412_v48, %v2838_v28 }
 0x335   : > { %v2969_v11 = vmax.f32 %v2423_v27, %v2841_v54 }
 0x336   : > { %v2967_v32 = vmax.f32 %v2415_v35, %v2839_v63  ;;  %v8445_v30 = vpop.f32.mrb[96].mxu0 }
 0x337   : > { %v2436_v61 = vadd.f32 %v8445_v30, %v10100_v33  ;;  %v2427_v34 = vpop.f32.mrb[97].mxu0  ;;  %v3081_v37 = vpack.c.bf16 %v2969_v11, %v2968_v41  ;;  %v8477_v38 = vpop.f32.mrb[64].mxu1 }
 0x338   : > { %v2428_v40 = vadd.f32 %v10100_v33, %v2427_v34  ;;  %v8446_v59 = vpop.f32.mrb[98].mxu0  ;;  %v3080_v42 = vpack.c.bf16 %v2967_v32, %v2966_v31  ;;  %v2564_v46 = vadd.f32 %v8477_v38, %v10100_v33  ;;  %v2555_v45 = vpop.f32.mrb[65].mxu1 }
 0x339   : > { %v2844_v29 = vmul.f32 0.01, %v2436_v61  ;;  %v2439_v0 = vadd.f32 %v8446_v59, %v10100_v33  ;;  %v2430_v49 = vpop.f32.mrb[99].mxu0  ;;  %v2556_v19 = vadd.f32 %v10100_v33, %v2555_v45  ;;  %v8478_v52 = vpop.f32.mrb[66].mxu1 }
 0x33a   : > { %v2842_v15 = vmul.f32 0.01, %v2428_v40  ;;  %v2431_v53 = vadd.f32 %v10100_v33, %v2430_v49  ;;  %8583 = vmatprep.mubr.bf16.mxu1 %v3080_v42  ;;  %v2876_v44 = vmul.f32 0.01, %v2564_v46  ;;  %v2567_v60 = vadd.f32 %v8478_v52, %v10100_v33  ;;  %v2558_v13 = vpop.f32.mrb[67].mxu1 }
 0x33b   : > { %v2845_v50 = vmul.f32 0.01, %v2439_v0  ;;  %8584 = vmatmul.mubr.bf16.gmra.mrb[156].mxu1 %v3081_v37  ;;  %v2874_v14 = vmul.f32 0.01, %v2556_v19  ;;  %v2559_v62 = vadd.f32 %v10100_v33, %v2558_v13  ;;  %v2972_v55 = vmax.f32 %v2436_v61, %v2844_v29 }
 0x33c   : > { %v2843_v25 = vmul.f32 0.01, %v2431_v53  ;;  %v3004_v43 = vmax.f32 %v2564_v46, %v2876_v44  ;;  %v2877_v56 = vmul.f32 0.01, %v2567_v60  ;;  %v2970_v16 = vmax.f32 %v2428_v40, %v2842_v15 }
 0x33d   : > { %v2973_v47 = vmax.f32 %v2439_v0, %v2845_v50  ;;  %v3002_v36 = vmax.f32 %v2556_v19, %v2874_v14  ;;  %v2875_v6 = vmul.f32 0.01, %v2559_v62 }
 0x33e   : > { %v2971_v9 = vmax.f32 %v2431_v53, %v2843_v25  ;;  %v8449_v58 = vpop.f32.mrb[100].mxu0  ;;  %v3005_v12 = vmax.f32 %v2567_v60, %v2877_v56 }
 0x33f   : > { %v2452_v57 = vadd.f32 %v8449_v58, %v10100_v33  ;;  %v2443_v4 = vpop.f32.mrb[101].mxu0  ;;  %v3083_v10 = vpack.c.bf16 %v2973_v47, %v2972_v55  ;;  %v3003_v22 = vmax.f32 %v2559_v62, %v2875_v6  ;;  %v8481_v23 = vpop.f32.mrb[68].mxu1 }
 0x340   : > { %v2444_v21 = vadd.f32 %v10100_v33, %v2443_v4  ;;  %v8450_v24 = vpop.f32.mrb[102].mxu0  ;;  %v3082_v26 = vpack.c.bf16 %v2971_v9, %v2970_v16  ;;  %v2580_v48 = vadd.f32 %v8481_v23, %v10100_v33  ;;  %v2571_v39 = vpop.f32.mrb[69].mxu1  ;;  %v10145_v7 = vpack.c.bf16 %v3005_v12, %v3004_v43 }
 0x341   : > { %v2848_v18 = vmul.f32 0.01, %v2452_v57  ;;  %v2455_v27 = vadd.f32 %v8450_v24, %v10100_v33  ;;  %v2446_v17 = vpop.f32.mrb[103].mxu0  ;;  %v2572_v28 = vadd.f32 %v10100_v33, %v2571_v39  ;;  %v8482_v35 = vpop.f32.mrb[70].mxu1  ;;  %v10149_v54 = vpack.c.bf16 %v3003_v22, %v3002_v36 }
 0x342   : > { %v2846_v63 = vmul.f32 0.01, %v2444_v21  ;;  %v2447_v41 = vadd.f32 %v10100_v33, %v2446_v17  ;;  %8587 = vmatprep.mubr.bf16.mxu1 %v3082_v26  ;;  %v2880_v11 = vmul.f32 0.01, %v2580_v48  ;;  %v2583_v31 = vadd.f32 %v8482_v35, %v10100_v33  ;;  %v2574_v32 = vpop.f32.mrb[71].mxu1  ;;  %v8991_v26 = vld [vmem:[#allocation11 + $0x38] sm:$0xff]  }
 0x343   : > { %v2849_v30 = vmul.f32 0.01, %v2455_v27  ;;  %8588 = vmatmul.mubr.bf16.gmra.mrb[160].mxu1 %v3083_v10  ;;  %v2878_v61 = vmul.f32 0.01, %v2572_v28  ;;  %v2575_v34 = vadd.f32 %v10100_v33, %v2574_v32  ;;  %v2976_v59 = vmax.f32 %v2452_v57, %v2848_v18  ;;  %8697 = vmatprep.subr.bf16.mxu0 %v8991_v26 }
 0x344   : > { %v2847_v37 = vmul.f32 0.01, %v2447_v41  ;;  %v3008_v38 = vmax.f32 %v2580_v48, %v2880_v11  ;;  %v2881_v40 = vmul.f32 0.01, %v2583_v31  ;;  %v2974_v29 = vmax.f32 %v2444_v21, %v2846_v63  ;;  %8698 = vmatpush3.bf16.msra.mxu0 %v8991_v26 }
 0x345   : > { %v2977_v42 = vmax.f32 %v2455_v27, %v2849_v30  ;;  %v3006_v46 = vmax.f32 %v2572_v28, %v2878_v61  ;;  %v2879_v45 = vmul.f32 0.01, %v2575_v34 }
 0x346   : > { %v2975_v0 = vmax.f32 %v2447_v41, %v2847_v37  ;;  %v8453_v49 = vpop.f32.mrb[104].mxu0  ;;  %v3009_v19 = vmax.f32 %v2583_v31, %v2881_v40 }
 0x347   : > { %v2468_v52 = vadd.f32 %v8453_v49, %v10100_v33  ;;  %v2459_v15 = vpop.f32.mrb[105].mxu0  ;;  %v3085_v53 = vpack.c.bf16 %v2977_v42, %v2976_v59  ;;  %v3007_v44 = vmax.f32 %v2575_v34, %v2879_v45  ;;  %v8485_v60 = vpop.f32.mrb[72].mxu1 }
 0x348   : > { %v2460_v13 = vadd.f32 %v10100_v33, %v2459_v15  ;;  %v8454_v50 = vpop.f32.mrb[106].mxu0  ;;  %v3084_v14 = vpack.c.bf16 %v2975_v0, %v2974_v29  ;;  %v2596_v62 = vadd.f32 %v8485_v60, %v10100_v33  ;;  %v2587_v25 = vpop.f32.mrb[73].mxu1  ;;  %v10157_v43 = vpack.c.bf16 %v3009_v19, %v3008_v38 }
 0x349   : > { %v2852_v56 = vmul.f32 0.01, %v2468_v52  ;;  %v2471_v20 = vadd.f32 %v8454_v50, %v10100_v33  ;;  %v2462_v55 = vpop.f32.mrb[107].mxu0  ;;  %v2588_v47 = vadd.f32 %v10100_v33, %v2587_v25  ;;  %v8486_v36 = vpop.f32.mrb[74].mxu1  ;;  %v10161_v6 = vpack.c.bf16 %v3007_v44, %v3006_v46 }
 0x34a   : > { %v2850_v16 = vmul.f32 0.01, %v2460_v13  ;;  %v2463_v9 = vadd.f32 %v10100_v33, %v2462_v55  ;;  %8591 = vmatprep.mubr.bf16.mxu1 %v3084_v14  ;;  %v2884_v58 = vmul.f32 0.01, %v2596_v62  ;;  %v2599_v12 = vadd.f32 %v8486_v36, %v10100_v33  ;;  %v2590_v57 = vpop.f32.mrb[75].mxu1 }
 0x34b   : > { %v2853_v4 = vmul.f32 0.01, %v2471_v20  ;;  %8592 = vmatmul.mubr.bf16.gmra.mrb[164].mxu1 %v3085_v53  ;;  %v2882_v10 = vmul.f32 0.01, %v2588_v47  ;;  %v2591_v22 = vadd.f32 %v10100_v33, %v2590_v57  ;;  %v2980_v48 = vmax.f32 %v2468_v52, %v2852_v56 }
 0x34c   : > { %v2851_v23 = vmul.f32 0.01, %v2463_v9  ;;  %v3012_v21 = vmax.f32 %v2596_v62, %v2884_v58  ;;  %v2885_v24 = vmul.f32 0.01, %v2599_v12  ;;  %v2978_v17 = vmax.f32 %v2460_v13, %v2850_v16 }
 0x34d   : > { %v2981_v39 = vmax.f32 %v2471_v20, %v2853_v4  ;;  %v3010_v18 = vmax.f32 %v2588_v47, %v2882_v10  ;;  %v2883_v27 = vmul.f32 0.01, %v2591_v22 }
 0x34e   : > { %v2979_v28 = vmax.f32 %v2463_v9, %v2851_v23  ;;  %v8457_v35 = vpop.f32.mrb[108].mxu0  ;;  %v3013_v63 = vmax.f32 %v2599_v12, %v2885_v24 }
 0x34f   : > { %v2484_v41 = vadd.f32 %v8457_v35, %v10100_v33  ;;  %v2475_v11 = vpop.f32.mrb[109].mxu0  ;;  %v3087_v31 = vpack.c.bf16 %v2981_v39, %v2980_v48  ;;  %v3011_v32 = vmax.f32 %v2591_v22, %v2883_v27  ;;  %v8489_v30 = vpop.f32.mrb[76].mxu1 }
 0x350   : > { %v2476_v61 = vadd.f32 %v10100_v33, %v2475_v11  ;;  %v8458_v34 = vpop.f32.mrb[110].mxu0  ;;  %v3086_v37 = vpack.c.bf16 %v2979_v28, %v2978_v17  ;;  %v2612_v38 = vadd.f32 %v8489_v30, %v10100_v33  ;;  %v2603_v40 = vpop.f32.mrb[77].mxu1  ;;  %v10169_v59 = vpack.c.bf16 %v3013_v63, %v3012_v21 }
 0x351   : > { %v2856_v42 = vmul.f32 0.01, %v2484_v41  ;;  %v2487_v46 = vadd.f32 %v8458_v34, %v10100_v33  ;;  %v2478_v45 = vpop.f32.mrb[111].mxu0  ;;  %v2604_v29 = vadd.f32 %v10100_v33, %v2603_v40  ;;  %v8490_v0 = vpop.f32.mrb[78].mxu1  ;;  %v10173_v49 = vpack.c.bf16 %v3011_v32, %v3010_v18 }
 0x352   : > { %v2854_v19 = vmul.f32 0.01, %v2476_v61  ;;  %v2479_v52 = vadd.f32 %v10100_v33, %v2478_v45  ;;  %8595 = vmatprep.mubr.bf16.mxu1 %v3086_v37  ;;  %v2888_v15 = vmul.f32 0.01, %v2612_v38  ;;  %v2615_v53 = vadd.f32 %v8490_v0, %v10100_v33  ;;  %v2606_v44 = vpop.f32.mrb[79].mxu1 }
 0x353   : > { %v2857_v60 = vmul.f32 0.01, %v2487_v46  ;;  %8596 = vmatmul.mubr.bf16.gmra.mrb[168].mxu1 %v3087_v31  ;;  %v2886_v13 = vmul.f32 0.01, %v2604_v29  ;;  %v2607_v50 = vadd.f32 %v10100_v33, %v2606_v44  ;;  %v2984_v56 = vmax.f32 %v2484_v41, %v2856_v42 }
 0x354   : > { %v2855_v14 = vmul.f32 0.01, %v2479_v52  ;;  %v3016_v62 = vmax.f32 %v2612_v38, %v2888_v15  ;;  %v2889_v25 = vmul.f32 0.01, %v2615_v53  ;;  %v2982_v36 = vmax.f32 %v2476_v61, %v2854_v19 }
 0x355   : > { %v2985_v20 = vmax.f32 %v2487_v46, %v2857_v60  ;;  %v3014_v55 = vmax.f32 %v2604_v29, %v2886_v13  ;;  %v2887_v47 = vmul.f32 0.01, %v2607_v50 }
 0x356   : > { %v2983_v16 = vmax.f32 %v2479_v52, %v2855_v14  ;;  %v8461_v9 = vpop.f32.mrb[112].mxu0  ;;  %v3017_v58 = vmax.f32 %v2615_v53, %v2889_v25 }
 0x357   : > { %v2500_v12 = vadd.f32 %v8461_v9, %v10100_v33  ;;  %v2491_v57 = vpop.f32.mrb[113].mxu0  ;;  %v3089_v4 = vpack.c.bf16 %v2985_v20, %v2984_v56  ;;  %v3015_v10 = vmax.f32 %v2607_v50, %v2887_v47  ;;  %v8493_v22 = vpop.f32.mrb[80].mxu1 }
 0x358   : > { %v2492_v23 = vadd.f32 %v10100_v33, %v2491_v57  ;;  %v8462_v21 = vpop.f32.mrb[114].mxu0  ;;  %v3088_v24 = vpack.c.bf16 %v2983_v16, %v2982_v36  ;;  %v2628_v26 = vadd.f32 %v8493_v22, %v10100_v33  ;;  %v2619_v48 = vpop.f32.mrb[81].mxu1  ;;  %v10181_v39 = vpack.c.bf16 %v3017_v58, %v3016_v62 }
 0x359   : > { %v2860_v18 = vmul.f32 0.01, %v2500_v12  ;;  %v2503_v27 = vadd.f32 %v8462_v21, %v10100_v33  ;;  %v2494_v17 = vpop.f32.mrb[115].mxu0  ;;  %v2620_v28 = vadd.f32 %v10100_v33, %v2619_v48  ;;  %v8494_v35 = vpop.f32.mrb[82].mxu1  ;;  %v10185_v63 = vpack.c.bf16 %v3015_v10, %v3014_v55 }
 0x35a   : > { %v2858_v41 = vmul.f32 0.01, %v2492_v23  ;;  %v2495_v11 = vadd.f32 %v10100_v33, %v2494_v17  ;;  %8599 = vmatprep.mubr.bf16.mxu1 %v3088_v24  ;;  %v2892_v31 = vmul.f32 0.01, %v2628_v26  ;;  %v2631_v32 = vadd.f32 %v8494_v35, %v10100_v33  ;;  %v2622_v30 = vpop.f32.mrb[83].mxu1 }
 0x35b   : > { %v2861_v61 = vmul.f32 0.01, %v2503_v27  ;;  %8600 = vmatmul.mubr.bf16.gmra.mrb[172].mxu1 %v3089_v4  ;;  %v2890_v34 = vmul.f32 0.01, %v2620_v28  ;;  %v2623_v37 = vadd.f32 %v10100_v33, %v2622_v30  ;;  %v2988_v46 = vmax.f32 %v2500_v12, %v2860_v18 }
 0x35c   : > { %v2859_v38 = vmul.f32 0.01, %v2495_v11  ;;  %v3020_v40 = vmax.f32 %v2628_v26, %v2892_v31  ;;  %v2893_v42 = vmul.f32 0.01, %v2631_v32  ;;  %v2986_v19 = vmax.f32 %v2492_v23, %v2858_v41 }
 0x35d   : > { %v2989_v45 = vmax.f32 %v2503_v27, %v2861_v61  ;;  %v3018_v29 = vmax.f32 %v2620_v28, %v2890_v34  ;;  %v2891_v0 = vmul.f32 0.01, %v2623_v37 }
 0x35e   : > { %v2987_v52 = vmax.f32 %v2495_v11, %v2859_v38  ;;  %v8465_v15 = vpop.f32.mrb[116].mxu0  ;;  %v3021_v53 = vmax.f32 %v2631_v32, %v2893_v42 }
 0x35f   : > { %v2516_v44 = vadd.f32 %v8465_v15, %v10100_v33  ;;  %v2507_v60 = vpop.f32.mrb[117].mxu0  ;;  %v3091_v13 = vpack.c.bf16 %v2989_v45, %v2988_v46  ;;  %v3019_v50 = vmax.f32 %v2623_v37, %v2891_v0  ;;  %v8497_v14 = vpop.f32.mrb[84].mxu1 }
 0x360   : > { %v2508_v62 = vadd.f32 %v10100_v33, %v2507_v60  ;;  %v8466_v25 = vpop.f32.mrb[118].mxu0  ;;  %v3090_v56 = vpack.c.bf16 %v2987_v52, %v2986_v19  ;;  %v2644_v20 = vadd.f32 %v8497_v14, %v10100_v33  ;;  %v2635_v55 = vpop.f32.mrb[85].mxu1  ;;  %v10193_v47 = vpack.c.bf16 %v3021_v53, %v3020_v40 }
 0x361   : > { %v2864_v36 = vmul.f32 0.01, %v2516_v44  ;;  %v2519_v16 = vadd.f32 %v8466_v25, %v10100_v33  ;;  %v2510_v9 = vpop.f32.mrb[119].mxu0  ;;  %v2636_v58 = vadd.f32 %v10100_v33, %v2635_v55  ;;  %v8498_v12 = vpop.f32.mrb[86].mxu1  ;;  %v10197_v57 = vpack.c.bf16 %v3019_v50, %v3018_v29 }
 0x362   : > { %v2862_v4 = vmul.f32 0.01, %v2508_v62  ;;  %v2511_v10 = vadd.f32 %v10100_v33, %v2510_v9  ;;  %8603 = vmatprep.mubr.bf16.mxu1 %v3090_v56  ;;  %v2896_v22 = vmul.f32 0.01, %v2644_v20  ;;  %v2647_v23 = vadd.f32 %v8498_v12, %v10100_v33  ;;  %v2638_v21 = vpop.f32.mrb[87].mxu1 }
 0x363   : > { %v2865_v24 = vmul.f32 0.01, %v2519_v16  ;;  %8604 = vmatmul.mubr.bf16.gmra.mrb[176].mxu1 %v3091_v13  ;;  %v2894_v26 = vmul.f32 0.01, %v2636_v58  ;;  %v2639_v48 = vadd.f32 %v10100_v33, %v2638_v21  ;;  %v2992_v28 = vmax.f32 %v2516_v44, %v2864_v36 }
 0x364   : > { %v2863_v18 = vmul.f32 0.01, %v2511_v10  ;;  %v3024_v27 = vmax.f32 %v2644_v20, %v2896_v22  ;;  %v2897_v17 = vmul.f32 0.01, %v2647_v23  ;;  %v2990_v31 = vmax.f32 %v2508_v62, %v2862_v4 }
 0x365   : > { %v2993_v35 = vmax.f32 %v2519_v16, %v2865_v24  ;;  %v3022_v41 = vmax.f32 %v2636_v58, %v2894_v26  ;;  %v2895_v11 = vmul.f32 0.01, %v2639_v48 }
 0x366   : > { %v2991_v32 = vmax.f32 %v2511_v10, %v2863_v18  ;;  %v8469_v30 = vpop.f32.mrb[120].mxu0  ;;  %v3025_v61 = vmax.f32 %v2647_v23, %v2897_v17 }
 0x367   : > { %v2532_v34 = vadd.f32 %v8469_v30, %v10100_v33  ;;  %v2523_v37 = vpop.f32.mrb[121].mxu0  ;;  %v3093_v38 = vpack.c.bf16 %v2993_v35, %v2992_v28  ;;  %v3023_v40 = vmax.f32 %v2639_v48, %v2895_v11  ;;  %v8501_v42 = vpop.f32.mrb[88].mxu1 }
 0x368   : > { %v2524_v46 = vadd.f32 %v10100_v33, %v2523_v37  ;;  %v8470_v45 = vpop.f32.mrb[122].mxu0  ;;  %v3092_v29 = vpack.c.bf16 %v2991_v32, %v2990_v31  ;;  %v2660_v0 = vadd.f32 %v8501_v42, %v10100_v33  ;;  %v2651_v19 = vpop.f32.mrb[89].mxu1  ;;  %v10205_v52 = vpack.c.bf16 %v3025_v61, %v3024_v27 }
 0x369   : > { %v2868_v15 = vmul.f32 0.01, %v2532_v34  ;;  %v2535_v53 = vadd.f32 %v8470_v45, %v10100_v33  ;;  %v2526_v44 = vpop.f32.mrb[123].mxu0  ;;  %v2652_v60 = vadd.f32 %v10100_v33, %v2651_v19  ;;  %v8502_v13 = vpop.f32.mrb[90].mxu1  ;;  %v10209_v50 = vpack.c.bf16 %v3023_v40, %v3022_v41 }
 0x36a   : > { %v2866_v14 = vmul.f32 0.01, %v2524_v46  ;;  %v2527_v62 = vadd.f32 %v10100_v33, %v2526_v44  ;;  %8607 = vmatprep.mubr.bf16.mxu1 %v3092_v29  ;;  %v2900_v25 = vmul.f32 0.01, %v2660_v0  ;;  %v2663_v56 = vadd.f32 %v8502_v13, %v10100_v33  ;;  %v2654_v20 = vpop.f32.mrb[91].mxu1 }
 0x36b   : > { %v2869_v55 = vmul.f32 0.01, %v2535_v53  ;;  %8608 = vmatmul.mubr.bf16.gmra.mrb[180].mxu1 %v3093_v38  ;;  %v2898_v36 = vmul.f32 0.01, %v2652_v60  ;;  %v2655_v16 = vadd.f32 %v10100_v33, %v2654_v20  ;;  %v2996_v4 = vmax.f32 %v2532_v34, %v2868_v15 }
 0x36c   : > { %v2867_v9 = vmul.f32 0.01, %v2527_v62  ;;  %v3028_v58 = vmax.f32 %v2660_v0, %v2900_v25  ;;  %v2901_v12 = vmul.f32 0.01, %v2663_v56  ;;  %v2994_v21 = vmax.f32 %v2524_v46, %v2866_v14 }
 0x36d   : > { %v2997_v10 = vmax.f32 %v2535_v53, %v2869_v55  ;;  %v3026_v22 = vmax.f32 %v2652_v60, %v2898_v36  ;;  %v2899_v23 = vmul.f32 0.01, %v2655_v16 }
 0x36e   : > { %v2995_v24 = vmax.f32 %v2527_v62, %v2867_v9  ;;  %v8473_v26 = vpop.f32.mrb[124].mxu0  ;;  %v3029_v48 = vmax.f32 %v2663_v56, %v2901_v12 }
 0x36f   : > { %v2548_v18 = vadd.f32 %v8473_v26, %v10100_v33  ;;  %v2539_v27 = vpop.f32.mrb[125].mxu0  ;;  %v3095_v17 = vpack.c.bf16 %v2997_v10, %v2996_v4  ;;  %v3027_v28 = vmax.f32 %v2655_v16, %v2899_v23  ;;  %v8505_v35 = vpop.f32.mrb[92].mxu1 }
 0x370   : > { %v2540_v41 = vadd.f32 %v10100_v33, %v2539_v27  ;;  %v8474_v11 = vpop.f32.mrb[126].mxu0  ;;  %v3094_v31 = vpack.c.bf16 %v2995_v24, %v2994_v21  ;;  %v2676_v32 = vadd.f32 %v8505_v35, %v10100_v33  ;;  %v2667_v30 = vpop.f32.mrb[93].mxu1  ;;  %v10217_v61 = vpack.c.bf16 %v3029_v48, %v3028_v58 }
 0x371   : > { %v2872_v34 = vmul.f32 0.01, %v2548_v18  ;;  %v2551_v37 = vadd.f32 %v8474_v11, %v10100_v33  ;;  %v2542_v38 = vpop.f32.mrb[127].mxu0  ;;  %v2668_v40 = vadd.f32 %v10100_v33, %v2667_v30  ;;  %v8506_v42 = vpop.f32.mrb[94].mxu1  ;;  %v10221_v46 = vpack.c.bf16 %v3027_v28, %v3026_v22 }
 0x372   : > { %v2870_v45 = vmul.f32 0.01, %v2540_v41  ;;  %v2543_v29 = vadd.f32 %v10100_v33, %v2542_v38  ;;  %8611 = vmatprep.mubr.bf16.mxu1 %v3094_v31  ;;  %v2904_v0 = vmul.f32 0.01, %v2676_v32  ;;  %v2679_v19 = vadd.f32 %v8506_v42, %v10100_v33  ;;  %v2670_v15 = vpop.f32.mrb[95].mxu1 }
 0x373   : > { %v2873_v53 = vmul.f32 0.01, %v2551_v37  ;;  %8612 = vmatmul.mubr.bf16.gmra.mrb[184].mxu1 %v3095_v17  ;;  %v2902_v44 = vmul.f32 0.01, %v2668_v40  ;;  %v2671_v60 = vadd.f32 %v10100_v33, %v2670_v15  ;;  %v3000_v25 = vmax.f32 %v2548_v18, %v2872_v34 }
 0x374   : > { %v2871_v13 = vmul.f32 0.01, %v2543_v29  ;;  %v3032_v14 = vmax.f32 %v2676_v32, %v2904_v0  ;;  %v2905_v62 = vmul.f32 0.01, %v2679_v19  ;;  %v2998_v36 = vmax.f32 %v2540_v41, %v2870_v45 }
 0x375   : > { %v3001_v56 = vmax.f32 %v2551_v37, %v2873_v53  ;;  %v3030_v20 = vmax.f32 %v2668_v40, %v2902_v44  ;;  %v2903_v55 = vmul.f32 0.01, %v2671_v60  ;;  %v10246_v44 = vld [vmem:[%s12119_s4] ss:$0 sm:$0xff] }
 0x376   : > { %v2999_v16 = vmax.f32 %v2543_v29, %v2871_v13  ;;  %v3033_v9 = vmax.f32 %v2679_v19, %v2905_v62 }
 0x377   : > { %v3097_v58 = vpack.c.bf16 %v3001_v56, %v3000_v25  ;;  %v3031_v12 = vmax.f32 %v2671_v60, %v2903_v55  ;;  %v8509_v4 = vpop.f32.mrb[96].mxu1 }
 0x378   : > { %v3096_v10 = vpack.c.bf16 %v2999_v16, %v2998_v36  ;;  %v2692_v22 = vadd.f32 %v8509_v4, %v10100_v33  ;;  %v2683_v23 = vpop.f32.mrb[97].mxu1  ;;  %v10227_v21 = vpack.c.bf16 %v3033_v9, %v3032_v14 }
 0x379   : > { %v2684_v24 = vadd.f32 %v10100_v33, %v2683_v23  ;;  %v8510_v26 = vpop.f32.mrb[98].mxu1  ;;  %v10230_v48 = vpack.c.bf16 %v3031_v12, %v3030_v20 }
 0x37a   : > { %8615 = vmatprep.mubr.bf16.mxu1 %v3096_v10  ;;  %v2908_v18 = vmul.f32 0.01, %v2692_v22  ;;  %v2695_v27 = vadd.f32 %v8510_v26, %v10100_v33  ;;  %v2686_v17 = vpop.f32.mrb[99].mxu1 }
 0x37b   : > { %8616 = vmatmul.mubr.bf16.gmra.mrb[188].mxu1 %v3097_v58  ;;  %v2906_v28 = vmul.f32 0.01, %v2684_v24  ;;  %v2687_v35 = vadd.f32 %v10100_v33, %v2686_v17 }
 0x37c   : > { %8619 = vmatprep.mubr.bf16.mxu1 %v10149_v54  ;;  %v3036_v41 = vmax.f32 %v2692_v22, %v2908_v18  ;;  %v2909_v11 = vmul.f32 0.01, %v2695_v27 }
 0x37d   : > { %v3034_v31 = vmax.f32 %v2684_v24, %v2906_v28  ;;  %v2907_v32 = vmul.f32 0.01, %v2687_v35 }
 0x37e   : > { %v3037_v30 = vmax.f32 %v2695_v27, %v2909_v11 }
 0x37f   : > { %v3035_v34 = vmax.f32 %v2687_v35, %v2907_v32  ;;  %v8513_v37 = vpop.f32.mrb[100].mxu1 }
 0x380   : > { %v2708_v38 = vadd.f32 %v8513_v37, %v10100_v33  ;;  %v2699_v40 = vpop.f32.mrb[101].mxu1  ;;  %v10236_v42 = vpack.c.bf16 %v3037_v30, %v3036_v41 }
 0x381   : > { %v2700_v45 = vadd.f32 %v10100_v33, %v2699_v40  ;;  %v8514_v29 = vpop.f32.mrb[102].mxu1  ;;  %v10239_v0 = vpack.c.bf16 %v3035_v34, %v3034_v31 }
 0x382   : > { %v2912_v19 = vmul.f32 0.01, %v2708_v38  ;;  %v2711_v54 = vadd.f32 %v8514_v29, %v10100_v33  ;;  %v2702_v15 = vpop.f32.mrb[103].mxu1 }
 0x383   : > { %8620 = vmatmul.mubr.bf16.gmra.mrb[192].mxu1 %v10145_v7  ;;  %v2910_v53 = vmul.f32 0.01, %v2700_v45  ;;  %v2703_v60 = vadd.f32 %v10246_v44, %v2702_v15 }
 0x384   : > { %8623 = vmatprep.mubr.bf16.mxu1 %v10161_v6  ;;  %v3040_v13 = vmax.f32 %v2708_v38, %v2912_v19  ;;  %v2913_v14 = vmul.f32 0.01, %v2711_v54 }
 0x385   : > { %v3038_v62 = vmax.f32 %v2700_v45, %v2910_v53  ;;  %v2911_v25 = vmul.f32 0.01, %v2703_v60 }
 0x386   : > { %v3041_v56 = vmax.f32 %v2711_v54, %v2913_v14 }
 0x387   : > { %v3039_v20 = vmax.f32 %v2703_v60, %v2911_v25  ;;  %v8517_v33 = vpop.f32.mrb[104].mxu1 }
 0x388   : > { %v2724_v55 = vadd.f32 %v10246_v44, %v8517_v33  ;;  %v2715_v7 = vpop.f32.mrb[105].mxu1  ;;  %v10251_v36 = vpack.c.bf16 %v3041_v56, %v3040_v13 }
 0x389   : > { %v2716_v16 = vadd.f32 %v10246_v44, %v2715_v7  ;;  %v8518_v9 = vpop.f32.mrb[106].mxu1  ;;  %v10254_v58 = vpack.c.bf16 %v3039_v20, %v3038_v62 }
 0x38a   : > { %v2916_v12 = vmul.f32 0.01, %v2724_v55  ;;  %v2727_v6 = vadd.f32 %v10246_v44, %v8518_v9  ;;  %v2718_v4 = vpop.f32.mrb[107].mxu1 }
 0x38b   : > { %8624 = vmatmul.mubr.bf16.gmra.mrb[196].mxu1 %v10157_v43  ;;  %v2914_v10 = vmul.f32 0.01, %v2716_v16  ;;  %v2719_v22 = vadd.f32 %v10246_v44, %v2718_v4  ;;  %v10280_v4 = vpop.permute.xlu1 %5604  ;;  %6010 = vbcast.lane.b32.xlu1 %v9867_v51, 264 }
 0x38c   : > { %8627 = vmatprep.mubr.bf16.mxu1 %v10173_v49  ;;  %v3044_v23 = vmax.f32 %v2724_v55, %v2916_v12  ;;  %v2917_v24 = vmul.f32 0.01, %v2727_v6 }
 0x38d   : > { %v3042_v26 = vmax.f32 %v2716_v16, %v2914_v10  ;;  %v2915_v18 = vmul.f32 0.01, %v2719_v22 }
 0x38e   : > { %v3045_v27 = vmax.f32 %v2727_v6, %v2917_v24 }
 0x38f   : > { %v3043_v17 = vmax.f32 %v2719_v22, %v2915_v18  ;;  %v8521_v28 = vpop.f32.mrb[108].mxu1 }
 0x390   : > { %v2740_v35 = vadd.f32 %v10246_v44, %v8521_v28  ;;  %v2731_v41 = vpop.f32.mrb[109].mxu1  ;;  %v10261_v11 = vpack.c.bf16 %v3045_v27, %v3044_v23 }
 0x391   : > { %v2732_v31 = vadd.f32 %v10246_v44, %v2731_v41  ;;  %v8522_v43 = vpop.f32.mrb[110].mxu1  ;;  %v10264_v32 = vpack.c.bf16 %v3043_v17, %v3042_v26  ;;  %v10286_v26 = vpop.permute.xlu0 %5608  ;;  %6022 = vbcast.lane.b32.xlu0 %v9867_v51, 288 }
 0x392   : > { %v2920_v30 = vmul.f32 0.01, %v2740_v35  ;;  %v2743_v49 = vadd.f32 %v10246_v44, %v8522_v43  ;;  %v2734_v34 = vpop.f32.mrb[111].mxu1  ;;  %v10293_v41 = vpop.permute.xlu1 %5612  ;;  %6018 = vbcast.lane.b32.xlu1 %v9867_v51, 280 }
 0x393   : > { %8628 = vmatmul.mubr.bf16.gmra.mrb[200].mxu1 %v10169_v59  ;;  %v2918_v37 = vmul.f32 0.01, %v2732_v31  ;;  %v2735_v38 = vadd.f32 %v10246_v44, %v2734_v34 }
 0x394   : > { %8631 = vmatprep.mubr.bf16.mxu1 %v10185_v63  ;;  %v3048_v40 = vmax.f32 %v2740_v35, %v2920_v30  ;;  %v2921_v45 = vmul.f32 0.01, %v2743_v49 }
 0x395   : > { %v3046_v29 = vmax.f32 %v2732_v31, %v2918_v37  ;;  %v2919_v19 = vmul.f32 0.01, %v2735_v38  ;;  %v10299_v34 = vpop.permute.xlu0 %5620  ;;  %6030 = vbcast.lane.b32.xlu0 %v9867_v51, 304 }
 0x396   : > { %v3049_v54 = vmax.f32 %v2743_v49, %v2921_v45  ;;  %v10302_v45 = vpop.permute.xlu1 %5616  ;;  %6026 = vbcast.lane.b32.xlu1 %v9867_v51, 296 }
 0x397   : > { %v3047_v15 = vmax.f32 %v2735_v38, %v2919_v19  ;;  %v8525_v53 = vpop.f32.mrb[112].mxu1 }
 0x398   : > { %v2756_v60 = vadd.f32 %v10246_v44, %v8525_v53  ;;  %v2747_v13 = vpop.f32.mrb[113].mxu1  ;;  %v10271_v14 = vpack.c.bf16 %v3049_v54, %v3048_v40 }
 0x399   : > { %v2748_v62 = vadd.f32 %v10246_v44, %v2747_v13  ;;  %v8526_v59 = vpop.f32.mrb[114].mxu1  ;;  %v10274_v25 = vpack.c.bf16 %v3047_v15, %v3046_v29 }
 0x39a   : > { %v2924_v56 = vmul.f32 0.01, %v2756_v60  ;;  %v2759_v63 = vadd.f32 %v10246_v44, %v8526_v59  ;;  %v2750_v20 = vpop.f32.mrb[115].mxu1 }
 0x39b   : > { %8632 = vmatmul.mubr.bf16.gmra.mrb[204].mxu1 %v10181_v39  ;;  %v2922_v33 = vmul.f32 0.01, %v2748_v62  ;;  %v2751_v55 = vadd.f32 %v10246_v44, %v2750_v20 }
 0x39c   : > { %8635 = vmatprep.mubr.bf16.mxu1 %v10197_v57  ;;  %v3052_v7 = vmax.f32 %v2756_v60, %v2924_v56  ;;  %v2925_v16 = vmul.f32 0.01, %v2759_v63 }
 0x39d   : > { %v3050_v9 = vmax.f32 %v2748_v62, %v2922_v33  ;;  %v2923_v12 = vmul.f32 0.01, %v2751_v55 }
 0x39e   : > { %v3053_v6 = vmax.f32 %v2759_v63, %v2925_v16  ;;  %v10315_v63 = vpop.permute.xlu1 %5624  ;;  %6034 = vbcast.lane.b32.xlu1 %v9867_v51, 312 }
 0x39f   : > { %v3051_v10 = vmax.f32 %v2751_v55, %v2923_v12  ;;  %v8529_v22 = vpop.f32.mrb[116].mxu1 }
 0x3a0   : > { %v2772_v23 = vadd.f32 %v10246_v44, %v8529_v22  ;;  %v2763_v24 = vpop.f32.mrb[117].mxu1  ;;  %v10284_v39 = vpack.c.bf16 %v3053_v6, %v3052_v7 }
 0x3a1   : > { %v2764_v57 = vadd.f32 %v10246_v44, %v2763_v24  ;;  %v8530_v18 = vpop.f32.mrb[118].mxu1  ;;  %v10290_v27 = vpack.c.bf16 %v3051_v10, %v3050_v9 }
 0x3a2   : > { %v2928_v17 = vmul.f32 0.01, %v2772_v23  ;;  %v2775_v28 = vadd.f32 %v10246_v44, %v8530_v18  ;;  %v2766_v35 = vpop.f32.mrb[119].mxu1  ;;  %v10324_v10 = vpop.permute.xlu1 %5632  ;;  %6042 = vbcast.lane.b32.xlu1 %v9867_v51, 328 }
 0x3a3   : > { %8636 = vmatmul.mubr.bf16.gmra.mrb[208].mxu1 %v10193_v47  ;;  %v2926_v31 = vmul.f32 0.01, %v2764_v57  ;;  %v2767_v43 = vadd.f32 %v10246_v44, %v2766_v35  ;;  %v6070_v35 = vsub.s32 7, %v9567_v1 }
 0x3a4   : > { %8639 = vmatprep.mubr.bf16.mxu1 %v10209_v50  ;;  %v3056_v30 = vmax.f32 %v2772_v23, %v2928_v17  ;;  %v2929_v49 = vmul.f32 0.01, %v2775_v28  ;;  %v10308_v50 = vpop.permute.xlu0 %5628  ;;  %6038 = vbcast.lane.b32.xlu0 %v9867_v51, 320 }
 0x3a5   : > { %v3054_v37 = vmax.f32 %v2764_v57, %v2926_v31  ;;  %v2927_v38 = vmul.f32 0.01, %v2767_v43 }
 0x3a6   : > { %v3057_v40 = vmax.f32 %v2775_v28, %v2929_v49  ;;  %v10338_v49 = vpop.permute.xlu1 %5640  ;;  %6050 = vbcast.lane.b32.xlu1 %v9867_v51, 344 }
 0x3a7   : > { %v3055_v29 = vmax.f32 %v2767_v43, %v2927_v38  ;;  %v8533_v47 = vpop.f32.mrb[120].mxu1 }
 0x3a8   : > { %v2788_v19 = vadd.f32 %v10246_v44, %v8533_v47  ;;  %v2779_v54 = vpop.f32.mrb[121].mxu1  ;;  %v10306_v15 = vpack.c.bf16 %v3057_v40, %v3056_v30  ;;  %v10321_v16 = vpop.permute.xlu0 %5636  ;;  %6046 = vbcast.lane.b32.xlu0 %v9867_v51, 336 }
 0x3a9   : > { %v2780_v53 = vadd.f32 %v10246_v44, %v2779_v54  ;;  %v8534_v60 = vpop.f32.mrb[122].mxu1  ;;  %v10312_v13 = vpack.c.bf16 %v3055_v29, %v3054_v37 }
 0x3aa   : > { %v2932_v62 = vmul.f32 0.01, %v2788_v19  ;;  %v2791_v59 = vadd.f32 %v10246_v44, %v8534_v60  ;;  %v2782_v56 = vpop.f32.mrb[123].mxu1 }
 0x3ab   : > { %8640 = vmatmul.mubr.bf16.gmra.mrb[212].mxu1 %v10205_v52  ;;  %v2930_v20 = vmul.f32 0.01, %v2780_v53  ;;  %v2783_v33 = vadd.f32 %v10246_v44, %v2782_v56 }
 0x3ac   : > { %8643 = vmatprep.mubr.bf16.mxu1 %v10221_v46  ;;  %v3060_v55 = vmax.f32 %v2788_v19, %v2932_v62  ;;  %v2933_v7 = vmul.f32 0.01, %v2791_v59  ;;  %v10330_v46 = vpop.permute.xlu0 %5644  ;;  %6054 = vbcast.lane.b32.xlu0 %v9867_v51, 352  ;;  %v10348_v62 = vpop.permute.xlu1 %5648 }
 0x3ad   : > { %v3058_v9 = vmax.f32 %v2780_v53, %v2930_v20  ;;  %v2931_v12 = vmul.f32 0.01, %v2783_v33  ;;  %v6071_v53 = vrot.slane %v9582_v8, %v6070_v35  ;;  %6058 = vbcast.lane.b32.xlu1 %v9867_v51, 360 }
 0x3ae   : > { %v3061_v6 = vmax.f32 %v2791_v59, %v2933_v7 }
 0x3af   : > { %v3059_v22 = vmax.f32 %v2783_v33, %v2931_v12  ;;  %v8537_v52 = vpop.f32.mrb[124].mxu1 }
 0x3b0   : > { %v2804_v23 = vadd.f32 %v10246_v44, %v8537_v52  ;;  %v2795_v24 = vpop.f32.mrb[125].mxu1  ;;  %v10328_v57 = vpack.c.bf16 %v3061_v6, %v3060_v55  ;;  %v10344_v47 = vpop.permute.xlu0 %5652  ;;  %6062 = vbcast.lane.b32.xlu0 %v9867_v51, 368 }
 0x3b1   : > { %v2796_v18 = vadd.f32 %v10246_v44, %v2795_v24  ;;  %v8538_v17 = vpop.f32.mrb[126].mxu1  ;;  %v10334_v28 = vpack.c.bf16 %v3059_v22, %v3058_v9  ;;  %v10357_v56 = vpop.permute.xlu1 %5656  ;;  %6066 = vbcast.lane.b32.xlu1 %v9867_v51, 376 }
 0x3b2   : > { %v2936_v31 = vmul.f32 0.01, %v2804_v23  ;;  %v2807_v43 = vadd.f32 %v10246_v44, %v8538_v17  ;;  %v2798_v30 = vpop.f32.mrb[127].mxu1 }
 0x3b3   : > { %8644 = vmatmul.mubr.bf16.gmra.mrb[216].mxu1 %v10217_v61  ;;  %v2934_v37 = vmul.f32 0.01, %v2796_v18  ;;  %v2799_v38 = vadd.f32 %v10246_v44, %v2798_v30 }
 0x3b4   : > { %8647 = vmatprep.mubr.bf16.mxu1 %v10230_v48  ;;  %v3064_v40 = vmax.f32 %v2804_v23, %v2936_v31  ;;  %v2937_v29 = vmul.f32 0.01, %v2807_v43  ;;  %v10353_v44 = vpop.permute.xlu0 %5660  ;;  %6073 = vbcast.lane.b32.xlu0 %v6071_v53, 256 }
 0x3b5   : > { %v3062_v19 = vmax.f32 %v2796_v18, %v2934_v37  ;;  %v2935_v54 = vmul.f32 0.01, %v2799_v38  ;;  %v10364_v20 = vpop.permute.xlu1 %5664  ;;  %6077 = vbcast.lane.b32.xlu1 %v6071_v53, 264 }
 0x3b6   : > { %v3065_v60 = vmax.f32 %v2807_v43, %v2937_v29 }
 0x3b7   : > { %v3063_v61 = vmax.f32 %v2799_v38, %v2935_v54 }
 0x3b8   : > { %v10351_v59 = vpack.c.bf16 %v3065_v60, %v3064_v40  ;;  %v10362_v8 = vpop.permute.xlu0 %5671  ;;  %6081 = vbcast.lane.b32.xlu0 %v6071_v53, 272 }
 0x3b9   : > { %v10355_v48 = vpack.c.bf16 %v3063_v61, %v3062_v19  ;;  %v10368_v55 = vpop.permute.xlu1 %5675  ;;  %6085 = vbcast.lane.b32.xlu1 %v6071_v53, 280 }
 0x3bb   : > { %8648 = vmatmul.mubr.bf16.gmra.mrb[220].mxu1 %v10227_v21 }
 0x3bc   : > { %8651 = vmatprep.mubr.bf16.mxu1 %v10239_v0  ;;  %v10366_v33 = vpop.permute.xlu0 %5679  ;;  %6089 = vbcast.lane.b32.xlu0 %v6071_v53, 288 }
 0x3bd   : > { %v10374_v21 = vpop.permute.xlu1 %5683  ;;  %6093 = vbcast.lane.b32.xlu1 %v6071_v53, 296 }
 0x3c0   : > { %v10372_v51 = vpop.permute.xlu0 %5687  ;;  %6097 = vbcast.lane.b32.xlu0 %v6071_v53, 304 }
 0x3c1   : > { %v10378_v7 = vpop.permute.xlu1 %5691  ;;  %6101 = vbcast.lane.b32.xlu1 %v6071_v53, 312 }
 0x3c3   : > { %8652 = vmatmul.mubr.bf16.gmra.mrb[224].mxu1 %v10236_v42 }
 0x3c4   : > { %8655 = vmatprep.mubr.bf16.mxu1 %v10254_v58  ;;  %v10376_v0 = vpop.permute.xlu0 %5695  ;;  %6105 = vbcast.lane.b32.xlu0 %v6071_v53, 320 }
 0x3c5   : > { %v10384_v42 = vpop.permute.xlu1 %5699  ;;  %6109 = vbcast.lane.b32.xlu1 %v6071_v53, 328 }
 0x3c8   : > { %v10382_v9 = vpop.permute.xlu0 %5703  ;;  %6113 = vbcast.lane.b32.xlu0 %v6071_v53, 336 }
 0x3c9   : > { %v10388_v12 = vpop.permute.xlu1 %5707  ;;  %6117 = vbcast.lane.b32.xlu1 %v6071_v53, 344 }
 0x3ca   : > { %12172 = vst [vmem:[#allocation23_spill] sm:$0xff] %v10388_v12 }
 0x3cb   : > { %8656 = vmatmul.mubr.bf16.gmra.mrb[228].mxu1 %v10251_v36  ;;  %v10395_v36 = vld [vmem:[%s12173_s27] ss:$0 sm:$0xff] }
 0x3cc   : > { %8659 = vmatprep.mubr.bf16.mxu1 %v10264_v32  ;;  %v10386_v58 = vpop.permute.xlu0 %5711  ;;  %6121 = vbcast.lane.b32.xlu0 %v6071_v53, 352 }
 0x3cd   : > { %v10399_v22 = vpop.permute.xlu1 %5715  ;;  %6125 = vbcast.lane.b32.xlu1 %v6071_v53, 360 }
 0x3ce   : > { %12175 = vst [vmem:[#allocation25_spill] sm:$0xff] %v10399_v22 }
 0x3d0   : > { %v10397_v32 = vpop.permute.xlu0 %5719  ;;  %6129 = vbcast.lane.b32.xlu0 %v6071_v53, 368 }
 0x3d1   : > { %12174 = vst [vmem:[#allocation24_spill] sm:$0xff] %v10397_v32  ;;  %v10405_v43 = vpop.permute.xlu1 %5723  ;;  %6133 = vbcast.lane.b32.xlu1 %v6071_v53, 376 }
 0x3d2   : > { %12176 = vst [vmem:[#allocation26_spill] sm:$0xff] %v10405_v43 }
 0x3d3   : > { %8660 = vmatmul.mubr.bf16.gmra.mrb[232].mxu1 %v10261_v11 }
 0x3d4   : > { %8663 = vmatprep.mubr.bf16.mxu1 %v10274_v25 }
 0x3d6   : > { %v8557_v6 = vpop.f32.mrb[128].mxu1 }
 0x3d7   : > { %v3244_v52 = vadd.f32 %v8557_v6, %v10395_v36  ;;  %v3235_v23 = vpop.f32.mrb[129].mxu1 }
 0x3d8   : > { %v3236_v24 = vadd.f32 %v10395_v36, %v3235_v23  ;;  %v8558_v11 = vpop.f32.mrb[130].mxu1 }
 0x3d9   : > { %v3748_v18 = vmul.f32 0.01, %v3244_v52  ;;  %v3247_v25 = vadd.f32 %v8558_v11, %v10395_v36  ;;  %v3238_v17 = vpop.f32.mrb[131].mxu1 }
 0x3da   : > { %v3746_v35 = vmul.f32 0.01, %v3236_v24  ;;  %v3239_v31 = vadd.f32 %v10395_v36, %v3238_v17 }
 0x3db   : > { %v3749_v30 = vmul.f32 0.01, %v3247_v25  ;;  %8664 = vmatmul.mubr.bf16.gmra.mrb[236].mxu1 %v10271_v14  ;;  %v3876_v38 = vmax.f32 %v3244_v52, %v3748_v18 }
 0x3dc   : > { %v3747_v37 = vmul.f32 0.01, %v3239_v31  ;;  %8667 = vmatprep.mubr.bf16.mxu1 %v10290_v27  ;;  %v3874_v29 = vmax.f32 %v3236_v24, %v3746_v35 }
 0x3dd   : > { %v3877_v40 = vmax.f32 %v3247_v25, %v3749_v30 }
 0x3de   : > { %v3875_v19 = vmax.f32 %v3239_v31, %v3747_v37  ;;  %v8561_v54 = vpop.f32.mrb[132].mxu1 }
 0x3df   : > { %v4003_v60 = vpack.c.bf16 %v3877_v40, %v3876_v38  ;;  %v3260_v61 = vadd.f32 %v8561_v54, %v10395_v36  ;;  %v3251_v6 = vpop.f32.mrb[133].mxu1 }
 0x3e0   : > { %v3252_v23 = vadd.f32 %v10395_v36, %v3251_v6  ;;  %v8562_v11 = vpop.f32.mrb[134].mxu1  ;;  %v4002_v17 = vpack.c.bf16 %v3875_v19, %v3874_v29 }
 0x3e1   : > { %v3752_v53 = vmul.f32 0.01, %v3260_v61  ;;  %v3263_v5 = vadd.f32 %v8562_v11, %v10395_v36  ;;  %v3254_v14 = vpop.f32.mrb[135].mxu1 }
 0x3e2   : > { %v3750_v1 = vmul.f32 0.01, %v3252_v23  ;;  %v3255_v27 = vadd.f32 %v10395_v36, %v3254_v14  ;;  %8699 = vmatprep.mubr.bf16.mxu0 %v4002_v17 }
 0x3e3   : > { %v3753_v52 = vmul.f32 0.01, %v3263_v5  ;;  %8668 = vmatmul.mubr.bf16.gmra.mrb[240].mxu1 %v10284_v39  ;;  %8700 = vmatmul.mubr.bf16.vlgmr.msra.gmra.mrb[128].mxu0 %v4003_v60  ;;  %v3880_v18 = vmax.f32 %v3260_v61, %v3752_v53 }
 0x3e4   : > { %v3751_v24 = vmul.f32 0.01, %v3255_v27  ;;  %8671 = vmatprep.mubr.bf16.mxu1 %v10312_v13  ;;  %v3878_v35 = vmax.f32 %v3252_v23, %v3750_v1 }
 0x3e5   : > { %v3881_v25 = vmax.f32 %v3263_v5, %v3753_v52 }
 0x3e6   : > { %v3879_v31 = vmax.f32 %v3255_v27, %v3751_v24  ;;  %v8565_v30 = vpop.f32.mrb[136].mxu1 }
 0x3e7   : > { %v3276_v37 = vadd.f32 %v8565_v30, %v10395_v36  ;;  %v3267_v38 = vpop.f32.mrb[137].mxu1  ;;  %v4005_v40 = vpack.c.bf16 %v3881_v25, %v3880_v18 }
 0x3e8   : > { %v3268_v29 = vadd.f32 %v10395_v36, %v3267_v38  ;;  %v8566_v19 = vpop.f32.mrb[138].mxu1  ;;  %v4004_v54 = vpack.c.bf16 %v3879_v31, %v3878_v35 }
 0x3e9   : > { %v3756_v6 = vmul.f32 0.01, %v3276_v37  ;;  %v3279_v39 = vadd.f32 %v8566_v19, %v10395_v36  ;;  %v3270_v60 = vpop.f32.mrb[139].mxu1 }
 0x3ea   : > { %v3754_v11 = vmul.f32 0.01, %v3268_v29  ;;  %v3271_v13 = vadd.f32 %v10395_v36, %v3270_v60  ;;  %8703 = vmatprep.mubr.bf16.mxu0 %v4004_v54 }
 0x3eb   : > { %v3757_v5 = vmul.f32 0.01, %v3279_v39  ;;  %8672 = vmatmul.mubr.bf16.gmra.mrb[244].mxu1 %v10306_v15  ;;  %8704 = vmatmul.mubr.bf16.gmra.mrb[132].mxu0 %v4005_v40  ;;  %v3884_v61 = vmax.f32 %v3276_v37, %v3756_v6 }
 0x3ec   : > { %v3755_v1 = vmul.f32 0.01, %v3271_v13  ;;  %8675 = vmatprep.mubr.bf16.mxu1 %v10334_v28  ;;  %v3882_v17 = vmax.f32 %v3268_v29, %v3754_v11 }
 0x3ed   : > { %v3885_v23 = vmax.f32 %v3279_v39, %v3757_v5 }
 0x3ee   : > { %v3883_v53 = vmax.f32 %v3271_v13, %v3755_v1  ;;  %v8569_v14 = vpop.f32.mrb[140].mxu1 }
 0x3ef   : > { %v3292_v27 = vadd.f32 %v8569_v14, %v10395_v36  ;;  %v3283_v52 = vpop.f32.mrb[141].mxu1  ;;  %v4007_v24 = vpack.c.bf16 %v3885_v23, %v3884_v61 }
 0x3f0   : > { %v3284_v18 = vadd.f32 %v10395_v36, %v3283_v52  ;;  %v8570_v25 = vpop.f32.mrb[142].mxu1  ;;  %v4006_v35 = vpack.c.bf16 %v3883_v53, %v3882_v17 }
 0x3f1   : > { %v3760_v31 = vmul.f32 0.01, %v3292_v27  ;;  %v3295_v15 = vadd.f32 %v8570_v25, %v10395_v36  ;;  %v3286_v30 = vpop.f32.mrb[143].mxu1 }
 0x3f2   : > { %v3758_v38 = vmul.f32 0.01, %v3284_v18  ;;  %v3287_v28 = vadd.f32 %v10395_v36, %v3286_v30  ;;  %8707 = vmatprep.mubr.bf16.mxu0 %v4006_v35 }
 0x3f3   : > { %v3761_v37 = vmul.f32 0.01, %v3295_v15  ;;  %8676 = vmatmul.mubr.bf16.gmra.mrb[248].mxu1 %v10328_v57  ;;  %8708 = vmatmul.mubr.bf16.gmra.mrb[136].mxu0 %v4007_v24  ;;  %v3888_v29 = vmax.f32 %v3292_v27, %v3760_v31 }
 0x3f4   : > { %v3759_v40 = vmul.f32 0.01, %v3287_v28  ;;  %8679 = vmatprep.mubr.bf16.mxu1 %v10355_v48  ;;  %v3886_v54 = vmax.f32 %v3284_v18, %v3758_v38 }
 0x3f5   : > { %v3889_v19 = vmax.f32 %v3295_v15, %v3761_v37 }
 0x3f6   : > { %v3887_v6 = vmax.f32 %v3287_v28, %v3759_v40  ;;  %v8573_v39 = vpop.f32.mrb[144].mxu1 }
 0x3f7   : > { %v3308_v60 = vadd.f32 %v8573_v39, %v10395_v36  ;;  %v3299_v11 = vpop.f32.mrb[145].mxu1  ;;  %v4009_v13 = vpack.c.bf16 %v3889_v19, %v3888_v29 }
 0x3f8   : > { %v3300_v5 = vadd.f32 %v10395_v36, %v3299_v11  ;;  %v8574_v1 = vpop.f32.mrb[146].mxu1  ;;  %v4008_v61 = vpack.c.bf16 %v3887_v6, %v3886_v54 }
 0x3f9   : > { %v3764_v23 = vmul.f32 0.01, %v3308_v60  ;;  %v3311_v57 = vadd.f32 %v8574_v1, %v10395_v36  ;;  %v3302_v17 = vpop.f32.mrb[147].mxu1 }
 0x3fa   : > { %v3762_v53 = vmul.f32 0.01, %v3300_v5  ;;  %v3303_v48 = vadd.f32 %v10395_v36, %v3302_v17  ;;  %8711 = vmatprep.mubr.bf16.mxu0 %v4008_v61 }
 0x3fb   : > { %v3765_v14 = vmul.f32 0.01, %v3311_v57  ;;  %8680 = vmatmul.mubr.bf16.gmra.mrb[252].mxu1 %v10351_v59  ;;  %8712 = vmatmul.mubr.bf16.gmra.mrb[140].mxu0 %v4009_v13  ;;  %v3892_v52 = vmax.f32 %v3308_v60, %v3764_v23 }
 0x3fc   : > { %v3763_v27 = vmul.f32 0.01, %v3303_v48  ;;  %v3890_v18 = vmax.f32 %v3300_v5, %v3762_v53 }
 0x3fd   : > { %v3893_v24 = vmax.f32 %v3311_v57, %v3765_v14 }
 0x3fe   : > { %v3891_v25 = vmax.f32 %v3303_v48, %v3763_v27  ;;  %v8577_v35 = vpop.f32.mrb[148].mxu1 }
 0x3ff   : > { %v3324_v31 = vadd.f32 %v8577_v35, %v10395_v36  ;;  %v3315_v15 = vpop.f32.mrb[149].mxu1  ;;  %v4011_v30 = vpack.c.bf16 %v3893_v24, %v3892_v52 }
 0x400   : > { %v3316_v38 = vadd.f32 %v10395_v36, %v3315_v15  ;;  %v8578_v28 = vpop.f32.mrb[150].mxu1  ;;  %v4010_v37 = vpack.c.bf16 %v3891_v25, %v3890_v18 }
 0x401   : > { %v3768_v40 = vmul.f32 0.01, %v3324_v31  ;;  %v3327_v29 = vadd.f32 %v8578_v28, %v10395_v36  ;;  %v3318_v19 = vpop.f32.mrb[151].mxu1 }
 0x402   : > { %v3766_v59 = vmul.f32 0.01, %v3316_v38  ;;  %v3319_v54 = vadd.f32 %v10395_v36, %v3318_v19  ;;  %8715 = vmatprep.mubr.bf16.mxu0 %v4010_v37 }
 0x403   : > { %v3769_v6 = vmul.f32 0.01, %v3327_v29  ;;  %8716 = vmatmul.mubr.bf16.gmra.mrb[144].mxu0 %v4011_v30  ;;  %v3896_v60 = vmax.f32 %v3324_v31, %v3768_v40 }
 0x404   : > { %v3767_v39 = vmul.f32 0.01, %v3319_v54  ;;  %v3894_v13 = vmax.f32 %v3316_v38, %v3766_v59 }
 0x405   : > { %v3897_v11 = vmax.f32 %v3327_v29, %v3769_v6 }
 0x406   : > { %v3895_v5 = vmax.f32 %v3319_v54, %v3767_v39  ;;  %v8581_v1 = vpop.f32.mrb[152].mxu1 }
 0x407   : > { %v3340_v61 = vadd.f32 %v8581_v1, %v10395_v36  ;;  %v3331_v23 = vpop.f32.mrb[153].mxu1  ;;  %v4013_v57 = vpack.c.bf16 %v3897_v11, %v3896_v60 }
 0x408   : > { %v3332_v17 = vadd.f32 %v10395_v36, %v3331_v23  ;;  %v8582_v53 = vpop.f32.mrb[154].mxu1  ;;  %v4012_v48 = vpack.c.bf16 %v3895_v5, %v3894_v13 }
 0x409   : > { %v3772_v14 = vmul.f32 0.01, %v3340_v61  ;;  %v3343_v27 = vadd.f32 %v8582_v53, %v10395_v36  ;;  %v3334_v52 = vpop.f32.mrb[155].mxu1 }
 0x40a   : > { %v3770_v24 = vmul.f32 0.01, %v3332_v17  ;;  %v3335_v18 = vadd.f32 %v10395_v36, %v3334_v52  ;;  %8719 = vmatprep.mubr.bf16.mxu0 %v4012_v48 }
 0x40b   : > { %v3773_v25 = vmul.f32 0.01, %v3343_v27  ;;  %8720 = vmatmul.mubr.bf16.gmra.mrb[148].mxu0 %v4013_v57  ;;  %v3900_v31 = vmax.f32 %v3340_v61, %v3772_v14 }
 0x40c   : > { %v3771_v35 = vmul.f32 0.01, %v3335_v18  ;;  %v3898_v30 = vmax.f32 %v3332_v17, %v3770_v24 }
 0x40d   : > { %v3901_v15 = vmax.f32 %v3343_v27, %v3773_v25 }
 0x40e   : > { %v3899_v38 = vmax.f32 %v3335_v18, %v3771_v35  ;;  %v8585_v28 = vpop.f32.mrb[156].mxu1 }
 0x40f   : > { %v3356_v37 = vadd.f32 %v8585_v28, %v10395_v36  ;;  %v3347_v40 = vpop.f32.mrb[157].mxu1  ;;  %v4015_v29 = vpack.c.bf16 %v3901_v15, %v3900_v31 }
 0x410   : > { %v3348_v19 = vadd.f32 %v10395_v36, %v3347_v40  ;;  %v8586_v59 = vpop.f32.mrb[158].mxu1  ;;  %v4014_v54 = vpack.c.bf16 %v3899_v38, %v3898_v30 }
 0x411   : > { %v3776_v6 = vmul.f32 0.01, %v3356_v37  ;;  %v3359_v39 = vadd.f32 %v8586_v59, %v10395_v36  ;;  %v3350_v60 = vpop.f32.mrb[159].mxu1 }
 0x412   : > { %v3774_v11 = vmul.f32 0.01, %v3348_v19  ;;  %v3351_v13 = vadd.f32 %v10395_v36, %v3350_v60  ;;  %8723 = vmatprep.mubr.bf16.mxu0 %v4014_v54 }
 0x413   : > { %v3777_v5 = vmul.f32 0.01, %v3359_v39  ;;  %8724 = vmatmul.mubr.bf16.gmra.mrb[152].mxu0 %v4015_v29  ;;  %v3904_v61 = vmax.f32 %v3356_v37, %v3776_v6 }
 0x414   : > { %v3775_v1 = vmul.f32 0.01, %v3351_v13  ;;  %v3902_v57 = vmax.f32 %v3348_v19, %v3774_v11 }
 0x415   : > { %v3905_v23 = vmax.f32 %v3359_v39, %v3777_v5 }
 0x416   : > { %v3903_v17 = vmax.f32 %v3351_v13, %v3775_v1  ;;  %v8589_v53 = vpop.f32.mrb[160].mxu1 }
 0x417   : > { %v3372_v48 = vadd.f32 %v8589_v53, %v10395_v36  ;;  %v3363_v14 = vpop.f32.mrb[161].mxu1  ;;  %v4017_v27 = vpack.c.bf16 %v3905_v23, %v3904_v61 }
 0x418   : > { %v3364_v52 = vadd.f32 %v10395_v36, %v3363_v14  ;;  %v8590_v24 = vpop.f32.mrb[162].mxu1  ;;  %v4016_v18 = vpack.c.bf16 %v3903_v17, %v3902_v57 }
 0x419   : > { %v3780_v25 = vmul.f32 0.01, %v3372_v48  ;;  %v3375_v35 = vadd.f32 %v8590_v24, %v10395_v36  ;;  %v3366_v31 = vpop.f32.mrb[163].mxu1 }
 0x41a   : > { %v3778_v15 = vmul.f32 0.01, %v3364_v52  ;;  %v3367_v30 = vadd.f32 %v10395_v36, %v3366_v31  ;;  %8727 = vmatprep.mubr.bf16.mxu0 %v4016_v18 }
 0x41b   : > { %v3781_v38 = vmul.f32 0.01, %v3375_v35  ;;  %8728 = vmatmul.mubr.bf16.gmra.mrb[156].mxu0 %v4017_v27  ;;  %v3908_v37 = vmax.f32 %v3372_v48, %v3780_v25 }
 0x41c   : > { %v3779_v28 = vmul.f32 0.01, %v3367_v30  ;;  %v3906_v29 = vmax.f32 %v3364_v52, %v3778_v15 }
 0x41d   : > { %v3909_v40 = vmax.f32 %v3375_v35, %v3781_v38 }
 0x41e   : > { %v3907_v19 = vmax.f32 %v3367_v30, %v3779_v28  ;;  %v8593_v59 = vpop.f32.mrb[164].mxu1 }
 0x41f   : > { %v3388_v54 = vadd.f32 %v8593_v59, %v10395_v36  ;;  %v3379_v6 = vpop.f32.mrb[165].mxu1  ;;  %v4019_v39 = vpack.c.bf16 %v3909_v40, %v3908_v37 }
 0x420   : > { %v3380_v60 = vadd.f32 %v10395_v36, %v3379_v6  ;;  %v8594_v11 = vpop.f32.mrb[166].mxu1  ;;  %v4018_v13 = vpack.c.bf16 %v3907_v19, %v3906_v29 }
 0x421   : > { %v3784_v5 = vmul.f32 0.01, %v3388_v54  ;;  %v3391_v1 = vadd.f32 %v8594_v11, %v10395_v36  ;;  %v3382_v61 = vpop.f32.mrb[167].mxu1 }
 0x422   : > { %v3782_v23 = vmul.f32 0.01, %v3380_v60  ;;  %v3383_v57 = vadd.f32 %v10395_v36, %v3382_v61  ;;  %8731 = vmatprep.mubr.bf16.mxu0 %v4018_v13 }
 0x423   : > { %v3785_v17 = vmul.f32 0.01, %v3391_v1  ;;  %8732 = vmatmul.mubr.bf16.gmra.mrb[160].mxu0 %v4019_v39  ;;  %v3912_v48 = vmax.f32 %v3388_v54, %v3784_v5 }
 0x424   : > { %v3783_v53 = vmul.f32 0.01, %v3383_v57  ;;  %v3910_v27 = vmax.f32 %v3380_v60, %v3782_v23 }
 0x425   : > { %v3913_v14 = vmax.f32 %v3391_v1, %v3785_v17 }
 0x426   : > { %v3911_v52 = vmax.f32 %v3383_v57, %v3783_v53  ;;  %v8597_v24 = vpop.f32.mrb[168].mxu1 }
 0x427   : > { %v3404_v18 = vadd.f32 %v8597_v24, %v10395_v36  ;;  %v3395_v25 = vpop.f32.mrb[169].mxu1  ;;  %v4021_v35 = vpack.c.bf16 %v3913_v14, %v3912_v48 }
 0x428   : > { %v3396_v31 = vadd.f32 %v10395_v36, %v3395_v25  ;;  %v8598_v15 = vpop.f32.mrb[170].mxu1  ;;  %v4020_v30 = vpack.c.bf16 %v3911_v52, %v3910_v27 }
 0x429   : > { %v3788_v38 = vmul.f32 0.01, %v3404_v18  ;;  %v3407_v28 = vadd.f32 %v8598_v15, %v10395_v36  ;;  %v3398_v37 = vpop.f32.mrb[171].mxu1 }
 0x42a   : > { %v3786_v40 = vmul.f32 0.01, %v3396_v31  ;;  %v3399_v29 = vadd.f32 %v10395_v36, %v3398_v37  ;;  %8735 = vmatprep.mubr.bf16.mxu0 %v4020_v30 }
 0x42b   : > { %v3789_v19 = vmul.f32 0.01, %v3407_v28  ;;  %8736 = vmatmul.mubr.bf16.gmra.mrb[164].mxu0 %v4021_v35  ;;  %v3916_v54 = vmax.f32 %v3404_v18, %v3788_v38 }
 0x42c   : > { %v3787_v59 = vmul.f32 0.01, %v3399_v29  ;;  %v3914_v39 = vmax.f32 %v3396_v31, %v3786_v40 }
 0x42d   : > { %v3917_v6 = vmax.f32 %v3407_v28, %v3789_v19 }
 0x42e   : > { %v3915_v60 = vmax.f32 %v3399_v29, %v3787_v59  ;;  %v8601_v11 = vpop.f32.mrb[172].mxu1 }
 0x42f   : > { %v3420_v13 = vadd.f32 %v8601_v11, %v10395_v36  ;;  %v3411_v5 = vpop.f32.mrb[173].mxu1  ;;  %v4023_v1 = vpack.c.bf16 %v3917_v6, %v3916_v54 }
 0x430   : > { %v3412_v61 = vadd.f32 %v10395_v36, %v3411_v5  ;;  %v8602_v23 = vpop.f32.mrb[174].mxu1  ;;  %v4022_v57 = vpack.c.bf16 %v3915_v60, %v3914_v39 }
 0x431   : > { %v3792_v17 = vmul.f32 0.01, %v3420_v13  ;;  %v3423_v53 = vadd.f32 %v8602_v23, %v10395_v36  ;;  %v3414_v48 = vpop.f32.mrb[175].mxu1 }
 0x432   : > { %v3790_v14 = vmul.f32 0.01, %v3412_v61  ;;  %v3415_v27 = vadd.f32 %v10395_v36, %v3414_v48  ;;  %8739 = vmatprep.mubr.bf16.mxu0 %v4022_v57 }
 0x433   : > { %v3793_v52 = vmul.f32 0.01, %v3423_v53  ;;  %8740 = vmatmul.mubr.bf16.gmra.mrb[168].mxu0 %v4023_v1  ;;  %v3920_v18 = vmax.f32 %v3420_v13, %v3792_v17  ;;  %v10464_v13 = vpop.permute.xlu0 %5727 }
 0x434   : > { %v3791_v24 = vmul.f32 0.01, %v3415_v27  ;;  %v3918_v35 = vmax.f32 %v3412_v61, %v3790_v14  ;;  %12177 = vst [vmem:[#allocation27_spill] sm:$0xff] %v10464_v13  ;;  %v10466_v61 = vpop.permute.xlu1 %5731 }
 0x435   : > { %v3921_v25 = vmax.f32 %v3423_v53, %v3793_v52  ;;  %12178 = vst [vmem:[#allocation28_spill] sm:$0xff] %v10466_v61 }
 0x436   : > { %v3919_v31 = vmax.f32 %v3415_v27, %v3791_v24  ;;  %v8605_v15 = vpop.f32.mrb[176].mxu1 }
 0x437   : > { %v3436_v30 = vadd.f32 %v8605_v15, %v10395_v36  ;;  %v3427_v38 = vpop.f32.mrb[177].mxu1  ;;  %v4025_v28 = vpack.c.bf16 %v3921_v25, %v3920_v18 }
 0x438   : > { %v3428_v37 = vadd.f32 %v10395_v36, %v3427_v38  ;;  %v8606_v40 = vpop.f32.mrb[178].mxu1  ;;  %v4024_v29 = vpack.c.bf16 %v3919_v31, %v3918_v35 }
 0x439   : > { %v3796_v19 = vmul.f32 0.01, %v3436_v30  ;;  %v3439_v59 = vadd.f32 %v8606_v40, %v10395_v36  ;;  %v3430_v54 = vpop.f32.mrb[179].mxu1 }
 0x43a   : > { %v3794_v6 = vmul.f32 0.01, %v3428_v37  ;;  %v3431_v39 = vadd.f32 %v10395_v36, %v3430_v54  ;;  %8743 = vmatprep.mubr.bf16.mxu0 %v4024_v29 }
 0x43b   : > { %v3797_v60 = vmul.f32 0.01, %v3439_v59  ;;  %8744 = vmatmul.mubr.bf16.gmra.mrb[172].mxu0 %v4025_v28  ;;  %v3924_v5 = vmax.f32 %v3436_v30, %v3796_v19  ;;  %v10472_v30 = vpop.permute.xlu0 %5738  ;;  %v10474_v28 = vpop.permute.xlu1 %5742 }
 0x43c   : > { %v3795_v11 = vmul.f32 0.01, %v3431_v39  ;;  %v3922_v23 = vmax.f32 %v3428_v37, %v3794_v6  ;;  %12179 = vst [vmem:[#allocation29_spill] sm:$0xff] %v10472_v30  ;;  %12180 = vst [vmem:[#allocation30_spill] sm:$0xff] %v10474_v28 }
 0x43d   : > { %v3925_v1 = vmax.f32 %v3439_v59, %v3797_v60 }
 0x43e   : > { %v3923_v57 = vmax.f32 %v3431_v39, %v3795_v11  ;;  %v8609_v17 = vpop.f32.mrb[180].mxu1 }
 0x43f   : > { %v3452_v53 = vadd.f32 %v8609_v17, %v10395_v36  ;;  %v3443_v48 = vpop.f32.mrb[181].mxu1  ;;  %v4027_v14 = vpack.c.bf16 %v3925_v1, %v3924_v5 }
 0x440   : > { %v3444_v27 = vadd.f32 %v10395_v36, %v3443_v48  ;;  %v8610_v52 = vpop.f32.mrb[182].mxu1  ;;  %v4026_v24 = vpack.c.bf16 %v3923_v57, %v3922_v23  ;;  %v10478_v23 = vpop.permute.xlu0 %5746 }
 0x441   : > { %v3800_v18 = vmul.f32 0.01, %v3452_v53  ;;  %v3455_v25 = vadd.f32 %v8610_v52, %v10395_v36  ;;  %v3446_v35 = vpop.f32.mrb[183].mxu1  ;;  %12181 = vst [vmem:[#allocation31_spill] sm:$0xff] %v10478_v23 }
 0x442   : > { %v3798_v31 = vmul.f32 0.01, %v3444_v27  ;;  %v3447_v15 = vadd.f32 %v10395_v36, %v3446_v35  ;;  %8747 = vmatprep.mubr.bf16.mxu0 %v4026_v24 }
 0x443   : > { %v3801_v38 = vmul.f32 0.01, %v3455_v25  ;;  %8748 = vmatmul.mubr.bf16.gmra.mrb[176].mxu0 %v4027_v14  ;;  %v3928_v40 = vmax.f32 %v3452_v53, %v3800_v18  ;;  %v10481_v14 = vpop.permute.xlu1 %5750 }
 0x444   : > { %v3799_v37 = vmul.f32 0.01, %v3447_v15  ;;  %v3926_v19 = vmax.f32 %v3444_v27, %v3798_v31  ;;  %12182 = vst [vmem:[#allocation32_spill] sm:$0xff] %v10481_v14 }
 0x445   : > { %v3929_v29 = vmax.f32 %v3455_v25, %v3801_v38  ;;  %v10484_v38 = vpop.permute.xlu0 %5754 }
 0x446   : > { %v3927_v59 = vmax.f32 %v3447_v15, %v3799_v37  ;;  %v8613_v54 = vpop.f32.mrb[184].mxu1  ;;  %12183 = vst [vmem:[#allocation33_spill] sm:$0xff] %v10484_v38 }
 0x447   : > { %v3468_v6 = vadd.f32 %v8613_v54, %v10395_v36  ;;  %v3459_v39 = vpop.f32.mrb[185].mxu1  ;;  %v4029_v60 = vpack.c.bf16 %v3929_v29, %v3928_v40 }
 0x448   : > { %v3460_v11 = vadd.f32 %v10395_v36, %v3459_v39  ;;  %v8614_v5 = vpop.f32.mrb[186].mxu1  ;;  %v4028_v1 = vpack.c.bf16 %v3927_v59, %v3926_v19  ;;  %v10487_v19 = vpop.permute.xlu1 %5758 }
 0x449   : > { %v3804_v57 = vmul.f32 0.01, %v3468_v6  ;;  %v3471_v17 = vadd.f32 %v8614_v5, %v10395_v36  ;;  %v3462_v48 = vpop.f32.mrb[187].mxu1  ;;  %12184 = vst [vmem:[#allocation34_spill] sm:$0xff] %v10487_v19 }
 0x44a   : > { %v3802_v53 = vmul.f32 0.01, %v3460_v11  ;;  %v3463_v27 = vadd.f32 %v10395_v36, %v3462_v48  ;;  %8751 = vmatprep.mubr.bf16.mxu0 %v4028_v1  ;;  %v10492_v48 = vpop.permute.xlu0 %5762 }
 0x44b   : > { %v3805_v52 = vmul.f32 0.01, %v3471_v17  ;;  %8752 = vmatmul.mubr.bf16.gmra.mrb[180].mxu0 %v4029_v60  ;;  %v3932_v18 = vmax.f32 %v3468_v6, %v3804_v57  ;;  %12185 = vst [vmem:[#allocation35_spill] sm:$0xff] %v10492_v48 }
 0x44c   : > { %v3803_v24 = vmul.f32 0.01, %v3463_v27  ;;  %v3930_v35 = vmax.f32 %v3460_v11, %v3802_v53 }
 0x44d   : > { %v3933_v25 = vmax.f32 %v3471_v17, %v3805_v52  ;;  %v10494_v52 = vpop.permute.xlu1 %5766 }
 0x44e   : > { %v3931_v31 = vmax.f32 %v3463_v27, %v3803_v24  ;;  %v8617_v15 = vpop.f32.mrb[188].mxu1  ;;  %12186 = vst [vmem:[#allocation36_spill] sm:$0xff] %v10494_v52 }
 0x44f   : > { %v3484_v37 = vadd.f32 %v8617_v15, %v10395_v36  ;;  %v3475_v40 = vpop.f32.mrb[189].mxu1  ;;  %v4031_v29 = vpack.c.bf16 %v3933_v25, %v3932_v18 }
 0x450   : > { %v3476_v59 = vadd.f32 %v10395_v36, %v3475_v40  ;;  %v8618_v54 = vpop.f32.mrb[190].mxu1  ;;  %v4030_v39 = vpack.c.bf16 %v3931_v31, %v3930_v35 }
 0x451   : > { %v3808_v5 = vmul.f32 0.01, %v3484_v37  ;;  %v3487_v60 = vadd.f32 %v8618_v54, %v10395_v36  ;;  %v3478_v6 = vpop.f32.mrb[191].mxu1 }
 0x452   : > { %v3806_v1 = vmul.f32 0.01, %v3476_v59  ;;  %v3479_v11 = vadd.f32 %v10395_v36, %v3478_v6  ;;  %8755 = vmatprep.mubr.bf16.mxu0 %v4030_v39 }
 0x453   : > { %v3809_v57 = vmul.f32 0.01, %v3487_v60  ;;  %8756 = vmatmul.mubr.bf16.gmra.mrb[184].mxu0 %v4031_v29  ;;  %v3936_v53 = vmax.f32 %v3484_v37, %v3808_v5  ;;  %v10500_v5 = vpop.permute.xlu0 %5770 }
 0x454   : > { %v3807_v17 = vmul.f32 0.01, %v3479_v11  ;;  %v3934_v24 = vmax.f32 %v3476_v59, %v3806_v1  ;;  %12187 = vst [vmem:[#allocation37_spill] sm:$0xff] %v10500_v5 }
 0x455   : > { %v3937_v27 = vmax.f32 %v3487_v60, %v3809_v57  ;;  %v10502_v60 = vpop.permute.xlu1 %5774 }
 0x456   : > { %v3935_v18 = vmax.f32 %v3479_v11, %v3807_v17  ;;  %v8621_v25 = vpop.f32.mrb[192].mxu1  ;;  %12188 = vst [vmem:[#allocation38_spill] sm:$0xff] %v10502_v60 }
 0x457   : > { %v3500_v35 = vadd.f32 %v8621_v25, %v10395_v36  ;;  %v3491_v31 = vpop.f32.mrb[193].mxu1  ;;  %v4033_v15 = vpack.c.bf16 %v3937_v27, %v3936_v53 }
 0x458   : > { %v3492_v40 = vadd.f32 %v10395_v36, %v3491_v31  ;;  %v8622_v54 = vpop.f32.mrb[194].mxu1  ;;  %v4032_v39 = vpack.c.bf16 %v3935_v18, %v3934_v24 }
 0x459   : > { %v3812_v6 = vmul.f32 0.01, %v3500_v35  ;;  %v3503_v29 = vadd.f32 %v8622_v54, %v10395_v36  ;;  %v3494_v2 = vpop.f32.mrb[195].mxu1  ;;  %v10509_v52 = vpop.permute.xlu1 %5782 }
 0x45a   : > { %v3810_v19 = vmul.f32 0.01, %v3492_v40  ;;  %v3495_v37 = vadd.f32 %v10395_v36, %v3494_v2  ;;  %8759 = vmatprep.mubr.bf16.mxu0 %v4032_v39  ;;  %v10506_v39 = vpop.permute.xlu0 %5778  ;;  %12190 = vst [vmem:[#allocation40_spill] sm:$0xff] %v10509_v52 }
 0x45b   : > { %v3813_v59 = vmul.f32 0.01, %v3503_v29  ;;  %8760 = vmatmul.mubr.bf16.gmra.mrb[188].mxu0 %v4033_v15  ;;  %v3940_v11 = vmax.f32 %v3500_v35, %v3812_v6  ;;  %12189 = vst [vmem:[#allocation39_spill] sm:$0xff] %v10506_v39 }
 0x45c   : > { %v3811_v1 = vmul.f32 0.01, %v3495_v37  ;;  %v3938_v17 = vmax.f32 %v3492_v40, %v3810_v19 }
 0x45d   : > { %v3941_v57 = vmax.f32 %v3503_v29, %v3813_v59 }
 0x45e   : > { %v3939_v53 = vmax.f32 %v3495_v37, %v3811_v1  ;;  %v8625_v27 = vpop.f32.mrb[196].mxu1 }
 0x45f   : > { %v3516_v24 = vadd.f32 %v8625_v27, %v10395_v36  ;;  %v3507_v18 = vpop.f32.mrb[197].mxu1  ;;  %v4035_v25 = vpack.c.bf16 %v3941_v57, %v3940_v11  ;;  %v10512_v57 = vpop.permute.xlu0 %5786 }
 0x460   : > { %v3508_v31 = vadd.f32 %v10395_v36, %v3507_v18  ;;  %v8626_v2 = vpop.f32.mrb[198].mxu1  ;;  %v4034_v54 = vpack.c.bf16 %v3939_v53, %v3938_v17  ;;  %12191 = vst [vmem:[#allocation41_spill] sm:$0xff] %v10512_v57  ;;  %v10515_v18 = vpop.permute.xlu1 %5790 }
 0x461   : > { %v3816_v5 = vmul.f32 0.01, %v3516_v24  ;;  %v3519_v15 = vadd.f32 %v8626_v2, %v10395_v36  ;;  %v3510_v60 = vpop.f32.mrb[199].mxu1  ;;  %12192 = vst [vmem:[#allocation42_spill] sm:$0xff] %v10515_v18 }
 0x462   : > { %v3814_v35 = vmul.f32 0.01, %v3508_v31  ;;  %v3511_v19 = vadd.f32 %v10395_v36, %v3510_v60  ;;  %8763 = vmatprep.mubr.bf16.mxu0 %v4034_v54 }
 0x463   : > { %v3817_v40 = vmul.f32 0.01, %v3519_v15  ;;  %8764 = vmatmul.mubr.bf16.gmra.mrb[192].mxu0 %v4035_v25  ;;  %v3944_v29 = vmax.f32 %v3516_v24, %v3816_v5 }
 0x464   : > { %v3815_v6 = vmul.f32 0.01, %v3511_v19  ;;  %v3942_v59 = vmax.f32 %v3508_v31, %v3814_v35 }
 0x465   : > { %v3945_v37 = vmax.f32 %v3519_v15, %v3817_v40 }
 0x466   : > { %v3943_v1 = vmax.f32 %v3511_v19, %v3815_v6  ;;  %v8629_v11 = vpop.f32.mrb[200].mxu1  ;;  %v10520_v19 = vpop.permute.xlu0 %5794 }
 0x467   : > { %v3532_v17 = vadd.f32 %v8629_v11, %v10395_v36  ;;  %v3523_v53 = vpop.f32.mrb[201].mxu1  ;;  %v4037_v27 = vpack.c.bf16 %v3945_v37, %v3944_v29  ;;  %12193 = vst [vmem:[#allocation43_spill] sm:$0xff] %v10520_v19  ;;  %v10522_v29 = vpop.permute.xlu1 %5798 }
 0x468   : > { %v3524_v2 = vadd.f32 %v10395_v36, %v3523_v53  ;;  %v8630_v60 = vpop.f32.mrb[202].mxu1  ;;  %v4036_v54 = vpack.c.bf16 %v3943_v1, %v3942_v59  ;;  %12194 = vst [vmem:[#allocation44_spill] sm:$0xff] %v10522_v29 }
 0x469   : > { %v3820_v52 = vmul.f32 0.01, %v3532_v17  ;;  %v3535_v25 = vadd.f32 %v8630_v60, %v10395_v36  ;;  %v3526_v5 = vpop.f32.mrb[203].mxu1 }
 0x46a   : > { %v3818_v24 = vmul.f32 0.01, %v3524_v2  ;;  %v3527_v31 = vadd.f32 %v10395_v36, %v3526_v5  ;;  %8767 = vmatprep.mubr.bf16.mxu0 %v4036_v54 }
 0x46b   : > { %v3821_v15 = vmul.f32 0.01, %v3535_v25  ;;  %8768 = vmatmul.mubr.bf16.gmra.mrb[196].mxu0 %v4037_v27  ;;  %v3948_v40 = vmax.f32 %v3532_v17, %v3820_v52  ;;  %v10528_v17 = vpop.permute.xlu0 %5805 }
 0x46c   : > { %v3819_v35 = vmul.f32 0.01, %v3527_v31  ;;  %v3946_v37 = vmax.f32 %v3524_v2, %v3818_v24  ;;  %12195 = vst [vmem:[#allocation45_spill] sm:$0xff] %v10528_v17 }
 0x46d   : > { %v3949_v6 = vmax.f32 %v3535_v25, %v3821_v15  ;;  %v10530_v25 = vpop.permute.xlu1 %5809 }
 0x46e   : > { %v3947_v11 = vmax.f32 %v3527_v31, %v3819_v35  ;;  %v8633_v59 = vpop.f32.mrb[204].mxu1  ;;  %12196 = vst [vmem:[#allocation46_spill] sm:$0xff] %v10530_v25 }
 0x46f   : > { %v3548_v1 = vadd.f32 %v8633_v59, %v10395_v36  ;;  %v3539_v53 = vpop.f32.mrb[205].mxu1  ;;  %v4039_v60 = vpack.c.bf16 %v3949_v6, %v3948_v40 }
 0x470   : > { %v3540_v18 = vadd.f32 %v10395_v36, %v3539_v53  ;;  %v8634_v5 = vpop.f32.mrb[206].mxu1  ;;  %v4038_v54 = vpack.c.bf16 %v3947_v11, %v3946_v37 }
 0x471   : > { %v3824_v57 = vmul.f32 0.01, %v3548_v1  ;;  %v3551_v27 = vadd.f32 %v8634_v5, %v10395_v36  ;;  %v3542_v39 = vpop.f32.mrb[207].mxu1  ;;  %v10537_v29 = vpop.permute.xlu1 %5817 }
 0x472   : > { %v3822_v19 = vmul.f32 0.01, %v3540_v18  ;;  %v3543_v52 = vadd.f32 %v10395_v36, %v3542_v39  ;;  %8771 = vmatprep.mubr.bf16.mxu0 %v4038_v54  ;;  %v10534_v54 = vpop.permute.xlu0 %5813  ;;  %12198 = vst [vmem:[#allocation48_spill] sm:$0xff] %v10537_v29 }
 0x473   : > { %v3825_v2 = vmul.f32 0.01, %v3551_v27  ;;  %8772 = vmatmul.mubr.bf16.gmra.mrb[200].mxu0 %v4039_v60  ;;  %v3952_v31 = vmax.f32 %v3548_v1, %v3824_v57  ;;  %12197 = vst [vmem:[#allocation47_spill] sm:$0xff] %v10534_v54 }
 0x474   : > { %v3823_v24 = vmul.f32 0.01, %v3543_v52  ;;  %v3950_v35 = vmax.f32 %v3540_v18, %v3822_v19 }
 0x475   : > { %v3953_v15 = vmax.f32 %v3551_v27, %v3825_v2 }
 0x476   : > { %v3951_v40 = vmax.f32 %v3543_v52, %v3823_v24  ;;  %v8637_v6 = vpop.f32.mrb[208].mxu1 }
 0x477   : > { %v3564_v37 = vadd.f32 %v8637_v6, %v10395_v36  ;;  %v3555_v11 = vpop.f32.mrb[209].mxu1  ;;  %v4041_v59 = vpack.c.bf16 %v3953_v15, %v3952_v31  ;;  %v10540_v15 = vpop.permute.xlu0 %5821 }
 0x478   : > { %v3556_v53 = vadd.f32 %v10395_v36, %v3555_v11  ;;  %v8638_v39 = vpop.f32.mrb[210].mxu1  ;;  %v4040_v5 = vpack.c.bf16 %v3951_v40, %v3950_v35  ;;  %12199 = vst [vmem:[#allocation49_spill] sm:$0xff] %v10540_v15  ;;  %v10543_v11 = vpop.permute.xlu1 %5825 }
 0x479   : > { %v3828_v17 = vmul.f32 0.01, %v3564_v37  ;;  %v3567_v60 = vadd.f32 %v8638_v39, %v10395_v36  ;;  %v3558_v25 = vpop.f32.mrb[211].mxu1  ;;  %12200 = vst [vmem:[#allocation50_spill] sm:$0xff] %v10543_v11 }
 0x47a   : > { %v3826_v57 = vmul.f32 0.01, %v3556_v53  ;;  %v3559_v18 = vadd.f32 %v10395_v36, %v3558_v25  ;;  %8775 = vmatprep.mubr.bf16.mxu0 %v4040_v5 }
 0x47b   : > { %v3829_v19 = vmul.f32 0.01, %v3567_v60  ;;  %8776 = vmatmul.mubr.bf16.gmra.mrb[204].mxu0 %v4041_v59  ;;  %v3956_v27 = vmax.f32 %v3564_v37, %v3828_v17 }
 0x47c   : > { %v3827_v1 = vmul.f32 0.01, %v3559_v18  ;;  %v3954_v2 = vmax.f32 %v3556_v53, %v3826_v57 }
 0x47d   : > { %v3957_v52 = vmax.f32 %v3567_v60, %v3829_v19 }
 0x47e   : > { %v3955_v24 = vmax.f32 %v3559_v18, %v3827_v1  ;;  %v8641_v31 = vpop.f32.mrb[212].mxu1  ;;  %v10548_v18 = vpop.permute.xlu0 %5829 }
 0x47f   : > { %v3580_v35 = vadd.f32 %v8641_v31, %v10395_v36  ;;  %v3571_v40 = vpop.f32.mrb[213].mxu1  ;;  %v4043_v6 = vpack.c.bf16 %v3957_v52, %v3956_v27  ;;  %12201 = vst [vmem:[#allocation51_spill] sm:$0xff] %v10548_v18  ;;  %v10550_v27 = vpop.permute.xlu1 %5833 }
 0x480   : > { %v3572_v39 = vadd.f32 %v10395_v36, %v3571_v40  ;;  %v8642_v25 = vpop.f32.mrb[214].mxu1  ;;  %v4042_v5 = vpack.c.bf16 %v3955_v24, %v3954_v2  ;;  %12202 = vst [vmem:[#allocation52_spill] sm:$0xff] %v10550_v27 }
 0x481   : > { %v3832_v29 = vmul.f32 0.01, %v3580_v35  ;;  %v3583_v59 = vadd.f32 %v8642_v25, %v10395_v36  ;;  %v3574_v17 = vpop.f32.mrb[215].mxu1 }
 0x482   : > { %v3830_v37 = vmul.f32 0.01, %v3572_v39  ;;  %v3575_v53 = vadd.f32 %v10395_v36, %v3574_v17  ;;  %8779 = vmatprep.mubr.bf16.mxu0 %v4042_v5 }
 0x483   : > { %v3833_v60 = vmul.f32 0.01, %v3583_v59  ;;  %8780 = vmatmul.mubr.bf16.gmra.mrb[208].mxu0 %v4043_v6  ;;  %v3960_v19 = vmax.f32 %v3580_v35, %v3832_v29  ;;  %v10556_v35 = vpop.permute.xlu0 %5837 }
 0x484   : > { %v3831_v57 = vmul.f32 0.01, %v3575_v53  ;;  %v3958_v52 = vmax.f32 %v3572_v39, %v3830_v37  ;;  %12203 = vst [vmem:[#allocation53_spill] sm:$0xff] %v10556_v35 }
 0x485   : > { %v3961_v1 = vmax.f32 %v3583_v59, %v3833_v60  ;;  %v10558_v59 = vpop.permute.xlu1 %5841 }
 0x486   : > { %v3959_v31 = vmax.f32 %v3575_v53, %v3831_v57  ;;  %v8645_v2 = vpop.f32.mrb[216].mxu1  ;;  %12204 = vst [vmem:[#allocation54_spill] sm:$0xff] %v10558_v59 }
 0x487   : > { %v3596_v24 = vadd.f32 %v8645_v2, %v10395_v36  ;;  %v3587_v40 = vpop.f32.mrb[217].mxu1  ;;  %v4045_v25 = vpack.c.bf16 %v3961_v1, %v3960_v19 }
 0x488   : > { %v3588_v11 = vadd.f32 %v10395_v36, %v3587_v40  ;;  %v8646_v17 = vpop.f32.mrb[218].mxu1  ;;  %v4044_v5 = vpack.c.bf16 %v3959_v31, %v3958_v52 }
 0x489   : > { %v3836_v15 = vmul.f32 0.01, %v3596_v24  ;;  %v3599_v6 = vadd.f32 %v8646_v17, %v10395_v36  ;;  %v3590_v54 = vpop.f32.mrb[219].mxu1  ;;  %v10565_v27 = vpop.permute.xlu1 %5849 }
 0x48a   : > { %v3834_v18 = vmul.f32 0.01, %v3588_v11  ;;  %v3591_v29 = vadd.f32 %v10395_v36, %v3590_v54  ;;  %8783 = vmatprep.mubr.bf16.mxu0 %v4044_v5  ;;  %v10562_v54 = vpop.permute.xlu0 %5845  ;;  %12206 = vst [vmem:[#allocation56_spill] sm:$0xff] %v10565_v27 }
 0x48b   : > { %v3837_v39 = vmul.f32 0.01, %v3599_v6  ;;  %8784 = vmatmul.mubr.bf16.gmra.mrb[212].mxu0 %v4045_v25  ;;  %v3964_v53 = vmax.f32 %v3596_v24, %v3836_v15  ;;  %12205 = vst [vmem:[#allocation55_spill] sm:$0xff] %v10562_v54 }
 0x48c   : > { %v3835_v37 = vmul.f32 0.01, %v3591_v29  ;;  %v3962_v57 = vmax.f32 %v3588_v11, %v3834_v18  ;;  %v10570_v11 = vld [vmem:[%s12173_s27] ss:$0 sm:$0xff] }
 0x48d   : > { %v3965_v60 = vmax.f32 %v3599_v6, %v3837_v39 }
 0x48e   : > { %v3963_v19 = vmax.f32 %v3591_v29, %v3835_v37  ;;  %v8649_v1 = vpop.f32.mrb[220].mxu1 }
 0x48f   : > { %v3612_v52 = vadd.f32 %v8649_v1, %v10395_v36  ;;  %v3603_v31 = vpop.f32.mrb[221].mxu1  ;;  %v4047_v2 = vpack.c.bf16 %v3965_v60, %v3964_v53  ;;  %v10576_v1 = vpop.permute.xlu1 %5857 }
 0x490   : > { %v3604_v40 = vadd.f32 %v10395_v36, %v3603_v31  ;;  %v8650_v17 = vpop.f32.mrb[222].mxu1  ;;  %v4046_v5 = vpack.c.bf16 %v3963_v19, %v3962_v57  ;;  %12208 = vst [vmem:[#allocation58_spill] sm:$0xff] %v10576_v1 }
 0x491   : > { %v3840_v35 = vmul.f32 0.01, %v3612_v52  ;;  %v3615_v25 = vadd.f32 %v8650_v17, %v10395_v36  ;;  %v3606_v59 = vpop.f32.mrb[223].mxu1  ;;  %v10573_v36 = vpop.permute.xlu0 %5853 }
 0x492   : > { %v3838_v15 = vmul.f32 0.01, %v3604_v40  ;;  %v3607_v18 = vadd.f32 %v10570_v11, %v3606_v59  ;;  %8787 = vmatprep.mubr.bf16.mxu0 %v4046_v5  ;;  %12207 = vst [vmem:[#allocation57_spill] sm:$0xff] %v10573_v36 }
 0x493   : > { %v3841_v24 = vmul.f32 0.01, %v3615_v25  ;;  %8788 = vmatmul.mubr.bf16.gmra.mrb[216].mxu0 %v4047_v2  ;;  %v3968_v29 = vmax.f32 %v3612_v52, %v3840_v35 }
 0x494   : > { %v3839_v6 = vmul.f32 0.01, %v3607_v18  ;;  %v3966_v37 = vmax.f32 %v3604_v40, %v3838_v15 }
 0x495   : > { %v3969_v39 = vmax.f32 %v3615_v25, %v3841_v24  ;;  %v10581_v15 = vpop.permute.xlu0 %5861 }
 0x496   : > { %v3967_v53 = vmax.f32 %v3607_v18, %v3839_v6  ;;  %v8653_v60 = vpop.f32.mrb[224].mxu1  ;;  %12209 = vst [vmem:[#allocation59_spill] sm:$0xff] %v10581_v15 }
 0x497   : > { %v3628_v57 = vadd.f32 %v10570_v11, %v8653_v60  ;;  %v3619_v19 = vpop.f32.mrb[225].mxu1  ;;  %v4049_v31 = vpack.c.bf16 %v3969_v39, %v3968_v29  ;;  %v10583_v29 = vpop.permute.xlu1 %5865 }
 0x498   : > { %v3620_v17 = vadd.f32 %v10570_v11, %v3619_v19  ;;  %v8654_v59 = vpop.f32.mrb[226].mxu1  ;;  %v4048_v5 = vpack.c.bf16 %v3967_v53, %v3966_v37  ;;  %12210 = vst [vmem:[#allocation60_spill] sm:$0xff] %v10583_v29 }
 0x499   : > { %v3844_v27 = vmul.f32 0.01, %v3628_v57  ;;  %v3631_v2 = vadd.f32 %v10570_v11, %v8654_v59  ;;  %v3622_v35 = vpop.f32.mrb[227].mxu1  ;;  %v10588_v54 = vpop.permute.xlu0 %5872 }
 0x49a   : > { %v3842_v52 = vmul.f32 0.01, %v3620_v17  ;;  %v3623_v40 = vadd.f32 %v10570_v11, %v3622_v35  ;;  %8791 = vmatprep.mubr.bf16.mxu0 %v4048_v5  ;;  %12211 = vst [vmem:[#allocation61_spill] sm:$0xff] %v10588_v54 }
 0x49b   : > { %v3845_v25 = vmul.f32 0.01, %v3631_v2  ;;  %8792 = vmatmul.mubr.bf16.gmra.mrb[220].mxu0 %v4049_v31  ;;  %v3972_v24 = vmax.f32 %v3628_v57, %v3844_v27 }
 0x49c   : > { %v3843_v18 = vmul.f32 0.01, %v3623_v40  ;;  %v3970_v39 = vmax.f32 %v3620_v17, %v3842_v52 }
 0x49d   : > { %v3973_v6 = vmax.f32 %v3631_v2, %v3845_v25  ;;  %v10591_v2 = vpop.permute.xlu1 %5876 }
 0x49e   : > { %v3971_v60 = vmax.f32 %v3623_v40, %v3843_v18  ;;  %v8657_v37 = vpop.f32.mrb[228].mxu1  ;;  %12212 = vst [vmem:[#allocation62_spill] sm:$0xff] %v10591_v2 }
 0x49f   : > { %v3644_v53 = vadd.f32 %v10570_v11, %v8657_v37  ;;  %v3635_v19 = vpop.f32.mrb[229].mxu1  ;;  %v4051_v59 = vpack.c.bf16 %v3973_v6, %v3972_v24 }
 0x4a0   : > { %v3636_v1 = vadd.f32 %v10570_v11, %v3635_v19  ;;  %v8658_v35 = vpop.f32.mrb[230].mxu1  ;;  %v4050_v5 = vpack.c.bf16 %v3971_v60, %v3970_v39  ;;  %v10594_v19 = vpop.permute.xlu0 %5880 }
 0x4a1   : > { %v3848_v36 = vmul.f32 0.01, %v3644_v53  ;;  %v3647_v31 = vadd.f32 %v10570_v11, %v8658_v35  ;;  %v3638_v15 = vpop.f32.mrb[231].mxu1  ;;  %12213 = vst [vmem:[#allocation63_spill] sm:$0xff] %v10594_v19  ;;  %v10597_v54 = vpop.permute.xlu1 %5884 }
 0x4a2   : > { %v3846_v27 = vmul.f32 0.01, %v3636_v1  ;;  %v3639_v57 = vadd.f32 %v10570_v11, %v3638_v15  ;;  %8795 = vmatprep.mubr.bf16.mxu0 %v4050_v5  ;;  %12214 = vst [vmem:[#allocation64_spill] sm:$0xff] %v10597_v54 }
 0x4a3   : > { %v3849_v17 = vmul.f32 0.01, %v3647_v31  ;;  %8796 = vmatmul.mubr.bf16.gmra.mrb[224].mxu0 %v4051_v59  ;;  %v3976_v40 = vmax.f32 %v3644_v53, %v3848_v36 }
 0x4a4   : > { %v3847_v52 = vmul.f32 0.01, %v3639_v57  ;;  %v3974_v18 = vmax.f32 %v3636_v1, %v3846_v27 }
 0x4a5   : > { %v3977_v25 = vmax.f32 %v3647_v31, %v3849_v17 }
 0x4a6   : > { %v3975_v24 = vmax.f32 %v3639_v57, %v3847_v52  ;;  %v8661_v6 = vpop.f32.mrb[232].mxu1  ;;  %v10601_v52 = vpop.permute.xlu0 %5888 }
 0x4a7   : > { %v3660_v39 = vadd.f32 %v10570_v11, %v8661_v6  ;;  %v3651_v60 = vpop.f32.mrb[233].mxu1  ;;  %v4053_v37 = vpack.c.bf16 %v3977_v25, %v3976_v40  ;;  %12215 = vst [vmem:[#allocation65_spill] sm:$0xff] %v10601_v52 }
 0x4a8   : > { %v3652_v35 = vadd.f32 %v10570_v11, %v3651_v60  ;;  %v8662_v15 = vpop.f32.mrb[234].mxu1  ;;  %v4052_v5 = vpack.c.bf16 %v3975_v24, %v3974_v18  ;;  %v10603_v24 = vpop.permute.xlu1 %5892 }
 0x4a9   : > { %v3852_v2 = vmul.f32 0.01, %v3660_v39  ;;  %v3663_v59 = vadd.f32 %v10570_v11, %v8662_v15  ;;  %v3654_v36 = vpop.f32.mrb[235].mxu1  ;;  %12216 = vst [vmem:[#allocation66_spill] sm:$0xff] %v10603_v24 }
 0x4aa   : > { %v3850_v53 = vmul.f32 0.01, %v3652_v35  ;;  %v3655_v1 = vadd.f32 %v10570_v11, %v3654_v36  ;;  %8799 = vmatprep.mubr.bf16.mxu0 %v4052_v5 }
 0x4ab   : > { %v3853_v31 = vmul.f32 0.01, %v3663_v59  ;;  %8800 = vmatmul.mubr.bf16.gmra.mrb[228].mxu0 %v4053_v37  ;;  %v3980_v57 = vmax.f32 %v3660_v39, %v3852_v2 }
 0x4ac   : > { %v3851_v27 = vmul.f32 0.01, %v3655_v1  ;;  %v3978_v40 = vmax.f32 %v3652_v35, %v3850_v53 }
 0x4ad   : > { %v3981_v17 = vmax.f32 %v3663_v59, %v3853_v31  ;;  %v5002_v31 = vld [vmem:[%s12219_s29] sm:$0x1]  ;;  %s7594_s29 = scalar_lea.sflag [#allocation5], %s9549_s14 }
 0x4ae   : > { %v3979_v25 = vmax.f32 %v3655_v1, %v3851_v27  ;;  %v8665_v18 = vpop.f32.mrb[236].mxu1  ;;  %v10612_v1 = vld [vmem:[%s12217_s19] ss:$0 sm:$0xff]  ;;  %v10617_v27 = vpop.permute.xlu0 %5896  ;;  %v5004_v19 = vpack.i.b16 %v5002_v31, %v5002_v31  ;;  %s12526_s19 = sld [smem:[#allocation163_spill]] }
 0x4af   : > { %v3676_v6 = vadd.f32 %v10570_v11, %v8665_v18  ;;  %v3667_v60 = vpop.f32.mrb[237].mxu1  ;;  %v4055_v15 = vpack.c.bf16 %v3981_v17, %v3980_v57  ;;  %12220 = vst [vmem:[#allocation67_spill] sm:$0xff] %v10617_v27  ;;  %v10619_v57 = vpop.permute.xlu1 %5900 }
 0x4b0   : > { %v3668_v54 = vadd.f32 %v10570_v11, %v3667_v60  ;;  %v8666_v36 = vpop.f32.mrb[238].mxu1  ;;  %v4054_v5 = vpack.c.bf16 %v3979_v25, %v3978_v40  ;;  %12221 = vst [vmem:[#allocation68_spill] sm:$0xff] %v10619_v57 }
 0x4b1   : > { %v3856_v29 = vmul.f32 0.01, %v3676_v6  ;;  %v3679_v37 = vadd.f32 %v10570_v11, %v8666_v36  ;;  %v3670_v2 = vpop.f32.mrb[239].mxu1 }
 0x4b2   : > { %v3854_v39 = vmul.f32 0.01, %v3668_v54  ;;  %v3671_v59 = vadd.f32 %v10570_v11, %v3670_v2  ;;  %8803 = vmatprep.mubr.bf16.mxu0 %v4054_v5 }
 0x4b3   : > { %v3857_v35 = vmul.f32 0.01, %v3679_v37  ;;  %8804 = vmatmul.mubr.bf16.gmra.mrb[232].mxu0 %v4055_v15  ;;  %v3984_v17 = vmax.f32 %v3676_v6, %v3856_v29 }
 0x4b4   : > { %v3855_v53 = vmul.f32 0.01, %v3671_v59  ;;  %v3982_v25 = vmax.f32 %v3668_v54, %v3854_v39  ;;  %s12527_s28 = smov %s12526_s19  ;;  %s12066_s30 = scalar_lea.hbm %s12526_s19, %s7791_s25 }
 0x4b5   : > { %v3985_v40 = vmax.f32 %v3679_v37, %v3857_v35 }
 0x4b6   : > { %v3983_v18 = vmax.f32 %v3671_v59, %v3855_v53  ;;  %v8669_v60 = vpop.f32.mrb[240].mxu1  ;;  %v8701_v15 = vpop.f32.mrb[128].mxu0 }
 0x4b7   : > { %v3692_v36 = vadd.f32 %v10570_v11, %v8669_v60  ;;  %v4180_v5 = vadd.f32 %v8701_v15, %v10612_v1  ;;  %v3683_v2 = vpop.f32.mrb[241].mxu1  ;;  %v4171_v52 = vpop.f32.mrb[129].mxu0  ;;  %v4057_v24 = vpack.c.bf16 %v3985_v40, %v3984_v17 }
 0x4b8   : > { %v3684_v38 = vadd.f32 %v10570_v11, %v3683_v2  ;;  %v4172_v27 = vadd.f32 %v10612_v1, %v4171_v52  ;;  %v8670_v48 = vpop.f32.mrb[242].mxu1  ;;  %v8702_v57 = vpop.f32.mrb[130].mxu0  ;;  %v4056_v29 = vpack.c.bf16 %v3983_v18, %v3982_v25  ;;  %v10630_v25 = vrot.slane %v5004_v19, %v9574_v3 }
 0x4b9   : > { %v3860_v6 = vmul.f32 0.01, %v3692_v36  ;;  %v4684_v54 = vmul.f32 0.01, %v4180_v5  ;;  %v3695_v37 = vadd.f32 %v10570_v11, %v8670_v48  ;;  %v4183_v39 = vadd.f32 %v8702_v57, %v10612_v1  ;;  %v3686_v59 = vpop.f32.mrb[243].mxu1  ;;  %v4174_v35 = vpop.f32.mrb[131].mxu0 }
 0x4ba   : > { %v3858_v53 = vmul.f32 0.01, %v3684_v38  ;;  %v4682_v60 = vmul.f32 0.01, %v4172_v27  ;;  %v3687_v17 = vadd.f32 %v10570_v11, %v3686_v59  ;;  %v4175_v31 = vadd.f32 %v10612_v1, %v4174_v35  ;;  %8807 = vmatprep.mubr.bf16.mxu0 %v4056_v29  ;;  %v10632_v48 = vpop.permute.xlu0 %5904  ;;  %v10634_v57 = vpop.permute.xlu1 %5908 }
 0x4bb   : > { %v3861_v40 = vmul.f32 0.01, %v3695_v37  ;;  %v4685_v52 = vmul.f32 0.01, %v4183_v39  ;;  %8808 = vmatmul.mubr.bf16.gmra.mrb[236].mxu0 %v4057_v24  ;;  %12222 = vst [vmem:[#allocation69_spill] sm:$0xff] %v10632_v48  ;;  %12223 = vst [vmem:[#allocation70_spill] sm:$0xff] %v10634_v57  ;;  %v3988_v2 = vmax.f32 %v3692_v36, %v3860_v6  ;;  %v4812_v28 = vmax.f32 %v4180_v5, %v4684_v54 }
 0x4bc   : > { %v3859_v18 = vmul.f32 0.01, %v3687_v17  ;;  %v4683_v15 = vmul.f32 0.01, %v4175_v31  ;;  %v3986_v59 = vmax.f32 %v3684_v38, %v3858_v53  ;;  %v4810_v23 = vmax.f32 %v4172_v27, %v4682_v60 }
 0x4bd   : > { %v3989_v14 = vmax.f32 %v3695_v37, %v3861_v40  ;;  %v4813_v30 = vmax.f32 %v4183_v39, %v4685_v52 }
 0x4be   : > { %v3987_v35 = vmax.f32 %v3687_v17, %v3859_v18  ;;  %v4811_v29 = vmax.f32 %v4175_v31, %v4683_v15  ;;  %v8673_v43 = vpop.f32.mrb[244].mxu1  ;;  %v8705_v61 = vpop.f32.mrb[132].mxu0 }
 0x4bf   : > { %v4939_v24 = vpack.c.bf16 %v4813_v30, %v4812_v28  ;;  %v10637_v3 = vadd.f32 %v10570_v11, %v8673_v43  ;;  %v4196_v19 = vadd.f32 %v8705_v61, %v10612_v1  ;;  %v3699_v32 = vpop.f32.mrb[245].mxu1  ;;  %v4187_v48 = vpop.f32.mrb[133].mxu0  ;;  %v4059_v13 = vpack.c.bf16 %v3989_v14, %v3988_v2 }
 0x4c0   : > { %v4938_v57 = vpack.c.bf16 %v4811_v29, %v4810_v23  ;;  %v10641_v36 = vadd.f32 %v10570_v11, %v3699_v32  ;;  %v4188_v38 = vadd.f32 %v10612_v1, %v4187_v48  ;;  %v8674_v27 = vpop.f32.mrb[246].mxu1  ;;  %v8706_v5 = vpop.f32.mrb[134].mxu0  ;;  %v4058_v6 = vpack.c.bf16 %v3987_v35, %v3986_v59 }
 0x4c1   : > { %v10645_v54 = vmul.f32 0.01, %v10637_v3  ;;  %v4688_v30 = vmul.f32 0.01, %v4196_v19  ;;  %v10648_v43 = vadd.f32 %v10570_v11, %v8674_v27  ;;  %v4199_v61 = vadd.f32 %v8706_v5, %v10612_v1  ;;  %v3702_v28 = vpop.f32.mrb[247].mxu1  ;;  %v4190_v14 = vpop.f32.mrb[135].mxu0 }
 0x4c2   : > { %v3862_v23 = vmul.f32 0.01, %v10641_v36  ;;  %v4686_v32 = vmul.f32 0.01, %v4188_v38  ;;  %v3703_v37 = vadd.f32 %v10570_v11, %v3702_v28  ;;  %v4191_v39 = vadd.f32 %v10612_v1, %v4190_v14  ;;  %8811 = vmatprep.mubr.bf16.mxu0 %v4058_v6  ;;  %v10657_v52 = vpop.permute.xlu0 %5912  ;;  %v10659_v18 = vpop.permute.xlu1 %5916 }
 0x4c3   : > { %v3865_v53 = vmul.f32 0.01, %v10648_v43  ;;  %v4689_v60 = vmul.f32 0.01, %v4199_v61  ;;  %8812 = vmatmul.mubr.bf16.gmra.mrb[240].mxu0 %v4059_v13  ;;  %v3992_v17 = vmax.f32 %v10637_v3, %v10645_v54  ;;  %v4816_v31 = vmax.f32 %v4196_v19, %v4688_v30  ;;  %12224 = vst [vmem:[#allocation71_spill] sm:$0xff] %v10657_v52  ;;  %12225 = vst [vmem:[#allocation72_spill] sm:$0xff] %v10659_v18 }
 0x4c4   : > { %v4687_v40 = vmul.f32 0.01, %v4191_v39  ;;  %v3863_v48 = vmul.f32 0.01, %v3703_v37  ;;  %v5011_v2 = vmul.bf16 %v10630_v25, %v4939_v24  ;;  %v10663_v59 = vmul.bf16 %v10630_v25, %v4938_v57 }
 0x4c5   : > { %v4817_v15 = vmax.f32 %v4199_v61, %v4689_v60  ;;  %v3990_v35 = vmax.f32 %v10641_v36, %v3862_v23  ;;  %v4814_v29 = vmax.f32 %v4188_v38, %v4686_v32  ;;  %v3993_v13 = vmax.f32 %v10648_v43, %v3865_v53 }
 0x4c6   : > { %v4815_v27 = vmax.f32 %v4191_v39, %v4687_v40  ;;  %v8709_v3 = vpop.f32.mrb[136].mxu0  ;;  %v8677_v19 = vpop.f32.mrb[248].mxu1  ;;  %v5076_v6 = vunpack.c.l.bf16 %v5011_v2  ;;  %v5075_v30 = vunpack.c.h.bf16 %v10663_v59  ;;  %v3991_v23 = vmax.f32 %v3703_v37, %v3863_v48 }
 0x4c7   : > { %v4941_v5 = vpack.c.bf16 %v4817_v15, %v4816_v31  ;;  %v4212_v54 = vadd.f32 %v8709_v3, %v10612_v1  ;;  %v3715_v61 = vpop.f32.mrb[249].mxu1  ;;  %v4203_v28 = vpop.f32.mrb[137].mxu0  ;;  %v10670_v57 = vadd.f32 %v10570_v11, %v8677_v19  ;;  %v5077_v3 = vunpack.c.h.bf16 %v5011_v2 }
 0x4c8   : > { %v4940_v24 = vpack.c.bf16 %v4815_v27, %v4814_v29  ;;  %v10673_v36 = vadd.f32 %v10570_v11, %v3715_v61  ;;  %v4204_v38 = vadd.f32 %v10612_v1, %v4203_v28  ;;  %v8678_v43 = vpop.f32.mrb[250].mxu1  ;;  %v8710_v14 = vpop.f32.mrb[138].mxu0  ;;  %5206 = vadd.xlane.f32.xlu0 %v5076_v6  ;;  %5204 = vadd.xlane.f32.xlu1 %v5075_v30  ;;  %v5074_v52 = vunpack.c.l.bf16 %v10663_v59 }
 0x4c9   : > { %v4692_v32 = vmul.f32 0.01, %v4212_v54  ;;  %v10677_v39 = vadd.f32 %v10570_v11, %v8678_v43  ;;  %v4215_v53 = vadd.f32 %v8710_v14, %v10612_v1  ;;  %v3718_v60 = vpop.f32.mrb[251].mxu1  ;;  %v4206_v31 = vpop.f32.mrb[139].mxu0  ;;  %v10681_v40 = vmul.f32 0.01, %v10670_v57 }
 0x4ca   : > { %v10684_v15 = vmul.f32 0.01, %v10673_v36  ;;  %v4690_v29 = vmul.f32 0.01, %v4204_v38  ;;  %v3719_v27 = vadd.f32 %v10570_v11, %v3718_v60  ;;  %v4207_v19 = vadd.f32 %v10612_v1, %v4206_v31  ;;  %v10688_v6 = vpop.permute.xlu0 %5920  ;;  %v10695_v14 = vpop.permute.xlu1 %5924 }
 0x4cb   : > { %v4820_v37 = vmax.f32 %v4212_v54, %v4692_v32  ;;  %v4693_v48 = vmul.f32 0.01, %v4215_v53  ;;  %12226 = vst [vmem:[#allocation73_spill] sm:$0xff] %v10688_v6  ;;  %v3996_v30 = vmax.f32 %v10670_v57, %v10681_v40  ;;  %v3869_v28 = vmul.f32 0.01, %v10677_v39  ;;  %12227 = vst [vmem:[#allocation74_spill] sm:$0xff] %v10695_v14 }
 0x4cc   : > { %v3994_v61 = vmax.f32 %v10673_v36, %v10684_v15  ;;  %v3867_v43 = vmul.f32 0.01, %v3719_v27  ;;  %v4818_v18 = vmax.f32 %v4204_v38, %v4690_v29  ;;  %5208 = vadd.xlane.f32.xlu0 %v5077_v3  ;;  %v4691_v54 = vmul.f32 0.01, %v4207_v19 }
 0x4cd   : > { %v4821_v60 = vmax.f32 %v4215_v53, %v4693_v48  ;;  %v4060_v2 = vpack.c.bf16 %v3991_v23, %v3990_v35  ;;  %v4061_v31 = vpack.c.bf16 %v3993_v13, %v3992_v17  ;;  %v5013_v6 = vmul.bf16 %v10630_v25, %v4941_v5 }
 0x4ce   : > { %v3995_v32 = vmax.f32 %v3719_v27, %v3867_v43  ;;  %v8681_v57 = vpop.f32.mrb[252].mxu1  ;;  %v8713_v40 = vpop.f32.mrb[140].mxu0  ;;  %v4819_v36 = vmax.f32 %v4207_v19, %v4691_v54  ;;  %v5012_v23 = vmul.bf16 %v10630_v25, %v4940_v24  ;;  %v3997_v54 = vmax.f32 %v10677_v39, %v3869_v28 }
 0x4cf   : > { %v4943_v12 = vpack.c.bf16 %v4821_v60, %v4820_v37  ;;  %8815 = vmatprep.mubr.bf16.mxu0 %v4060_v2  ;;  %v10700_v15 = vadd.f32 %v10570_v11, %v8681_v57  ;;  %v4228_v38 = vadd.f32 %v8713_v40, %v10612_v1  ;;  %v3731_v53 = vpop.f32.mrb[253].mxu1  ;;  %v4219_v29 = vpop.f32.mrb[141].mxu0  ;;  %v5080_v35 = vunpack.c.l.bf16 %v5013_v6 }
 0x4d0   : > { %8816 = vmatmul.mubr.bf16.gmra.mrb[244].mxu0 %v4061_v31  ;;  %v10704_v17 = vadd.f32 %v10570_v11, %v3731_v53  ;;  %v4220_v13 = vadd.f32 %v10612_v1, %v4219_v29  ;;  %v8682_v59 = vpop.f32.mrb[254].mxu1  ;;  %v8714_v5 = vpop.f32.mrb[142].mxu0  ;;  %v4942_v27 = vpack.c.bf16 %v4819_v36, %v4818_v18  ;;  %5202 = vadd.xlane.f32.xlu0 %v5074_v52  ;;  %v5081_v39 = vunpack.c.h.bf16 %v5013_v6 }
 0x4d1   : > { %v3872_v37 = vmul.f32 0.01, %v10700_v15  ;;  %v4696_v48 = vmul.f32 0.01, %v4228_v38  ;;  %v3743_v3 = vadd.f32 %v10570_v11, %v8682_v59  ;;  %v4222_v19 = vpop.f32.mrb[143].mxu0  ;;  %v3734_v43 = vpop.f32.mrb[255].mxu1  ;;  %5214 = vadd.xlane.f32.xlu1 %v5080_v35  ;;  %v4231_v31 = vadd.f32 %v8714_v5, %v10612_v1 }
 0x4d2   : > { %v10710_v60 = vpop.permute.xlu0 %5928  ;;  %v4694_v2 = vmul.f32 0.01, %v4220_v13  ;;  %v4223_v57 = vadd.f32 %v10612_v1, %v4222_v19  ;;  %v3870_v24 = vmul.f32 0.01, %v10704_v17  ;;  %v5078_v59 = vunpack.c.l.bf16 %v5012_v23  ;;  %v10717_v14 = vpop.permute.xlu1 %5932 }
 0x4d3   : > { %12228 = vst [vmem:[#allocation75_spill] sm:$0xff] %v10710_v60  ;;  %v4000_v18 = vmax.f32 %v10700_v15, %v3872_v37  ;;  %v4824_v52 = vmax.f32 %v4228_v38, %v4696_v48  ;;  %v3873_v40 = vmul.f32 0.01, %v3743_v3  ;;  %v4697_v53 = vmul.f32 0.01, %v4231_v31  ;;  %12229 = vst [vmem:[#allocation76_spill] sm:$0xff] %v10717_v14 }
 0x4d4   : > { %v4822_v36 = vmax.f32 %v4220_v13, %v4694_v2  ;;  %v4695_v29 = vmul.f32 0.01, %v4223_v57  ;;  %v3735_v28 = vadd.f32 %v10570_v11, %v3734_v43  ;;  %v4062_v35 = vpack.c.bf16 %v3995_v32, %v3994_v61  ;;  %5216 = vadd.xlane.f32.xlu0 %v5081_v39 }
 0x4d5   : > { %v4001_v60 = vmax.f32 %v3743_v3, %v3873_v40  ;;  %v4825_v5 = vmax.f32 %v4231_v31, %v4697_v53  ;;  %5210 = vadd.xlane.f32.xlu1 %v5078_v59  ;;  %v4063_v19 = vpack.c.bf16 %v3997_v54, %v3996_v30  ;;  %v5015_v15 = vmul.bf16 %v10630_v25, %v4943_v12 }
 0x4d6   : > { %v4823_v22 = vmax.f32 %v4223_v57, %v4695_v29  ;;  %v8717_v38 = vpop.f32.mrb[144].mxu0  ;;  %v3998_v37 = vmax.f32 %v10704_v17, %v3870_v24  ;;  %v3871_v13 = vmul.f32 0.01, %v3735_v28  ;;  %8819 = vmatprep.mubr.bf16.mxu0 %v4062_v35  ;;  %v5014_v6 = vmul.bf16 %v10630_v25, %v4942_v27  ;;  %v10724_v3 = vpop.permute.xlu0 %5939 }
 0x4d7   : > { %v4244_v48 = vadd.f32 %v8717_v38, %v10612_v1  ;;  %v4235_v2 = vpop.f32.mrb[145].mxu0  ;;  %12230 = vst [vmem:[#allocation77_spill] sm:$0xff] %v10724_v3  ;;  %v4945_v11 = vpack.c.bf16 %v4825_v5, %v4824_v52  ;;  %v5084_v32 = vunpack.c.l.bf16 %v5015_v15  ;;  %v5079_v54 = vunpack.c.h.bf16 %v5012_v23  ;;  %v10729_v53 = vpop.permute.xlu1 %5943 }
 0x4d8   : > { %v4944_v61 = vpack.c.bf16 %v4823_v22, %v4822_v36  ;;  %8820 = vmatmul.mubr.bf16.gmra.mrb[248].mxu0 %v4063_v19  ;;  %v4236_v30 = vadd.f32 %v10612_v1, %v4235_v2  ;;  %v8718_v12 = vpop.f32.mrb[146].mxu0  ;;  %v3999_v43 = vmax.f32 %v3735_v28, %v3871_v13  ;;  %v4065_v27 = vpack.c.bf16 %v4001_v60, %v4000_v18 }
 0x4d9   : > { %v4700_v17 = vmul.f32 0.01, %v4244_v48  ;;  %v4247_v31 = vadd.f32 %v8718_v12, %v10612_v1  ;;  %v4238_v57 = vpop.f32.mrb[147].mxu0  ;;  %5222 = vadd.xlane.f32.xlu1 %v5084_v32  ;;  %12231 = vst [vmem:[#allocation78_spill] sm:$0xff] %v10729_v53  ;;  %5212 = vadd.xlane.f32.xlu0 %v5079_v54  ;;  %v5017_v36 = vmul.bf16 %v10630_v25, %v4945_v11  ;;  %v5082_v59 = vunpack.c.l.bf16 %v5014_v6 }
 0x4da   : > { %v4698_v24 = vmul.f32 0.01, %v4236_v30  ;;  %v4239_v40 = vadd.f32 %v10612_v1, %v4238_v57  ;;  %v4064_v52 = vpack.c.bf16 %v3999_v43, %v3998_v37  ;;  %v5085_v28 = vunpack.c.h.bf16 %v5015_v15  ;;  %v10732_v35 = vpop.permute.xlu0 %5947 }
 0x4db   : > { %v4701_v22 = vmul.f32 0.01, %v4247_v31  ;;  %v4828_v39 = vmax.f32 %v4244_v48, %v4700_v17  ;;  %12232 = vst [vmem:[#allocation79_spill] sm:$0xff] %v10732_v35  ;;  %v5088_v38 = vunpack.c.l.bf16 %v5017_v36  ;;  %v5016_v15 = vmul.bf16 %v10630_v25, %v4944_v61  ;;  %v10737_v32 = vpop.permute.xlu1 %5951 }
 0x4dc   : > { %v4699_v29 = vmul.f32 0.01, %v4239_v40  ;;  %8823 = vmatprep.mubr.bf16.mxu0 %v4064_v52  ;;  %v4826_v5 = vmax.f32 %v4236_v30, %v4698_v24  ;;  %12233 = vst [vmem:[#allocation80_spill] sm:$0xff] %v10737_v32  ;;  %v5083_v12 = vunpack.c.h.bf16 %v5014_v6 }
 0x4dd   : > { %v4829_v23 = vmax.f32 %v4247_v31, %v4701_v22  ;;  %5218 = vadd.xlane.f32.xlu1 %v5082_v59  ;;  %5224 = vadd.xlane.f32.xlu0 %v5085_v28  ;;  %v5086_v22 = vunpack.c.l.bf16 %v5016_v15 }
 0x4de   : > { %v4827_v19 = vmax.f32 %v4239_v40, %v4699_v29  ;;  %v8721_v60 = vpop.f32.mrb[148].mxu0  ;;  %v10742_v40 = vpop.permute.xlu0 %5955  ;;  %v5089_v29 = vunpack.c.h.bf16 %v5017_v36 }
 0x4df   : > { %v4947_v18 = vpack.c.bf16 %v4829_v23, %v4828_v39  ;;  %v4260_v13 = vadd.f32 %v8721_v60, %v10612_v1  ;;  %v4251_v37 = vpop.f32.mrb[149].mxu0  ;;  %12234 = vst [vmem:[#allocation81_spill] sm:$0xff] %v10742_v40  ;;  %v10744_v28 = vpop.permute.xlu1 %5959 }
 0x4e0   : > { %v4946_v2 = vpack.c.bf16 %v4827_v19, %v4826_v5  ;;  %8824 = vmatmul.mubr.bf16.gmra.mrb[252].mxu0 %v4065_v27  ;;  %v4252_v11 = vadd.f32 %v10612_v1, %v4251_v37  ;;  %v8722_v48 = vpop.f32.mrb[150].mxu0  ;;  %12235 = vst [vmem:[#allocation82_spill] sm:$0xff] %v10744_v28 }
 0x4e1   : > { %v4704_v30 = vmul.f32 0.01, %v4260_v13  ;;  %v4263_v43 = vadd.f32 %v8722_v48, %v10612_v1  ;;  %v4254_v54 = vpop.f32.mrb[151].mxu0  ;;  %5230 = vadd.xlane.f32.xlu1 %v5088_v38  ;;  %v5019_v57 = vmul.bf16 %v10630_v25, %v4947_v18  ;;  %5220 = vadd.xlane.f32.xlu0 %v5083_v12  ;;  %v5087_v48 = vunpack.c.h.bf16 %v5016_v15 }
 0x4e2   : > { %v4702_v17 = vmul.f32 0.01, %v4252_v11  ;;  %v4255_v31 = vadd.f32 %v10612_v1, %v4254_v54 }
 0x4e3   : > { %v4705_v24 = vmul.f32 0.01, %v4263_v43  ;;  %v4832_v61 = vmax.f32 %v4260_v13, %v4704_v30  ;;  %v5092_v39 = vunpack.c.l.bf16 %v5019_v57  ;;  %v5018_v13 = vmul.bf16 %v10630_v25, %v4946_v2  ;;  %v10750_v30 = vpop.permute.xlu0 %5963 }
 0x4e4   : > { %v4703_v27 = vmul.f32 0.01, %v4255_v31  ;;  %v4830_v6 = vmax.f32 %v4252_v11, %v4702_v17  ;;  %12236 = vst [vmem:[#allocation83_spill] sm:$0xff] %v10750_v30 }
 0x4e5   : > { %v4833_v52 = vmax.f32 %v4263_v43, %v4705_v24  ;;  %5226 = vadd.xlane.f32.xlu1 %v5086_v22  ;;  %5232 = vadd.xlane.f32.xlu0 %v5089_v29  ;;  %v10754_v22 = vpop.permute.xlu1 %5967 }
 0x4e6   : > { %v4831_v59 = vmax.f32 %v4255_v31, %v4703_v27  ;;  %v8725_v23 = vpop.f32.mrb[152].mxu0  ;;  %v5090_v27 = vunpack.c.l.bf16 %v5018_v13  ;;  %12237 = vst [vmem:[#allocation84_spill] sm:$0xff] %v10754_v22 }
 0x4e7   : > { %v4949_v5 = vpack.c.bf16 %v4833_v52, %v4832_v61  ;;  %v4276_v19 = vadd.f32 %v8725_v23, %v10612_v1  ;;  %v4267_v38 = vpop.f32.mrb[153].mxu0  ;;  %v5093_v61 = vunpack.c.h.bf16 %v5019_v57  ;;  %v5091_v57 = vunpack.c.h.bf16 %v5018_v13 }
 0x4e8   : > { %v4948_v60 = vpack.c.bf16 %v4831_v59, %v4830_v6  ;;  %v4268_v18 = vadd.f32 %v10612_v1, %v4267_v38  ;;  %v8726_v37 = vpop.f32.mrb[154].mxu0 }
 0x4e9   : > { %v4708_v36 = vmul.f32 0.01, %v4276_v19  ;;  %v4279_v11 = vadd.f32 %v8726_v37, %v10612_v1  ;;  %v4270_v12 = vpop.f32.mrb[155].mxu0  ;;  %5238 = vadd.xlane.f32.xlu1 %v5092_v39  ;;  %v5021_v17 = vmul.bf16 %v10630_v25, %v4949_v5  ;;  %5228 = vadd.xlane.f32.xlu0 %v5087_v48  ;;  %v10757_v5 = vpop.permute.xlu0 %5971 }
 0x4ea   : > { %v4706_v43 = vmul.f32 0.01, %v4268_v18  ;;  %v4271_v54 = vadd.f32 %v10612_v1, %v4270_v12  ;;  %12238 = vst [vmem:[#allocation85_spill] sm:$0xff] %v10757_v5 }
 0x4eb   : > { %v4709_v31 = vmul.f32 0.01, %v4279_v11  ;;  %v4836_v2 = vmax.f32 %v4276_v19, %v4708_v36  ;;  %v5096_v6 = vunpack.c.l.bf16 %v5021_v17  ;;  %v5020_v19 = vmul.bf16 %v10630_v25, %v4948_v60 }
 0x4ec   : > { %v4707_v24 = vmul.f32 0.01, %v4271_v54  ;;  %v4834_v52 = vmax.f32 %v4268_v18, %v4706_v43  ;;  %v9242_v36 = vmov 0  }
 0x4ed   : > { %v4837_v15 = vmax.f32 %v4279_v11, %v4709_v31  ;;  %5234 = vadd.xlane.f32.xlu1 %v5090_v27  ;;  %5240 = vadd.xlane.f32.xlu0 %v5093_v61  ;;  %v10764_v27 = vpop.permute.xlu1 %5975  ;;  %v5094_v60 = vunpack.c.l.bf16 %v5020_v19  ;;  %v10766_v13 = vpop.permute.xlu0 %5979 }
 0x4ee   : > { %v4835_v29 = vmax.f32 %v4271_v54, %v4707_v24  ;;  %v8729_v59 = vpop.f32.mrb[156].mxu0  ;;  %8950 = vset.pattern.permute.xlu1 %v9242_v36  ;;  %8951 = vset.pattern.permute.xlu0 %v9242_v36  ;;  %12239 = vst [vmem:[#allocation86_spill] sm:$0xff] %v10764_v27  ;;  %12240 = vst [vmem:[#allocation87_spill] sm:$0xff] %v10766_v13 }
 0x4ef   : > { %v4951_v39 = vpack.c.bf16 %v4837_v15, %v4836_v2  ;;  %v4292_v23 = vadd.f32 %v8729_v59, %v10612_v1  ;;  %v4283_v38 = vpop.f32.mrb[157].mxu0 }
 0x4f0   : > { %v4950_v37 = vpack.c.bf16 %v4835_v29, %v4834_v52  ;;  %v4284_v48 = vadd.f32 %v10612_v1, %v4283_v38  ;;  %v8730_v12 = vpop.f32.mrb[158].mxu0  ;;  %v5097_v29 = vunpack.c.h.bf16 %v5021_v17  ;;  %v5095_v17 = vunpack.c.h.bf16 %v5020_v19 }
 0x4f1   : > { %v4712_v18 = vmul.f32 0.01, %v4292_v23  ;;  %v4295_v11 = vadd.f32 %v8730_v12, %v10612_v1  ;;  %v4286_v43 = vpop.f32.mrb[159].mxu0  ;;  %5246 = vadd.xlane.f32.xlu1 %v5096_v6  ;;  %v5023_v24 = vmul.bf16 %v10630_v25, %v4951_v39  ;;  %5236 = vadd.xlane.f32.xlu0 %v5091_v57 }
 0x4f2   : > { %v4710_v54 = vmul.f32 0.01, %v4284_v48  ;;  %v4287_v31 = vadd.f32 %v10612_v1, %v4286_v43 }
 0x4f3   : > { %v4713_v2 = vmul.f32 0.01, %v4295_v11  ;;  %v4840_v61 = vmax.f32 %v4292_v23, %v4712_v18  ;;  %v5100_v6 = vunpack.c.l.bf16 %v5023_v24  ;;  %v5022_v23 = vmul.bf16 %v10630_v25, %v4950_v37  ;;  %v10771_v18 = vpop.permute.xlu1 %5983 }
 0x4f4   : > { %v4711_v15 = vmul.f32 0.01, %v4287_v31  ;;  %v4838_v59 = vmax.f32 %v4284_v48, %v4710_v54  ;;  %12241 = vst [vmem:[#allocation88_spill] sm:$0xff] %v10771_v18 }
 0x4f5   : > { %v4841_v52 = vmax.f32 %v4295_v11, %v4713_v2  ;;  %5242 = vadd.xlane.f32.xlu1 %v5094_v60  ;;  %5248 = vadd.xlane.f32.xlu0 %v5097_v29  ;;  %v5098_v29 = vunpack.c.l.bf16 %v5022_v23 }
 0x4f6   : > { %v4839_v38 = vmax.f32 %v4287_v31, %v4711_v15  ;;  %v8733_v12 = vpop.f32.mrb[160].mxu0 }
 0x4f7   : > { %v4953_v36 = vpack.c.bf16 %v4841_v52, %v4840_v61  ;;  %v4308_v39 = vadd.f32 %v8733_v12, %v10612_v1  ;;  %v4299_v43 = vpop.f32.mrb[161].mxu0  ;;  %v10776_v61 = vpop.permute.xlu0 %5987 }
 0x4f8   : > { %v4952_v3 = vpack.c.bf16 %v4839_v38, %v4838_v59  ;;  %v4300_v57 = vadd.f32 %v10612_v1, %v4299_v43  ;;  %v8734_v32 = vpop.f32.mrb[162].mxu0  ;;  %12242 = vst [vmem:[#allocation89_spill] sm:$0xff] %v10776_v61  ;;  %v5101_v38 = vunpack.c.h.bf16 %v5023_v24 }
 0x4f9   : > { %v4716_v11 = vmul.f32 0.01, %v4308_v39  ;;  %v4311_v48 = vadd.f32 %v8734_v32, %v10612_v1  ;;  %v4302_v54 = vpop.f32.mrb[163].mxu0  ;;  %5254 = vadd.xlane.f32.xlu1 %v5100_v6  ;;  %v5025_v15 = vmul.bf16 %v10630_v25, %v4953_v36  ;;  %5244 = vadd.xlane.f32.xlu0 %v5095_v17  ;;  %v10778_v6 = vpop.permute.xlu1 %5991 }
 0x4fa   : > { %v4714_v31 = vmul.f32 0.01, %v4300_v57  ;;  %v4303_v2 = vadd.f32 %v10612_v1, %v4302_v54  ;;  %12243 = vst [vmem:[#allocation90_spill] sm:$0xff] %v10778_v6 }
 0x4fb   : > { %v4717_v60 = vmul.f32 0.01, %v4311_v48  ;;  %v4844_v37 = vmax.f32 %v4308_v39, %v4716_v11  ;;  %v5104_v32 = vunpack.c.l.bf16 %v5025_v15  ;;  %v5024_v39 = vmul.bf16 %v10630_v25, %v4952_v3 }
 0x4fc   : > { %v4715_v52 = vmul.f32 0.01, %v4303_v2  ;;  %v4842_v19 = vmax.f32 %v4300_v57, %v4714_v31  ;;  %v5099_v11 = vunpack.c.h.bf16 %v5022_v23  ;;  %v10784_v31 = vpop.permute.xlu0 %5995 }
 0x4fd   : > { %v4845_v59 = vmax.f32 %v4311_v48, %v4717_v60  ;;  %5250 = vadd.xlane.f32.xlu1 %v5098_v29  ;;  %5256 = vadd.xlane.f32.xlu0 %v5101_v38  ;;  %12244 = vst [vmem:[#allocation91_spill] sm:$0xff] %v10784_v31  ;;  %v10788_v38 = vpop.permute.xlu1 %5999 }
 0x4fe   : > { %v4843_v12 = vmax.f32 %v4303_v2, %v4715_v52  ;;  %v8737_v43 = vpop.f32.mrb[164].mxu0  ;;  %12245 = vst [vmem:[#allocation92_spill] sm:$0xff] %v10788_v38 }
 0x4ff   : > { %v4955_v27 = vpack.c.bf16 %v4845_v59, %v4844_v37  ;;  %v4324_v36 = vadd.f32 %v8737_v43, %v10612_v1  ;;  %v4315_v17 = vpop.f32.mrb[165].mxu0  ;;  %v5102_v59 = vunpack.c.l.bf16 %v5024_v39 }
 0x500   : > { %v4954_v54 = vpack.c.bf16 %v4843_v12, %v4842_v19  ;;  %v4316_v61 = vadd.f32 %v10612_v1, %v4315_v17  ;;  %v8738_v35 = vpop.f32.mrb[166].mxu0  ;;  %v5105_v19 = vunpack.c.h.bf16 %v5025_v15 }
 0x501   : > { %v4720_v24 = vmul.f32 0.01, %v4324_v36  ;;  %v4327_v57 = vadd.f32 %v8738_v35, %v10612_v1  ;;  %v4318_v48 = vpop.f32.mrb[167].mxu0  ;;  %5262 = vadd.xlane.f32.xlu1 %v5104_v32  ;;  %v5027_v52 = vmul.bf16 %v10630_v25, %v4955_v27  ;;  %5252 = vadd.xlane.f32.xlu0 %v5099_v11  ;;  %v10791_v27 = vpop.permute.xlu0 %6006 }
 0x502   : > { %v4718_v2 = vmul.f32 0.01, %v4316_v61  ;;  %v4319_v60 = vadd.f32 %v10612_v1, %v4318_v48  ;;  %12246 = vst [vmem:[#allocation93_spill] sm:$0xff] %v10791_v27 }
 0x503   : > { %v4721_v29 = vmul.f32 0.01, %v4327_v57  ;;  %v4848_v3 = vmax.f32 %v4324_v36, %v4720_v24  ;;  %v5108_v43 = vunpack.c.l.bf16 %v5027_v52  ;;  %v5026_v36 = vmul.bf16 %v10630_v25, %v4954_v54 }
 0x504   : > { %v4719_v37 = vmul.f32 0.01, %v4319_v60  ;;  %v4846_v12 = vmax.f32 %v4316_v61, %v4718_v2  ;;  %v5103_v24 = vunpack.c.h.bf16 %v5024_v39  ;;  %v5109_v54 = vunpack.c.h.bf16 %v5027_v52 }
 0x505   : > { %v4849_v23 = vmax.f32 %v4327_v57, %v4721_v29  ;;  %5258 = vadd.xlane.f32.xlu1 %v5102_v59  ;;  %5264 = vadd.xlane.f32.xlu0 %v5105_v19  ;;  %v10800_v39 = vpop.permute.xlu0 %6014  ;;  %v5107_v52 = vunpack.c.h.bf16 %v5026_v36 }
 0x506   : > { %v4847_v35 = vmax.f32 %v4319_v60, %v4719_v37  ;;  %v8741_v17 = vpop.f32.mrb[168].mxu0  ;;  %v10798_v37 = vpop.permute.xlu1 %6010  ;;  %12248 = vst [vmem:[#allocation95_spill] sm:$0xff] %v10800_v39 }
 0x507   : > { %v4957_v32 = vpack.c.bf16 %v4849_v23, %v4848_v3  ;;  %v4340_v48 = vadd.f32 %v8741_v17, %v10612_v1  ;;  %v4331_v6 = vpop.f32.mrb[169].mxu0  ;;  %12247 = vst [vmem:[#allocation94_spill] sm:$0xff] %v10798_v37 }
 0x508   : > { %v4956_v11 = vpack.c.bf16 %v4847_v35, %v4846_v12  ;;  %v4332_v31 = vadd.f32 %v10612_v1, %v4331_v6  ;;  %v8742_v5 = vpop.f32.mrb[170].mxu0  ;;  %v5106_v6 = vunpack.c.l.bf16 %v5026_v36 }
 0x509   : > { %v4724_v15 = vmul.f32 0.01, %v4340_v48  ;;  %v4343_v61 = vadd.f32 %v8742_v5, %v10612_v1  ;;  %v4334_v57 = vpop.f32.mrb[171].mxu0  ;;  %5270 = vadd.xlane.f32.xlu1 %v5108_v43  ;;  %v5029_v29 = vmul.bf16 %v10630_v25, %v4957_v32  ;;  %5260 = vadd.xlane.f32.xlu0 %v5103_v24 }
 0x50a   : > { %v4722_v2 = vmul.f32 0.01, %v4332_v31  ;;  %v4335_v60 = vadd.f32 %v10612_v1, %v4334_v57 }
 0x50b   : > { %v4725_v59 = vmul.f32 0.01, %v4343_v61  ;;  %v4852_v23 = vmax.f32 %v4340_v48, %v4724_v15  ;;  %v5112_v35 = vunpack.c.l.bf16 %v5029_v29  ;;  %v5028_v48 = vmul.bf16 %v10630_v25, %v4956_v11  ;;  %v10805_v15 = vpop.permute.xlu1 %6018 }
 0x50c   : > { %v4723_v3 = vmul.f32 0.01, %v4335_v60  ;;  %v4850_v12 = vmax.f32 %v4332_v31, %v4722_v2  ;;  %12249 = vst [vmem:[#allocation96_spill] sm:$0xff] %v10805_v15 }
 0x50d   : > { %v4853_v19 = vmax.f32 %v4343_v61, %v4725_v59  ;;  %5266 = vadd.xlane.f32.xlu1 %v5106_v6  ;;  %5272 = vadd.xlane.f32.xlu0 %v5109_v54  ;;  %v5110_v54 = vunpack.c.l.bf16 %v5028_v48 }
 0x50e   : > { %v4851_v5 = vmax.f32 %v4335_v60, %v4723_v3  ;;  %v8745_v43 = vpop.f32.mrb[172].mxu0 }
 0x50f   : > { %v4959_v17 = vpack.c.bf16 %v4853_v19, %v4852_v23  ;;  %v4356_v32 = vadd.f32 %v8745_v43, %v10612_v1  ;;  %v4347_v57 = vpop.f32.mrb[173].mxu0  ;;  %v10810_v23 = vpop.permute.xlu0 %6022 }
 0x510   : > { %v4958_v38 = vpack.c.bf16 %v4851_v5, %v4850_v12  ;;  %v4348_v24 = vadd.f32 %v10612_v1, %v4347_v57  ;;  %v8746_v27 = vpop.f32.mrb[174].mxu0  ;;  %12250 = vst [vmem:[#allocation97_spill] sm:$0xff] %v10810_v23  ;;  %v5113_v5 = vunpack.c.h.bf16 %v5029_v29 }
 0x511   : > { %v4728_v61 = vmul.f32 0.01, %v4356_v32  ;;  %v4359_v31 = vadd.f32 %v8746_v27, %v10612_v1  ;;  %v4350_v2 = vpop.f32.mrb[175].mxu0  ;;  %5278 = vadd.xlane.f32.xlu1 %v5112_v35  ;;  %v5031_v3 = vmul.bf16 %v10630_v25, %v4959_v17  ;;  %5268 = vadd.xlane.f32.xlu0 %v5107_v52  ;;  %v10812_v35 = vpop.permute.xlu1 %6026 }
 0x512   : > { %v4726_v60 = vmul.f32 0.01, %v4348_v24  ;;  %v4351_v59 = vadd.f32 %v10612_v1, %v4350_v2  ;;  %12251 = vst [vmem:[#allocation98_spill] sm:$0xff] %v10812_v35 }
 0x513   : > { %v4729_v6 = vmul.f32 0.01, %v4359_v31  ;;  %v4856_v11 = vmax.f32 %v4356_v32, %v4728_v61  ;;  %v5116_v27 = vunpack.c.l.bf16 %v5031_v3  ;;  %v5030_v32 = vmul.bf16 %v10630_v25, %v4958_v38 }
 0x514   : > { %v4727_v19 = vmul.f32 0.01, %v4351_v59  ;;  %v4854_v36 = vmax.f32 %v4348_v24, %v4726_v60  ;;  %v5111_v61 = vunpack.c.h.bf16 %v5028_v48  ;;  %v10818_v60 = vpop.permute.xlu0 %6030 }
 0x515   : > { %v4857_v12 = vmax.f32 %v4359_v31, %v4729_v6  ;;  %5274 = vadd.xlane.f32.xlu1 %v5110_v54  ;;  %5280 = vadd.xlane.f32.xlu0 %v5113_v5  ;;  %12252 = vst [vmem:[#allocation99_spill] sm:$0xff] %v10818_v60  ;;  %v10822_v5 = vpop.permute.xlu1 %6034 }
 0x516   : > { %v4855_v43 = vmax.f32 %v4351_v59, %v4727_v19  ;;  %v8749_v57 = vpop.f32.mrb[176].mxu0  ;;  %12253 = vst [vmem:[#allocation100_spill] sm:$0xff] %v10822_v5 }
 0x517   : > { %v4961_v39 = vpack.c.bf16 %v4857_v12, %v4856_v11  ;;  %v4372_v17 = vadd.f32 %v8749_v57, %v10612_v1  ;;  %v4363_v52 = vpop.f32.mrb[177].mxu0  ;;  %v5114_v12 = vunpack.c.l.bf16 %v5030_v32 }
 0x518   : > { %v4960_v2 = vpack.c.bf16 %v4855_v43, %v4854_v36  ;;  %v4364_v23 = vadd.f32 %v10612_v1, %v4363_v52  ;;  %v8750_v37 = vpop.f32.mrb[178].mxu0  ;;  %v5117_v36 = vunpack.c.h.bf16 %v5031_v3 }
 0x519   : > { %v4732_v29 = vmul.f32 0.01, %v4372_v17  ;;  %v4375_v24 = vadd.f32 %v8750_v37, %v10612_v1  ;;  %v4366_v31 = vpop.f32.mrb[179].mxu0  ;;  %5286 = vadd.xlane.f32.xlu1 %v5116_v27  ;;  %v5033_v19 = vmul.bf16 %v10630_v25, %v4961_v39  ;;  %5276 = vadd.xlane.f32.xlu0 %v5111_v61  ;;  %v10825_v39 = vpop.permute.xlu0 %6038 }
 0x51a   : > { %v4730_v59 = vmul.f32 0.01, %v4364_v23  ;;  %v4367_v6 = vadd.f32 %v10612_v1, %v4366_v31  ;;  %12254 = vst [vmem:[#allocation101_spill] sm:$0xff] %v10825_v39 }
 0x51b   : > { %v4733_v54 = vmul.f32 0.01, %v4375_v24  ;;  %v4860_v38 = vmax.f32 %v4372_v17, %v4732_v29  ;;  %v5120_v57 = vunpack.c.l.bf16 %v5033_v19  ;;  %v5032_v17 = vmul.bf16 %v10630_v25, %v4960_v2 }
 0x51c   : > { %v4731_v11 = vmul.f32 0.01, %v4367_v6  ;;  %v4858_v43 = vmax.f32 %v4364_v23, %v4730_v59  ;;  %v5115_v29 = vunpack.c.h.bf16 %v5030_v32  ;;  %v5121_v2 = vunpack.c.h.bf16 %v5033_v19 }
 0x51d   : > { %v4861_v48 = vmax.f32 %v4375_v24, %v4733_v54  ;;  %5282 = vadd.xlane.f32.xlu1 %v5114_v12  ;;  %5288 = vadd.xlane.f32.xlu0 %v5117_v36  ;;  %v10834_v32 = vpop.permute.xlu0 %6046  ;;  %v5119_v19 = vunpack.c.h.bf16 %v5032_v17 }
 0x51e   : > { %v4859_v37 = vmax.f32 %v4367_v6, %v4731_v11  ;;  %v8753_v52 = vpop.f32.mrb[180].mxu0  ;;  %v10832_v11 = vpop.permute.xlu1 %6042  ;;  %12256 = vst [vmem:[#allocation103_spill] sm:$0xff] %v10834_v32 }
 0x51f   : > { %v4963_v27 = vpack.c.bf16 %v4861_v48, %v4860_v38  ;;  %v4388_v31 = vadd.f32 %v8753_v52, %v10612_v1  ;;  %v4379_v35 = vpop.f32.mrb[181].mxu0  ;;  %12255 = vst [vmem:[#allocation102_spill] sm:$0xff] %v10832_v11 }
 0x520   : > { %v4962_v61 = vpack.c.bf16 %v4859_v37, %v4858_v43  ;;  %v4380_v60 = vadd.f32 %v10612_v1, %v4379_v35  ;;  %v8754_v15 = vpop.f32.mrb[182].mxu0  ;;  %v5118_v35 = vunpack.c.l.bf16 %v5032_v17 }
 0x521   : > { %v4736_v3 = vmul.f32 0.01, %v4388_v31  ;;  %v4391_v23 = vadd.f32 %v8754_v15, %v10612_v1  ;;  %v4382_v24 = vpop.f32.mrb[183].mxu0  ;;  %5294 = vadd.xlane.f32.xlu1 %v5120_v57  ;;  %v5035_v54 = vmul.bf16 %v10630_v25, %v4963_v27  ;;  %5284 = vadd.xlane.f32.xlu0 %v5115_v29 }
 0x522   : > { %v4734_v59 = vmul.f32 0.01, %v4380_v60  ;;  %v4383_v6 = vadd.f32 %v10612_v1, %v4382_v24 }
 0x523   : > { %v4737_v12 = vmul.f32 0.01, %v4391_v23  ;;  %v4864_v48 = vmax.f32 %v4388_v31, %v4736_v3  ;;  %v5124_v37 = vunpack.c.l.bf16 %v5035_v54  ;;  %v5034_v31 = vmul.bf16 %v10630_v25, %v4962_v61  ;;  %v10839_v3 = vpop.permute.xlu1 %6050 }
 0x524   : > { %v4735_v38 = vmul.f32 0.01, %v4383_v6  ;;  %v4862_v43 = vmax.f32 %v4380_v60, %v4734_v59  ;;  %12257 = vst [vmem:[#allocation104_spill] sm:$0xff] %v10839_v3  ;;  %v10844_v60 = vld [vmem:[%s12218_s26] ss:$0 sm:$0xff] }
 0x525   : > { %v4865_v36 = vmax.f32 %v4391_v23, %v4737_v12  ;;  %5290 = vadd.xlane.f32.xlu1 %v5118_v35  ;;  %5296 = vadd.xlane.f32.xlu0 %v5121_v2  ;;  %v10849_v35 = vpop.permute.xlu0 %6054 }
 0x526   : > { %v4863_v15 = vmax.f32 %v4383_v6, %v4735_v38  ;;  %v8757_v57 = vpop.f32.mrb[184].mxu0  ;;  %12258 = vst [vmem:[#allocation105_spill] sm:$0xff] %v10849_v35 }
 0x527   : > { %v4965_v52 = vpack.c.bf16 %v4865_v36, %v4864_v48  ;;  %v4404_v27 = vadd.f32 %v8757_v57, %v10612_v1  ;;  %v4395_v24 = vpop.f32.mrb[185].mxu0  ;;  %v5122_v48 = vunpack.c.l.bf16 %v5034_v31 }
 0x528   : > { %v4964_v11 = vpack.c.bf16 %v4863_v15, %v4862_v43  ;;  %v4396_v29 = vadd.f32 %v10612_v1, %v4395_v24  ;;  %v8758_v39 = vpop.f32.mrb[186].mxu0  ;;  %v5125_v43 = vunpack.c.h.bf16 %v5035_v54 }
 0x529   : > { %v4740_v23 = vmul.f32 0.01, %v4404_v27  ;;  %v4407_v59 = vadd.f32 %v10844_v60, %v8758_v39  ;;  %v4398_v6 = vpop.f32.mrb[187].mxu0  ;;  %5302 = vadd.xlane.f32.xlu1 %v5124_v37  ;;  %v5037_v1 = vmul.bf16 %v10630_v25, %v4965_v52  ;;  %5292 = vadd.xlane.f32.xlu0 %v5119_v19  ;;  %v10851_v37 = vpop.permute.xlu1 %6058 }
 0x52a   : > { %v4738_v12 = vmul.f32 0.01, %v4396_v29  ;;  %v4399_v38 = vadd.f32 %v10844_v60, %v4398_v6  ;;  %12259 = vst [vmem:[#allocation106_spill] sm:$0xff] %v10851_v37 }
 0x52b   : > { %v4741_v61 = vmul.f32 0.01, %v4407_v59  ;;  %v4868_v36 = vmax.f32 %v4404_v27, %v4740_v23  ;;  %v5128_v39 = vunpack.c.l.bf16 %v5037_v1  ;;  %v5036_v27 = vmul.bf16 %v10630_v25, %v4964_v11 }
 0x52c   : > { %v4739_v17 = vmul.f32 0.01, %v4399_v38  ;;  %v4866_v15 = vmax.f32 %v4396_v29, %v4738_v12  ;;  %v5123_v23 = vunpack.c.h.bf16 %v5034_v31  ;;  %v10857_v12 = vpop.permute.xlu0 %6062 }
 0x52d   : > { %v4869_v2 = vmax.f32 %v4407_v59, %v4741_v61  ;;  %5298 = vadd.xlane.f32.xlu1 %v5122_v48  ;;  %5304 = vadd.xlane.f32.xlu0 %v5125_v43  ;;  %12260 = vst [vmem:[#allocation107_spill] sm:$0xff] %v10857_v12  ;;  %v10861_v43 = vpop.permute.xlu1 %6066 }
 0x52e   : > { %v4867_v57 = vmax.f32 %v4399_v38, %v4739_v17  ;;  %v8761_v24 = vpop.f32.mrb[188].mxu0  ;;  %12261 = vst [vmem:[#allocation108_spill] sm:$0xff] %v10861_v43 }
 0x52f   : > { %v4967_v3 = vpack.c.bf16 %v4869_v2, %v4868_v36  ;;  %v4420_v52 = vadd.f32 %v10844_v60, %v8761_v24  ;;  %v4411_v19 = vpop.f32.mrb[189].mxu0  ;;  %v5126_v2 = vunpack.c.l.bf16 %v5036_v27 }
 0x530   : > { %v4966_v6 = vpack.c.bf16 %v4867_v57, %v4866_v15  ;;  %v4412_v35 = vadd.f32 %v10844_v60, %v4411_v19  ;;  %v8762_v32 = vpop.f32.mrb[190].mxu0  ;;  %v5129_v15 = vunpack.c.h.bf16 %v5037_v1 }
 0x531   : > { %v4744_v54 = vmul.f32 0.01, %v4420_v52  ;;  %v4423_v29 = vadd.f32 %v10844_v60, %v8762_v32  ;;  %v4414_v59 = vpop.f32.mrb[191].mxu0  ;;  %5310 = vadd.xlane.f32.xlu1 %v5128_v39  ;;  %v5039_v17 = vmul.bf16 %v10630_v25, %v4967_v3  ;;  %5300 = vadd.xlane.f32.xlu0 %v5123_v23  ;;  %v10864_v3 = vpop.permute.xlu0 %6073 }
 0x532   : > { %v4742_v38 = vmul.f32 0.01, %v4412_v35  ;;  %v4415_v61 = vadd.f32 %v10844_v60, %v4414_v59  ;;  %12262 = vst [vmem:[#allocation109_spill] sm:$0xff] %v10864_v3 }
 0x533   : > { %v4745_v48 = vmul.f32 0.01, %v4423_v29  ;;  %v4872_v11 = vmax.f32 %v4420_v52, %v4744_v54  ;;  %v5132_v24 = vunpack.c.l.bf16 %v5039_v17  ;;  %v5038_v52 = vmul.bf16 %v10630_v25, %v4966_v6 }
 0x534   : > { %v4743_v36 = vmul.f32 0.01, %v4415_v61  ;;  %v4870_v57 = vmax.f32 %v4412_v35, %v4742_v38  ;;  %v5127_v54 = vunpack.c.h.bf16 %v5036_v27  ;;  %v5133_v6 = vunpack.c.h.bf16 %v5039_v17 }
 0x535   : > { %v4873_v31 = vmax.f32 %v4423_v29, %v4745_v48  ;;  %5306 = vadd.xlane.f32.xlu1 %v5126_v2  ;;  %5312 = vadd.xlane.f32.xlu0 %v5129_v15  ;;  %v10873_v27 = vpop.permute.xlu0 %6081  ;;  %v5131_v17 = vunpack.c.h.bf16 %v5038_v52 }
 0x536   : > { %v4871_v32 = vmax.f32 %v4415_v61, %v4743_v36  ;;  %v8765_v19 = vpop.f32.mrb[192].mxu0  ;;  %v10871_v36 = vpop.permute.xlu1 %6077  ;;  %12264 = vst [vmem:[#allocation111_spill] sm:$0xff] %v10873_v27 }
 0x537   : > { %v4969_v39 = vpack.c.bf16 %v4873_v31, %v4872_v11  ;;  %v4436_v59 = vadd.f32 %v10844_v60, %v8765_v19  ;;  %v4427_v37 = vpop.f32.mrb[193].mxu0  ;;  %12263 = vst [vmem:[#allocation110_spill] sm:$0xff] %v10871_v36 }
 0x538   : > { %v4968_v23 = vpack.c.bf16 %v4871_v32, %v4870_v57  ;;  %v4428_v12 = vadd.f32 %v10844_v60, %v4427_v37  ;;  %v8766_v5 = vpop.f32.mrb[194].mxu0  ;;  %v5130_v37 = vunpack.c.l.bf16 %v5038_v52 }
 0x539   : > { %v4748_v1 = vmul.f32 0.01, %v4436_v59  ;;  %v4439_v35 = vadd.f32 %v10844_v60, %v8766_v5  ;;  %v4430_v29 = vpop.f32.mrb[195].mxu0  ;;  %5318 = vadd.xlane.f32.xlu1 %v5132_v24  ;;  %v5041_v48 = vmul.bf16 %v10630_v25, %v4969_v39  ;;  %5308 = vadd.xlane.f32.xlu0 %v5127_v54 }
 0x53a   : > { %v4746_v38 = vmul.f32 0.01, %v4428_v12  ;;  %v4431_v61 = vadd.f32 %v10844_v60, %v4430_v29 }
 0x53b   : > { %v4749_v2 = vmul.f32 0.01, %v4439_v35  ;;  %v4876_v31 = vmax.f32 %v4436_v59, %v4748_v1  ;;  %v5136_v32 = vunpack.c.l.bf16 %v5041_v48  ;;  %v5040_v59 = vmul.bf16 %v10630_v25, %v4968_v23  ;;  %v10878_v1 = vpop.permute.xlu1 %6085 }
 0x53c   : > { %v4747_v11 = vmul.f32 0.01, %v4431_v61  ;;  %v4874_v57 = vmax.f32 %v4428_v12, %v4746_v38  ;;  %12265 = vst [vmem:[#allocation112_spill] sm:$0xff] %v10878_v1 }
 0x53d   : > { %v4877_v15 = vmax.f32 %v4439_v35, %v4749_v2  ;;  %5314 = vadd.xlane.f32.xlu1 %v5130_v37  ;;  %5320 = vadd.xlane.f32.xlu0 %v5133_v6  ;;  %v5134_v6 = vunpack.c.l.bf16 %v5040_v59 }
 0x53e   : > { %v4875_v5 = vmax.f32 %v4431_v61, %v4747_v11  ;;  %v8769_v24 = vpop.f32.mrb[196].mxu0 }
 0x53f   : > { %v4971_v19 = vpack.c.bf16 %v4877_v15, %v4876_v31  ;;  %v4452_v39 = vadd.f32 %v10844_v60, %v8769_v24  ;;  %v4443_v29 = vpop.f32.mrb[197].mxu0  ;;  %v10883_v31 = vpop.permute.xlu0 %6089 }
 0x540   : > { %v4970_v3 = vpack.c.bf16 %v4875_v5, %v4874_v57  ;;  %v4444_v54 = vadd.f32 %v10844_v60, %v4443_v29  ;;  %v8770_v36 = vpop.f32.mrb[198].mxu0  ;;  %12266 = vst [vmem:[#allocation113_spill] sm:$0xff] %v10883_v31  ;;  %v5137_v5 = vunpack.c.h.bf16 %v5041_v48 }
 0x541   : > { %v4752_v35 = vmul.f32 0.01, %v4452_v39  ;;  %v4455_v12 = vadd.f32 %v10844_v60, %v8770_v36  ;;  %v4446_v38 = vpop.f32.mrb[199].mxu0  ;;  %5326 = vadd.xlane.f32.xlu1 %v5136_v32  ;;  %v5043_v11 = vmul.bf16 %v10630_v25, %v4971_v19  ;;  %5316 = vadd.xlane.f32.xlu0 %v5131_v17  ;;  %v10885_v32 = vpop.permute.xlu1 %6093 }
 0x542   : > { %v4750_v61 = vmul.f32 0.01, %v4444_v54  ;;  %v4447_v2 = vadd.f32 %v10844_v60, %v4446_v38  ;;  %12267 = vst [vmem:[#allocation114_spill] sm:$0xff] %v10885_v32 }
 0x543   : > { %v4753_v37 = vmul.f32 0.01, %v4455_v12  ;;  %v4880_v23 = vmax.f32 %v4452_v39, %v4752_v35  ;;  %v5140_v36 = vunpack.c.l.bf16 %v5043_v11  ;;  %v5042_v39 = vmul.bf16 %v10630_v25, %v4970_v3 }
 0x544   : > { %v4751_v15 = vmul.f32 0.01, %v4447_v2  ;;  %v4878_v52 = vmax.f32 %v4444_v54, %v4750_v61  ;;  %v5135_v35 = vunpack.c.h.bf16 %v5040_v59  ;;  %v10891_v61 = vpop.permute.xlu0 %6097 }
 0x545   : > { %v4881_v57 = vmax.f32 %v4455_v12, %v4753_v37  ;;  %5322 = vadd.xlane.f32.xlu1 %v5134_v6  ;;  %5328 = vadd.xlane.f32.xlu0 %v5137_v5  ;;  %12268 = vst [vmem:[#allocation115_spill] sm:$0xff] %v10891_v61  ;;  %v10895_v5 = vpop.permute.xlu1 %6101 }
 0x546   : > { %v4879_v24 = vmax.f32 %v4447_v2, %v4751_v15  ;;  %v8773_v29 = vpop.f32.mrb[200].mxu0  ;;  %12269 = vst [vmem:[#allocation116_spill] sm:$0xff] %v10895_v5 }
 0x547   : > { %v4973_v43 = vpack.c.bf16 %v4881_v57, %v4880_v23  ;;  %v4468_v19 = vadd.f32 %v10844_v60, %v8773_v29  ;;  %v4459_v17 = vpop.f32.mrb[201].mxu0  ;;  %v5138_v57 = vunpack.c.l.bf16 %v5042_v39 }
 0x548   : > { %v4972_v38 = vpack.c.bf16 %v4879_v24, %v4878_v52  ;;  %v4460_v31 = vadd.f32 %v10844_v60, %v4459_v17  ;;  %v8774_v1 = vpop.f32.mrb[202].mxu0  ;;  %v5141_v52 = vunpack.c.h.bf16 %v5043_v11 }
 0x549   : > { %v4756_v48 = vmul.f32 0.01, %v4468_v19  ;;  %v4471_v54 = vadd.f32 %v10844_v60, %v8774_v1  ;;  %v4462_v12 = vpop.f32.mrb[203].mxu0  ;;  %5334 = vadd.xlane.f32.xlu1 %v5140_v36  ;;  %v5045_v15 = vmul.bf16 %v10630_v25, %v4973_v43  ;;  %5324 = vadd.xlane.f32.xlu0 %v5135_v35  ;;  %v10898_v43 = vpop.permute.xlu0 %6105 }
 0x54a   : > { %v4754_v2 = vmul.f32 0.01, %v4460_v31  ;;  %v4463_v37 = vadd.f32 %v10844_v60, %v4462_v12  ;;  %12270 = vst [vmem:[#allocation117_spill] sm:$0xff] %v10898_v43 }
 0x54b   : > { %v4757_v6 = vmul.f32 0.01, %v4471_v54  ;;  %v4884_v3 = vmax.f32 %v4468_v19, %v4756_v48  ;;  %v5144_v29 = vunpack.c.l.bf16 %v5045_v15  ;;  %v5044_v19 = vmul.bf16 %v10630_v25, %v4972_v38 }
 0x54c   : > { %v4755_v23 = vmul.f32 0.01, %v4463_v37  ;;  %v4882_v24 = vmax.f32 %v4460_v31, %v4754_v2  ;;  %v5139_v48 = vunpack.c.h.bf16 %v5042_v39  ;;  %v5145_v38 = vunpack.c.h.bf16 %v5045_v15 }
 0x54d   : > { %v4885_v59 = vmax.f32 %v4471_v54, %v4757_v6  ;;  %5330 = vadd.xlane.f32.xlu1 %v5138_v57  ;;  %5336 = vadd.xlane.f32.xlu0 %v5141_v52  ;;  %v10907_v39 = vpop.permute.xlu0 %6113  ;;  %v5143_v15 = vunpack.c.h.bf16 %v5044_v19 }
 0x54e   : > { %v4883_v1 = vmax.f32 %v4463_v37, %v4755_v23  ;;  %v8777_v17 = vpop.f32.mrb[204].mxu0  ;;  %v10905_v23 = vpop.permute.xlu1 %6109  ;;  %12272 = vst [vmem:[#allocation119_spill] sm:$0xff] %v10907_v39 }
 0x54f   : > { %v4975_v36 = vpack.c.bf16 %v4885_v59, %v4884_v3  ;;  %v4484_v12 = vadd.f32 %v10844_v60, %v8777_v17  ;;  %v4475_v32 = vpop.f32.mrb[205].mxu0  ;;  %12271 = vst [vmem:[#allocation118_spill] sm:$0xff] %v10905_v23 }
 0x550   : > { %v4974_v35 = vpack.c.bf16 %v4883_v1, %v4882_v24  ;;  %v4476_v61 = vadd.f32 %v10844_v60, %v4475_v32  ;;  %v8778_v27 = vpop.f32.mrb[206].mxu0  ;;  %v5142_v32 = vunpack.c.l.bf16 %v5044_v19 }
 0x551   : > { %v4760_v11 = vmul.f32 0.01, %v4484_v12  ;;  %v4487_v31 = vadd.f32 %v10844_v60, %v8778_v27  ;;  %v4478_v54 = vpop.f32.mrb[207].mxu0  ;;  %5342 = vadd.xlane.f32.xlu1 %v5144_v29  ;;  %v5047_v6 = vmul.bf16 %v10630_v25, %v4975_v36  ;;  %5332 = vadd.xlane.f32.xlu0 %v5139_v48 }
 0x552   : > { %v4758_v2 = vmul.f32 0.01, %v4476_v61  ;;  %v4479_v37 = vadd.f32 %v10844_v60, %v4478_v54  ;;  %v5046_v23 = vmul.bf16 %v10630_v25, %v4974_v35 }
 0x553   : > { %v4761_v57 = vmul.f32 0.01, %v4487_v31  ;;  %v4888_v59 = vmax.f32 %v4484_v12, %v4760_v11  ;;  %v5148_v1 = vunpack.c.l.bf16 %v5047_v6  ;;  %v10915_v12 = vpop.permute.xlu1 %6117 }
 0x554   : > { %v4759_v3 = vmul.f32 0.01, %v4479_v37  ;;  %v4886_v24 = vmax.f32 %v4476_v61, %v4758_v2  ;;  %12273 = vst [vmem:[#allocation120_spill] sm:$0xff] %v10915_v12 }
 0x555   : > { %v4889_v52 = vmax.f32 %v4487_v31, %v4761_v57  ;;  %5338 = vadd.xlane.f32.xlu1 %v5142_v32  ;;  %5344 = vadd.xlane.f32.xlu0 %v5145_v38  ;;  %v10920_v32 = vpop.permute.xlu0 %6121  ;;  %v5149_v38 = vunpack.c.h.bf16 %v5047_v6  ;;  %v5147_v6 = vunpack.c.h.bf16 %v5046_v23 }
 0x556   : > { %v4887_v27 = vmax.f32 %v4479_v37, %v4759_v3  ;;  %v8781_v17 = vpop.f32.mrb[208].mxu0  ;;  %12274 = vst [vmem:[#allocation121_spill] sm:$0xff] %v10920_v32 }
 0x557   : > { %v10909_v29 = vpack.c.bf16 %v4889_v52, %v4888_v59  ;;  %v4500_v48 = vadd.f32 %v10844_v60, %v8781_v17  ;;  %v4491_v54 = vpop.f32.mrb[209].mxu0  ;;  %v5146_v52 = vunpack.c.l.bf16 %v5046_v23 }
 0x558   : > { %v10911_v36 = vpack.c.bf16 %v4887_v27, %v4886_v24  ;;  %v4492_v11 = vadd.f32 %v10844_v60, %v4491_v54  ;;  %v8782_v61 = vpop.f32.mrb[210].mxu0 }
 0x559   : > { %5350 = vadd.xlane.f32.xlu1 %v5148_v1  ;;  %v4764_v31 = vmul.f32 0.01, %v4500_v48  ;;  %v4503_v2 = vadd.f32 %v10844_v60, %v8782_v61  ;;  %v4494_v37 = vpop.f32.mrb[211].mxu0  ;;  %5340 = vadd.xlane.f32.xlu0 %v5143_v15  ;;  %v10922_v1 = vpop.permute.xlu1 %6125 }
 0x55a   : > { %v4762_v57 = vmul.f32 0.01, %v4492_v11  ;;  %v4495_v3 = vadd.f32 %v10844_v60, %v4494_v37  ;;  %12275 = vst [vmem:[#allocation122_spill] sm:$0xff] %v10922_v1 }
 0x55b   : > { %v4765_v59 = vmul.f32 0.01, %v4503_v2  ;;  %v4892_v19 = vmax.f32 %v4500_v48, %v4764_v31 }
 0x55c   : > { %v4763_v35 = vmul.f32 0.01, %v4495_v3  ;;  %v4890_v17 = vmax.f32 %v4492_v11, %v4762_v57 }
 0x55d   : > { %v4893_v24 = vmax.f32 %v4503_v2, %v4765_v59  ;;  %5346 = vadd.xlane.f32.xlu1 %v5146_v52  ;;  %5352 = vadd.xlane.f32.xlu0 %v5149_v38  ;;  %v10931_v59 = vpop.permute.xlu0 %6129 }
 0x55e   : > { %v8785_v27 = vpop.f32.mrb[212].mxu0  ;;  %v4891_v54 = vmax.f32 %v4495_v3, %v4763_v35  ;;  %12276 = vst [vmem:[#allocation123_spill] sm:$0xff] %v10931_v59  ;;  %v10934_v35 = vpop.permute.xlu1 %6133 }
 0x55f   : > { %v4516_v15 = vadd.f32 %v10844_v60, %v8785_v27  ;;  %v4507_v61 = vpop.f32.mrb[213].mxu0  ;;  %v10925_v37 = vpack.c.bf16 %v4893_v24, %v4892_v19  ;;  %12277 = vst [vmem:[#allocation124_spill] sm:$0xff] %v10934_v35  ;;  %v10936_v24 = vstv %s5458_s18  ;;  %s9146_s18 = sshll.u32 %s9243_s13, 4  ;;  %s9147_s18 = int_to_ptr.vmem [resolvable:$false] %s9146_s18 }
 0x560   : > { %v4508_v32 = vadd.f32 %v10844_v60, %v4507_v61  ;;  %v8786_v43 = vpop.f32.mrb[214].mxu0  ;;  %v10928_v12 = vpack.c.bf16 %v4891_v54, %v4890_v17  ;;  %s9148_s16 = scalar_lea.vmem %s9147_s18, 256  ;;  %p9149_p3 = scmp.lt.s32.totalorder %s12068_s9, %s9147_s18 }
 0x561   : > { %v4768_v48 = vmul.f32 0.01, %v4516_v15  ;;  %v4519_v31 = vadd.f32 %v10844_v60, %v8786_v43  ;;  %v4510_v2 = vpop.f32.mrb[215].mxu0  ;;  %5348 = vadd.xlane.f32.xlu0 %v5147_v6  ;;  %v5207_v27 = vpop.xlane.xlu0 %5206  ;;  %p9150_p7 = scmp.lt.s32.totalorder %s9148_s16, %s9142_s10 }
 0x562   : > { %v4766_v11 = vmul.f32 0.01, %v4508_v32  ;;  %v4511_v57 = vadd.f32 %v10844_v60, %v4510_v2  ;;  %v5462_v35 = vadd.f32 %v10936_v24, %v5207_v27 }
 0x563   : > { %v4769_v3 = vmul.f32 0.01, %v4519_v31  ;;  %v4896_v38 = vmax.f32 %v4516_v15, %v4768_v48  ;;  %p9151_p9 = por %p9150_p7, %p9149_p3 }
 0x564   : > { %v4767_v52 = vmul.f32 0.01, %v4511_v57  ;;  %v4894_v23 = vmax.f32 %v4508_v32, %v4766_v11 }
 0x565   : > { %v4897_v19 = vmax.f32 %v4519_v31, %v4769_v3  ;;  %v5205_v3 = vpop.xlane.xlu1 %5204  ;;  %p9152_p0 = pnand %p9151_p9, %p9145_p10 }
 0x566   : > { %v4895_v17 = vmax.f32 %v4511_v57, %v4767_v52  ;;  %v8789_v54 = vpop.f32.mrb[216].mxu0 }
 0x567   : > { %v10938_v43 = vpack.c.bf16 %v4897_v19, %v4896_v38  ;;  %v4532_v61 = vadd.f32 %v10844_v60, %v8789_v54  ;;  %v4523_v59 = vpop.f32.mrb[217].mxu0  ;;  %v6265_v38 = vmul.f32 %v10293_v41, %v5462_v35  ;;  %v5461_v19 = vadd.f32 %v10936_v24, %v5205_v3 }
 0x568   : > { %v10941_v1 = vpack.c.bf16 %v4895_v17, %v4894_v23  ;;  %v4524_v6 = vadd.f32 %v10844_v60, %v4523_v59  ;;  %v8790_v2 = vpop.f32.mrb[218].mxu0  ;;  %v5209_v59 = vpop.xlane.xlu0 %5208 }
 0x569   : > { %v4772_v15 = vmul.f32 0.01, %v4532_v61  ;;  %v4535_v48 = vadd.f32 %v10844_v60, %v8790_v2  ;;  %v4526_v31 = vpop.f32.mrb[219].mxu0  ;;  %v6264_v41 = vmul.f32 %v10286_v26, %v5461_v19  ;;  %v5463_v3 = vadd.f32 %v10936_v24, %v5209_v59 }
 0x56a   : > { %v4770_v32 = vmul.f32 0.01, %v4524_v6  ;;  %v4527_v11 = vadd.f32 %v10844_v60, %v4526_v31 }
 0x56b   : > { %v4773_v57 = vmul.f32 0.01, %v4535_v48  ;;  %v4900_v23 = vmax.f32 %v4532_v61, %v4772_v15  ;;  %v6266_v26 = vmul.f32 %v10302_v45, %v5463_v3 }
 0x56c   : > { %v4771_v52 = vmul.f32 0.01, %v4527_v11  ;;  %v4898_v54 = vmax.f32 %v4524_v6, %v4770_v32 }
 0x56d   : > { %v4901_v17 = vmax.f32 %v4535_v48, %v4773_v57 }
 0x56e   : > { %v4899_v39 = vmax.f32 %v4527_v11, %v4771_v52  ;;  %v8793_v27 = vpop.f32.mrb[220].mxu0  ;;  %6527 = vperm.xlu1 %8950, %v6265_v38   ;;  %v5203_v11 = vpop.xlane.xlu0 %5202 }
 0x56f   : > { %v10949_v5 = vpack.c.bf16 %v4901_v17, %v4900_v23  ;;  %v4548_v2 = vadd.f32 %v10844_v60, %v8793_v27  ;;  %v4539_v18 = vpop.f32.mrb[221].mxu0  ;;  %v5460_v19 = vadd.f32 %v10936_v24, %v5203_v11 }
 0x570   : > { %v10952_v13 = vpack.c.bf16 %v4899_v39, %v4898_v54  ;;  %v4540_v31 = vadd.f32 %v10844_v60, %v4539_v18  ;;  %v8794_v14 = vpop.f32.mrb[222].mxu0 }
 0x571   : > { %v4776_v35 = vmul.f32 0.01, %v4548_v2  ;;  %v4551_v61 = vadd.f32 %v10844_v60, %v8794_v14  ;;  %v4542_v15 = vpop.f32.mrb[223].mxu0 }
 0x572   : > { %v4774_v6 = vmul.f32 0.01, %v4540_v31  ;;  %v4543_v48 = vadd.f32 %v10844_v60, %v4542_v15  ;;  %6524 = vperm.xlu1 %8950, %v6264_v41   ;;  %v6263_v15 = vmul.f32 %v10280_v4, %v5460_v19 }
 0x573   : > { %v4777_v32 = vmul.f32 0.01, %v4551_v61  ;;  %v4904_v39 = vmax.f32 %v4548_v2, %v4776_v35 }
 0x574   : > { %v4775_v57 = vmul.f32 0.01, %v4543_v48  ;;  %v4902_v38 = vmax.f32 %v4540_v31, %v4774_v6 }
 0x575   : > { %v4905_v52 = vmax.f32 %v4551_v61, %v4777_v32 }
 0x576   : > { %v4903_v18 = vmax.f32 %v4543_v48, %v4775_v57  ;;  %v8797_v23 = vpop.f32.mrb[224].mxu0 }
 0x577   : > { %v10961_v14 = vpack.c.bf16 %v4905_v52, %v4904_v39  ;;  %v4564_v17 = vadd.f32 %v10844_v60, %v8797_v23  ;;  %v4555_v54 = vpop.f32.mrb[225].mxu0  ;;  %6530 = vperm.xlu0 %8951, %v6266_v26  }
 0x578   : > { %v10964_v27 = vpack.c.bf16 %v4903_v18, %v4902_v38  ;;  %v4556_v59 = vadd.f32 %v10844_v60, %v4555_v54  ;;  %v8798_v41 = vpop.f32.mrb[226].mxu0 }
 0x579   : > { %v4780_v2 = vmul.f32 0.01, %v4564_v17  ;;  %v4567_v31 = vadd.f32 %v10844_v60, %v8798_v41  ;;  %v4558_v35 = vpop.f32.mrb[227].mxu0 }
 0x57a   : > { %v4778_v61 = vmul.f32 0.01, %v4556_v59  ;;  %v4559_v45 = vadd.f32 %v10844_v60, %v4558_v35 }
 0x57b   : > { %v4781_v6 = vmul.f32 0.01, %v4567_v31  ;;  %v4908_v3 = vmax.f32 %v4564_v17, %v4780_v2  ;;  %6521 = vperm.xlu0 %8951, %v6263_v15  }
 0x57c   : > { %v4779_v48 = vmul.f32 0.01, %v4559_v45  ;;  %v4906_v11 = vmax.f32 %v4556_v59, %v4778_v61 }
 0x57d   : > { %v4909_v32 = vmax.f32 %v4567_v31, %v4781_v6 }
 0x57e   : > { %v4907_v57 = vmax.f32 %v4559_v45, %v4779_v48  ;;  %v8801_v39 = vpop.f32.mrb[228].mxu0 }
 0x57f   : > { %v10970_v52 = vpack.c.bf16 %v4909_v32, %v4908_v3  ;;  %v4580_v38 = vadd.f32 %v10844_v60, %v8801_v39  ;;  %v4571_v18 = vpop.f32.mrb[229].mxu0 }
 0x580   : > { %v10973_v23 = vpack.c.bf16 %v4907_v57, %v4906_v11  ;;  %v4572_v26 = vadd.f32 %v10844_v60, %v4571_v18  ;;  %v8802_v54 = vpop.f32.mrb[230].mxu0 }
 0x581   : > { %v4784_v41 = vmul.f32 0.01, %v4580_v38  ;;  %v4583_v4 = vadd.f32 %v10844_v60, %v8802_v54  ;;  %v4574_v19 = vpop.f32.mrb[231].mxu0 }
 0x582   : > { %v4782_v17 = vmul.f32 0.01, %v4572_v26  ;;  %v4575_v2 = vadd.f32 %v10844_v60, %v4574_v19 }
 0x583   : > { %v4785_v59 = vmul.f32 0.01, %v4583_v4  ;;  %v4912_v35 = vmax.f32 %v4580_v38, %v4784_v41 }
 0x584   : > { %v4783_v31 = vmul.f32 0.01, %v4575_v2  ;;  %v4910_v45 = vmax.f32 %v4572_v26, %v4782_v17 }
 0x585   : > { %v4913_v61 = vmax.f32 %v4583_v4, %v4785_v59 }
 0x586   : > { %v4911_v15 = vmax.f32 %v4575_v2, %v4783_v31  ;;  %v8805_v6 = vpop.f32.mrb[232].mxu0 }
 0x587   : > { %v10978_v48 = vpack.c.bf16 %v4913_v61, %v4912_v35  ;;  %v4596_v3 = vadd.f32 %v10844_v60, %v8805_v6  ;;  %v4587_v32 = vpop.f32.mrb[233].mxu0 }
 0x588   : > { %v10981_v11 = vpack.c.bf16 %v4911_v15, %v4910_v45  ;;  %v4588_v57 = vadd.f32 %v10844_v60, %v4587_v32  ;;  %v8806_v39 = vpop.f32.mrb[234].mxu0 }
 0x589   : > { %v4788_v18 = vmul.f32 0.01, %v4596_v3  ;;  %v4599_v54 = vadd.f32 %v10844_v60, %v8806_v39  ;;  %v4590_v19 = vpop.f32.mrb[235].mxu0 }
 0x58a   : > { %v4786_v28 = vmul.f32 0.01, %v4588_v57  ;;  %v4591_v38 = vadd.f32 %v10844_v60, %v4590_v19 }
 0x58b   : > { %v4789_v26 = vmul.f32 0.01, %v4599_v54  ;;  %v4916_v4 = vmax.f32 %v4596_v3, %v4788_v18  ;;  %v5049_v3 = vmul.bf16 %v10630_v25, %v10909_v29 }
 0x58c   : > { %v4787_v41 = vmul.f32 0.01, %v4591_v38  ;;  %v4914_v2 = vmax.f32 %v4588_v57, %v4786_v28 }
 0x58d   : > { %v4917_v17 = vmax.f32 %v4599_v54, %v4789_v26 }
 0x58e   : > { %v4915_v59 = vmax.f32 %v4591_v38, %v4787_v41  ;;  %v8809_v31 = vpop.f32.mrb[236].mxu0  ;;  %v5152_v41 = vunpack.c.l.bf16 %v5049_v3 }
 0x58f   : > { %v10986_v35 = vpack.c.bf16 %v4917_v17, %v4916_v4  ;;  %v4612_v61 = vadd.f32 %v10844_v60, %v8809_v31  ;;  %v4603_v45 = vpop.f32.mrb[237].mxu0  ;;  %v5048_v4 = vmul.bf16 %v10630_v25, %v10911_v36  ;;  %v5153_v36 = vunpack.c.h.bf16 %v5049_v3 }
 0x590   : > { %v10989_v15 = vpack.c.bf16 %v4915_v59, %v4914_v2  ;;  %v4604_v6 = vadd.f32 %v10844_v60, %v4603_v45  ;;  %v8810_v32 = vpop.f32.mrb[238].mxu0 }
 0x591   : > { %v4792_v39 = vmul.f32 0.01, %v4612_v61  ;;  %v4615_v19 = vadd.f32 %v10844_v60, %v8810_v32  ;;  %v4606_v40 = vpop.f32.mrb[239].mxu0 }
 0x592   : > { %v4790_v28 = vmul.f32 0.01, %v4604_v6  ;;  %v4607_v57 = vadd.f32 %v10844_v60, %v4606_v40 }
 0x593   : > { %v4793_v18 = vmul.f32 0.01, %v4615_v19  ;;  %v4920_v38 = vmax.f32 %v4612_v61, %v4792_v39  ;;  %v5150_v61 = vunpack.c.l.bf16 %v5048_v4 }
 0x594   : > { %v4791_v54 = vmul.f32 0.01, %v4607_v57  ;;  %v4918_v17 = vmax.f32 %v4604_v6, %v4790_v28 }
 0x595   : > { %v4921_v26 = vmax.f32 %v4615_v19, %v4793_v18 }
 0x596   : > { %v4919_v2 = vmax.f32 %v4607_v57, %v4791_v54  ;;  %v8813_v59 = vpop.f32.mrb[240].mxu0  ;;  %5358 = vadd.xlane.f32.xlu1 %v5152_v41 }
 0x597   : > { %v10998_v31 = vpack.c.bf16 %v4921_v26, %v4920_v38  ;;  %v4628_v45 = vadd.f32 %v10844_v60, %v8813_v59  ;;  %v4619_v29 = vpop.f32.mrb[241].mxu0 }
 0x598   : > { %v11001_v32 = vpack.c.bf16 %v4919_v2, %v4918_v17  ;;  %v4620_v40 = vadd.f32 %v10844_v60, %v4619_v29  ;;  %v8814_v22 = vpop.f32.mrb[242].mxu0  ;;  %v5151_v2 = vunpack.c.h.bf16 %v5048_v4 }
 0x599   : > { %v4796_v39 = vmul.f32 0.01, %v4628_v45  ;;  %v4631_v19 = vadd.f32 %v10844_v60, %v8814_v22  ;;  %v4622_v18 = vpop.f32.mrb[243].mxu0  ;;  %v5215_v22 = vpop.xlane.xlu1 %5214 }
 0x59a   : > { %12278 = vst [vmem:[#allocation125_spill] sm:$0xff] %v11001_v32  ;;  %v4794_v6 = vmul.f32 0.01, %v4620_v40  ;;  %v4623_v28 = vadd.f32 %v10844_v60, %v4622_v18  ;;  %5354 = vadd.xlane.f32.xlu1 %v5150_v61  ;;  %5360 = vadd.xlane.f32.xlu0 %v5153_v36  ;;  %v5466_v36 = vadd.f32 %v10936_v24, %v5215_v22 }
 0x59b   : > { %v4797_v57 = vmul.f32 0.01, %v4631_v19  ;;  %v4924_v38 = vmax.f32 %v4628_v45, %v4796_v39 }
 0x59c   : > { %v4795_v54 = vmul.f32 0.01, %v4623_v28  ;;  %v4922_v41 = vmax.f32 %v4620_v40, %v4794_v6 }
 0x59d   : > { %v4925_v26 = vmax.f32 %v4631_v19, %v4797_v57  ;;  %v5211_v4 = vpop.xlane.xlu1 %5210 }
 0x59e   : > { %v4923_v17 = vmax.f32 %v4623_v28, %v4795_v54  ;;  %5356 = vadd.xlane.f32.xlu0 %v5151_v2  ;;  %v6269_v54 = vmul.f32 %v10308_v50, %v5466_v36 }
 0x59f   : > { %v11006_v59 = vpack.c.bf16 %v4925_v26, %v4924_v38 }
 0x5a0   : > { %v11008_v29 = vpack.c.bf16 %v4923_v17, %v4922_v41 }
 0x5a1   : > { %12279 = vst [vmem:[#allocation126_spill] sm:$0xff] %v11006_v59 }
 0x5a2   : > { %12280 = vst [vmem:[#allocation127_spill] sm:$0xff] %v11008_v29 }
 0x5a3   : > { %v8817_v30 = vpop.f32.mrb[244].mxu0 }
 0x5a4   : > { %v4644_v3 = vadd.f32 %v10844_v60, %v8817_v30  ;;  %v4635_v53 = vpop.f32.mrb[245].mxu0  ;;  %v5464_v30 = vadd.f32 %v10936_v24, %v5211_v4 }
 0x5a5   : > { %v4636_v61 = vadd.f32 %v10844_v60, %v4635_v53  ;;  %v8818_v18 = vpop.f32.mrb[246].mxu0  ;;  %v5217_v53 = vpop.xlane.xlu0 %5216 }
 0x5a6   : > { %v4800_v45 = vmul.f32 0.01, %v4644_v3  ;;  %v4647_v40 = vadd.f32 %v10844_v60, %v8818_v18  ;;  %v4638_v39 = vpop.f32.mrb[247].mxu0  ;;  %v6267_v50 = vmul.f32 %v10299_v34, %v5464_v30  ;;  %v5467_v4 = vadd.f32 %v10936_v24, %v5217_v53 }
 0x5a7   : > { %v4798_v19 = vmul.f32 0.01, %v4636_v61  ;;  %v4639_v6 = vadd.f32 %v10844_v60, %v4638_v39 }
 0x5a8   : > { %v4801_v28 = vmul.f32 0.01, %v4647_v40  ;;  %v4928_v38 = vmax.f32 %v4644_v3, %v4800_v45  ;;  %v6270_v34 = vmul.f32 %v10324_v10, %v5467_v4 }
 0x5a9   : > { %v4799_v57 = vmul.f32 0.01, %v4639_v6  ;;  %v4926_v41 = vmax.f32 %v4636_v61, %v4798_v19 }
 0x5aa   : > { %v4929_v26 = vmax.f32 %v4647_v40, %v4801_v28 }
 0x5ab   : > { %v4927_v17 = vmax.f32 %v4639_v6, %v4799_v57  ;;  %v8821_v2 = vpop.f32.mrb[248].mxu0  ;;  %6539 = vperm.xlu1 %8950, %v6269_v54   ;;  %v5213_v6 = vpop.xlane.xlu0 %5212 }
 0x5ac   : > { %v11017_v22 = vpack.c.bf16 %v4929_v26, %v4928_v38  ;;  %v4660_v18 = vadd.f32 %v10844_v60, %v8821_v2  ;;  %v4651_v29 = vpop.f32.mrb[249].mxu0  ;;  %v5465_v30 = vadd.f32 %v10936_v24, %v5213_v6 }
 0x5ad   : > { %v11020_v59 = vpack.c.bf16 %v4927_v17, %v4926_v41  ;;  %v4652_v39 = vadd.f32 %v10844_v60, %v4651_v29  ;;  %v8822_v32 = vpop.f32.mrb[250].mxu0 }
 0x5ae   : > { %v4804_v36 = vmul.f32 0.01, %v4660_v18  ;;  %v4663_v3 = vadd.f32 %v10844_v60, %v8822_v32  ;;  %v4654_v45 = vpop.f32.mrb[251].mxu0 }
 0x5af   : > { %v4802_v61 = vmul.f32 0.01, %v4652_v39  ;;  %v4655_v40 = vadd.f32 %v10844_v60, %v4654_v45  ;;  %6533 = vperm.xlu1 %8950, %v6267_v50  }
 0x5b0   : > { %v4805_v19 = vmul.f32 0.01, %v4663_v3  ;;  %v4932_v57 = vmax.f32 %v4660_v18, %v4804_v36 }
 0x5b1   : > { %v4803_v28 = vmul.f32 0.01, %v4655_v40  ;;  %v4930_v38 = vmax.f32 %v4652_v39, %v4802_v61 }
 0x5b2   : > { %v4933_v54 = vmax.f32 %v4663_v3, %v4805_v19  ;;  %v6268_v3 = vmul.f32 %v10315_v63, %v5465_v30  ;;  %v5223_v30 = vpop.xlane.xlu1 %5222 }
 0x5b3   : > { %v4931_v29 = vmax.f32 %v4655_v40, %v4803_v28  ;;  %v8825_v26 = vpop.f32.mrb[252].mxu0 }
 0x5b4   : > { %v11029_v32 = vpack.c.bf16 %v4933_v54, %v4932_v57  ;;  %v4676_v41 = vadd.f32 %v10844_v60, %v8825_v26  ;;  %v4667_v17 = vpop.f32.mrb[253].mxu0  ;;  %6542 = vperm.xlu0 %8951, %v6270_v34  }
 0x5b5   : > { %v11032_v2 = vpack.c.bf16 %v4931_v29, %v4930_v38  ;;  %v4668_v53 = vadd.f32 %v10844_v60, %v4667_v17  ;;  %v8826_v50 = vpop.f32.mrb[254].mxu0  ;;  %v5051_v38 = vmul.bf16 %v10630_v25, %v10925_v37  ;;  %v5225_v37 = vpop.xlane.xlu0 %5224 }
 0x5b6   : > { %v4808_v45 = vmul.f32 0.01, %v4676_v41  ;;  %v4679_v18 = vadd.f32 %v10844_v60, %v8826_v50  ;;  %v4670_v39 = vpop.f32.mrb[255].mxu0  ;;  %v5219_v17 = vpop.xlane.xlu1 %5218 }
 0x5b7   : > { %v4806_v36 = vmul.f32 0.01, %v4668_v53  ;;  %v4671_v10 = vadd.f32 %v10844_v60, %v4670_v39  ;;  %v5156_v29 = vunpack.c.l.bf16 %v5051_v38  ;;  %v5050_v60 = vmul.bf16 %v10630_v25, %v10928_v12 }
 0x5b8   : > { %v4809_v61 = vmul.f32 0.01, %v4679_v18  ;;  %v4936_v4 = vmax.f32 %v4676_v41, %v4808_v45  ;;  %6536 = vperm.xlu0 %8951, %v6268_v3   ;;  %v5157_v26 = vunpack.c.h.bf16 %v5051_v38  ;;  %v5470_v41 = vadd.f32 %v10936_v24, %v5223_v30 }
 0x5b9   : > { %v4807_v40 = vmul.f32 0.01, %v4671_v10  ;;  %v4934_v6 = vmax.f32 %v4668_v53, %v4806_v36  ;;  %v5154_v63 = vunpack.c.l.bf16 %v5050_v60  ;;  %v5155_v34 = vunpack.c.h.bf16 %v5050_v60 }
 0x5ba   : > { %v4937_v19 = vmax.f32 %v4679_v18, %v4809_v61  ;;  %v6273_v53 = vmul.f32 %v10330_v46, %v5470_v41  ;;  %v5468_v50 = vadd.f32 %v10936_v24, %v5219_v17  ;;  %v5471_v12 = vadd.f32 %v10936_v24, %v5225_v37  ;;  %v5221_v18 = vpop.xlane.xlu0 %5220 }
 0x5bb   : > { %v4935_v28 = vmax.f32 %v4671_v10, %v4807_v40  ;;  %v5469_v36 = vadd.f32 %v10936_v24, %v5221_v18  ;;  %v5053_v46 = vmul.bf16 %v10630_v25, %v10938_v43  ;;  %v5052_v61 = vmul.bf16 %v10630_v25, %v10941_v1 }
 0x5bc   : > { %v11038_v57 = vpack.c.bf16 %v4937_v19, %v4936_v4  ;;  %v6271_v45 = vmul.f32 %v10321_v16, %v5468_v50  ;;  %v6274_v39 = vmul.f32 %v10348_v62, %v5471_v12  ;;  %v5231_v62 = vpop.xlane.xlu1 %5230  ;;  %v5054_v30 = vmul.bf16 %v10630_v25, %v10952_v13 }
 0x5bd   : > { %v11040_v54 = vpack.c.bf16 %v4935_v28, %v4934_v6  ;;  %v6272_v10 = vmul.f32 %v10338_v49, %v5469_v36  ;;  %v5160_v3 = vunpack.c.l.bf16 %v5053_v46  ;;  %v5158_v16 = vunpack.c.l.bf16 %v5052_v61 }
 0x5be   : > { %v5161_v40 = vunpack.c.h.bf16 %v5053_v46  ;;  %v5159_v4 = vunpack.c.h.bf16 %v5052_v61  ;;  %v5474_v19 = vadd.f32 %v10936_v24, %v5231_v62  ;;  %v5233_v43 = vpop.xlane.xlu0 %5232  ;;  %v5163_v17 = vunpack.c.h.bf16 %v5054_v30 }
 0x5bf   : > { %v5475_v1 = vadd.f32 %v10936_v24, %v5233_v43  ;;  %v5056_v46 = vmul.bf16 %v10630_v25, %v10964_v27 }
 0x5c0   : > { %v5227_v6 = vpop.xlane.xlu1 %5226  ;;  %v6277_v49 = vmul.f32 %v10353_v44, %v5474_v19  ;;  %v5055_v44 = vmul.bf16 %v10630_v25, %v10949_v5 }
 0x5c1   : > { %v5472_v28 = vadd.f32 %v10936_v24, %v5227_v6  ;;  %v6278_v60 = vmul.f32 %v10364_v20, %v5475_v1  ;;  %v5167_v61 = vunpack.c.h.bf16 %v5056_v46 }
 0x5c2   : > { %v5165_v41 = vunpack.c.h.bf16 %v5055_v44 }
 0x5c3   : > { %v6275_v38 = vmul.f32 %v10344_v47, %v5472_v28  ;;  %v5162_v47 = vunpack.c.l.bf16 %v5054_v30 }
 0x5c4   : > { %v5239_v20 = vpop.xlane.xlu1 %5238 }
 0x5c8   : > { %v5235_v50 = vpop.xlane.xlu1 %5234 }
 0x5c9   : > { %v5476_v37 = vadd.f32 %v10936_v24, %v5235_v50 }
 0x5d3   : > { %5366 = vadd.xlane.f32.xlu1 %v5156_v29  ;;  %v5229_v29 = vpop.xlane.xlu0 %5228 }
 0x5d7   : > { %5362 = vadd.xlane.f32.xlu1 %v5154_v63  ;;  %5368 = vadd.xlane.f32.xlu0 %v5157_v26  ;;  %v5473_v63 = vadd.f32 %v10936_v24, %v5229_v29  ;;  %v5241_v5 = vpop.xlane.xlu0 %5240 }
 0x5d8   : > { %v5479_v13 = vadd.f32 %v10936_v24, %v5241_v5 }
 0x5d9   : > { %v6276_v26 = vmul.f32 %v10357_v56, %v5473_v63 }
 0x5da   : > { %v6282_v18 = vmul.f32 %v10374_v21, %v5479_v13  ;;  %v5247_v21 = vpop.xlane.xlu1 %5246 }
 0x5db   : > { %5364 = vadd.xlane.f32.xlu0 %v5155_v34  ;;  %v5164_v34 = vunpack.c.l.bf16 %v5055_v44  ;;  %v5237_v12 = vpop.xlane.xlu0 %5236 }
 0x5e8   : > { %6551 = vperm.xlu1 %8950, %v6273_v53   ;;  %v5478_v53 = vadd.f32 %v10936_v24, %v5239_v20  ;;  %v12282_v20 = vld [vmem:[#allocation23_spill] sm:$0xff] }
 0x5ea   : > { %v6281_v56 = vmul.f32 %v10366_v33, %v5478_v53  ;;  %v5057_v33 = vmul.bf16 %v10630_v25, %v10961_v14  ;;  %v5249_v14 = vpop.xlane.xlu0 %5248 }
 0x5eb   : > { %v5483_v27 = vadd.f32 %v10936_v24, %v5249_v14 }
 0x5ec   : > { %6545 = vperm.xlu1 %8950, %v6271_v45   ;;  %v6279_v45 = vmul.f32 %v10362_v8, %v5476_v37  ;;  %v5166_v8 = vunpack.c.l.bf16 %v5056_v46 }
 0x5ed   : > { %v6286_v6 = vmul.f32 %v10384_v42, %v5483_v27 }
 0x5ee   : > { %v5245_v19 = vpop.xlane.xlu0 %5244 }
 0x5f1   : > { %6554 = vperm.xlu0 %8951, %v6274_v39   ;;  %v5477_v39 = vadd.f32 %v10936_v24, %v5237_v12 }
 0x5f3   : > { %v6280_v36 = vmul.f32 %v10368_v55, %v5477_v39 }
 0x5f5   : > { %6548 = vperm.xlu0 %8951, %v6272_v10   ;;  %v5168_v10 = vunpack.c.l.bf16 %v5057_v33 }
 0x610   : > { %5374 = vadd.xlane.f32.xlu1 %v5160_v3  ;;  %v5169_v3 = vunpack.c.h.bf16 %v5057_v33  ;;  %v12283_v33 = vld [vmem:[#allocation27_spill] sm:$0xff] }
 0x614   : > { %5370 = vadd.xlane.f32.xlu1 %v5158_v16  ;;  %5376 = vadd.xlane.f32.xlu0 %v5161_v40  ;;  %v5482_v16 = vadd.f32 %v10936_v24, %v5247_v21  ;;  %v5243_v40 = vpop.xlane.xlu1 %5242  ;;  %v12285_v21 = vld [vmem:[#allocation28_spill] sm:$0xff] }
 0x616   : > { %v6285_v55 = vmul.f32 %v10376_v0, %v5482_v16  ;;  %v5059_v0 = vmul.bf16 %v10630_v25, %v10970_v52 }
 0x618   : > { %5372 = vadd.xlane.f32.xlu0 %v5159_v4  ;;  %v5480_v4 = vadd.f32 %v10936_v24, %v5243_v40  ;;  %v5172_v43 = vunpack.c.l.bf16 %v5059_v0  ;;  %v5173_v1 = vunpack.c.h.bf16 %v5059_v0  ;;  %v5255_v29 = vpop.xlane.xlu1 %5254 }
 0x619   : > { %v5486_v63 = vadd.f32 %v10936_v24, %v5255_v29 }
 0x61a   : > { %v6283_v62 = vmul.f32 %v10372_v51, %v5480_v4  ;;  %v12286_v4 = vld [vmem:[#allocation26_spill] sm:$0xff] }
 0x625   : > { %6563 = vperm.xlu1 %8950, %v6277_v49   ;;  %v5481_v49 = vadd.f32 %v10936_v24, %v5245_v19 }
 0x627   : > { %v6284_v28 = vmul.f32 %v10378_v7, %v5481_v49  ;;  %v5251_v7 = vpop.xlane.xlu1 %5250  ;;  %v5063_v49 = vmul.bf16 %v10630_v25, %v10986_v35 }
 0x628   : > { %v5484_v52 = vadd.f32 %v10936_v24, %v5251_v7 }
 0x629   : > { %6557 = vperm.xlu1 %8950, %v6275_v38   ;;  %v5058_v38 = vmul.bf16 %v10630_v25, %v10973_v23  ;;  %v5180_v0 = vunpack.c.l.bf16 %v5063_v49 }
 0x62a   : > { %v6287_v44 = vmul.f32 %v10382_v9, %v5484_v52  ;;  %v5060_v9 = vmul.bf16 %v10630_v25, %v10981_v11 }
 0x62b   : > { %v5170_v51 = vunpack.c.l.bf16 %v5058_v38  ;;  %v5171_v42 = vunpack.c.h.bf16 %v5058_v38 }
 0x62c   : > { %v5174_v5 = vunpack.c.l.bf16 %v5060_v9 }
 0x62e   : > { %6566 = vperm.xlu0 %8951, %v6278_v60   ;;  %v5257_v60 = vpop.xlane.xlu0 %5256 }
 0x62f   : > { %v5487_v23 = vadd.f32 %v10936_v24, %v5257_v60 }
 0x632   : > { %6560 = vperm.xlu0 %8951, %v6276_v26   ;;  %v6289_v26 = vmul.f32 %v10386_v58, %v5486_v63  ;;  %v5253_v30 = vpop.xlane.xlu0 %5252  ;;  %v5061_v58 = vmul.bf16 %v10630_v25, %v10978_v48 }
 0x634   : > { %v5176_v37 = vunpack.c.l.bf16 %v5061_v58  ;;  %v5177_v13 = vunpack.c.h.bf16 %v5061_v58  ;;  %v12290_v58 = vld [vmem:[#allocation30_spill] sm:$0xff] }
 0x636   : > { %v5265_v50 = vpop.xlane.xlu0 %5264 }
 0x64d   : > { %5382 = vadd.xlane.f32.xlu1 %v5164_v34  ;;  %v5263_v34 = vpop.xlane.xlu1 %5262 }
 0x651   : > { %5378 = vadd.xlane.f32.xlu1 %v5162_v47  ;;  %5384 = vadd.xlane.f32.xlu0 %v5165_v41  ;;  %v12281_v47 = vld [vmem:[#allocation25_spill] sm:$0xff] }
 0x652   : > { %v6290_v41 = vmul.f32 %v12281_v47, %v5487_v23 }
 0x655   : > { %5380 = vadd.xlane.f32.xlu0 %v5163_v17  ;;  %v5485_v17 = vadd.f32 %v10936_v24, %v5253_v30 }
 0x657   : > { %v6288_v53 = vmul.f32 %v12282_v20, %v5485_v17  ;;  %v12289_v20 = vld [vmem:[#allocation32_spill] sm:$0xff] }
 0x662   : > { %6575 = vperm.xlu1 %8950, %v6281_v56   ;;  %v5259_v56 = vpop.xlane.xlu1 %5258 }
 0x663   : > { %v5488_v48 = vadd.f32 %v10936_v24, %v5259_v56 }
 0x666   : > { %6569 = vperm.xlu1 %8950, %v6279_v45   ;;  %v5261_v45 = vpop.xlane.xlu0 %5260  ;;  %v5271_v12 = vpop.xlane.xlu1 %5270 }
 0x667   : > { %v5489_v40 = vadd.f32 %v10936_v24, %v5261_v45  ;;  %v5494_v63 = vadd.f32 %v10936_v24, %v5271_v12 }
 0x669   : > { %v6292_v14 = vmul.f32 %v12286_v4, %v5489_v40 }
 0x66a   : > { %v5273_v39 = vpop.xlane.xlu0 %5272  ;;  %v5267_v46 = vpop.xlane.xlu1 %5266 }
 0x66b   : > { %6578 = vperm.xlu0 %8951, %v6282_v18   ;;  %v5175_v18 = vunpack.c.h.bf16 %v5060_v9  ;;  %v5492_v52 = vadd.f32 %v10936_v24, %v5267_v46  ;;  %v5495_v47 = vadd.f32 %v10936_v24, %v5273_v39  ;;  %v12291_v46 = vld [vmem:[#allocation125_spill] sm:$0xff] }
 0x66f   : > { %6572 = vperm.xlu0 %8951, %v6280_v36   ;;  %v5490_v36 = vadd.f32 %v10936_v24, %v5263_v34  ;;  %v12288_v34 = vld [vmem:[#allocation29_spill] sm:$0xff] }
 0x670   : > { %v6295_v30 = vmul.f32 %v12288_v34, %v5492_v52  ;;  %v12294_v34 = vld [vmem:[#allocation36_spill] sm:$0xff] }
 0x68a   : > { %5390 = vadd.xlane.f32.xlu1 %v5168_v10  ;;  %v6293_v10 = vmul.f32 %v12283_v33, %v5490_v36  ;;  %v5065_v36 = vmul.bf16 %v10630_v25, %v10998_v31 }
 0x68e   : > { %5386 = vadd.xlane.f32.xlu1 %v5166_v8  ;;  %5392 = vadd.xlane.f32.xlu0 %v5169_v3  ;;  %v12284_v8 = vld [vmem:[#allocation24_spill] sm:$0xff]  ;;  %v5491_v3 = vadd.f32 %v10936_v24, %v5265_v50 }
 0x68f   : > { %v6291_v11 = vmul.f32 %v12284_v8, %v5488_v48  ;;  %v5184_v48 = vunpack.c.l.bf16 %v5065_v36  ;;  %v5064_v8 = vmul.bf16 %v10630_v25, %v12291_v46 }
 0x690   : > { %v6294_v16 = vmul.f32 %v12285_v21, %v5491_v3 }
 0x691   : > { %v5182_v3 = vunpack.c.l.bf16 %v5064_v8  ;;  %v5183_v40 = vunpack.c.h.bf16 %v5064_v8  ;;  %v12299_v8 = vld [vmem:[#allocation126_spill] sm:$0xff] }
 0x692   : > { %5388 = vadd.xlane.f32.xlu0 %v5167_v61  ;;  %v11111_v61 = vpop.xlane.xlu1 %5278 }
 0x696   : > { %v11118_v27 = vpop.xlane.xlu1 %5274 }
 0x69a   : > { %v11120_v19 = vpop.xlane.xlu1 %5286 }
 0x69f   : > { %6587 = vperm.xlu1 %8950, %v6285_v55   ;;  %v5269_v55 = vpop.xlane.xlu0 %5268 }
 0x6a0   : > { %v5493_v50 = vadd.f32 %v10936_v24, %v5269_v55 }
 0x6a2   : > { %v6296_v56 = vmul.f32 %v12290_v58, %v5493_v50 }
 0x6a3   : > { %6581 = vperm.xlu1 %8950, %v6283_v62   ;;  %v11116_v62 = vpop.xlane.xlu0 %5280 }
 0x6a8   : > { %6590 = vperm.xlu0 %8951, %v6286_v6   ;;  %v11122_v6 = vpop.xlane.xlu1 %5282 }
 0x6ac   : > { %6584 = vperm.xlu0 %8951, %v6284_v28   ;;  %v11126_v28 = vpop.xlane.xlu1 %5294 }
 0x6b0   : > { %v11132_v29 = vpop.xlane.xlu1 %5290 }
 0x6b4   : > { %v11136_v35 = vpop.xlane.xlu1 %5302 }
 0x6b8   : > { %v11139_v7 = vpop.xlane.xlu1 %5298 }
 0x6bc   : > { %v11145_v23 = vpop.xlane.xlu1 %5310 }
 0x6c0   : > { %v11151_v17 = vpop.xlane.xlu1 %5306 }
 0x6c4   : > { %v11158_v9 = vpop.xlane.xlu1 %5318 }
 0x6c7   : > { %5398 = vadd.xlane.f32.xlu1 %v5172_v43  ;;  %v5062_v43 = vmul.bf16 %v10630_v25, %v10989_v15  ;;  %v12287_v15 = vld [vmem:[#allocation31_spill] sm:$0xff] }
 0x6c8   : > { %v11162_v45 = vpop.xlane.xlu1 %5314 }
 0x6c9   : > { %v5178_v38 = vunpack.c.l.bf16 %v5062_v43 }
 0x6cb   : > { %5394 = vadd.xlane.f32.xlu1 %v5170_v51  ;;  %5400 = vadd.xlane.f32.xlu0 %v5173_v1  ;;  %v11130_v51 = vpop.xlane.xlu0 %5276  ;;  %v5181_v1 = vunpack.c.h.bf16 %v5063_v49 }
 0x6cc   : > { %v11166_v12 = vpop.xlane.xlu1 %5326 }
 0x6cf   : > { %5396 = vadd.xlane.f32.xlu0 %v5171_v42  ;;  %v5179_v42 = vunpack.c.h.bf16 %v5062_v43  ;;  %v11134_v60 = vpop.xlane.xlu0 %5288 }
 0x6d0   : > { %v11170_v39 = vpop.xlane.xlu1 %5322 }
 0x6dc   : > { %6599 = vperm.xlu1 %8950, %v6289_v26   ;;  %v6297_v26 = vmul.f32 %v12287_v15, %v5494_v63  ;;  %v12293_v63 = vld [vmem:[#allocation33_spill] sm:$0xff] }
 0x6e0   : > { %6593 = vperm.xlu1 %8950, %v6287_v44   ;;  %v11143_v44 = vpop.xlane.xlu0 %5284 }
 0x6e5   : > { %6602 = vperm.xlu0 %8951, %v6290_v41   ;;  %v11149_v41 = vpop.xlane.xlu0 %5296 }
 0x6e9   : > { %6596 = vperm.xlu0 %8951, %v6288_v53   ;;  %v6298_v53 = vmul.f32 %v12289_v20, %v5495_v47  ;;  %v12295_v20 = vld [vmem:[#allocation34_spill] sm:$0xff] }
 0x704   : > { %5406 = vadd.xlane.f32.xlu1 %v5176_v37  ;;  %v11156_v37 = vpop.xlane.xlu0 %5292 }
 0x708   : > { %5402 = vadd.xlane.f32.xlu1 %v5174_v5  ;;  %5408 = vadd.xlane.f32.xlu0 %v5177_v13  ;;  %v11160_v5 = vpop.xlane.xlu0 %5304 }
 0x70c   : > { %5404 = vadd.xlane.f32.xlu0 %v5175_v18  ;;  %v11164_v13 = vpop.xlane.xlu0 %5300 }
 0x710   : > { %v11168_v18 = vpop.xlane.xlu0 %5312 }
 0x714   : > { %v11174_v33 = vpop.xlane.xlu0 %5308 }
 0x719   : > { %6611 = vperm.xlu1 %8950, %v6293_v10   ;;  %v11176_v10 = vpop.xlane.xlu1 %5334 }
 0x71d   : > { %6605 = vperm.xlu1 %8950, %v6291_v11   ;;  %v11180_v11 = vpop.xlane.xlu0 %5320  ;;  %v11182_v21 = vpop.xlane.xlu1 %5330 }
 0x721   : > { %v11184_v55 = vpop.xlane.xlu0 %5316  ;;  %v11186_v31 = vpop.xlane.xlu1 %5342 }
 0x722   : > { %6614 = vperm.xlu0 %8951, %v6294_v16   ;;  %v5185_v16 = vunpack.c.h.bf16 %v5065_v36 }
 0x725   : > { %v11188_v4 = vpop.xlane.xlu0 %5328  ;;  %v11192_v49 = vpop.xlane.xlu1 %5338 }
 0x726   : > { %6608 = vperm.xlu0 %8951, %v6292_v14   ;;  %v5498_v14 = vadd.f32 %v10936_v24, %v11111_v61 }
 0x741   : > { %5414 = vadd.xlane.f32.xlu1 %v5180_v0  ;;  %v12292_v0 = vld [vmem:[#allocation35_spill] sm:$0xff] }
 0x742   : > { %v6301_v43 = vmul.f32 %v12292_v0, %v5498_v14  ;;  %v12300_v14 = vld [vmem:[#allocation127_spill] sm:$0xff] }
 0x743   : > { %v5066_v0 = vmul.bf16 %v10630_v25, %v12300_v14 }
 0x745   : > { %5410 = vadd.xlane.f32.xlu1 %v5178_v38  ;;  %5416 = vadd.xlane.f32.xlu0 %v5181_v1  ;;  %v5496_v38 = vadd.f32 %v10936_v24, %v11118_v27  ;;  %v11197_v1 = vpop.xlane.xlu0 %5324  ;;  %v5497_v27 = vadd.f32 %v10936_v24, %v11130_v51 }
 0x747   : > { %v6299_v15 = vmul.f32 %v12293_v63, %v5496_v38  ;;  %v5186_v63 = vunpack.c.l.bf16 %v5066_v0 }
 0x749   : > { %5412 = vadd.xlane.f32.xlu0 %v5179_v42  ;;  %v11199_v42 = vpop.xlane.xlu1 %5350  ;;  %v11204_v52 = vpop.xlane.xlu0 %5336 }
 0x74d   : > { %v11206_v61 = vpop.xlane.xlu1 %5346  ;;  %v11211_v47 = vpop.xlane.xlu0 %5332 }
 0x751   : > { %v11214_v50 = vpop.permute.xlu1 %6527  ;;  %v11216_v58 = vpop.xlane.xlu0 %5344 }
 0x752   : > { %12296 = vst [vmem:[#allocation25_spill] sm:$0xff] %v11214_v50 }
 0x755   : > { %v11222_v36 = vpop.xlane.xlu0 %5340 }
 0x756   : > { %6623 = vperm.xlu1 %8950, %v6297_v26   ;;  %v5499_v26 = vadd.f32 %v10936_v24, %v11116_v62  ;;  %v11218_v62 = vpop.permute.xlu1 %6524 }
 0x757   : > { %12297 = vst [vmem:[#allocation23_spill] sm:$0xff] %v11218_v62 }
 0x759   : > { %v11226_v46 = vpop.xlane.xlu0 %5352 }
 0x75a   : > { %6617 = vperm.xlu1 %8950, %v6295_v30   ;;  %v6302_v30 = vmul.f32 %v12294_v34, %v5499_v26 }
 0x75f   : > { %6626 = vperm.xlu0 %8951, %v6298_v53   ;;  %v6300_v53 = vmul.f32 %v12295_v20, %v5497_v27 }
 0x763   : > { %6620 = vperm.xlu0 %8951, %v6296_v56   ;;  %v11220_v56 = vpop.xlane.xlu1 %5358 }
 0x77e   : > { %5422 = vadd.xlane.f32.xlu1 %v5184_v48  ;;  %v11224_v48 = vpop.xlane.xlu1 %5354 }
 0x782   : > { %5418 = vadd.xlane.f32.xlu1 %v5182_v3  ;;  %5424 = vadd.xlane.f32.xlu0 %v5185_v16  ;;  %v11228_v51 = vpop.permute.xlu1 %6539  ;;  %v5067_v3 = vmul.bf16 %v10630_v25, %v12299_v8  ;;  %v11232_v16 = vpop.xlane.xlu0 %5348 }
 0x783   : > { %12298 = vst [vmem:[#allocation27_spill] sm:$0xff] %v11228_v51 }
 0x786   : > { %5420 = vadd.xlane.f32.xlu0 %v5183_v40  ;;  %v5188_v40 = vunpack.c.l.bf16 %v5067_v3  ;;  %v11238_v38 = vpop.permute.xlu1 %6533 }
 0x787   : > { %12302 = vst [vmem:[#allocation28_spill] sm:$0xff] %v11238_v38  ;;  %v5503_v38 = vadd.f32 %v10936_v24, %v11134_v60 }
 0x78a   : > { %v11240_v26 = vpop.xlane.xlu1 %5366 }
 0x78b   : > { %12303 = vst [vmem:[#allocation26_spill] sm:$0xff] %v11240_v26 }
 0x78e   : > { %v11246_v20 = vpop.xlane.xlu1 %5362 }
 0x78f   : > { %12305 = vst [vmem:[#allocation29_spill] sm:$0xff] %v11246_v20 }
 0x793   : > { %6635 = vperm.xlu1 %8950, %v6301_v43   ;;  %v11236_v43 = vpop.permute.xlu0 %6530 }
 0x794   : > { %12301 = vst [vmem:[#allocation24_spill] sm:$0xff] %v11236_v43 }
 0x797   : > { %6629 = vperm.xlu1 %8950, %v6299_v15   ;;  %v5189_v15 = vunpack.c.h.bf16 %v5067_v3  ;;  %v11242_v34 = vpop.permute.xlu0 %6521  ;;  %v12307_v3 = vld [vmem:[#allocation39_spill] sm:$0xff] }
 0x798   : > { %12304 = vst [vmem:[#allocation31_spill] sm:$0xff] %v11242_v34 }
 0x79b   : > { %v11244_v27 = vpop.xlane.xlu0 %5360 }
 0x79c   : > { %6638 = vperm.xlu0 %8951, %v6302_v30   ;;  %v5187_v30 = vunpack.c.h.bf16 %v5066_v0 }
 0x79f   : > { %v11250_v8 = vpop.xlane.xlu0 %5356 }
 0x7a0   : > { %6632 = vperm.xlu0 %8951, %v6300_v53   ;;  %v5502_v53 = vadd.f32 %v10936_v24, %v11120_v19 }
 0x7a2   : > { %v6305_v14 = vmul.f32 %v12307_v3, %v5502_v53 }
 0x7a3   : > { %v11257_v51 = vpop.permute.xlu0 %6542 }
 0x7a4   : > { %12308 = vst [vmem:[#allocation30_spill] sm:$0xff] %v11257_v51 }
 0x7a7   : > { %v11264_v19 = vpop.permute.xlu0 %6536 }
 0x7a8   : > { %12311 = vst [vmem:[#allocation35_spill] sm:$0xff] %v11264_v19 }
 0x7ab   : > { %v11271_v3 = vpop.xlane.xlu0 %5368 }
 0x7ac   : > { %12313 = vst [vmem:[#allocation33_spill] sm:$0xff] %v11271_v3 }
 0x7bb   : > { %5430 = vadd.xlane.f32.xlu1 %v5188_v40  ;;  %v11252_v40 = vpop.permute.xlu1 %6551 }
 0x7bc   : > { %12306 = vst [vmem:[#allocation32_spill] sm:$0xff] %v11252_v40  ;;  %v12312_v40 = vld [vmem:[#allocation40_spill] sm:$0xff] }
 0x7bd   : > { %v6306_v53 = vmul.f32 %v12312_v40, %v5503_v38 }
 0x7bf   : > { %5426 = vadd.xlane.f32.xlu1 %v5186_v63  ;;  %5432 = vadd.xlane.f32.xlu0 %v5189_v15  ;;  %v5500_v63 = vadd.f32 %v10936_v24, %v11122_v6  ;;  %v11259_v0 = vpop.permute.xlu1 %6545  ;;  %v12310_v15 = vld [vmem:[#allocation37_spill] sm:$0xff]  ;;  %v5501_v6 = vadd.f32 %v10936_v24, %v11143_v44 }
 0x7c0   : > { %12309 = vst [vmem:[#allocation125_spill] sm:$0xff] %v11259_v0  ;;  %v12314_v0 = vld [vmem:[#allocation38_spill] sm:$0xff] }
 0x7c3   : > { %5428 = vadd.xlane.f32.xlu0 %v5187_v30  ;;  %v6303_v30 = vmul.f32 %v12310_v15, %v5500_v63  ;;  %v11266_v43 = vpop.xlane.xlu1 %5374  ;;  %v6304_v63 = vmul.f32 %v12314_v0, %v5501_v6  ;;  %v11276_v15 = vpop.xlane.xlu0 %5364  ;;  %v5069_v0 = vmul.bf16 %v10630_v25, %v11017_v22 }
 0x7d0   : > { %6647 = vperm.xlu1 %8950, %v6305_v14   ;;  %v11273_v14 = vpop.xlane.xlu1 %5370 }
 0x7d4   : > { %6641 = vperm.xlu1 %8950, %v6303_v30   ;;  %v11278_v60 = vpop.permute.xlu1 %6563  ;;  %v11280_v30 = vpop.permute.xlu0 %6554 }
 0x7d5   : > { %12315 = vst [vmem:[#allocation36_spill] sm:$0xff] %v11278_v60  ;;  %12316 = vst [vmem:[#allocation34_spill] sm:$0xff] %v11280_v30  ;;  %v5068_v60 = vmul.bf16 %v10630_v25, %v11020_v59  ;;  %v5506_v59 = vadd.f32 %v10936_v24, %v11126_v28 }
 0x7d7   : > { %v5190_v30 = vunpack.c.l.bf16 %v5068_v60  ;;  %v5191_v34 = vunpack.c.h.bf16 %v5068_v60 }
 0x7d8   : > { %v11282_v51 = vpop.permute.xlu1 %6557  ;;  %v11284_v38 = vpop.permute.xlu0 %6548 }
 0x7d9   : > { %6650 = vperm.xlu0 %8951, %v6306_v53   ;;  %12317 = vst [vmem:[#allocation126_spill] sm:$0xff] %v11282_v51  ;;  %12318 = vst [vmem:[#allocation127_spill] sm:$0xff] %v11284_v38  ;;  %v5193_v38 = vunpack.c.h.bf16 %v5069_v0 }
 0x7dc   : > { %v11286_v40 = vpop.xlane.xlu1 %5382  ;;  %v11288_v44 = vpop.xlane.xlu0 %5376 }
 0x7dd   : > { %6644 = vperm.xlu0 %8951, %v6304_v63   ;;  %v5192_v63 = vunpack.c.l.bf16 %v5069_v0 }
 0x7e0   : > { %v11290_v53 = vpop.xlane.xlu1 %5378  ;;  %v11292_v19 = vpop.xlane.xlu0 %5372 }
 0x7e4   : > { %v11296_v6 = vpop.permute.xlu0 %6566  ;;  %v11300_v51 = vpop.permute.xlu1 %6575 }
 0x7e5   : > { %12319 = vst [vmem:[#allocation39_spill] sm:$0xff] %v11296_v6  ;;  %12320 = vst [vmem:[#allocation37_spill] sm:$0xff] %v11300_v51  ;;  %v12329_v51 = vld [vmem:[#allocation41_spill] sm:$0xff] }
 0x7e8   : > { %v11302_v50 = vpop.permute.xlu0 %6560  ;;  %v11304_v62 = vpop.permute.xlu1 %6569 }
 0x7e9   : > { %12321 = vst [vmem:[#allocation40_spill] sm:$0xff] %v11302_v50  ;;  %12322 = vst [vmem:[#allocation38_spill] sm:$0xff] %v11304_v62  ;;  %v12327_v50 = vld [vmem:[#allocation43_spill] sm:$0xff] }
 0x7ec   : > { %v11306_v20 = vpop.xlane.xlu0 %5384  ;;  %v11308_v22 = vpop.xlane.xlu1 %5390 }
 0x7ed   : > { %12323 = vst [vmem:[#allocation128_spill] sm:$0xff] %v11308_v22  ;;  %v5507_v22 = vadd.f32 %v10936_v24, %v11149_v41 }
 0x7f0   : > { %v11310_v6 = vpop.xlane.xlu0 %5380 }
 0x7f1   : > { %12324 = vst [vmem:[#allocation129_spill] sm:$0xff] %v11310_v6 }
 0x7f4   : > { %v11316_v0 = vpop.permute.xlu0 %6578 }
 0x7f5   : > { %12326 = vst [vmem:[#allocation131_spill] sm:$0xff] %v11316_v0  ;;  %v12333_v0 = vld [vmem:[#allocation44_spill] sm:$0xff] }
 0x7f8   : > { %5438 = vadd.xlane.f32.xlu1 %v5192_v63  ;;  %v11314_v63 = vpop.xlane.xlu1 %5386 }
 0x7f9   : > { %12325 = vst [vmem:[#allocation130_spill] sm:$0xff] %v11314_v63 }
 0x7fc   : > { %5434 = vadd.xlane.f32.xlu1 %v5190_v30  ;;  %5440 = vadd.xlane.f32.xlu0 %v5193_v38  ;;  %v6309_v30 = vmul.f32 %v12327_v50, %v5506_v59  ;;  %v5504_v38 = vadd.f32 %v10936_v24, %v11132_v29  ;;  %v11321_v60 = vpop.permute.xlu1 %6587  ;;  %v6310_v50 = vmul.f32 %v12333_v0, %v5507_v22 }
 0x7fd   : > { %12328 = vst [vmem:[#allocation43_spill] sm:$0xff] %v11321_v60  ;;  %v5505_v29 = vadd.f32 %v10936_v24, %v11156_v37 }
 0x7fe   : > { %v6307_v62 = vmul.f32 %v12329_v51, %v5504_v38 }
 0x800   : > { %5436 = vadd.xlane.f32.xlu0 %v5191_v34  ;;  %v11324_v34 = vpop.permute.xlu0 %6572  ;;  %v11328_v28 = vpop.permute.xlu1 %6581 }
 0x801   : > { %12330 = vst [vmem:[#allocation41_spill] sm:$0xff] %v11324_v34  ;;  %12331 = vst [vmem:[#allocation132_spill] sm:$0xff] %v11328_v28 }
 0x804   : > { %v11330_v63 = vpop.xlane.xlu0 %5392  ;;  %v11335_v59 = vpop.xlane.xlu1 %5398 }
 0x805   : > { %12332 = vst [vmem:[#allocation133_spill] sm:$0xff] %v11330_v63  ;;  %12334 = vst [vmem:[#allocation44_spill] sm:$0xff] %v11335_v59 }
 0x808   : > { %v11338_v38 = vpop.xlane.xlu0 %5388  ;;  %v11340_v60 = vpop.xlane.xlu1 %5394 }
 0x809   : > { %12337 = vst [vmem:[#allocation134_spill] sm:$0xff] %v11340_v60 }
 0x80c   : > { %v11342_v41 = vpop.permute.xlu0 %6590 }
 0x80d   : > { %6659 = vperm.xlu1 %8950, %v6309_v30   ;;  %v12335_v30 = vld [vmem:[#allocation42_spill] sm:$0xff]  ;;  %12338 = vst [vmem:[#allocation135_spill] sm:$0xff] %v11342_v41 }
 0x80e   : > { %v6308_v51 = vmul.f32 %v12335_v30, %v5505_v29  ;;  %12336 = vst [vmem:[#allocation42_spill] sm:$0xff] %v11338_v38  ;;  %v5071_v29 = vmul.bf16 %v10630_v25, %v11029_v32  ;;  %v12371_v38 = vld [vmem:[#allocation20_spill] sm:$0xff] }
 0x810   : > { %v11346_v63 = vpop.permute.xlu0 %6584  ;;  %v5196_v41 = vunpack.c.l.bf16 %v5071_v29 }
 0x811   : > { %6653 = vperm.xlu1 %8950, %v6307_v62   ;;  %v11344_v62 = vpop.permute.xlu1 %6599  ;;  %12340 = vst [vmem:[#allocation137_spill] sm:$0xff] %v11346_v63 }
 0x812   : > { %12339 = vst [vmem:[#allocation136_spill] sm:$0xff] %v11344_v62  ;;  %v5070_v62 = vmul.bf16 %v10630_v25, %v11032_v2  ;;  %v5510_v2 = vadd.f32 %v10936_v24, %v11136_v35 }
 0x814   : > { %v11348_v22 = vpop.xlane.xlu0 %5400  ;;  %v5194_v63 = vunpack.c.l.bf16 %v5070_v62  ;;  %v5195_v32 = vunpack.c.h.bf16 %v5070_v62  ;;  %v12356_v62 = vld [vmem:[#allocation45_spill] sm:$0xff] }
 0x815   : > { %12341 = vst [vmem:[#allocation138_spill] sm:$0xff] %v11348_v22  ;;  %v11350_v0 = vpop.permute.xlu1 %6593 }
 0x816   : > { %6662 = vperm.xlu0 %8951, %v6310_v50   ;;  %12342 = vst [vmem:[#allocation139_spill] sm:$0xff] %v11350_v0  ;;  %v5197_v0 = vunpack.c.h.bf16 %v5071_v29  ;;  %v12354_v29 = vld [vmem:[#allocation47_spill] sm:$0xff] }
 0x818   : > { %v11354_v50 = vpop.xlane.xlu0 %5396 }
 0x819   : > { %v11352_v37 = vpop.xlane.xlu1 %5406  ;;  %12344 = vst [vmem:[#allocation141_spill] sm:$0xff] %v11354_v50 }
 0x81a   : > { %6656 = vperm.xlu0 %8951, %v6308_v51   ;;  %12343 = vst [vmem:[#allocation140_spill] sm:$0xff] %v11352_v37 }
 0x81c   : > { %v11358_v30 = vpop.permute.xlu0 %6602 }
 0x81d   : > { %12345 = vst [vmem:[#allocation142_spill] sm:$0xff] %v11358_v30  ;;  %v11360_v51 = vpop.xlane.xlu1 %5402 }
 0x81e   : > { %12346 = vst [vmem:[#allocation143_spill] sm:$0xff] %v11360_v51 }
 0x820   : > { %v11364_v28 = vpop.permute.xlu0 %6596 }
 0x821   : > { %12347 = vst [vmem:[#allocation144_spill] sm:$0xff] %v11364_v28  ;;  %v11366_v34 = vpop.permute.xlu1 %6611  ;;  %v6313_v28 = vmul.f32 %v12354_v29, %v5510_v2  ;;  %v5509_v2 = vadd.f32 %v10936_v24, %v11164_v13  ;;  %v12360_v29 = vld [vmem:[#allocation46_spill] sm:$0xff] }
 0x822   : > { %12348 = vst [vmem:[#allocation145_spill] sm:$0xff] %v11366_v34 }
 0x824   : > { %v11368_v60 = vpop.xlane.xlu0 %5408 }
 0x825   : > { %12349 = vst [vmem:[#allocation146_spill] sm:$0xff] %v11368_v60  ;;  %v11370_v30 = vpop.permute.xlu1 %6605 }
 0x826   : > { %12350 = vst [vmem:[#allocation147_spill] sm:$0xff] %v11370_v30  ;;  %v5511_v30 = vadd.f32 %v10936_v24, %v11160_v5 }
 0x828   : > { %v11372_v51 = vpop.xlane.xlu0 %5404 }
 0x829   : > { %12351 = vst [vmem:[#allocation148_spill] sm:$0xff] %v11372_v51  ;;  %v11374_v37 = vpop.xlane.xlu1 %5414 }
 0x82a   : > { %12352 = vst [vmem:[#allocation149_spill] sm:$0xff] %v11374_v37 }
 0x835   : > { %5446 = vadd.xlane.f32.xlu1 %v5196_v41  ;;  %v11378_v41 = vpop.permute.xlu0 %6614 }
 0x836   : > { %12353 = vst [vmem:[#allocation150_spill] sm:$0xff] %v11378_v41  ;;  %v12359_v41 = vld [vmem:[#allocation48_spill] sm:$0xff] }
 0x837   : > { %v6314_v51 = vmul.f32 %v12359_v41, %v5511_v30 }
 0x839   : > { %5442 = vadd.xlane.f32.xlu1 %v5194_v63  ;;  %5448 = vadd.xlane.f32.xlu0 %v5197_v0  ;;  %v5508_v63 = vadd.f32 %v10936_v24, %v11139_v7  ;;  %v11383_v0 = vpop.xlane.xlu1 %5410  ;;  %v11386_v34 = vpop.permute.xlu0 %6608 }
 0x83a   : > { %12355 = vst [vmem:[#allocation47_spill] sm:$0xff] %v11383_v0  ;;  %12357 = vst [vmem:[#allocation45_spill] sm:$0xff] %v11386_v34 }
 0x83d   : > { %5444 = vadd.xlane.f32.xlu0 %v5195_v32  ;;  %v6311_v32 = vmul.f32 %v12356_v62, %v5508_v63  ;;  %v6624_v37 = vpop.permute.xlu1 %6623  ;;  %v11390_v35 = vpop.xlane.xlu0 %5416 }
 0x83e   : > { %12358 = vst [vmem:[#allocation151_spill] sm:$0xff] %v11390_v35 }
 0x841   : > { %v6618_v7 = vpop.permute.xlu1 %6617  ;;  %v11396_v0 = vpop.xlane.xlu0 %5412 }
 0x842   : > { %12361 = vst [vmem:[#allocation48_spill] sm:$0xff] %v11396_v0 }
 0x845   : > { %v11398_v63 = vpop.xlane.xlu1 %5422  ;;  %v11400_v62 = vpop.permute.xlu0 %6626 }
 0x846   : > { %12362 = vst [vmem:[#allocation46_spill] sm:$0xff] %v11398_v63 }
 0x849   : > { %v11402_v5 = vpop.xlane.xlu1 %5418 }
 0x84a   : > { %6671 = vperm.xlu1 %8950, %v6313_v28   ;;  %v6312_v28 = vmul.f32 %v12360_v29, %v5509_v2  ;;  %12363 = vst [vmem:[#allocation152_spill] sm:$0xff] %v11402_v5  ;;  %v5072_v5 = vmul.bf16 %v10630_v25, %v11040_v54 }
 0x84c   : > { %v5198_v35 = vunpack.c.l.bf16 %v5072_v5  ;;  %v5199_v60 = vunpack.c.h.bf16 %v5072_v5 }
 0x84d   : > { %v11406_v30 = vpop.permute.xlu1 %6635 }
 0x84e   : > { %6665 = vperm.xlu1 %8950, %v6311_v32   ;;  %v6621_v32 = vpop.permute.xlu0 %6620 }
 0x851   : > { %v11410_v13 = vpop.permute.xlu1 %6629 }
 0x852   : > { %v11404_v34 = vpop.xlane.xlu0 %5424 }
 0x853   : > { %6674 = vperm.xlu0 %8951, %v6314_v51   ;;  %12364 = vst [vmem:[#allocation153_spill] sm:$0xff] %v11404_v34  ;;  %v5073_v51 = vmul.bf16 %v10630_v25, %v11038_v57  ;;  %v12369_v57 = vld [vmem:[#allocation21_spill] sm:$0xff] }
 0x854   : > { %v6908_v59 = vadd.s32 4294967288, %v12369_v57  ;;  %v6915_v54 = vadd.s32 4294967280, %v12369_v57 }
 0x855   : > { %v11416_v29 = vpop.xlane.xlu1 %5430  ;;  %v5201_v63 = vunpack.c.h.bf16 %v5073_v51 }
 0x856   : > { %v11408_v41 = vpop.xlane.xlu0 %5420  ;;  %12366 = vst [vmem:[#allocation155_spill] sm:$0xff] %v11416_v29  ;;  %v11430_v25 = vsub.s32 %v6908_v59, %v12371_v38  ;;  %v6922_v59 = vadd.s32 4294967272, %v12369_v57 }
 0x857   : > { %6668 = vperm.xlu0 %8951, %v6312_v28   ;;  %12365 = vst [vmem:[#allocation154_spill] sm:$0xff] %v11408_v41  ;;  %v5200_v28 = vunpack.c.l.bf16 %v5073_v51  ;;  %v5514_v51 = vadd.f32 %v10936_v24, %v11145_v23  ;;  %v11449_v23 = vsub.s32 %v6915_v54, %v12371_v38 }
 0x858   : > { %12372 = vst [vmem:[#allocation20_spill] sm:$0xff] %v11430_v25 }
 0x859   : > { %v11420_v34 = vpop.xlane.xlu1 %5426  ;;  %v7104_v26 = vrot.slane %v6624_v37, %v11449_v23  ;;  %v5518_v37 = vadd.f32 %v10936_v24, %v11158_v9 }
 0x85a   : > { %v11414_v2 = vpop.permute.xlu0 %6638  ;;  %12367 = vst [vmem:[#allocation156_spill] sm:$0xff] %v11420_v34  ;;  %v6936_v34 = vadd.s32 4294967256, %v12369_v57 }
 0x85c   : > { %v11465_v54 = vsub.s32 %v6936_v34, %v12371_v38 }
 0x85d   : > { %v11425_v50 = vpop.permute.xlu1 %6647 }
 0x85e   : > { %v6633_v0 = vpop.permute.xlu0 %6632  ;;  %12376 = vst [vmem:[#allocation159_spill] sm:$0xff] %v11465_v54 }
 0x85f   : > { %v7119_v34 = vrot.slane %v6633_v0, %v11465_v54 }
 0x861   : > { %v11440_v5 = vpop.permute.xlu1 %6641 }
 0x862   : > { %v11422_v41 = vpop.xlane.xlu0 %5432 }
 0x863   : > { %12368 = vst [vmem:[#allocation157_spill] sm:$0xff] %v11422_v41  ;;  %v12373_v41 = vld [vmem:[#allocation51_spill] sm:$0xff] }
 0x864   : > { %v6317_v22 = vmul.f32 %v12373_v41, %v5514_v51  ;;  %v6943_v41 = vadd.s32 4294967248, %v12369_v57 }
 0x866   : > { %v11427_v29 = vpop.xlane.xlu0 %5428 }
 0x867   : > { %12370 = vst [vmem:[#allocation21_spill] sm:$0xff] %v11427_v29 }
 0x872   : > { %5454 = vadd.xlane.f32.xlu1 %v5200_v28  ;;  %v11443_v28 = vpop.permute.xlu0 %6650 }
 0x876   : > { %5450 = vadd.xlane.f32.xlu1 %v5198_v35  ;;  %5456 = vadd.xlane.f32.xlu0 %v5201_v63  ;;  %v11437_v35 = vsub.s32 %v12369_v57, %v12371_v38  ;;  %v7099_v63 = vrot.slane %v6621_v32, %v11430_v25  ;;  %v5512_v32 = vadd.f32 %v10936_v24, %v11151_v17  ;;  %v6645_v51 = vpop.permute.xlu0 %6644 }
 0x878   : > { %v7095_v29 = vrot.slane %v6618_v7, %v11437_v35  ;;  %v11462_v7 = vsub.s32 %v6922_v59, %v12371_v38 }
 0x87a   : > { %5452 = vadd.xlane.f32.xlu0 %v5199_v60  ;;  %v6929_v60 = vadd.s32 4294967264, %v12369_v57  ;;  %v7100_v25 = vsel %vm6913_vm1, %v7099_v63, %v7095_v29  ;;  %v12377_v63 = vld [vmem:[#allocation49_spill] sm:$0xff]  ;;  %v7109_v59 = vrot.slane %v11400_v62, %v11462_v7  ;;  %v11486_v62 = vsub.s32 %v6943_v41, %v12371_v38 }
 0x87b   : > { %v7105_v17 = vsel %vm6920_vm2, %v7104_v26, %v7100_v25  ;;  %v6957_v26 = vadd.s32 4294967232, %v12369_v57  ;;  %v6964_v25 = vadd.s32 4294967224, %v12369_v57 }
 0x87c   : > { %v11458_v6 = vsub.s32 %v6929_v60, %v12371_v38  ;;  %v6315_v60 = vmul.f32 %v12377_v63, %v5512_v32  ;;  %v7110_v9 = vsel %vm6927_vm3, %v7109_v59, %v7105_v17  ;;  %v12379_v63 = vld [vmem:[#allocation55_spill] sm:$0xff]  ;;  %v7124_v41 = vrot.slane %v11406_v30, %v11486_v62  ;;  %v12381_v30 = vld [vmem:[#allocation53_spill] sm:$0xff] }
 0x87d   : > { %v6321_v54 = vmul.f32 %v12379_v63, %v5518_v37  ;;  %v11498_v17 = vsub.s32 %v6957_v26, %v12371_v38  ;;  %v11507_v37 = vsub.s32 %v6964_v25, %v12371_v38  ;;  %v6985_v63 = vadd.s32 4294967200, %v12369_v57 }
 0x87e   : > { %12375 = vst [vmem:[#allocation158_spill] sm:$0xff] %v11458_v6  ;;  %v7114_v29 = vrot.slane %v11410_v13, %v11458_v6  ;;  %v6950_v13 = vadd.s32 4294967240, %v12369_v57 }
 0x87f   : > { %v7134_v26 = vrot.slane %v11440_v5, %v11498_v17  ;;  %v7139_v25 = vrot.slane %v6645_v51, %v11507_v37  ;;  %v5519_v5 = vadd.f32 %v10936_v24, %v11180_v11  ;;  %v12383_v51 = vld [vmem:[#allocation59_spill] sm:$0xff] }
 0x880   : > { %v7115_v0 = vsel %vm6934_vm4, %v7114_v29, %v7110_v9  ;;  %v11504_v59 = vsub.s32 %v6950_v13, %v12371_v38 }
 0x881   : > { %v7120_v6 = vsel %vm6941_vm5, %v7119_v34, %v7115_v0  ;;  %v12382_v0 = vld [vmem:[#allocation50_spill] sm:$0xff] }
 0x882   : > { %v7125_v34 = vsel %vm6948_vm6, %v7124_v41, %v7120_v6  ;;  %v7129_v13 = vrot.slane %v11414_v2, %v11504_v59 }
 0x885   : > { %v11455_v3 = vpop.xlane.xlu1 %5438 }
 0x886   : > { %12374 = vst [vmem:[#allocation51_spill] sm:$0xff] %v11455_v3 }
 0x887   : > { %6683 = vperm.xlu1 %8950, %v6317_v22   ;;  %v5515_v22 = vadd.f32 %v10936_v24, %v11168_v18  ;;  %v5516_v18 = vadd.f32 %v10936_v24, %v11162_v45 }
 0x889   : > { %v11477_v3 = vpop.xlane.xlu1 %5434  ;;  %v11489_v32 = vpop.xlane.xlu0 %5440  ;;  %v6319_v9 = vmul.f32 %v12381_v30, %v5516_v18  ;;  %v6978_v18 = vadd.s32 4294967208, %v12369_v57 }
 0x88a   : > { %12378 = vst [vmem:[#allocation49_spill] sm:$0xff] %v11477_v3  ;;  %v5513_v3 = vadd.f32 %v10936_v24, %v11174_v33  ;;  %v6971_v33 = vadd.s32 4294967216, %v12369_v57 }
 0x88b   : > { %6677 = vperm.xlu1 %8950, %v6315_v60   ;;  %v12380_v60 = vld [vmem:[#allocation52_spill] sm:$0xff] }
 0x88c   : > { %v6318_v29 = vmul.f32 %v12380_v60, %v5515_v22  ;;  %v5522_v22 = vadd.f32 %v10936_v24, %v11166_v12  ;;  %v7130_v12 = vsel %vm6955_vm7, %v7129_v13, %v7125_v34  ;;  %v11530_v2 = vsub.s32 %v6971_v33, %v12371_v38  ;;  %v12384_v13 = vld [vmem:[#allocation56_spill] sm:$0xff] }
 0x88d   : > { %v11509_v45 = vpop.permute.xlu1 %6659  ;;  %v11523_v6 = vpop.xlane.xlu0 %5436  ;;  %v5520_v60 = vadd.f32 %v10936_v24, %v11170_v39  ;;  %v5517_v34 = vadd.f32 %v10936_v24, %v11184_v55  ;;  %v6999_v33 = vadd.s32 4294967184, %v12369_v57  ;;  %v6322_v39 = vmul.f32 %v12384_v13, %v5519_v5 }
 0x88e   : > { %v6325_v41 = vmul.f32 %v12383_v51, %v5522_v22  ;;  %v5526_v55 = vadd.f32 %v10936_v24, %v11176_v10 }
 0x88f   : > { %6695 = vperm.xlu1 %8950, %v6321_v54   ;;  %v6316_v54 = vmul.f32 %v12382_v0, %v5513_v3  ;;  %v7135_v3 = vsel %vm6962_vm8, %v7134_v26, %v7130_v12  ;;  %v7144_v26 = vrot.slane %v11425_v50, %v11530_v2  ;;  %v11548_v0 = vsub.s32 %v6978_v18, %v12371_v38  ;;  %v12385_v12 = vld [vmem:[#allocation57_spill] sm:$0xff]  ;;  %v12386_v18 = vld [vmem:[#allocation54_spill] sm:$0xff] }
 0x890   : > { %6686 = vperm.xlu0 %8951, %v6318_v29   ;;  %v6992_v29 = vadd.s32 4294967192, %v12369_v57  ;;  %v7140_v11 = vsel %vm6969_vm9, %v7139_v25, %v7135_v3  ;;  %v7006_v25 = vadd.s32 4294967176, %v12369_v57  ;;  %v6323_v3 = vmul.f32 %v12385_v12, %v5520_v60  ;;  %v12390_v12 = vld [vmem:[#allocation58_spill] sm:$0xff] }
 0x891   : > { %v6654_v30 = vpop.permute.xlu1 %6653  ;;  %v7149_v5 = vrot.slane %v11443_v28, %v11548_v0  ;;  %v6320_v51 = vmul.f32 %v12386_v18, %v5517_v34  ;;  %v11565_v10 = vsub.s32 %v6999_v33, %v12371_v38  ;;  %v12387_v28 = vld [vmem:[#allocation63_spill] sm:$0xff]  ;;  %v5524_v33 = vadd.f32 %v10936_v24, %v11182_v21 }
 0x892   : > { %v11557_v50 = vsub.s32 %v6992_v29, %v12371_v38  ;;  %v11568_v60 = vsub.s32 %v7006_v25, %v12371_v38  ;;  %v12388_v25 = vld [vmem:[#allocation60_spill] sm:$0xff]  ;;  %v12391_v18 = vld [vmem:[#allocation67_spill] sm:$0xff] }
 0x893   : > { %6689 = vperm.xlu1 %8950, %v6319_v9   ;;  %v11542_v9 = vsub.s32 %v6985_v63, %v12371_v38 }
 0x894   : > { %6680 = vperm.xlu0 %8951, %v6316_v54   ;;  %v7145_v54 = vsel %vm6976_vm10, %v7144_v26, %v7140_v11  ;;  %v6329_v26 = vmul.f32 %v12387_v28, %v5526_v55  ;;  %v5529_v28 = vadd.f32 %v10936_v24, %v11222_v36  ;;  %v12397_v36 = vld [vmem:[#allocation71_spill] sm:$0xff] }
 0x895   : > { %v6663_v22 = vpop.permute.xlu0 %6662  ;;  %v7154_v63 = vrot.slane %v6654_v30, %v11542_v9  ;;  %v7150_v29 = vsel %vm12147_vm11, %v7149_v5, %v7145_v54  ;;  %v5521_v54 = vadd.f32 %v10936_v24, %v11197_v1  ;;  %v5527_v5 = vadd.f32 %v10936_v24, %v11204_v52  ;;  %v12394_v52 = vld [vmem:[#allocation62_spill] sm:$0xff] }
 0x896   : > { %v7169_v38 = vrot.slane %v6663_v22, %v11568_v60  ;;  %v5530_v22 = vadd.f32 %v10936_v24, %v11186_v31  ;;  %v5531_v1 = vadd.f32 %v10936_v24, %v11216_v58  ;;  %v12393_v31 = vld [vmem:[#allocation68_spill] sm:$0xff]  ;;  %v5534_v58 = vadd.f32 %v10936_v24, %v11199_v42 }
 0x897   : > { %6707 = vperm.xlu1 %8950, %v6325_v41   ;;  %v5523_v41 = vadd.f32 %v10936_v24, %v11188_v4  ;;  %v7164_v4 = vrot.slane %v11509_v45, %v11565_v10  ;;  %v7155_v34 = vsel %vm12148_vm12, %v7154_v63, %v7150_v29  ;;  %v12389_v63 = vld [vmem:[#allocation61_spill] sm:$0xff]  ;;  %v5525_v29 = vadd.f32 %v10936_v24, %v11211_v47 }
 0x898   : > { %6698 = vperm.xlu0 %8951, %v6322_v39   ;;  %v6327_v21 = vmul.f32 %v12389_v63, %v5524_v33  ;;  %v12396_v47 = vld [vmem:[#allocation65_spill] sm:$0xff]  ;;  %v5546_v42 = vadd.f32 %v10936_v24, %v11266_v43  ;;  %v12399_v63 = vld [vmem:[#allocation72_spill] sm:$0xff]  ;;  %v5544_v43 = vadd.f32 %v10936_v24, %v11273_v14  ;;  %v5539_v14 = vadd.f32 %v10936_v24, %v11244_v27 }
 0x899   : > { %v6657_v11 = vpop.permute.xlu0 %6656  ;;  %v6326_v55 = vmul.f32 %v12388_v25, %v5523_v41  ;;  %v12392_v41 = vld [vmem:[#allocation64_spill] sm:$0xff]  ;;  %v5535_v25 = vadd.f32 %v10936_v24, %v11226_v46  ;;  %v12401_v46 = vld [vmem:[#allocation69_spill] sm:$0xff]  ;;  %v5551_v27 = vadd.f32 %v10936_v24, %v11306_v20  ;;  %v12412_v20 = vld [vmem:[#allocation26_spill] sm:$0xff] }
 0x89a   : > { %v7159_v30 = vrot.slane %v6657_v11, %v11557_v50  ;;  %v6330_v11 = vmul.f32 %v12392_v41, %v5527_v5  ;;  %v5533_v5 = vadd.f32 %v10936_v24, %v11232_v16  ;;  %v5538_v41 = vadd.f32 %v10936_v24, %v11220_v56  ;;  %v12405_v16 = vld [vmem:[#allocation75_spill] sm:$0xff] }
 0x89b   : > { %6701 = vperm.xlu1 %8950, %v6323_v3   ;;  %v6324_v3 = vmul.f32 %v12390_v12, %v5521_v54  ;;  %v5532_v54 = vadd.f32 %v10936_v24, %v11206_v61  ;;  %v5547_v12 = vadd.f32 %v10936_v24, %v11288_v44  ;;  %v12404_v44 = vld [vmem:[#allocation81_spill] sm:$0xff]  ;;  %v5536_v56 = vadd.f32 %v10936_v24, %v11224_v48 }
 0x89c   : > { %v7160_v13 = vsel %vm6997_vm13, %v7159_v30, %v7155_v34  ;;  %6692 = vperm.xlu0 %8951, %v6320_v51   ;;  %v6333_v51 = vmul.f32 %v12391_v18, %v5530_v22  ;;  %v6334_v30 = vmul.f32 %v12393_v31, %v5531_v1  ;;  %v12395_v34 = vld [vmem:[#allocation66_spill] sm:$0xff]  ;;  %v12402_v18 = vld [vmem:[#allocation84_spill] sm:$0xff]  ;;  %v6341_v31 = vmul.f32 %v12405_v16, %v5538_v41 }
 0x89d   : > { %v7165_v39 = vsel %vm7004_vm14, %v7164_v4, %v7160_v13  ;;  %v5528_v4 = vadd.f32 %v10936_v24, %v11192_v49  ;;  %v6332_v33 = vmul.f32 %v12395_v34, %v5529_v28  ;;  %v5541_v13 = vadd.f32 %v10936_v24, %v11276_v15  ;;  %v12398_v49 = vld [vmem:[#allocation78_spill] sm:$0xff]  ;;  %v12400_v15 = vld [vmem:[#allocation83_spill] sm:$0xff]  ;;  %v12420_v41 = vld [vmem:[#allocation80_spill] sm:$0xff] }
 0x89e   : > { %v11585_v45 = vsel %vm7011_vm15, %v7169_v38, %v7165_v39  ;;  %v6337_v39 = vmul.f32 %v12397_v36, %v5534_v58  ;;  %v6349_v22 = vmul.f32 %v12400_v15, %v5546_v42  ;;  %v6350_v61 = vmul.f32 %v12402_v18, %v5547_v12  ;;  %v12408_v58 = vld [vmem:[#allocation87_spill] sm:$0xff]  ;;  %v12410_v36 = vld [vmem:[#allocation88_spill] sm:$0xff]  ;;  %v12413_v42 = vld [vmem:[#allocation85_spill] sm:$0xff] }
 0x89f   : > { %6719 = vperm.xlu1 %8950, %v6329_v26   ;;  %v6328_v26 = vmul.f32 %v12394_v52, %v5525_v29  ;;  %v6331_v38 = vmul.f32 %v12396_v47, %v5528_v4  ;;  %v5545_v29 = vadd.f32 %v10936_v24, %v11292_v19  ;;  %v5550_v52 = vadd.f32 %v10936_v24, %v11286_v40  ;;  %v12407_v4 = vld [vmem:[#allocation76_spill] sm:$0xff]  ;;  %v12416_v12 = vld [vmem:[#allocation33_spill] sm:$0xff] }
 0x8a0   : > { %6710 = vperm.xlu0 %8951, %v6326_v55   ;;  %v6344_v55 = vmul.f32 %v12398_v49, %v5541_v13  ;;  %v6342_v19 = vmul.f32 %v12407_v4, %v5539_v14  ;;  %v5537_v40 = vadd.f32 %v10936_v24, %v11250_v8  ;;  %v5548_v48 = vadd.f32 %v10936_v24, %v11290_v53  ;;  %v12414_v8 = vld [vmem:[#allocation129_spill] sm:$0xff] }
 0x8a1   : > { %v6353_v34 = vmul.f32 %v12408_v58, %v5550_v52  ;;  %v12423_v52 = vld [vmem:[#allocation20_spill] sm:$0xff]  ;;  %v12424_v4 = vld [vmem:[#allocation77_spill] sm:$0xff]  ;;  %v12425_v58 = vld [vmem:[#allocation138_spill] sm:$0xff] }
 0x8a3   : > { %6713 = vperm.xlu1 %8950, %v6327_v21   ;;  %v6338_v21 = vmul.f32 %v12399_v63, %v5535_v25  ;;  %v12411_v25 = vld [vmem:[#allocation74_spill] sm:$0xff]  ;;  %v5549_v63 = vadd.f32 %v10936_v24, %v12414_v8 }
 0x8a4   : > { %6704 = vperm.xlu0 %8951, %v6324_v3   ;;  %v6335_v3 = vmul.f32 %v12401_v46, %v5532_v54  ;;  %v6340_v49 = vmul.f32 %v12411_v25, %v5537_v40  ;;  %v6351_v54 = vmul.f32 %v12413_v42, %v5548_v48  ;;  %v5543_v46 = vadd.f32 %v10936_v24, %v12416_v12  ;;  %v12426_v40 = vld [vmem:[#allocation89_spill] sm:$0xff]  ;;  %v12430_v8 = vld [vmem:[#allocation90_spill] sm:$0xff] }
 0x8a5   : > { %v12429_v42 = vld [vmem:[#allocation141_spill] sm:$0xff] }
 0x8a7   : > { %6731 = vperm.xlu1 %8950, %v6333_v51   ;;  %v12403_v51 = vld [vmem:[#allocation70_spill] sm:$0xff] }
 0x8a8   : > { %6722 = vperm.xlu0 %8951, %v6330_v11   ;;  %v6336_v1 = vmul.f32 %v12403_v51, %v5533_v5  ;;  %v6347_v11 = vmul.f32 %v12404_v44, %v5544_v43  ;;  %v12418_v43 = vld [vmem:[#allocation128_spill] sm:$0xff]  ;;  %v12419_v51 = vld [vmem:[#allocation29_spill] sm:$0xff]  ;;  %v6346_v44 = vmul.f32 %v12420_v41, %v5543_v46  ;;  %v12437_v41 = vld [vmem:[#allocation146_spill] sm:$0xff] }
 0x8a9   : > { %v5554_v18 = vadd.f32 %v10936_v24, %v12418_v43  ;;  %v12433_v46 = vld [vmem:[#allocation140_spill] sm:$0xff] }
 0x8ab   : > { %6734 = vperm.xlu1 %8950, %v6334_v30   ;;  %v12406_v30 = vld [vmem:[#allocation82_spill] sm:$0xff] }
 0x8ac   : > { %6716 = vperm.xlu0 %8951, %v6328_v26   ;;  %v6348_v28 = vmul.f32 %v12406_v30, %v5545_v29  ;;  %v12421_v29 = vld [vmem:[#allocation91_spill] sm:$0xff] }
 0x8ad   : > { %v6357_v16 = vmul.f32 %v12421_v29, %v5554_v18  ;;  %v12435_v18 = vld [vmem:[#allocation134_spill] sm:$0xff] }
 0x8af   : > { %6728 = vperm.xlu1 %8950, %v6332_v33   ;;  %v12409_v33 = vld [vmem:[#allocation73_spill] sm:$0xff] }
 0x8b0   : > { %6725 = vperm.xlu0 %8951, %v6331_v38   ;;  %v6339_v47 = vmul.f32 %v12409_v33, %v5536_v56 }
 0x8b3   : > { %6743 = vperm.xlu1 %8950, %v6337_v39   ;;  %v6354_v39 = vmul.f32 %v12410_v36, %v5551_v27  ;;  %v12427_v36 = vld [vmem:[#allocation42_spill] sm:$0xff] }
 0x8b4   : > { %6764 = vperm.xlu0 %8951, %v6344_v55   ;;  %v5542_v55 = vadd.f32 %v10936_v24, %v12412_v20  ;;  %v12428_v20 = vld [vmem:[#allocation96_spill] sm:$0xff] }
 0x8b7   : > { %6746 = vperm.xlu1 %8950, %v6338_v21  }
 0x8b8   : > { %6779 = vperm.xlu0 %8951, %v6349_v22   ;;  %v12415_v22 = vld [vmem:[#allocation79_spill] sm:$0xff] }
 0x8b9   : > { %v6345_v53 = vmul.f32 %v12415_v22, %v5542_v55 }
 0x8bb   : > { %6737 = vperm.xlu1 %8950, %v6335_v3   ;;  %v12417_v3 = vld [vmem:[#allocation86_spill] sm:$0xff] }
 0x8bc   : > { %6782 = vperm.xlu0 %8951, %v6350_v61   ;;  %v6352_v5 = vmul.f32 %v12417_v3, %v5549_v63  ;;  %v5562_v3 = vadd.f32 %v10936_v24, %v12433_v46  ;;  %v12453_v46 = vld [vmem:[#allocation151_spill] sm:$0xff] }
 0x8bf   : > { %6740 = vperm.xlu1 %8950, %v6336_v1   ;;  %v5540_v1 = vadd.f32 %v10936_v24, %v12419_v51  ;;  %v12436_v51 = vld [vmem:[#allocation99_spill] sm:$0xff] }
 0x8c0   : > { %6773 = vperm.xlu0 %8951, %v6347_v11  }
 0x8c2   : > { %v11641_v26 = vpop.xlane.xlu1 %5446 }
 0x8c3   : > { %6755 = vperm.xlu1 %8950, %v6341_v31   ;;  %v12422_v31 = vld [vmem:[#allocation130_spill] sm:$0xff] }
 0x8c4   : > { %6776 = vperm.xlu0 %8951, %v6348_v28   ;;  %v5552_v14 = vadd.f32 %v10936_v24, %v12422_v31 }
 0x8c6   : > { %v11652_v38 = vpop.xlane.xlu0 %5448  ;;  %v11654_v13 = vpop.xlane.xlu1 %5442  ;;  %v6355_v48 = vmul.f32 %v12426_v40, %v5552_v14  ;;  %v12440_v14 = vld [vmem:[#allocation143_spill] sm:$0xff] }
 0x8c7   : > { %6758 = vperm.xlu1 %8950, %v6342_v19   ;;  %v6343_v19 = vmul.f32 %v12424_v4, %v5540_v1  ;;  %v6365_v1 = vmul.f32 %v12436_v51, %v5562_v3  ;;  %v12442_v4 = vld [vmem:[#allocation111_spill] sm:$0xff]  ;;  %v5567_v3 = vadd.f32 %v10936_v24, %v12453_v46 }
 0x8c8   : > { %6791 = vperm.xlu0 %8951, %v6353_v34   ;;  %v5559_v34 = vadd.f32 %v10936_v24, %v12425_v58  ;;  %v12443_v58 = vld [vmem:[#allocation157_spill] sm:$0xff]  ;;  %v12456_v51 = vld [vmem:[#allocation47_spill] sm:$0xff] }
 0x8ca   : > { %v11665_v21 = vpop.xlane.xlu0 %5444  ;;  %v6672_v15 = vpop.permute.xlu1 %6671  ;;  %v6362_v55 = vmul.f32 %v12428_v20, %v5559_v34  ;;  %v5575_v34 = vadd.f32 %v10936_v24, %v12443_v58  ;;  %v12448_v20 = vld [vmem:[#allocation98_spill] sm:$0xff]  ;;  %v5579_v58 = vadd.f32 %v10936_v24, %v11489_v32 }
 0x8cb   : > { %6749 = vperm.xlu1 %8950, %v6339_v47   ;;  %v7183_v27 = vrot.slane %v6672_v15, %v11449_v23  ;;  %v12431_v15 = vld [vmem:[#allocation44_spill] sm:$0xff] }
 0x8cc   : > { %6794 = vperm.xlu0 %8951, %v6354_v39   ;;  %v5553_v39 = vadd.f32 %v10936_v24, %v12427_v36  ;;  %v5558_v22 = vadd.f32 %v10936_v24, %v12431_v15  ;;  %v12451_v15 = vld [vmem:[#allocation153_spill] sm:$0xff] }
 0x8ce   : > { %v6666_v11 = vpop.permute.xlu1 %6665  ;;  %v6356_v63 = vmul.f32 %v12430_v8, %v5553_v39  ;;  %v12447_v39 = vld [vmem:[#allocation112_spill] sm:$0xff]  ;;  %v12450_v8 = vld [vmem:[#allocation107_spill] sm:$0xff] }
 0x8cf   : > { %6752 = vperm.xlu1 %8950, %v6340_v49   ;;  %v7174_v28 = vrot.slane %v6666_v11, %v11437_v35  ;;  %v12438_v11 = vld [vmem:[#allocation93_spill] sm:$0xff] }
 0x8d0   : > { %6785 = vperm.xlu0 %8951, %v6351_v54   ;;  %v5557_v54 = vadd.f32 %v10936_v24, %v12429_v42  ;;  %v12449_v42 = vld [vmem:[#allocation149_spill] sm:$0xff] }
 0x8d2   : > { %v6675_v61 = vpop.permute.xlu0 %6674 }
 0x8d3   : > { %6767 = vperm.xlu1 %8950, %v6345_v53   ;;  %v7188_v33 = vrot.slane %v6675_v61, %v11462_v7  ;;  %v12432_v53 = vld [vmem:[#allocation94_spill] sm:$0xff]  ;;  %v5556_v61 = vadd.f32 %v10936_v24, %v12435_v18  ;;  %v12455_v18 = vld [vmem:[#allocation21_spill] sm:$0xff] }
 0x8d4   : > { %6788 = vperm.xlu0 %8951, %v6352_v5   ;;  %v6360_v12 = vmul.f32 %v12432_v53, %v5557_v54  ;;  %v12434_v5 = vld [vmem:[#allocation95_spill] sm:$0xff]  ;;  %v5566_v54 = vadd.f32 %v10936_v24, %v12449_v42  ;;  %v12468_v42 = vld [vmem:[#allocation116_spill] sm:$0xff] }
 0x8d5   : > { %v6361_v43 = vmul.f32 %v12434_v5, %v5558_v22  ;;  %v6359_v29 = vmul.f32 %v12438_v11, %v5556_v61  ;;  %v5571_v22 = vadd.f32 %v10936_v24, %v12451_v15  ;;  %v12452_v53 = vld [vmem:[#allocation103_spill] sm:$0xff]  ;;  %v12454_v5 = vld [vmem:[#allocation108_spill] sm:$0xff]  ;;  %v5573_v61 = vadd.f32 %v10936_v24, %v12455_v18  ;;  %v12458_v11 = vld [vmem:[#allocation110_spill] sm:$0xff] }
 0x8d6   : > { %v6669_v30 = vpop.permute.xlu0 %6668  ;;  %v6382_v32 = vmul.f32 %v12468_v42, %v5579_v58  ;;  %v12470_v15 = vld [vmem:[#allocation38_spill] sm:$0xff]  ;;  %v12480_v58 = vld [vmem:[#allocation35_spill] sm:$0xff] }
 0x8d7   : > { %6770 = vperm.xlu1 %8950, %v6346_v44   ;;  %v7178_v56 = vrot.slane %v6669_v30, %v12423_v52  ;;  %v5563_v44 = vadd.f32 %v10936_v24, %v12437_v41  ;;  %v5560_v30 = vadd.f32 %v10936_v24, %v12440_v14  ;;  %v12457_v41 = vld [vmem:[#allocation104_spill] sm:$0xff]  ;;  %v12460_v14 = vld [vmem:[#allocation101_spill] sm:$0xff] }
 0x8d8   : > { %6803 = vperm.xlu0 %8951, %v6357_v16   ;;  %v12439_v16 = vld [vmem:[#allocation155_spill] sm:$0xff] }
 0x8d9   : > { %v7179_v47 = vsel %vm6913_vm1, %v7178_v56, %v7174_v28  ;;  %v5574_v31 = vadd.f32 %v10936_v24, %v12439_v16  ;;  %v12441_v28 = vld [vmem:[#allocation100_spill] sm:$0xff]  ;;  %v12459_v16 = vld [vmem:[#allocation51_spill] sm:$0xff] }
 0x8da   : > { %v7184_v25 = vsel %vm6920_vm2, %v7183_v27, %v7179_v47  ;;  %v6366_v56 = vmul.f32 %v12441_v28, %v5563_v44  ;;  %v12444_v27 = vld [vmem:[#allocation97_spill] sm:$0xff]  ;;  %v12445_v47 = vld [vmem:[#allocation148_spill] sm:$0xff]  ;;  %v6370_v44 = vmul.f32 %v12457_v41, %v5567_v3 }
 0x8db   : > { %6761 = vperm.xlu1 %8950, %v6343_v19   ;;  %v11692_v49 = vsel %vm6927_vm3, %v7188_v33, %v7184_v25  ;;  %v6377_v19 = vmul.f32 %v12442_v4, %v5574_v31  ;;  %v6363_v33 = vmul.f32 %v12444_v27, %v5560_v30  ;;  %v5561_v40 = vadd.f32 %v10936_v24, %v12445_v47  ;;  %v12461_v28 = vld [vmem:[#allocation48_spill] sm:$0xff]  ;;  %v12462_v4 = vld [vmem:[#allocation115_spill] sm:$0xff]  ;;  %v12464_v47 = vld [vmem:[#allocation102_spill] sm:$0xff] }
 0x8dc   : > { %6797 = vperm.xlu0 %8951, %v6355_v48   ;;  %v12446_v48 = vld [vmem:[#allocation46_spill] sm:$0xff]  ;;  %v6378_v25 = vmul.f32 %v12447_v39, %v5575_v34  ;;  %v5578_v31 = vadd.f32 %v10936_v24, %v12459_v16  ;;  %v12463_v27 = vld [vmem:[#allocation31_spill] sm:$0xff]  ;;  %v12466_v39 = vld [vmem:[#allocation41_spill] sm:$0xff] }
 0x8dd   : > { %v5570_v36 = vadd.f32 %v10936_v24, %v12446_v48  ;;  %v12465_v48 = vld [vmem:[#allocation152_spill] sm:$0xff] }
 0x8de   : > { %v12472_v3 = vld [vmem:[#allocation156_spill] sm:$0xff] }
 0x8df   : > { %6818 = vperm.xlu1 %8950, %v6362_v55   ;;  %v6364_v55 = vmul.f32 %v12448_v20, %v5561_v40  ;;  %v12467_v20 = vld [vmem:[#allocation23_spill] sm:$0xff] }
 0x8e0   : > { %6800 = vperm.xlu0 %8951, %v6356_v63   ;;  %v6373_v63 = vmul.f32 %v12450_v8, %v5570_v36  ;;  %v5568_v36 = vadd.f32 %v10936_v24, %v12465_v48 }
 0x8e3   : > { %6812 = vperm.xlu1 %8950, %v6360_v12   ;;  %v6369_v12 = vmul.f32 %v12452_v53, %v5566_v54  ;;  %v12469_v54 = vld [vmem:[#allocation49_spill] sm:$0xff] }
 0x8e4   : > { %6815 = vperm.xlu0 %8951, %v6361_v43   ;;  %v6374_v43 = vmul.f32 %v12454_v5, %v5571_v22  ;;  %v5576_v8 = vadd.f32 %v10936_v24, %v12469_v54  ;;  %v7016_v22 = vrot.slane %v12470_v15, %v11437_v35  ;;  %v5572_v5 = vadd.f32 %v10936_v24, %v12472_v3  ;;  %v12486_v54 = vld [vmem:[#allocation114_spill] sm:$0xff] }
 0x8e5   : > { %v5582_v15 = vadd.f32 %v10936_v24, %v11641_v26  ;;  %v12489_v26 = vld [vmem:[#allocation27_spill] sm:$0xff] }
 0x8e7   : > { %6827 = vperm.xlu1 %8950, %v6365_v1   ;;  %v5564_v1 = vadd.f32 %v10936_v24, %v12456_v51 }
 0x8e8   : > { %6809 = vperm.xlu0 %8951, %v6359_v29   ;;  %v6376_v29 = vmul.f32 %v12458_v11, %v5573_v61 }
 0x8e9   : > { %v6367_v30 = vmul.f32 %v12460_v14, %v5564_v1  ;;  %v12474_v1 = vld [vmem:[#allocation37_spill] sm:$0xff] }
 0x8ea   : > { %v7025_v41 = vrot.slane %v12474_v1, %v11449_v23  ;;  %v12488_v1 = vld [vmem:[#allocation106_spill] sm:$0xff] }
 0x8eb   : > { %6830 = vperm.xlu1 %8950, %v6366_v56   ;;  %v5565_v56 = vadd.f32 %v10936_v24, %v12461_v28  ;;  %v12477_v28 = vld [vmem:[#allocation158_spill] sm:$0xff] }
 0x8ec   : > { %6863 = vperm.xlu0 %8951, %v6377_v19   ;;  %v6381_v19 = vmul.f32 %v12462_v4, %v5578_v31  ;;  %v12476_v31 = vld [vmem:[#allocation24_spill] sm:$0xff] }
 0x8ed   : > { %v6368_v40 = vmul.f32 %v12464_v47, %v5565_v56  ;;  %v6926_v14 = vrot.slane %v12476_v31, %v11462_v7  ;;  %v12478_v56 = vld [vmem:[#allocation28_spill] sm:$0xff]  ;;  %v12490_v31 = vld [vmem:[#allocation43_spill] sm:$0xff] }
 0x8ee   : > { %v6933_v4 = vrot.slane %v12478_v56, %v12477_v28  ;;  %v12481_v47 = vld [vmem:[#allocation132_spill] sm:$0xff] }
 0x8ef   : > { %6821 = vperm.xlu1 %8950, %v6363_v33   ;;  %v6907_v33 = vrot.slane %v12463_v27, %v11437_v35 }
 0x8f0   : > { %6866 = vperm.xlu0 %8951, %v6378_v25   ;;  %v7020_v25 = vrot.slane %v12466_v39, %v12423_v52 }
 0x8f2   : > { %v7021_v61 = vsel %vm6913_vm1, %v7020_v25, %v7016_v22  ;;  %v12484_v25 = vld [vmem:[#allocation131_spill] sm:$0xff] }
 0x8f3   : > { %6824 = vperm.xlu1 %8950, %v6364_v55   ;;  %v6912_v55 = vrot.slane %v12467_v20, %v12423_v52  ;;  %v7030_v20 = vrot.slane %v12484_v25, %v11462_v7 }
 0x8f4   : > { %6851 = vperm.xlu0 %8951, %v6373_v63  }
 0x8f5   : > { %v6914_v53 = vsel %vm6913_vm1, %v6912_v55, %v6907_v33  ;;  %v7026_v33 = vsel %vm6920_vm2, %v7025_v41, %v7021_v61  ;;  %v12485_v55 = vld [vmem:[#allocation137_spill] sm:$0xff] }
 0x8f7   : > { %6839 = vperm.xlu1 %8950, %v6369_v12   ;;  %v12471_v12 = vld [vmem:[#allocation105_spill] sm:$0xff] }
 0x8f8   : > { %6854 = vperm.xlu0 %8951, %v6374_v43   ;;  %v6371_v46 = vmul.f32 %v12471_v12, %v5568_v36  ;;  %v12473_v43 = vld [vmem:[#allocation25_spill] sm:$0xff]  ;;  %v7031_v12 = vsel %vm6927_vm3, %v7030_v20, %v7026_v33 }
 0x8f9   : > { %v6919_v18 = vrot.slane %v12473_v43, %v11449_v23  ;;  %v12483_v36 = vld [vmem:[#allocation109_spill] sm:$0xff] }
 0x8fa   : > { %v6375_v39 = vmul.f32 %v12483_v36, %v5572_v5  ;;  %v12487_v43 = vld [vmem:[#allocation133_spill] sm:$0xff] }
 0x8fb   : > { %6842 = vperm.xlu1 %8950, %v6370_v44   ;;  %v12475_v44 = vld [vmem:[#allocation113_spill] sm:$0xff] }
 0x8fc   : > { %6860 = vperm.xlu0 %8951, %v6376_v29   ;;  %v6379_v11 = vmul.f32 %v12475_v44, %v5576_v8  ;;  %v5577_v29 = vadd.f32 %v10936_v24, %v11523_v6  ;;  %v12482_v6 = vld [vmem:[#allocation154_spill] sm:$0xff]  ;;  %v6947_v44 = vrot.slane %v12489_v26, %v11486_v62 }
 0x8fd   : > { %v5569_v48 = vadd.f32 %v10936_v24, %v12482_v6 }
 0x8fe   : > { %v6380_v8 = vmul.f32 %v12486_v54, %v5577_v29 }
 0x8ff   : > { %6833 = vperm.xlu1 %8950, %v6367_v30   ;;  %v11748_v34 = vpop.xlane.xlu1 %5454  ;;  %v6921_v30 = vsel %vm6920_vm2, %v6919_v18, %v6914_v53  ;;  %v5555_v18 = vadd.f32 %v10936_v24, %v12487_v43  ;;  %v6372_v41 = vmul.f32 %v12488_v1, %v5569_v48  ;;  %v12500_v1 = vld [vmem:[#allocation122_spill] sm:$0xff] }
 0x900   : > { %6875 = vperm.xlu0 %8951, %v6381_v19   ;;  %v12479_v19 = vld [vmem:[#allocation159_spill] sm:$0xff] }
 0x901   : > { %v6940_v27 = vrot.slane %v12480_v58, %v12479_v19  ;;  %v7040_v42 = vrot.slane %v12485_v55, %v12479_v19  ;;  %v12496_v55 = vld [vmem:[#allocation135_spill] sm:$0xff] }
 0x903   : > { %6836 = vperm.xlu1 %8950, %v6368_v40   ;;  %v11762_v63 = vpop.xlane.xlu1 %5450  ;;  %v11773_v51 = vpop.xlane.xlu0 %5456  ;;  %v7035_v40 = vrot.slane %v12481_v47, %v12477_v28  ;;  %v12492_v47 = vld [vmem:[#allocation92_spill] sm:$0xff] }
 0x904   : > { %6878 = vperm.xlu0 %8951, %v6382_v32   ;;  %v6928_v32 = vsel %vm6927_vm3, %v6926_v14, %v6921_v30  ;;  %v7045_v14 = vrot.slane %v12490_v31, %v11486_v62  ;;  %v12491_v30 = vld [vmem:[#allocation119_spill] sm:$0xff] }
 0x905   : > { %v6935_v53 = vsel %vm6934_vm4, %v6933_v4, %v6928_v32  ;;  %v7036_v61 = vsel %vm6934_vm4, %v7035_v40, %v7031_v12  ;;  %v6385_v56 = vmul.f32 %v12491_v30, %v5582_v15  ;;  %v5583_v4 = vadd.f32 %v10936_v24, %v11652_v38  ;;  %v12495_v38 = vld [vmem:[#allocation125_spill] sm:$0xff]  ;;  %v12497_v32 = vld [vmem:[#allocation144_spill] sm:$0xff] }
 0x906   : > { %v6942_v5 = vsel %vm6941_vm5, %v6940_v27, %v6935_v53  ;;  %v6358_v40 = vmul.f32 %v12492_v47, %v5555_v18  ;;  %v6961_v20 = vrot.slane %v12495_v38, %v11498_v17  ;;  %v7060_v54 = vrot.slane %v12497_v32, %v11507_v37  ;;  %v12502_v30 = vld [vmem:[#allocation117_spill] sm:$0xff] }
 0x907   : > { %6845 = vperm.xlu1 %8950, %v6371_v46   ;;  %v11780_v16 = vpop.permute.xlu1 %6683  ;;  %v5453_v46 = vpop.xlane.xlu0 %5452  ;;  %v6949_v27 = vsel %vm6948_vm6, %v6947_v44, %v6942_v5  ;;  %v12501_v44 = vld [vmem:[#allocation136_spill] sm:$0xff] }
 0x908   : > { %6869 = vperm.xlu0 %8951, %v6379_v11   ;;  %v7041_v11 = vsel %vm6941_vm5, %v7040_v42, %v7036_v61  ;;  %v5585_v36 = vadd.f32 %v10936_v24, %v5453_v46  ;;  %v7050_v42 = vrot.slane %v12496_v55, %v11504_v59  ;;  %v12499_v46 = vld [vmem:[#allocation127_spill] sm:$0xff]  ;;  %v5586_v61 = vadd.f32 %v10936_v24, %v11748_v34 }
 0x909   : > { %v7046_v6 = vsel %vm6948_vm6, %v7045_v14, %v7041_v11  ;;  %v7065_v11 = vrot.slane %v12501_v44, %v11530_v2  ;;  %v7203_v14 = vrot.slane %v11780_v16, %v11486_v62  ;;  %v5581_v34 = vadd.f32 %v10936_v24, %v11665_v21  ;;  %v12504_v21 = vld [vmem:[#allocation147_spill] sm:$0xff] }
 0x90a   : > { %v7051_v5 = vsel %vm6955_vm7, %v7050_v42, %v7046_v6  ;;  %v12507_v42 = vld [vmem:[#allocation45_spill] sm:$0xff] }
 0x90b   : > { %6857 = vperm.xlu1 %8950, %v6375_v39   ;;  %v6678_v22 = vpop.permute.xlu1 %6677  ;;  %v12494_v39 = vld [vmem:[#allocation30_spill] sm:$0xff]  ;;  %v7080_v32 = vrot.slane %v12507_v42, %v11557_v50 }
 0x90c   : > { %v7193_v3 = vrot.slane %v6678_v22, %v12477_v28  ;;  %6872 = vperm.xlu0 %8951, %v6380_v8   ;;  %v6954_v25 = vrot.slane %v12494_v39, %v11504_v59  ;;  %v12498_v8 = vld [vmem:[#allocation120_spill] sm:$0xff]  ;;  %v5580_v22 = vadd.f32 %v10936_v24, %v11654_v13 }
 0x90d   : > { %v6386_v15 = vmul.f32 %v12498_v8, %v5583_v4 }
 0x90e   : > { %v7194_v29 = vsel %vm6934_vm4, %v7193_v3, %v11692_v49  ;;  %v12493_v49 = vld [vmem:[#allocation139_spill] sm:$0xff]  ;;  %v6956_v12 = vsel %vm6955_vm7, %v6954_v25, %v6949_v27  ;;  %v6968_v3 = vrot.slane %v12499_v46, %v11507_v37  ;;  %v12509_v46 = vld [vmem:[#allocation34_spill] sm:$0xff] }
 0x90f   : > { %6848 = vperm.xlu1 %8950, %v6372_v41   ;;  %v11821_v58 = vpop.permute.xlu1 %6695  ;;  %v6687_v33 = vpop.permute.xlu0 %6686  ;;  %v7055_v48 = vrot.slane %v12493_v49, %v11498_v17  ;;  %v6388_v41 = vmul.f32 %v12500_v1, %v5585_v36  ;;  %v6963_v13 = vsel %vm6962_vm8, %v6961_v20, %v6956_v12  ;;  %v12505_v25 = vld [vmem:[#allocation123_spill] sm:$0xff]  ;;  %v12506_v20 = vld [vmem:[#allocation142_spill] sm:$0xff]  ;;  %v12511_v1 = vld [vmem:[#allocation40_spill] sm:$0xff] }
 0x910   : > { %6887 = vperm.xlu0 %8951, %v6385_v56   ;;  %v6383_v56 = vmul.f32 %v12502_v30, %v5580_v22  ;;  %v7208_v4 = vrot.slane %v6687_v33, %v11504_v59  ;;  %v6970_v49 = vsel %vm6969_vm9, %v6968_v3, %v6963_v13  ;;  %v7075_v33 = vrot.slane %v12504_v21, %v11542_v9 }
 0x911   : > { %v7056_v18 = vsel %vm6962_vm8, %v7055_v48, %v7051_v5  ;;  %v7070_v55 = vrot.slane %v12506_v20, %v11548_v0  ;;  %v6982_v3 = vrot.slane %v12509_v46, %v11548_v0  ;;  %v12510_v5 = vld [vmem:[#allocation126_spill] sm:$0xff] }
 0x912   : > { %v7061_v31 = vsel %vm6969_vm9, %v7060_v54, %v7056_v18 }
 0x913   : > { %6806 = vperm.xlu1 %8950, %v6358_v40   ;;  %v6690_v53 = vpop.permute.xlu1 %6689  ;;  %v6681_v43 = vpop.permute.xlu0 %6680  ;;  %v12503_v40 = vld [vmem:[#allocation32_spill] sm:$0xff]  ;;  %v7066_v39 = vsel %vm6976_vm10, %v7065_v11, %v7061_v31  ;;  %v7223_v11 = vrot.slane %v11821_v58, %v11530_v2  ;;  %v5587_v31 = vadd.f32 %v10936_v24, %v11773_v51 }
 0x914   : > { %v7198_v26 = vrot.slane %v6681_v43, %v12479_v19  ;;  %6890 = vperm.xlu0 %8951, %v6386_v15   ;;  %v6975_v6 = vrot.slane %v12503_v40, %v11530_v2  ;;  %v7213_v16 = vrot.slane %v6690_v53, %v11498_v17  ;;  %v12508_v15 = vld [vmem:[#allocation118_spill] sm:$0xff]  ;;  %v5584_v53 = vadd.f32 %v10936_v24, %v11762_v63  ;;  %v12513_v40 = vld [vmem:[#allocation145_spill] sm:$0xff]  ;;  %v12514_v51 = vld [vmem:[#allocation36_spill] sm:$0xff] }
 0x915   : > { %v6384_v22 = vmul.f32 %v12508_v15, %v5581_v34  ;;  %v6989_v43 = vrot.slane %v12510_v5, %v11542_v9  ;;  %v7071_v18 = vsel %vm12147_vm11, %v7070_v55, %v7066_v39 }
 0x916   : > { %v7199_v27 = vsel %vm6941_vm5, %v7198_v26, %v7194_v29  ;;  %v6389_v29 = vmul.f32 %v12505_v25, %v5586_v61  ;;  %v6977_v8 = vsel %vm6976_vm10, %v6975_v6, %v6970_v49  ;;  %v7076_v26 = vsel %vm12148_vm12, %v7075_v33, %v7071_v18  ;;  %v12515_v33 = vld [vmem:[#allocation150_spill] sm:$0xff] }
 0x917   : > { %6896 = vperm.xlu1 %8950, %v6388_v41   ;;  %v11860_v47 = vpop.permute.xlu1 %6707  ;;  %v7204_v48 = vsel %vm6948_vm6, %v7203_v14, %v7199_v27  ;;  %v6699_v36 = vpop.permute.xlu0 %6698  ;;  %v6996_v41 = vrot.slane %v12511_v1, %v11557_v50  ;;  %v6984_v63 = vsel %vm12147_vm11, %v6982_v3, %v6977_v8  ;;  %v7081_v44 = vsel %vm6997_vm13, %v7080_v32, %v7076_v26  ;;  %v12512_v14 = vld [vmem:[#allocation121_spill] sm:$0xff]  ;;  %v12517_v32 = vld [vmem:[#allocation39_spill] sm:$0xff] }
 0x918   : > { %v7209_v38 = vsel %vm6955_vm7, %v7208_v4, %v7204_v48  ;;  %6881 = vperm.xlu0 %8951, %v6383_v56   ;;  %v6387_v30 = vmul.f32 %v12512_v14, %v5584_v53  ;;  %v7228_v56 = vrot.slane %v6699_v36, %v11548_v0  ;;  %v6991_v27 = vsel %vm12148_vm12, %v6989_v43, %v6984_v63 }
 0x919   : > { %v7214_v54 = vsel %vm6962_vm8, %v7213_v16, %v7209_v38  ;;  %v7085_v6 = vrot.slane %v12513_v40, %v11565_v10  ;;  %v6998_v16 = vsel %vm6997_vm13, %v6996_v41, %v6991_v27  ;;  %v7003_v36 = vrot.slane %v12514_v51, %v11565_v10 }
 0x91a   : > { %v7090_v25 = vrot.slane %v12515_v33, %v11568_v60 }
 0x91b   : > { %6899 = vperm.xlu1 %8950, %v6389_v29   ;;  %v6702_v12 = vpop.permute.xlu1 %6701  ;;  %v6693_v61 = vpop.permute.xlu0 %6692  ;;  %v7086_v39 = vsel %vm7004_vm14, %v7085_v6, %v7081_v44  ;;  %v12516_v29 = vld [vmem:[#allocation124_spill] sm:$0xff]  ;;  %v7005_v55 = vsel %vm7004_vm14, %v7003_v36, %v6998_v16 }
 0x91c   : > { %v7218_v13 = vrot.slane %v6693_v61, %v11507_v37  ;;  %6884 = vperm.xlu0 %8951, %v6384_v22   ;;  %v7233_v48 = vrot.slane %v6702_v12, %v11542_v9  ;;  %v6390_v38 = vmul.f32 %v12516_v29, %v5587_v31  ;;  %v7091_v8 = vsel %vm7011_vm15, %v7090_v25, %v7086_v39 }
 0x91d   : > { %v7243_v22 = vrot.slane %v11860_v47, %v11565_v10 }
 0x91e   : > { %v7219_v34 = vsel %vm6969_vm9, %v7218_v13, %v7214_v54  ;;  %v7010_v54 = vrot.slane %v12517_v32, %v11568_v60 }
 0x91f   : > { %v6720_v4 = vpop.permute.xlu1 %6719  ;;  %v7224_v49 = vsel %vm6976_vm10, %v7223_v11, %v7219_v34  ;;  %v6711_v58 = vpop.permute.xlu0 %6710 }
 0x920   : > { %v7229_v24 = vsel %vm12147_vm11, %v7228_v56, %v7224_v49  ;;  %6893 = vperm.xlu0 %8951, %v6387_v30   ;;  %vm7568_vm11 = vcmask 1042434   ;;  %v7012_v53 = vsel %vm7011_vm15, %v7010_v54, %v7005_v55  ;;  %v7248_v12 = vrot.slane %v6711_v58, %v11568_v60 }
 0x921   : > { %v7234_v21 = vsel %vm12148_vm12, %v7233_v48, %v7229_v24  ;;  %vm7570_vm12 = vcmask 1043459   ;;  %v7567_v5 = vsel %vm7566_vm0, %v7091_v8, %v7012_v53  ;;  %v7262_v44 = vrot.slane %v6720_v4, %v11449_v23 }
 0x922   : > { %v7569_v61 = vsel %vm7568_vm11, %v11585_v45, %v7567_v5  ;;  %vm12518_vm11 = vcmask 786112   ;;  %vm7572_vm0 = vcmask 1044484  }
 0x923   : > { %v6714_v20 = vpop.permute.xlu1 %6713  ;;  %v6705_v42 = vpop.permute.xlu0 %6704 }
 0x924   : > { %v7238_v15 = vrot.slane %v6705_v42, %v11557_v50  ;;  %6902 = vperm.xlu0 %8951, %v6390_v38   ;;  %v7253_v47 = vrot.slane %v6714_v20, %v11437_v35 }
 0x926   : > { %v7239_v46 = vsel %vm6997_vm13, %v7238_v15, %v7234_v21 }
 0x927   : > { %v6732_v3 = vpop.permute.xlu1 %6731  ;;  %v7244_v43 = vsel %vm7004_vm14, %v7243_v22, %v7239_v46  ;;  %v6723_v18 = vpop.permute.xlu0 %6722 }
 0x928   : > { %v7249_v1 = vsel %vm7011_vm15, %v7248_v12, %v7244_v43  ;;  %v7267_v11 = vrot.slane %v6723_v18, %v11462_v7  ;;  %v7282_v40 = vrot.slane %v6732_v3, %v11486_v62 }
 0x929   : > { %v7571_v41 = vsel %vm7570_vm12, %v7249_v1, %v7569_v61  ;;  %vm12519_vm12 = vcmask 851712  }
 0x92b   : > { %v6735_v26 = vpop.permute.xlu1 %6734  ;;  %v6717_v13 = vpop.permute.xlu0 %6716 }
 0x92c   : > { %v7257_v63 = vrot.slane %v6717_v13, %v12423_v52  ;;  %v7287_v4 = vrot.slane %v6735_v26, %v11504_v59 }
 0x92e   : > { %v7258_v31 = vsel %vm6913_vm1, %v7257_v63, %v7253_v47 }
 0x92f   : > { %v6729_v14 = vpop.permute.xlu1 %6728  ;;  %v7263_v30 = vsel %vm6920_vm2, %v7262_v44, %v7258_v31  ;;  %v6726_v56 = vpop.permute.xlu0 %6725 }
 0x930   : > { %v7277_v45 = vrot.slane %v6729_v14, %v12479_v19  ;;  %v7268_v34 = vsel %vm6927_vm3, %v7267_v11, %v7263_v30  ;;  %v7272_v27 = vrot.slane %v6726_v56, %v12477_v28 }
 0x932   : > { %v7273_v6 = vsel %vm6934_vm4, %v7272_v27, %v7268_v34 }
 0x933   : > { %v6744_v49 = vpop.permute.xlu1 %6743  ;;  %v7278_v48 = vsel %vm6941_vm5, %v7277_v45, %v7273_v6  ;;  %v6765_v58 = vpop.permute.xlu0 %6764 }
 0x934   : > { %v7283_v16 = vsel %vm6948_vm6, %v7282_v40, %v7278_v48  ;;  %v7302_v55 = vrot.slane %v6744_v49, %v11530_v2  ;;  %v7336_v34 = vrot.slane %v6765_v58, %v12423_v52 }
 0x935   : > { %v7288_v24 = vsel %vm6955_vm7, %v7287_v4, %v7283_v16 }
 0x937   : > { %v6747_v51 = vpop.permute.xlu1 %6746  ;;  %v6780_v36 = vpop.permute.xlu0 %6779 }
 0x938   : > { %v7307_v42 = vrot.slane %v6747_v51, %v11548_v0  ;;  %v7361_v58 = vrot.slane %v6780_v36, %v11486_v62 }
 0x93b   : > { %v6738_v39 = vpop.permute.xlu1 %6737  ;;  %v6783_v21 = vpop.permute.xlu0 %6782 }
 0x93c   : > { %v7292_v33 = vrot.slane %v6738_v39, %v11498_v17 }
 0x93e   : > { %v7293_v25 = vsel %vm6962_vm8, %v7292_v33, %v7288_v24 }
 0x93f   : > { %v6741_v29 = vpop.permute.xlu1 %6740  ;;  %v6774_v38 = vpop.permute.xlu0 %6773 }
 0x940   : > { %v7297_v20 = vrot.slane %v6741_v29, %v11507_v37  ;;  %v7351_v48 = vrot.slane %v6774_v38, %v12477_v28 }
 0x942   : > { %v7298_v32 = vsel %vm6969_vm9, %v7297_v20, %v7293_v25  ;;  %v7366_v25 = vrot.slane %v6783_v21, %v11504_v59 }
 0x943   : > { %v7303_v54 = vsel %vm6976_vm10, %v7302_v55, %v7298_v32  ;;  %v6756_v8 = vpop.permute.xlu1 %6755  ;;  %v6777_v15 = vpop.permute.xlu0 %6776 }
 0x944   : > { %v7308_v22 = vsel %vm12518_vm11, %v7307_v42, %v7303_v54  ;;  %v7322_v26 = vrot.slane %v6756_v8, %v11565_v10  ;;  %v7356_v24 = vrot.slane %v6777_v15, %v12479_v19 }
 0x947   : > { %v6759_v53 = vpop.permute.xlu1 %6758  ;;  %v6792_v12 = vpop.permute.xlu0 %6791 }
 0x948   : > { %v7327_v13 = vrot.slane %v6759_v53, %v11568_v60  ;;  %v7381_v8 = vrot.slane %v6792_v12, %v11530_v2 }
 0x94b   : > { %v6750_v46 = vpop.permute.xlu1 %6749  ;;  %v6795_v3 = vpop.permute.xlu0 %6794 }
 0x94c   : > { %v7312_v5 = vrot.slane %v6750_v46, %v11542_v9  ;;  %v7386_v15 = vrot.slane %v6795_v3, %v11548_v0 }
 0x94e   : > { %v7313_v43 = vsel %vm12519_vm12, %v7312_v5, %v7308_v22 }
 0x94f   : > { %v6753_v18 = vpop.permute.xlu1 %6752  ;;  %v6786_v61 = vpop.permute.xlu0 %6785 }
 0x950   : > { %v7317_v1 = vrot.slane %v6753_v18, %v11557_v50  ;;  %v7371_v20 = vrot.slane %v6786_v61, %v11498_v17 }
 0x952   : > { %v7318_v47 = vsel %vm6997_vm13, %v7317_v1, %v7313_v43 }
 0x953   : > { %v7323_v63 = vsel %vm7004_vm14, %v7322_v26, %v7318_v47  ;;  %v6768_v44 = vpop.permute.xlu1 %6767  ;;  %v6789_v31 = vpop.permute.xlu0 %6788 }
 0x954   : > { %v7328_v11 = vsel %vm7011_vm15, %v7327_v13, %v7323_v63  ;;  %v7341_v6 = vrot.slane %v6768_v44, %v11449_v23  ;;  %v7376_v42 = vrot.slane %v6789_v31, %v11507_v37 }
 0x955   : > { %v11957_v14 = vsel %vm7572_vm0, %v7328_v11, %v7571_v41 }
 0x957   : > { %v6771_v30 = vpop.permute.xlu1 %6770  ;;  %v6804_v56 = vpop.permute.xlu0 %6803 }
 0x958   : > { %v7346_v49 = vrot.slane %v6771_v30, %v11462_v7  ;;  %v7401_v61 = vrot.slane %v6804_v56, %v11565_v10 }
 0x95b   : > { %v6762_v45 = vpop.permute.xlu1 %6761  ;;  %v6798_v27 = vpop.permute.xlu0 %6797 }
 0x95c   : > { %v7332_v40 = vrot.slane %v6762_v45, %v11437_v35  ;;  %v7391_v22 = vrot.slane %v6798_v27, %v11542_v9 }
 0x95e   : > { %v7337_v4 = vsel %vm6913_vm1, %v7336_v34, %v7332_v40 }
 0x95f   : > { %v7342_v16 = vsel %vm6920_vm2, %v7341_v6, %v7337_v4  ;;  %v6819_v41 = vpop.permute.xlu1 %6818  ;;  %v6801_v39 = vpop.permute.xlu0 %6800 }
 0x960   : > { %v7347_v51 = vsel %vm6927_vm3, %v7346_v49, %v7342_v16  ;;  %v7396_v43 = vrot.slane %v6801_v39, %v11557_v50 }
 0x961   : > { %v7352_v33 = vsel %vm6934_vm4, %v7351_v48, %v7347_v51 }
 0x962   : > { %v7357_v29 = vsel %vm6941_vm5, %v7356_v24, %v7352_v33  ;;  %v7425_v33 = vrot.slane %v6819_v41, %v11462_v7 }
 0x963   : > { %v7362_v38 = vsel %vm6948_vm6, %v7361_v58, %v7357_v29  ;;  %v6813_v55 = vpop.permute.xlu1 %6812  ;;  %v6816_v54 = vpop.permute.xlu0 %6815 }
 0x964   : > { %v7367_v32 = vsel %vm6955_vm7, %v7366_v25, %v7362_v38  ;;  %v7415_v49 = vrot.slane %v6813_v55, %v12423_v52  ;;  %v7420_v16 = vrot.slane %v6816_v54, %v11449_v23 }
 0x965   : > { %v7372_v36 = vsel %vm6962_vm8, %v7371_v20, %v7367_v32 }
 0x966   : > { %v7377_v21 = vsel %vm6969_vm9, %v7376_v42, %v7372_v36 }
 0x967   : > { %v7382_v53 = vsel %vm6976_vm10, %v7381_v8, %v7377_v21  ;;  %v6828_v46 = vpop.permute.xlu1 %6827  ;;  %v6810_v18 = vpop.permute.xlu0 %6809 }
 0x968   : > { %v7387_v5 = vsel %vm12518_vm11, %v7386_v15, %v7382_v53  ;;  %v7411_v40 = vrot.slane %v6810_v18, %v11437_v35  ;;  %v7440_v41 = vrot.slane %v6828_v46, %v11486_v62 }
 0x969   : > { %v7392_v12 = vsel %vm12519_vm12, %v7391_v22, %v7387_v5 }
 0x96a   : > { %v7397_v1 = vsel %vm6997_vm13, %v7396_v43, %v7392_v12  ;;  %v7416_v48 = vsel %vm6913_vm1, %v7415_v49, %v7411_v40 }
 0x96b   : > { %v6831_v26 = vpop.permute.xlu1 %6830  ;;  %v7402_v3 = vsel %vm7004_vm14, %v7401_v61, %v7397_v1  ;;  %v6864_v13 = vpop.permute.xlu0 %6863  ;;  %v7421_v39 = vsel %vm6920_vm2, %v7420_v16, %v7416_v48 }
 0x96c   : > { %v7426_v20 = vsel %vm6927_vm3, %v7425_v33, %v7421_v39  ;;  %v7499_v32 = vrot.slane %v6864_v13, %v11449_v23  ;;  %v7445_v5 = vrot.slane %v6831_v26, %v11504_v59 }
 0x96f   : > { %v6822_v47 = vpop.permute.xlu1 %6821  ;;  %v6867_v63 = vpop.permute.xlu0 %6866 }
 0x970   : > { %v7430_v58 = vrot.slane %v6822_v47, %v12477_v28  ;;  %v7504_v15 = vrot.slane %v6867_v63, %v11462_v7 }
 0x972   : > { %v7431_v54 = vsel %vm6934_vm4, %v7430_v58, %v7426_v20 }
 0x973   : > { %v6825_v44 = vpop.permute.xlu1 %6824  ;;  %v11988_v11 = vpop.permute.xlu0 %6851 }
 0x974   : > { %v7435_v25 = vrot.slane %v6825_v44, %v12479_v19  ;;  %v7480_v20 = vrot.slane %v11988_v11, %v11565_v10 }
 0x976   : > { %v7436_v8 = vsel %vm6941_vm5, %v7435_v25, %v7431_v54 }
 0x977   : > { %v6840_v31 = vpop.permute.xlu1 %6839  ;;  %v11990_v30 = vpop.permute.xlu0 %6854 }
 0x978   : > { %v7460_v44 = vrot.slane %v6840_v31, %v11530_v2 }
 0x97b   : > { %v6843_v45 = vpop.permute.xlu1 %6842  ;;  %v6861_v34 = vpop.permute.xlu0 %6860 }
 0x97c   : > { %v7494_v38 = vrot.slane %v6861_v34, %v12423_v52  ;;  %v7441_v52 = vsel %vm6948_vm6, %v7440_v41, %v7436_v8  ;;  %v7465_v49 = vrot.slane %v6843_v45, %v11548_v0 }
 0x97d   : > { %v7446_v46 = vsel %vm6955_vm7, %v7445_v5, %v7441_v52 }
 0x97f   : > { %v6834_v27 = vpop.permute.xlu1 %6833  ;;  %v6876_v56 = vpop.permute.xlu0 %6875 }
 0x983   : > { %v6837_v6 = vpop.permute.xlu1 %6836  ;;  %v6879_v4 = vpop.permute.xlu0 %6878 }
 0x984   : > { %v7455_v43 = vrot.slane %v6837_v6, %v11507_v37 }
 0x987   : > { %v6846_v24 = vpop.permute.xlu1 %6845  ;;  %v6870_v51 = vpop.permute.xlu0 %6869 }
 0x988   : > { %v7509_v18 = vrot.slane %v6870_v51, %v12477_v28  ;;  %v7470_v31 = vrot.slane %v6846_v24, %v11542_v9 }
 0x98b   : > { %v6858_v29 = vpop.permute.xlu1 %6857  ;;  %v6873_v55 = vpop.permute.xlu0 %6872 }
 0x98c   : > { %v7490_v42 = vrot.slane %v6858_v29, %v11437_v35  ;;  %v7450_v35 = vrot.slane %v6834_v27, %v11498_v17  ;;  %v7514_v47 = vrot.slane %v6873_v55, %v12479_v19  ;;  %v7519_v27 = vrot.slane %v6876_v56, %v11486_v62 }
 0x98e   : > { %v7495_v36 = vsel %vm6913_vm1, %v7494_v38, %v7490_v42  ;;  %vm7574_vm1 = vcmask 1045509   ;;  %v7451_v13 = vsel %vm6962_vm8, %v7450_v35, %v7446_v46  ;;  %v12525_v35 = vld [vmem:[#allocation22_spill] sm:$0xff] }
 0x98f   : > { %v7500_v21 = vsel %vm6920_vm2, %v7499_v32, %v7495_v36  ;;  %v6849_v22 = vpop.permute.xlu1 %6848  ;;  %v6888_v53 = vpop.permute.xlu0 %6887  ;;  %v7456_v63 = vsel %vm6969_vm9, %v7455_v43, %v7451_v13  ;;  %vm12520_vm2 = vmmov %vm12518_vm11  ;;  %v7485_v32 = vrot.slane %v11990_v30, %v11568_v60 }
 0x990   : > { %v7505_v23 = vsel %vm6927_vm3, %v7504_v15, %v7500_v21  ;;  %v7461_v6 = vsel %vm6976_vm10, %v7460_v44, %v7456_v63  ;;  %v7539_v45 = vrot.slane %v6888_v53, %v11530_v2  ;;  %vm12521_vm3 = vmmov %vm12519_vm12 }
 0x991   : > { %v7510_v7 = vsel %vm6934_vm4, %v7509_v18, %v7505_v23  ;;  %v7466_v51 = vsel %vm12520_vm2, %v7465_v49, %v7461_v6  ;;  %vm12522_vm4 = vmmov %vm12520_vm2 }
 0x992   : > { %v7515_v28 = vsel %vm6941_vm5, %v7514_v47, %v7510_v7  ;;  %vm12523_vm5 = vmmov %vm12521_vm3 }
 0x993   : > { %v6807_v61 = vpop.permute.xlu1 %6806  ;;  %v6891_v12 = vpop.permute.xlu0 %6890  ;;  %v7520_v48 = vsel %vm6948_vm6, %v7519_v27, %v7515_v28  ;;  %vm7576_vm6 = vcmask 1046534  }
 0x994   : > { %v7406_v1 = vrot.slane %v6807_v61, %v11568_v60  ;;  %v7544_v33 = vrot.slane %v6891_v12, %v11548_v0 }
 0x996   : > { %v7407_v26 = vsel %vm7011_vm15, %v7406_v1, %v7402_v3  ;;  %v7524_v3 = vrot.slane %v6879_v4, %v11504_v59 }
 0x997   : > { %v7575_v34 = vsel %vm7574_vm1, %v7407_v26, %v11957_v14  ;;  %v6882_v40 = vpop.permute.xlu0 %6881  ;;  %v6897_v16 = vpop.permute.xlu1 %6896  ;;  %v7475_v14 = vrot.slane %v6849_v22, %v11557_v50 }
 0x998   : > { %v7529_v19 = vrot.slane %v6882_v40, %v11498_v17  ;;  %v7525_v62 = vsel %vm6955_vm7, %v7524_v3, %v7520_v48  ;;  %v7471_v17 = vsel %vm12521_vm3, %v7470_v31, %v7466_v51  ;;  %v7554_v38 = vrot.slane %v6897_v16, %v11557_v50 }
 0x999   : > { %v7476_v4 = vsel %vm6997_vm13, %v7475_v14, %v7471_v17  ;;  %vm7578_vm7 = vcmask 1047559  }
 0x99a   : > { %v7530_v58 = vsel %vm6962_vm8, %v7529_v19, %v7525_v62  ;;  %v7481_v55 = vsel %vm7004_vm14, %v7480_v20, %v7476_v4  ;;  %vm6391_vm8 = vcmp.lt.s32.totalorder %v12369_v57, 8 }
 0x99b   : > { %v6885_v39 = vpop.permute.xlu0 %6884  ;;  %v6900_v25 = vpop.permute.xlu1 %6899 }
 0x99c   : > { %v7534_v56 = vrot.slane %v6885_v39, %v11507_v37  ;;  %v7559_v0 = vrot.slane %v6900_v25, %v11565_v10 }
 0x99e   : > { %v7535_v59 = vsel %vm6969_vm9, %v7534_v56, %v7530_v58 }
 0x99f   : > { %v7540_v24 = vsel %vm6976_vm10, %v7539_v45, %v7535_v59  ;;  %v6894_v29 = vpop.permute.xlu0 %6893 }
 0x9a0   : > { %v7545_v37 = vsel %vm12522_vm4, %v7544_v33, %v7540_v24  ;;  %v7549_v2 = vrot.slane %v6894_v29, %v11542_v9  ;;  %v7486_v9 = vsel %vm7011_vm15, %v7485_v32, %v7481_v55 }
 0x9a1   : > { %v7577_v10 = vsel %vm7576_vm6, %v7486_v9, %v7575_v34 }
 0x9a2   : > { %v7550_v42 = vsel %vm12523_vm5, %v7549_v2, %v7545_v37 }
 0x9a3   : > { %v7555_v54 = vsel %vm6997_vm13, %v7554_v38, %v7550_v42  ;;  %v6903_v8 = vpop.permute.xlu0 %6902 }
 0x9a4   : > { %v7564_v11 = vrot.slane %v6903_v8, %v11568_v60  ;;  %v7560_v36 = vsel %vm7004_vm14, %v7559_v0, %v7555_v54 }
 0x9a6   : > { %v7565_v50 = vsel %vm7011_vm15, %v7564_v11, %v7560_v36 }
 0x9a7   : > { %v7579_v41 = vsel %vm7578_vm7, %v7565_v50, %v7577_v10 }
 0x9a8   : > { %v7581_v30 = vsel %vm6391_vm8, %v7579_v41, -1e+30 }
 0x9a9   : > { %7582 = vmax.xlane.f32.xlu1 %v7581_v30 }
 0xa36   : > { %v7583_v15 = vpop.xlane.xlu1 %7582 }
 0xa37   : > { %v7584_v21 = vsub.f32 %v7581_v30, %v7583_v15 }
 0xa39   : > { %v7585_v22 = vmul.f32 1.442695, %v7584_v21 }
 0xa3b   : > { %8992 = vpow2.f32 %v7585_v22 }
 0xa45   : > { %v8993_v60 = vpop.eup %8992 }
 0xa46   : > { %7587 = vadd.xlane.f32.xlu0 %v8993_v60 }
 0xad3   : > { %v7588_v53 = vpop.xlane.xlu0 %7587 }
 0xad4   : > { %8994 = vrcp.f32 %v7588_v53 }
 0xade   : > { %v8995_v57 = vpop.eup %8994 }
 0xadf   : > { %v7590_v52 = vmul.f32 %v8995_v57, %v8993_v60 }
 0xae1   : > { %v7591_v23 = vadd.f32 %v12525_v35, %v7590_v52 }
 0xae3   : > { %7592 = vst [vmem:[%s477_s22] sm:$0xff] %v7591_v23 }
 0xae4   : > { %9155 = shalt.err (!%p9152_p0)
}
 0xae5   : > { %s9156_s14 = scalar_lea.hbm %s12066_s30, 128  ;;  %s9160_s22 = scalar_lea.hbm %s12527_s28, 256 }
 0xae6   : > { %p9157_p4 = scmp.ne.s32.totalorder %s12066_s30, %s9156_s14  ;;  %p9161_p12 = scmp.lt.u32.totalorder %s12066_s30, %s12527_s28 }
 0xae7   : > { %p9162_p1 = scmp.lt.u32.totalorder %s9160_s22, %s9156_s14  ;;  %p9164_p8 = scmp.lt.u32.totalorder %s9156_s14, %s12066_s30 }
 0xae8   : > { %p9158_p13 = pnand %p9157_p4, %p9491_p5 }
 0xae9   : > { %p9163_p11 = por %p9162_p1, %p9161_p12 }
 0xaea   : > { %p9159_p2 = pneg %p9158_p13 }
 0xaeb   : > { %p9165_p6 = por %p9164_p8, %p9163_p11 }
 0xaed   : > { %p9166_p10 = pnand %p9165_p6, %p9159_p2 }
 0xaef   : > { %9169 = shalt.err (!%p9166_p10)
}
 0xaf0   : > { %8861 = dma.vmem_to_hbm [thread:$0]  (%p9491_p5), %s12068_s9, 128, %s12066_s30, %s7594_s29  }
 0xaf1 PF: > { %s12528_s19 = sld [smem:[#allocation17_spill]]  ;;  %s12529_s10 = sld [smem:[#allocation19_spill]] }
 0xaf2   : > { %p12531_p7 = scmp.ge.s32.totalorder %s9232_s24, 2 }
 0xaf7   : > { %s7620_s13 = sand.u32 1, %s12528_s19   ;;  %p12530_p3 = scmp.ne.s32.totalorder %s12529_s10, 0 }
 0xaf8   : > { %s7621_s18 = scalar_lea.sflag [#allocation5], %s7620_s13 }
 0xaf9   : > { %p8881_p9 = pnand %p12531_p7, %p12530_p3 }
 0xafb   : > { %9207 = dma.done.wait (!%p8881_p9), %s7621_s18, 128  }
 0xafc   : > { %9209 = vsyncadd (!%p8881_p9), %s7621_s18, 4294967168  ;;  %s30_s24 = sadd.s32 1, %s9232_s24   ;;  %s12532_s19 = smov %s9216_s20 }
 0xafd   : > { %p27_p0 = scmp.ge.s32.totalorder %s30_s24, 4   ;;  %s12533_s20 = smov %s9220_s21 }
 0xafe   : > { %s12534_s21 = smov %s9500_s15  ;;  %s12535_s22 = smov %s9228_s23 }
 0xaff   : > { %s12536_s23 = smov %s12538_s11  ;;  %29 = sbr.rel (!%p27_p0) target bundleno = 14 (0xe), region = 126 }
 0xb06   :  { %7626 = vsyncpa [#allocation4], 1 }
 0xb07   :  { %7628 = vsyncpa [#allocation4 + $0x1], 1 }
 0xb08   :  { %7629 = vsyncpa [#allocation7], 1 }
 0xb09   :  { %7630 = vsyncpa [#allocation10], 1 }
 0xb0a   :  { %7631 = vsyncpa [#allocation5], 1 }
 0xb0b   :  { %7633 = vsyncpa [#allocation5 + $0x1], 1 }

</bundles_post_ra>
